<compile_context>
chip_gen: v6e
topology: v6e:2x2x1
jax: 0.10.0
libtpu: 0.0.40
codegen_flags: <defaults>
</compile_context>

<pallas_src>
import functools

import jax
import jax.numpy as jnp
from jax import lax
from jax.experimental import pallas as pl
from jax.experimental.pallas import tpu as pltpu

_DIL2_OFFS = tuple((dy, dx) for dy in (0, 2, 4) for dx in (0, 2, 4))  # 3x3, dilation 2
_K3_OFFS = tuple((dy, dx) for dy in (0, 1, 2) for dx in (0, 1, 2))    # 3x3, dilation 1
_BN_EPS = 1e-5
_MXU_DTYPE = jnp.bfloat16   # MXU input dtype for the conv matmuls (f32 accumulation)


def _zero_border(ref, pad, h, w):
    """Zero only the border strips of a (TB, h+2p, w+2p, C) padded scratch ref."""
    tb, hp, wp, cc = ref.shape
    zrow = jnp.zeros((tb, pad, wp, cc), ref.dtype)
    ref[:, pl.ds(0, pad), :, :] = zrow
    ref[:, pl.ds(h + pad, pad), :, :] = zrow
    zcol = jnp.zeros((tb, hp, pad, cc), ref.dtype)
    ref[:, :, pl.ds(0, pad), :] = zcol
    ref[:, :, pl.ds(w + pad, pad), :] = zcol


# -----------------------------------------------------------------------------
# Fused kernel: conv1(x3 branches) -> pool -> [conv2 -> maxpool3] -> CBAM
#               -> block-diagonal 1x1 conv -> ReLU, for TB samples per step.
# -----------------------------------------------------------------------------
def _stm_block_kernel(x_ref, w1_ref, s1_ref, t1_ref, w2_ref, s2_ref, t2_ref,
                      fc1_ref, fc2_ref, saw_ref, wl_ref, bl_ref,
                      o_ref,
                      xpad, ypad, mpad, sapad, colbuf,
                      *, TB, H, W, Cin, Cout):
    C = Cout
    Ho, Wo = H // 2, W // 2
    HWo = Ho * Wo
    M = TB * HWo

    # Border-only zeroing of the zero-padded scratch buffers; interiors are
    # fully overwritten every step, borders must be zero on every core.
    _zero_border(xpad, 2, H, W)
    _zero_border(ypad, 2, Ho, Wo)
    _zero_border(mpad, 1, Ho, Wo)
    _zero_border(sapad, 1, Ho, Wo)

    # ---------------- stage 1: the three branch conv1's as ONE bf16 im2col matmul
    xpad[:, pl.ds(2, H), pl.ds(2, W), :] = x_ref[...]                  # bf16 store
    patches = jnp.concatenate(
        [xpad[:, pl.ds(dy, H), pl.ds(dx, W), :] for (dy, dx) in _DIL2_OFFS],
        axis=-1)                                                       # (TB,H,W,9Cin) bf16
    p1 = patches.reshape(TB * H * W, 9 * Cin)
    y1 = jnp.dot(p1, w1_ref[...], preferred_element_type=jnp.float32)  # (TB*HW, 3C)
    y1 = jnp.maximum(y1 * s1_ref[...] + t1_ref[...], 0.0)              # folded BN + ReLU
    y1 = y1.reshape(TB * H, W, 3 * C)

    # ---------------- fused 2x2 stride-2 pooling for all three branches
    # rows: even/odd split via a leading-dim reshape (free, stays in registers)
    zr = y1.reshape(TB * Ho, 2, W, 3 * C)
    r0, r1 = zr[:, 0], zr[:, 1]
    r_avg = r0 + r1                                                    # B, C branches
    r_max = jnp.maximum(r0, r1)                                        # D branch
    colbuf[...] = jnp.concatenate([r_avg[..., :2 * C], r_max[..., 2 * C:]], axis=-1)
    # cols: one store + two strided sublane reads covering all 3C channels
    c0 = colbuf[:, pl.ds(0, Wo, 2), :]
    c1 = colbuf[:, pl.ds(1, Wo, 2), :]
    feat_avg = 0.25 * (c0[..., :2 * C] + c1[..., :2 * C])              # (TB*Ho, Wo, 2C)
    featD = jnp.maximum(c0[..., 2 * C:], c1[..., 2 * C:])              # (TB*Ho, Wo, C)
    featB = feat_avg[..., :C]
    featC = feat_avg[..., C:]

    # ---------------- block B: conv2 (3x3 dil 2, pad 2) + BN + ReLU + MaxPool(3,1,1)
    ypad[:, pl.ds(2, Ho), pl.ds(2, Wo), :] = (
        featB.reshape(TB, Ho, Wo, C).astype(ypad.dtype))               # bf16 store
    patches2 = jnp.concatenate(
        [ypad[:, pl.ds(dy, Ho), pl.ds(dx, Wo), :] for (dy, dx) in _DIL2_OFFS],
        axis=-1)                                                       # (TB,Ho,Wo,9C) bf16
    p2 = patches2.reshape(M, 9 * C)
    y2 = jnp.dot(p2, w2_ref[...], preferred_element_type=jnp.float32)  # (M, C)
    y2 = jnp.maximum(y2 * s2_ref[...] + t2_ref[...], 0.0)
    # 3x3 stride-1 max pool with zero padding (== -inf padding here: post-ReLU
    # values are >= 0 and every window contains its own center).
    mpad[:, pl.ds(1, Ho), pl.ds(1, Wo), :] = y2.reshape(TB, Ho, Wo, C)
    m = mpad[:, pl.ds(0, Ho), pl.ds(0, Wo), :]
    for (dy, dx) in _K3_OFFS[1:]:
        m = jnp.maximum(m, mpad[:, pl.ds(dy, Ho), pl.ds(dx, Wo), :])
    featB = m.reshape(TB, HWo, C)
    featC = featC.reshape(TB, HWo, C)
    featD = featD.reshape(TB, HWo, C)

    # ---------------- CBAM attention: all three branches fused (block-diag weights)
    xf = jnp.concatenate([featB, featC, featD], axis=-1)               # (TB, HWo, 3C)

    # ChannelAttention2: one block-diagonal MLP pass on the stacked (avg, max) rows.
    avg = jnp.mean(xf, axis=1)                                         # (TB, 3C)
    mx = jnp.max(xf, axis=1)                                           # (TB, 3C)
    pooled = jnp.concatenate([avg, mx], axis=0)                        # (2TB, 3C)
    h = jnp.maximum(jnp.dot(pooled, fc1_ref[...],
                            preferred_element_type=jnp.float32), 0.0)  # (2TB, 3cr)
    o2 = jnp.dot(h, fc2_ref[...], preferred_element_type=jnp.float32)  # (2TB, 3C)
    ca = jax.nn.sigmoid(o2[:TB] + o2[TB:])                             # (TB, 3C)
    x1 = xf * ca[:, None, :]                                           # (TB, HWo, 3C)

    # SpatialAttention2: per-branch [mean_c, max_c] maps -> one packed 3x3 conv
    # as a single (M, 54) x (54, 3) matmul + one sigmoid.
    x1_4d = x1.reshape(TB, Ho, Wo, 3 * C)
    am_parts = []
    for b in range(3):
        xb = x1_4d[..., b * C:(b + 1) * C]
        am_parts.append(jnp.mean(xb, axis=-1, keepdims=True))
        am_parts.append(jnp.max(xb, axis=-1, keepdims=True))
    sapad[:, pl.ds(1, Ho), pl.ds(1, Wo), :] = jnp.concatenate(am_parts, axis=-1)
    spatch = jnp.concatenate(
        [sapad[:, pl.ds(dy, Ho), pl.ds(dx, Wo), :] for (dy, dx) in _K3_OFFS],
        axis=-1)                                                       # (TB, Ho, Wo, 54)
    logits = jnp.dot(spatch.reshape(M, 54), saw_ref[...],
                     preferred_element_type=jnp.float32)               # (M, 3)
    sa = jax.nn.sigmoid(logits)

    x1_flat = x1.reshape(M, 3 * C)
    x2_all = jnp.concatenate(
        [x1_flat[:, b * C:(b + 1) * C] * sa[:, b:b + 1] for b in range(3)],
        axis=-1)                                                       # (M, 3C)

    # ---------------- fused final 1x1 convs (block-diagonal) + bias + ReLU
    out_t = lax.dot_general(wl_ref[...], x2_all.astype(_MXU_DTYPE),
                            dimension_numbers=(((1,), (1,)), ((), ())),
                            preferred_element_type=jnp.float32)        # (CLt, M)
    out_t = jnp.maximum(out_t + bl_ref[...], 0.0)
    o_ref[0] = out_t.astype(o_ref.dtype)           # lane-dense (CLt, TB*HWo) store


def _const_spec(a):
    """Full-array block, replicated across the batch grid."""
    nd = a.ndim
    return pl.BlockSpec(a.shape, lambda g, _nd=nd: (0,) * _nd)


def _pick_tb(n, max_tb=8):
    """Largest per-step batch <= max_tb dividing n that keeps >= 2 grid steps."""
    best = 1
    for tb in range(1, min(n, max_tb) + 1):
        if n % tb == 0 and n // tb >= 2:
            best = tb
    return best


def _fused_forward(x_nhwc, fp):
    N, H, W, Cin = x_nhwc.shape
    assert H % 2 == 0 and W % 2 == 0, "2x2 stride-2 pooling requires even H and W"
    Cout = fp["s2"].shape[-1]
    CLt = fp["wl_t"].shape[0]
    Ho, Wo = H // 2, W // 2
    TB = _pick_tb(N)
    G = N // TB
    M = TB * Ho * Wo

    kern = functools.partial(_stm_block_kernel, TB=TB, H=H, W=W, Cin=Cin, Cout=Cout)
    return pl.pallas_call(
        kern,
        out_shape=jax.ShapeDtypeStruct((G, CLt, M), jnp.float32),
        grid=(G,),
        in_specs=[
            pl.BlockSpec((TB, H, W, Cin), lambda g: (g, 0, 0, 0)),
            _const_spec(fp["w1"]), _const_spec(fp["s1"]), _const_spec(fp["t1"]),
            _const_spec(fp["w2"]), _const_spec(fp["s2"]), _const_spec(fp["t2"]),
            _const_spec(fp["fc1_bd"]), _const_spec(fp["fc2_bd"]),
            _const_spec(fp["saw_bd"]), _const_spec(fp["wl_t"]), _const_spec(fp["bl"]),
        ],
        out_specs=pl.BlockSpec((1, CLt, M), lambda g: (g, 0, 0)),
        scratch_shapes=[
            pltpu.VMEM((TB, H + 4, W + 4, Cin), _MXU_DTYPE),          # conv1 zero-pad
            pltpu.VMEM((TB, Ho + 4, Wo + 4, Cout), _MXU_DTYPE),       # conv2 zero-pad
            pltpu.VMEM((TB, Ho + 2, Wo + 2, Cout), jnp.float32),      # maxpool3 pad
            pltpu.VMEM((TB, Ho + 2, Wo + 2, 6), jnp.float32),         # spatial-attn pad
            pltpu.VMEM((TB * Ho, W, 3 * Cout), jnp.float32),          # pool column step
        ],
        compiler_params=pltpu.CompilerParams(
            dimension_semantics=("parallel",),
            vmem_limit_bytes=32 * 1024 * 1024),
    )(x_nhwc, fp["w1"], fp["s1"], fp["t1"], fp["w2"], fp["s2"], fp["t2"],
      fp["fc1_bd"], fp["fc2_bd"], fp["saw_bd"], fp["wl_t"], fp["bl"])


@jax.jit
def stm_renet2_cbam1_block(x_nchw, fused_params):
    """x_nchw: (N, Cin, H, W)  ->  (N, sum(last_channels), H//2, W//2)."""
    N, _, H, W = x_nchw.shape
    Ho, Wo = H // 2, W // 2
    x = jnp.transpose(x_nchw, (0, 2, 3, 1)).astype(_MXU_DTYPE)     # NCHW -> NHWC bf16
    out = _fused_forward(x, fused_params)                          # (G, CLt, TB*HWo)
    G, CLt = out.shape[0], out.shape[1]
    TB = N // G
    out = out.reshape(G, CLt, TB, Ho * Wo).transpose(0, 2, 1, 3)   # wrapper-side relayout
    return out.reshape(N, CLt, Ho, Wo)


# -----------------------------------------------------------------------------
# Deterministic parameter construction (synthetic, matching module shapes)
# -----------------------------------------------------------------------------
def _fold_bn(bias, gamma, beta, mean, var):
    scale = gamma / jnp.sqrt(var + _BN_EPS)
    shift = beta + (bias - mean) * scale
    return (scale.reshape(1, -1).astype(jnp.float32),
            shift.reshape(1, -1).astype(jnp.float32))


def _conv_bn_params(key, cin, cout):
    kw, kb, kg, kbe, km, kv = jax.random.split(key, 6)
    # Weight layout (ky*3+kx, Cin, Cout); a PyTorch (Cout, Cin, 3, 3) weight maps
    # via transpose(2, 3, 1, 0).reshape(9, Cin, Cout) -- keep orderings matched.
    w = 0.15 * jax.random.normal(kw, (9, cin, cout), jnp.float32)
    b = 0.05 * jax.random.normal(kb, (cout,), jnp.float32)
    gamma = 1.0 + 0.1 * jax.random.normal(kg, (cout,), jnp.float32)
    beta = 0.1 * jax.random.normal(kbe, (cout,), jnp.float32)
    mean = 0.1 * jax.random.normal(km, (cout,), jnp.float32)
    var = 0.5 + 0.1 * jnp.abs(jax.random.normal(kv, (cout,), jnp.float32))
    scale, shift = _fold_bn(b, gamma, beta, mean, var)
    return {"w": w, "scale": scale, "shift": shift}


def _attn_last_params(key, c, c_last):
    cr = c // 16                                          # ChannelAttention2 ratio 16
    assert cr >= 1, "ChannelAttention2 requires >= 16 channels"
    k1, k2, k3, k4, k5 = jax.random.split(key, 5)
    return {
        "fc1": 0.2 * jax.random.normal(k1, (c, cr), jnp.float32),
        "fc2": 0.2 * jax.random.normal(k2, (cr, c), jnp.float32),
        "sa_w": 0.2 * jax.random.normal(k3, (9, 2), jnp.float32),  # [:,0]=avg, [:,1]=max
        "w_last": 0.15 * jax.random.normal(k4, (c, c_last), jnp.float32),
        "b_last": 0.05 * jax.random.normal(k5, (1, c_last), jnp.float32),
    }


def init_params(key, in_ch, out_ch, last_channels):
    kB, kC, kD = jax.random.split(key, 3)

    def make(k, with_conv2, c_last):
        k1, k2, k3 = jax.random.split(k, 3)
        p = {"conv1": _conv_bn_params(k1, in_ch, out_ch)}
        if with_conv2:
            p["conv2"] = _conv_bn_params(k2, out_ch, out_ch)
        p["attn"] = _attn_last_params(k3, out_ch, c_last)
        return p

    return {"B": make(kB, True, last_channels[0]),
            "C": make(kC, False, last_channels[1]),
            "D": make(kD, False, last_channels[2])}


def build_fused_params(params):
    """Fold the per-branch module parameters into the fused-kernel operand set."""
    pB, pC, pD = params["B"], params["C"], params["D"]
    branches = (pB, pC, pD)

    # conv1 of B/C/D concatenated along output channels, im2col (9*Cin, 3*Cout).
    w1 = jnp.concatenate([p["conv1"]["w"] for p in branches], axis=-1)
    nine, cin, c3 = w1.shape
    w1 = w1.reshape(nine * cin, c3)
    s1 = jnp.concatenate([p["conv1"]["scale"] for p in branches], axis=-1)
    t1 = jnp.concatenate([p["conv1"]["shift"] for p in branches], axis=-1)

    # block-B conv2, im2col (9*Cout, Cout).
    w2 = pB["conv2"]["w"].reshape(-1, pB["conv2"]["w"].shape[-1])
    s2, t2 = pB["conv2"]["scale"], pB["conv2"]["shift"]

    c = pB["attn"]["fc1"].shape[0]
    cr = pB["attn"]["fc1"].shape[1]
    # Block-diagonal channel-attention MLP: (3C, 3cr) and (3cr, 3C).
    fc1_bd = jnp.zeros((3 * c, 3 * cr), jnp.float32)
    fc2_bd = jnp.zeros((3 * cr, 3 * c), jnp.float32)
    for b, p in enumerate(branches):
        fc1_bd = fc1_bd.at[b * c:(b + 1) * c, b * cr:(b + 1) * cr].set(p["attn"]["fc1"])
        fc2_bd = fc2_bd.at[b * cr:(b + 1) * cr, b * c:(b + 1) * c].set(p["attn"]["fc2"])

    # Packed spatial-attention weights: row = offset*6 + branch*2 + {0:avg, 1:max}.
    saw_bd = jnp.zeros((9 * 6, 3), jnp.float32)
    for b, p in enumerate(branches):
        w = p["attn"]["sa_w"]                           # (9, 2), [:,0]=avg, [:,1]=max
        for k in range(2):
            saw_bd = saw_bd.at[jnp.arange(9) * 6 + b * 2 + k, b].set(w[:, k])

    # Block-diagonal final 1x1 convs: out_t = wl_t @ x2_all^T,
    # wl_t (sum(Cl), 3*Cout); row order [B, C, D] matches torch.cat channel order.
    wls = [p["attn"]["w_last"] for p in branches]
    clt = sum(w.shape[1] for w in wls)
    wl_t = jnp.zeros((clt, 3 * c), jnp.float32)
    row = 0
    for b, w in enumerate(wls):
        wl_t = wl_t.at[row:row + w.shape[1], b * c:(b + 1) * c].set(w.T)
        row += w.shape[1]
    bl = jnp.concatenate([p["attn"]["b_last"] for p in branches],
                         axis=-1).reshape(clt, 1)

    return {"w1": w1.astype(_MXU_DTYPE), "s1": s1, "t1": t1,
            "w2": w2.astype(_MXU_DTYPE), "s2": s2, "t2": t2,
            "fc1_bd": fc1_bd, "fc2_bd": fc2_bd, "saw_bd": saw_bd,
            "wl_t": wl_t.astype(_MXU_DTYPE), "bl": bl}


if __name__ == "__main__":
    in_channels, out_channels = 4, 16
    last_channels = (8, 8, 8)
    params = init_params(jax.random.PRNGKey(1), in_channels, out_channels, last_channels)
    fused = build_fused_params(params)

    # batch 4 exercises TB=2 per grid step (lane-dense store, 2 steps for v7x).
    x4 = jax.random.normal(jax.random.PRNGKey(0), (4, in_channels, 16, 16), jnp.float32)
    out4 = stm_renet2_cbam1_block(x4, fused)
    jax.block_until_ready(out4)
    assert out4.shape == (4, sum(last_channels), 8, 8), out4.shape

    # batch 2 exercises TB=1 (still 2 grid steps).
    x2 = jax.random.normal(jax.random.PRNGKey(0), (2, in_channels, 16, 16), jnp.float32)
    out2 = stm_renet2_cbam1_block(x2, fused)
    jax.block_until_ready(out2)
    assert out2.shape == (2, sum(last_channels), 8, 8), out2.shape

    assert bool(jnp.all(jnp.isfinite(out4))) and bool(jnp.all(jnp.isfinite(out2)))
    print("KERNEL_OK")
</pallas_src>

<mosaic_0001>
module attributes {stable_mosaic.version = 11 : i64} {
  func.func @_stm_block_kernel(%arg0: i32, %arg1: memref<2x16x16x4xbf16, #tpu.memory_space<vmem>>, %arg2: memref<36x48xbf16, #tpu.memory_space<vmem>>, %arg3: memref<1x48xf32, #tpu.memory_space<vmem>>, %arg4: memref<1x48xf32, #tpu.memory_space<vmem>>, %arg5: memref<144x16xbf16, #tpu.memory_space<vmem>>, %arg6: memref<1x16xf32, #tpu.memory_space<vmem>>, %arg7: memref<1x16xf32, #tpu.memory_space<vmem>>, %arg8: memref<48x3xf32, #tpu.memory_space<vmem>>, %arg9: memref<3x48xf32, #tpu.memory_space<vmem>>, %arg10: memref<54x3xf32, #tpu.memory_space<vmem>>, %arg11: memref<24x48xbf16, #tpu.memory_space<vmem>>, %arg12: memref<24x1xf32, #tpu.memory_space<vmem>>, %arg13: memref<1x24x128xf32, #tpu.memory_space<vmem>>, %arg14: memref<2x20x20x4xbf16, #tpu.memory_space<vmem>>, %arg15: memref<2x12x12x16xbf16, #tpu.memory_space<vmem>>, %arg16: memref<2x10x10x16xf32, #tpu.memory_space<vmem>>, %arg17: memref<2x10x10x6xf32, #tpu.memory_space<vmem>>, %arg18: memref<16x16x48xf32, #tpu.memory_space<vmem>>) attributes {dimension_semantics = [#tpu.dimension_semantics<parallel>], iteration_bounds = array<i64: 2>, scalar_prefetch = 0 : i64, scratch_operands = 5 : i64, tpu.core_type = #tpu.core_type<tc>, window_params = [{transform_indices = @transform_0, window_bounds = array<i64: 2, 16, 16, 4>}, {pipeline_mode = #tpu.pipeline_mode<synchronous>, transform_indices = @transform_1, window_bounds = array<i64: 36, 48>}, {pipeline_mode = #tpu.pipeline_mode<synchronous>, transform_indices = @transform_2, window_bounds = array<i64: 1, 48>}, {pipeline_mode = #tpu.pipeline_mode<synchronous>, transform_indices = @transform_3, window_bounds = array<i64: 1, 48>}, {pipeline_mode = #tpu.pipeline_mode<synchronous>, transform_indices = @transform_4, window_bounds = array<i64: 144, 16>}, {pipeline_mode = #tpu.pipeline_mode<synchronous>, transform_indices = @transform_5, window_bounds = array<i64: 1, 16>}, {pipeline_mode = #tpu.pipeline_mode<synchronous>, transform_indices = @transform_6, window_bounds = array<i64: 1, 16>}, {pipeline_mode = #tpu.pipeline_mode<synchronous>, transform_indices = @transform_7, window_bounds = array<i64: 48, 3>}, {pipeline_mode = #tpu.pipeline_mode<synchronous>, transform_indices = @transform_8, window_bounds = array<i64: 3, 48>}, {pipeline_mode = #tpu.pipeline_mode<synchronous>, transform_indices = @transform_9, window_bounds = array<i64: 54, 3>}, {pipeline_mode = #tpu.pipeline_mode<synchronous>, transform_indices = @transform_10, window_bounds = array<i64: 24, 48>}, {pipeline_mode = #tpu.pipeline_mode<synchronous>, transform_indices = @transform_11, window_bounds = array<i64: 24, 1>}, {transform_indices = @transform_12, window_bounds = array<i64: 1, 24, 128>}]} {
    %cst = arith.constant 0.000000e+00 : bf16
    %0 = vector.broadcast %cst : bf16 to vector<2x2x20x4xbf16>
    %c0 = arith.constant 0 : index
    %c0_0 = arith.constant 0 : index
    %c0_1 = arith.constant 0 : index
    %c0_2 = arith.constant 0 : index
    %1 = vector.load %arg14[%c0, %c0_0, %c0_1, %c0_2] : memref<2x20x20x4xbf16, #tpu.memory_space<vmem>>, vector<2x2x20x4xbf16>
    tpu.vector_store %arg14[%c0, %c0_0, %c0_1, %c0_2], %0 {strides = array<i32>} : memref<2x20x20x4xbf16, #tpu.memory_space<vmem>>, vector<2x2x20x4xbf16>,
    %c0_3 = arith.constant 0 : index
    %c18 = arith.constant 18 : index
    %c0_4 = arith.constant 0 : index
    %c0_5 = arith.constant 0 : index
    %2 = vector.load %arg14[%c0_3, %c18, %c0_4, %c0_5] : memref<2x20x20x4xbf16, #tpu.memory_space<vmem>>, vector<2x2x20x4xbf16>
    tpu.vector_store %arg14[%c0_3, %c18, %c0_4, %c0_5], %0 {strides = array<i32>} : memref<2x20x20x4xbf16, #tpu.memory_space<vmem>>, vector<2x2x20x4xbf16>,
    %cst_6 = arith.constant 0.000000e+00 : bf16
    %3 = vector.broadcast %cst_6 : bf16 to vector<2x20x2x4xbf16>
    %c0_7 = arith.constant 0 : index
    %c0_8 = arith.constant 0 : index
    %c0_9 = arith.constant 0 : index
    %c0_10 = arith.constant 0 : index
    %4 = vector.load %arg14[%c0_7, %c0_8, %c0_9, %c0_10] : memref<2x20x20x4xbf16, #tpu.memory_space<vmem>>, vector<2x20x2x4xbf16>
    tpu.vector_store %arg14[%c0_7, %c0_8, %c0_9, %c0_10], %3 {strides = array<i32>} : memref<2x20x20x4xbf16, #tpu.memory_space<vmem>>, vector<2x20x2x4xbf16>,
    %c0_11 = arith.constant 0 : index
    %c0_12 = arith.constant 0 : index
    %c18_13 = arith.constant 18 : index
    %c0_14 = arith.constant 0 : index
    %5 = vector.load %arg14[%c0_11, %c0_12, %c18_13, %c0_14] : memref<2x20x20x4xbf16, #tpu.memory_space<vmem>>, vector<2x20x2x4xbf16>
    tpu.vector_store %arg14[%c0_11, %c0_12, %c18_13, %c0_14], %3 {strides = array<i32>} : memref<2x20x20x4xbf16, #tpu.memory_space<vmem>>, vector<2x20x2x4xbf16>,
    %cst_15 = arith.constant 0.000000e+00 : bf16
    %6 = vector.broadcast %cst_15 : bf16 to vector<2x2x12x16xbf16>
    %c0_16 = arith.constant 0 : index
    %c0_17 = arith.constant 0 : index
    %c0_18 = arith.constant 0 : index
    %c0_19 = arith.constant 0 : index
    %7 = vector.load %arg15[%c0_16, %c0_17, %c0_18, %c0_19] : memref<2x12x12x16xbf16, #tpu.memory_space<vmem>>, vector<2x2x12x16xbf16>
    tpu.vector_store %arg15[%c0_16, %c0_17, %c0_18, %c0_19], %6 {strides = array<i32>} : memref<2x12x12x16xbf16, #tpu.memory_space<vmem>>, vector<2x2x12x16xbf16>,
    %c0_20 = arith.constant 0 : index
    %c10 = arith.constant 10 : index
    %c0_21 = arith.constant 0 : index
    %c0_22 = arith.constant 0 : index
    %8 = vector.load %arg15[%c0_20, %c10, %c0_21, %c0_22] : memref<2x12x12x16xbf16, #tpu.memory_space<vmem>>, vector<2x2x12x16xbf16>
    tpu.vector_store %arg15[%c0_20, %c10, %c0_21, %c0_22], %6 {strides = array<i32>} : memref<2x12x12x16xbf16, #tpu.memory_space<vmem>>, vector<2x2x12x16xbf16>,
    %cst_23 = arith.constant 0.000000e+00 : bf16
    %9 = vector.broadcast %cst_23 : bf16 to vector<2x12x2x16xbf16>
    %c0_24 = arith.constant 0 : index
    %c0_25 = arith.constant 0 : index
    %c0_26 = arith.constant 0 : index
    %c0_27 = arith.constant 0 : index
    %10 = vector.load %arg15[%c0_24, %c0_25, %c0_26, %c0_27] : memref<2x12x12x16xbf16, #tpu.memory_space<vmem>>, vector<2x12x2x16xbf16>
    tpu.vector_store %arg15[%c0_24, %c0_25, %c0_26, %c0_27], %9 {strides = array<i32>} : memref<2x12x12x16xbf16, #tpu.memory_space<vmem>>, vector<2x12x2x16xbf16>,
    %c0_28 = arith.constant 0 : index
    %c0_29 = arith.constant 0 : index
    %c10_30 = arith.constant 10 : index
    %c0_31 = arith.constant 0 : index
    %11 = vector.load %arg15[%c0_28, %c0_29, %c10_30, %c0_31] : memref<2x12x12x16xbf16, #tpu.memory_space<vmem>>, vector<2x12x2x16xbf16>
    tpu.vector_store %arg15[%c0_28, %c0_29, %c10_30, %c0_31], %9 {strides = array<i32>} : memref<2x12x12x16xbf16, #tpu.memory_space<vmem>>, vector<2x12x2x16xbf16>,
    %cst_32 = arith.constant 0.000000e+00 : f32
    %12 = vector.broadcast %cst_32 : f32 to vector<2x1x10x16xf32>
    %c0_33 = arith.constant 0 : index
    %c0_34 = arith.constant 0 : index
    %c0_35 = arith.constant 0 : index
    %c0_36 = arith.constant 0 : index
    %13 = vector.load %arg16[%c0_33, %c0_34, %c0_35, %c0_36] : memref<2x10x10x16xf32, #tpu.memory_space<vmem>>, vector<2x1x10x16xf32>
    tpu.vector_store %arg16[%c0_33, %c0_34, %c0_35, %c0_36], %12 {strides = array<i32>} : memref<2x10x10x16xf32, #tpu.memory_space<vmem>>, vector<2x1x10x16xf32>,
    %c0_37 = arith.constant 0 : index
    %c9 = arith.constant 9 : index
    %c0_38 = arith.constant 0 : index
    %c0_39 = arith.constant 0 : index
    %14 = vector.load %arg16[%c0_37, %c9, %c0_38, %c0_39] : memref<2x10x10x16xf32, #tpu.memory_space<vmem>>, vector<2x1x10x16xf32>
    tpu.vector_store %arg16[%c0_37, %c9, %c0_38, %c0_39], %12 {strides = array<i32>} : memref<2x10x10x16xf32, #tpu.memory_space<vmem>>, vector<2x1x10x16xf32>,
    %cst_40 = arith.constant 0.000000e+00 : f32
    %15 = vector.broadcast %cst_40 : f32 to vector<2x10x1x16xf32>
    %c0_41 = arith.constant 0 : index
    %c0_42 = arith.constant 0 : index
    %c0_43 = arith.constant 0 : index
    %c0_44 = arith.constant 0 : index
    %16 = vector.load %arg16[%c0_41, %c0_42, %c0_43, %c0_44] : memref<2x10x10x16xf32, #tpu.memory_space<vmem>>, vector<2x10x1x16xf32>
    tpu.vector_store %arg16[%c0_41, %c0_42, %c0_43, %c0_44], %15 {strides = array<i32>} : memref<2x10x10x16xf32, #tpu.memory_space<vmem>>, vector<2x10x1x16xf32>,
    %c0_45 = arith.constant 0 : index
    %c0_46 = arith.constant 0 : index
    %c9_47 = arith.constant 9 : index
    %c0_48 = arith.constant 0 : index
    %17 = vector.load %arg16[%c0_45, %c0_46, %c9_47, %c0_48] : memref<2x10x10x16xf32, #tpu.memory_space<vmem>>, vector<2x10x1x16xf32>
    tpu.vector_store %arg16[%c0_45, %c0_46, %c9_47, %c0_48], %15 {strides = array<i32>} : memref<2x10x10x16xf32, #tpu.memory_space<vmem>>, vector<2x10x1x16xf32>,
    %cst_49 = arith.constant 0.000000e+00 : f32
    %18 = vector.broadcast %cst_49 : f32 to vector<2x1x10x6xf32>
    %c0_50 = arith.constant 0 : index
    %c0_51 = arith.constant 0 : index
    %c0_52 = arith.constant 0 : index
    %c0_53 = arith.constant 0 : index
    %19 = vector.load %arg17[%c0_50, %c0_51, %c0_52, %c0_53] : memref<2x10x10x6xf32, #tpu.memory_space<vmem>>, vector<2x1x10x6xf32>
    tpu.vector_store %arg17[%c0_50, %c0_51, %c0_52, %c0_53], %18 {strides = array<i32>} : memref<2x10x10x6xf32, #tpu.memory_space<vmem>>, vector<2x1x10x6xf32>,
    %c0_54 = arith.constant 0 : index
    %c9_55 = arith.constant 9 : index
    %c0_56 = arith.constant 0 : index
    %c0_57 = arith.constant 0 : index
    %20 = vector.load %arg17[%c0_54, %c9_55, %c0_56, %c0_57] : memref<2x10x10x6xf32, #tpu.memory_space<vmem>>, vector<2x1x10x6xf32>
    tpu.vector_store %arg17[%c0_54, %c9_55, %c0_56, %c0_57], %18 {strides = array<i32>} : memref<2x10x10x6xf32, #tpu.memory_space<vmem>>, vector<2x1x10x6xf32>,
    %cst_58 = arith.constant 0.000000e+00 : f32
    %21 = vector.broadcast %cst_58 : f32 to vector<2x10x1x6xf32>
    %c0_59 = arith.constant 0 : index
    %c0_60 = arith.constant 0 : index
    %c0_61 = arith.constant 0 : index
    %c0_62 = arith.constant 0 : index
    %22 = vector.load %arg17[%c0_59, %c0_60, %c0_61, %c0_62] : memref<2x10x10x6xf32, #tpu.memory_space<vmem>>, vector<2x10x1x6xf32>
    tpu.vector_store %arg17[%c0_59, %c0_60, %c0_61, %c0_62], %21 {strides = array<i32>} : memref<2x10x10x6xf32, #tpu.memory_space<vmem>>, vector<2x10x1x6xf32>,
    %c0_63 = arith.constant 0 : index
    %c0_64 = arith.constant 0 : index
    %c9_65 = arith.constant 9 : index
    %c0_66 = arith.constant 0 : index
    %23 = vector.load %arg17[%c0_63, %c0_64, %c9_65, %c0_66] : memref<2x10x10x6xf32, #tpu.memory_space<vmem>>, vector<2x10x1x6xf32>
    tpu.vector_store %arg17[%c0_63, %c0_64, %c9_65, %c0_66], %21 {strides = array<i32>} : memref<2x10x10x6xf32, #tpu.memory_space<vmem>>, vector<2x10x1x6xf32>,
    %c0_67 = arith.constant 0 : index
    %c0_68 = arith.constant 0 : index
    %c0_69 = arith.constant 0 : index
    %c0_70 = arith.constant 0 : index
    %24 = vector.load %arg1[%c0_67, %c0_68, %c0_69, %c0_70] : memref<2x16x16x4xbf16, #tpu.memory_space<vmem>>, vector<2x16x16x4xbf16>
    %c0_71 = arith.constant 0 : index
    %c2 = arith.constant 2 : index
    %c2_72 = arith.constant 2 : index
    %c0_73 = arith.constant 0 : index
    %25 = vector.load %arg14[%c0_71, %c2, %c2_72, %c0_73] : memref<2x20x20x4xbf16, #tpu.memory_space<vmem>>, vector<2x16x16x4xbf16>
    tpu.vector_store %arg14[%c0_71, %c2, %c2_72, %c0_73], %24 {strides = array<i32>} : memref<2x20x20x4xbf16, #tpu.memory_space<vmem>>, vector<2x16x16x4xbf16>,
    %c0_74 = arith.constant 0 : index
    %c0_75 = arith.constant 0 : index
    %c0_76 = arith.constant 0 : index
    %c0_77 = arith.constant 0 : index
    %26 = vector.load %arg14[%c0_74, %c0_75, %c0_76, %c0_77] : memref<2x20x20x4xbf16, #tpu.memory_space<vmem>>, vector<2x16x16x4xbf16>
    %c0_78 = arith.constant 0 : index
    %c0_79 = arith.constant 0 : index
    %c2_80 = arith.constant 2 : index
    %c0_81 = arith.constant 0 : index
    %27 = vector.load %arg14[%c0_78, %c0_79, %c2_80, %c0_81] : memref<2x20x20x4xbf16, #tpu.memory_space<vmem>>, vector<2x16x16x4xbf16>
    %c0_82 = arith.constant 0 : index
    %c0_83 = arith.constant 0 : index
    %c4 = arith.constant 4 : index
    %c0_84 = arith.constant 0 : index
    %28 = vector.load %arg14[%c0_82, %c0_83, %c4, %c0_84] : memref<2x20x20x4xbf16, #tpu.memory_space<vmem>>, vector<2x16x16x4xbf16>
    %c0_85 = arith.constant 0 : index
    %c2_86 = arith.constant 2 : index
    %c0_87 = arith.constant 0 : index
    %c0_88 = arith.constant 0 : index
    %29 = vector.load %arg14[%c0_85, %c2_86, %c0_87, %c0_88] : memref<2x20x20x4xbf16, #tpu.memory_space<vmem>>, vector<2x16x16x4xbf16>
    %c0_89 = arith.constant 0 : index
    %c2_90 = arith.constant 2 : index
    %c2_91 = arith.constant 2 : index
    %c0_92 = arith.constant 0 : index
    %30 = vector.load %arg14[%c0_89, %c2_90, %c2_91, %c0_92] : memref<2x20x20x4xbf16, #tpu.memory_space<vmem>>, vector<2x16x16x4xbf16>
    %c0_93 = arith.constant 0 : index
    %c2_94 = arith.constant 2 : index
    %c4_95 = arith.constant 4 : index
    %c0_96 = arith.constant 0 : index
    %31 = vector.load %arg14[%c0_93, %c2_94, %c4_95, %c0_96] : memref<2x20x20x4xbf16, #tpu.memory_space<vmem>>, vector<2x16x16x4xbf16>
    %c0_97 = arith.constant 0 : index
    %c4_98 = arith.constant 4 : index
    %c0_99 = arith.constant 0 : index
    %c0_100 = arith.constant 0 : index
    %32 = vector.load %arg14[%c0_97, %c4_98, %c0_99, %c0_100] : memref<2x20x20x4xbf16, #tpu.memory_space<vmem>>, vector<2x16x16x4xbf16>
    %c0_101 = arith.constant 0 : index
    %c4_102 = arith.constant 4 : index
    %c2_103 = arith.constant 2 : index
    %c0_104 = arith.constant 0 : index
    %33 = vector.load %arg14[%c0_101, %c4_102, %c2_103, %c0_104] : memref<2x20x20x4xbf16, #tpu.memory_space<vmem>>, vector<2x16x16x4xbf16>
    %c0_105 = arith.constant 0 : index
    %c4_106 = arith.constant 4 : index
    %c4_107 = arith.constant 4 : index
    %c0_108 = arith.constant 0 : index
    %34 = vector.load %arg14[%c0_105, %c4_106, %c4_107, %c0_108] : memref<2x20x20x4xbf16, #tpu.memory_space<vmem>>, vector<2x16x16x4xbf16>
    %35 = tpu.concatenate %26, %27, %28, %29, %30, %31, %32, %33, %34 in 3 : vector<2x16x16x4xbf16>, vector<2x16x16x4xbf16>, vector<2x16x16x4xbf16>, vector<2x16x16x4xbf16>, vector<2x16x16x4xbf16>, vector<2x16x16x4xbf16>, vector<2x16x16x4xbf16>, vector<2x16x16x4xbf16>, vector<2x16x16x4xbf16> -> vector<2x16x16x36xbf16>
    %36 = vector.shape_cast %35 : vector<2x16x16x36xbf16> to vector<512x36xbf16>
    %c0_109 = arith.constant 0 : index
    %c0_110 = arith.constant 0 : index
    %37 = vector.load %arg2[%c0_109, %c0_110] : memref<36x48xbf16, #tpu.memory_space<vmem>>, vector<36x48xbf16>
    %cst_111 = arith.constant dense<0.000000e+00> : vector<512x48xf32>
    %38 = tpu.matmul %36, %37, %cst_111 {dimension_numbers = #tpu.dot_dimension_numbers<[1], [0], [0], [1], [0, 0, 1, 1], [], []>} : vector<512x36xbf16>, vector<36x48xbf16>, vector<512x48xf32> -> vector<512x48xf32>
    %c0_112 = arith.constant 0 : index
    %c0_113 = arith.constant 0 : index
    %39 = vector.load %arg3[%c0_112, %c0_113] : memref<1x48xf32, #tpu.memory_space<vmem>>, vector<1x48xf32>
    %40 = vector.broadcast %39 : vector<1x48xf32> to vector<512x48xf32>
    %41 = arith.mulf %38, %40 : vector<512x48xf32>
    %c0_114 = arith.constant 0 : index
    %c0_115 = arith.constant 0 : index
    %42 = vector.load %arg4[%c0_114, %c0_115] : memref<1x48xf32, #tpu.memory_space<vmem>>, vector<1x48xf32>
    %43 = vector.broadcast %42 : vector<1x48xf32> to vector<512x48xf32>
    %44 = arith.addf %41, %43 : vector<512x48xf32>
    %cst_116 = arith.constant 0.000000e+00 : f32
    %45 = vector.broadcast %cst_116 : f32 to vector<512x48xf32>
    %46 = arith.maximumf %44, %45 : vector<512x48xf32>
    %47 = vector.shape_cast %46 : vector<512x48xf32> to vector<32x16x48xf32>
    %48 = vector.shape_cast %47 : vector<32x16x48xf32> to vector<16x2x16x48xf32>
    %49 = vector.extract_strided_slice %48 {offsets = [0, 0, 0, 0], sizes = [16, 1, 16, 48], strides = [1, 1, 1, 1]} : vector<16x2x16x48xf32> to vector<16x1x16x48xf32>
    %50 = vector.shape_cast %49 : vector<16x1x16x48xf32> to vector<16x16x48xf32>
    %51 = vector.extract_strided_slice %48 {offsets = [0, 1, 0, 0], sizes = [16, 1, 16, 48], strides = [1, 1, 1, 1]} : vector<16x2x16x48xf32> to vector<16x1x16x48xf32>
    %52 = vector.shape_cast %51 : vector<16x1x16x48xf32> to vector<16x16x48xf32>
    %53 = arith.addf %50, %52 : vector<16x16x48xf32>
    %54 = arith.maximumf %50, %52 : vector<16x16x48xf32>
    %55 = vector.extract_strided_slice %53 {offsets = [0, 0, 0], sizes = [16, 16, 32], strides = [1, 1, 1]} : vector<16x16x48xf32> to vector<16x16x32xf32>
    %56 = vector.extract_strided_slice %54 {offsets = [0, 0, 32], sizes = [16, 16, 16], strides = [1, 1, 1]} : vector<16x16x48xf32> to vector<16x16x16xf32>
    %57 = tpu.concatenate %55, %56 in 2 : vector<16x16x32xf32>, vector<16x16x16xf32> -> vector<16x16x48xf32>
    %c0_117 = arith.constant 0 : index
    %c0_118 = arith.constant 0 : index
    %c0_119 = arith.constant 0 : index
    %58 = vector.load %arg18[%c0_117, %c0_118, %c0_119] : memref<16x16x48xf32, #tpu.memory_space<vmem>>, vector<16x16x48xf32>
    tpu.vector_store %arg18[%c0_117, %c0_118, %c0_119], %57 {strides = array<i32>} : memref<16x16x48xf32, #tpu.memory_space<vmem>>, vector<16x16x48xf32>,
    %c0_120 = arith.constant 0 : index
    %c0_121 = arith.constant 0 : index
    %c0_122 = arith.constant 0 : index
    %59 = tpu.strided_load %arg18[%c0_120, %c0_121, %c0_122] {strides = array<i32: 1, 2, 1>} : memref<16x16x48xf32, #tpu.memory_space<vmem>>, vector<16x8x48xf32>
    %c0_123 = arith.constant 0 : index
    %c1 = arith.constant 1 : index
    %c0_124 = arith.constant 0 : index
    %60 = tpu.strided_load %arg18[%c0_123, %c1, %c0_124] {strides = array<i32: 1, 2, 1>} : memref<16x16x48xf32, #tpu.memory_space<vmem>>, vector<16x8x48xf32>
    %61 = vector.extract_strided_slice %59 {offsets = [0, 0, 0], sizes = [16, 8, 32], strides = [1, 1, 1]} : vector<16x8x48xf32> to vector<16x8x32xf32>
    %62 = vector.extract_strided_slice %60 {offsets = [0, 0, 0], sizes = [16, 8, 32], strides = [1, 1, 1]} : vector<16x8x48xf32> to vector<16x8x32xf32>
    %63 = arith.addf %61, %62 : vector<16x8x32xf32>
    %cst_125 = arith.constant 2.500000e-01 : f32
    %64 = vector.broadcast %cst_125 : f32 to vector<16x8x32xf32>
    %65 = arith.mulf %64, %63 : vector<16x8x32xf32>
    %66 = vector.extract_strided_slice %59 {offsets = [0, 0, 32], sizes = [16, 8, 16], strides = [1, 1, 1]} : vector<16x8x48xf32> to vector<16x8x16xf32>
    %67 = vector.extract_strided_slice %60 {offsets = [0, 0, 32], sizes = [16, 8, 16], strides = [1, 1, 1]} : vector<16x8x48xf32> to vector<16x8x16xf32>
    %68 = arith.maximumf %66, %67 : vector<16x8x16xf32>
    %69 = vector.extract_strided_slice %65 {offsets = [0, 0, 0], sizes = [16, 8, 16], strides = [1, 1, 1]} : vector<16x8x32xf32> to vector<16x8x16xf32>
    %70 = vector.extract_strided_slice %65 {offsets = [0, 0, 16], sizes = [16, 8, 16], strides = [1, 1, 1]} : vector<16x8x32xf32> to vector<16x8x16xf32>
    %71 = vector.shape_cast %69 : vector<16x8x16xf32> to vector<2x8x8x16xf32>
    %72 = arith.truncf %71 : vector<2x8x8x16xf32> to vector<2x8x8x16xbf16>
    %c0_126 = arith.constant 0 : index
    %c2_127 = arith.constant 2 : index
    %c2_128 = arith.constant 2 : index
    %c0_129 = arith.constant 0 : index
    %73 = vector.load %arg15[%c0_126, %c2_127, %c2_128, %c0_129] : memref<2x12x12x16xbf16, #tpu.memory_space<vmem>>, vector<2x8x8x16xbf16>
    tpu.vector_store %arg15[%c0_126, %c2_127, %c2_128, %c0_129], %72 {strides = array<i32>} : memref<2x12x12x16xbf16, #tpu.memory_space<vmem>>, vector<2x8x8x16xbf16>,
    %c0_130 = arith.constant 0 : index
    %c0_131 = arith.constant 0 : index
    %c0_132 = arith.constant 0 : index
    %c0_133 = arith.constant 0 : index
    %74 = vector.load %arg15[%c0_130, %c0_131, %c0_132, %c0_133] : memref<2x12x12x16xbf16, #tpu.memory_space<vmem>>, vector<2x8x8x16xbf16>
    %c0_134 = arith.constant 0 : index
    %c0_135 = arith.constant 0 : index
    %c2_136 = arith.constant 2 : index
    %c0_137 = arith.constant 0 : index
    %75 = vector.load %arg15[%c0_134, %c0_135, %c2_136, %c0_137] : memref<2x12x12x16xbf16, #tpu.memory_space<vmem>>, vector<2x8x8x16xbf16>
    %c0_138 = arith.constant 0 : index
    %c0_139 = arith.constant 0 : index
    %c4_140 = arith.constant 4 : index
    %c0_141 = arith.constant 0 : index
    %76 = vector.load %arg15[%c0_138, %c0_139, %c4_140, %c0_141] : memref<2x12x12x16xbf16, #tpu.memory_space<vmem>>, vector<2x8x8x16xbf16>
    %c0_142 = arith.constant 0 : index
    %c2_143 = arith.constant 2 : index
    %c0_144 = arith.constant 0 : index
    %c0_145 = arith.constant 0 : index
    %77 = vector.load %arg15[%c0_142, %c2_143, %c0_144, %c0_145] : memref<2x12x12x16xbf16, #tpu.memory_space<vmem>>, vector<2x8x8x16xbf16>
    %c0_146 = arith.constant 0 : index
    %c2_147 = arith.constant 2 : index
    %c2_148 = arith.constant 2 : index
    %c0_149 = arith.constant 0 : index
    %78 = vector.load %arg15[%c0_146, %c2_147, %c2_148, %c0_149] : memref<2x12x12x16xbf16, #tpu.memory_space<vmem>>, vector<2x8x8x16xbf16>
    %c0_150 = arith.constant 0 : index
    %c2_151 = arith.constant 2 : index
    %c4_152 = arith.constant 4 : index
    %c0_153 = arith.constant 0 : index
    %79 = vector.load %arg15[%c0_150, %c2_151, %c4_152, %c0_153] : memref<2x12x12x16xbf16, #tpu.memory_space<vmem>>, vector<2x8x8x16xbf16>
    %c0_154 = arith.constant 0 : index
    %c4_155 = arith.constant 4 : index
    %c0_156 = arith.constant 0 : index
    %c0_157 = arith.constant 0 : index
    %80 = vector.load %arg15[%c0_154, %c4_155, %c0_156, %c0_157] : memref<2x12x12x16xbf16, #tpu.memory_space<vmem>>, vector<2x8x8x16xbf16>
    %c0_158 = arith.constant 0 : index
    %c4_159 = arith.constant 4 : index
    %c2_160 = arith.constant 2 : index
    %c0_161 = arith.constant 0 : index
    %81 = vector.load %arg15[%c0_158, %c4_159, %c2_160, %c0_161] : memref<2x12x12x16xbf16, #tpu.memory_space<vmem>>, vector<2x8x8x16xbf16>
    %c0_162 = arith.constant 0 : index
    %c4_163 = arith.constant 4 : index
    %c4_164 = arith.constant 4 : index
    %c0_165 = arith.constant 0 : index
    %82 = vector.load %arg15[%c0_162, %c4_163, %c4_164, %c0_165] : memref<2x12x12x16xbf16, #tpu.memory_space<vmem>>, vector<2x8x8x16xbf16>
    %83 = tpu.concatenate %74, %75, %76, %77, %78, %79, %80, %81, %82 in 3 : vector<2x8x8x16xbf16>, vector<2x8x8x16xbf16>, vector<2x8x8x16xbf16>, vector<2x8x8x16xbf16>, vector<2x8x8x16xbf16>, vector<2x8x8x16xbf16>, vector<2x8x8x16xbf16>, vector<2x8x8x16xbf16>, vector<2x8x8x16xbf16> -> vector<2x8x8x144xbf16>
    %84 = vector.shape_cast %83 : vector<2x8x8x144xbf16> to vector<128x144xbf16>
    %c0_166 = arith.constant 0 : index
    %c0_167 = arith.constant 0 : index
    %85 = vector.load %arg5[%c0_166, %c0_167] : memref<144x16xbf16, #tpu.memory_space<vmem>>, vector<144x16xbf16>
    %cst_168 = arith.constant dense<0.000000e+00> : vector<128x16xf32>
    %86 = tpu.matmul %84, %85, %cst_168 {dimension_numbers = #tpu.dot_dimension_numbers<[1], [0], [0], [1], [0, 0, 1, 1], [], []>} : vector<128x144xbf16>, vector<144x16xbf16>, vector<128x16xf32> -> vector<128x16xf32>
    %c0_169 = arith.constant 0 : index
    %c0_170 = arith.constant 0 : index
    %87 = vector.load %arg6[%c0_169, %c0_170] : memref<1x16xf32, #tpu.memory_space<vmem>>, vector<1x16xf32>
    %88 = vector.broadcast %87 : vector<1x16xf32> to vector<128x16xf32>
    %89 = arith.mulf %86, %88 : vector<128x16xf32>
    %c0_171 = arith.constant 0 : index
    %c0_172 = arith.constant 0 : index
    %90 = vector.load %arg7[%c0_171, %c0_172] : memref<1x16xf32, #tpu.memory_space<vmem>>, vector<1x16xf32>
    %91 = vector.broadcast %90 : vector<1x16xf32> to vector<128x16xf32>
    %92 = arith.addf %89, %91 : vector<128x16xf32>
    %cst_173 = arith.constant 0.000000e+00 : f32
    %93 = vector.broadcast %cst_173 : f32 to vector<128x16xf32>
    %94 = arith.maximumf %92, %93 : vector<128x16xf32>
    %95 = vector.shape_cast %94 : vector<128x16xf32> to vector<2x8x8x16xf32>
    %c0_174 = arith.constant 0 : index
    %c1_175 = arith.constant 1 : index
    %c1_176 = arith.constant 1 : index
    %c0_177 = arith.constant 0 : index
    %96 = vector.load %arg16[%c0_174, %c1_175, %c1_176, %c0_177] : memref<2x10x10x16xf32, #tpu.memory_space<vmem>>, vector<2x8x8x16xf32>
    tpu.vector_store %arg16[%c0_174, %c1_175, %c1_176, %c0_177], %95 {strides = array<i32>} : memref<2x10x10x16xf32, #tpu.memory_space<vmem>>, vector<2x8x8x16xf32>,
    %c0_178 = arith.constant 0 : index
    %c0_179 = arith.constant 0 : index
    %c0_180 = arith.constant 0 : index
    %c0_181 = arith.constant 0 : index
    %97 = vector.load %arg16[%c0_178, %c0_179, %c0_180, %c0_181] : memref<2x10x10x16xf32, #tpu.memory_space<vmem>>, vector<2x8x8x16xf32>
    %c0_182 = arith.constant 0 : index
    %c0_183 = arith.constant 0 : index
    %c1_184 = arith.constant 1 : index
    %c0_185 = arith.constant 0 : index
    %98 = vector.load %arg16[%c0_182, %c0_183, %c1_184, %c0_185] : memref<2x10x10x16xf32, #tpu.memory_space<vmem>>, vector<2x8x8x16xf32>
    %99 = arith.maximumf %97, %98 : vector<2x8x8x16xf32>
    %c0_186 = arith.constant 0 : index
    %c0_187 = arith.constant 0 : index
    %c2_188 = arith.constant 2 : index
    %c0_189 = arith.constant 0 : index
    %100 = vector.load %arg16[%c0_186, %c0_187, %c2_188, %c0_189] : memref<2x10x10x16xf32, #tpu.memory_space<vmem>>, vector<2x8x8x16xf32>
    %101 = arith.maximumf %99, %100 : vector<2x8x8x16xf32>
    %c0_190 = arith.constant 0 : index
    %c1_191 = arith.constant 1 : index
    %c0_192 = arith.constant 0 : index
    %c0_193 = arith.constant 0 : index
    %102 = vector.load %arg16[%c0_190, %c1_191, %c0_192, %c0_193] : memref<2x10x10x16xf32, #tpu.memory_space<vmem>>, vector<2x8x8x16xf32>
    %103 = arith.maximumf %101, %102 : vector<2x8x8x16xf32>
    %c0_194 = arith.constant 0 : index
    %c1_195 = arith.constant 1 : index
    %c1_196 = arith.constant 1 : index
    %c0_197 = arith.constant 0 : index
    %104 = vector.load %arg16[%c0_194, %c1_195, %c1_196, %c0_197] : memref<2x10x10x16xf32, #tpu.memory_space<vmem>>, vector<2x8x8x16xf32>
    %105 = arith.maximumf %103, %104 : vector<2x8x8x16xf32>
    %c0_198 = arith.constant 0 : index
    %c1_199 = arith.constant 1 : index
    %c2_200 = arith.constant 2 : index
    %c0_201 = arith.constant 0 : index
    %106 = vector.load %arg16[%c0_198, %c1_199, %c2_200, %c0_201] : memref<2x10x10x16xf32, #tpu.memory_space<vmem>>, vector<2x8x8x16xf32>
    %107 = arith.maximumf %105, %106 : vector<2x8x8x16xf32>
    %c0_202 = arith.constant 0 : index
    %c2_203 = arith.constant 2 : index
    %c0_204 = arith.constant 0 : index
    %c0_205 = arith.constant 0 : index
    %108 = vector.load %arg16[%c0_202, %c2_203, %c0_204, %c0_205] : memref<2x10x10x16xf32, #tpu.memory_space<vmem>>, vector<2x8x8x16xf32>
    %109 = arith.maximumf %107, %108 : vector<2x8x8x16xf32>
    %c0_206 = arith.constant 0 : index
    %c2_207 = arith.constant 2 : index
    %c1_208 = arith.constant 1 : index
    %c0_209 = arith.constant 0 : index
    %110 = vector.load %arg16[%c0_206, %c2_207, %c1_208, %c0_209] : memref<2x10x10x16xf32, #tpu.memory_space<vmem>>, vector<2x8x8x16xf32>
    %111 = arith.maximumf %109, %110 : vector<2x8x8x16xf32>
    %c0_210 = arith.constant 0 : index
    %c2_211 = arith.constant 2 : index
    %c2_212 = arith.constant 2 : index
    %c0_213 = arith.constant 0 : index
    %112 = vector.load %arg16[%c0_210, %c2_211, %c2_212, %c0_213] : memref<2x10x10x16xf32, #tpu.memory_space<vmem>>, vector<2x8x8x16xf32>
    %113 = arith.maximumf %111, %112 : vector<2x8x8x16xf32>
    %114 = vector.shape_cast %113 : vector<2x8x8x16xf32> to vector<2x64x16xf32>
    %115 = vector.shape_cast %70 : vector<16x8x16xf32> to vector<2x64x16xf32>
    %116 = vector.shape_cast %68 : vector<16x8x16xf32> to vector<2x64x16xf32>
    %117 = tpu.concatenate %114, %115, %116 in 2 : vector<2x64x16xf32>, vector<2x64x16xf32>, vector<2x64x16xf32> -> vector<2x64x48xf32>
    %cst_214 = arith.constant dense<0.000000e+00> : vector<2x48xf32>
    %118 = vector.multi_reduction <add>, %117, %cst_214 [1] : vector<2x64x48xf32> to vector<2x48xf32>
    %cst_215 = arith.constant 6.400000e+01 : f32
    %119 = vector.broadcast %cst_215 : f32 to vector<2x48xf32>
    %120 = arith.divf %118, %119 : vector<2x48xf32>
    %cst_216 = arith.constant dense<0xFF800000> : vector<2x48xf32>
    %121 = vector.multi_reduction <maximumf>, %117, %cst_216 [1] : vector<2x64x48xf32> to vector<2x48xf32>
    %122 = tpu.concatenate %120, %121 in 0 : vector<2x48xf32>, vector<2x48xf32> -> vector<4x48xf32>
    %c0_217 = arith.constant 0 : index
    %c0_218 = arith.constant 0 : index
    %123 = vector.load %arg8[%c0_217, %c0_218] : memref<48x3xf32, #tpu.memory_space<vmem>>, vector<48x3xf32>
    %cst_219 = arith.constant dense<0.000000e+00> : vector<4x3xf32>
    %124 = tpu.matmul %122, %123, %cst_219 {dimension_numbers = #tpu.dot_dimension_numbers<[1], [0], [0], [1], [0, 0, 1, 1], [], []>} : vector<4x48xf32>, vector<48x3xf32>, vector<4x3xf32> -> vector<4x3xf32>
    %cst_220 = arith.constant 0.000000e+00 : f32
    %125 = vector.broadcast %cst_220 : f32 to vector<4x3xf32>
    %126 = arith.maximumf %124, %125 : vector<4x3xf32>
    %c0_221 = arith.constant 0 : index
    %c0_222 = arith.constant 0 : index
    %127 = vector.load %arg9[%c0_221, %c0_222] : memref<3x48xf32, #tpu.memory_space<vmem>>, vector<3x48xf32>
    %cst_223 = arith.constant dense<0.000000e+00> : vector<4x48xf32>
    %128 = tpu.matmul %126, %127, %cst_223 {dimension_numbers = #tpu.dot_dimension_numbers<[1], [0], [0], [1], [0, 0, 1, 1], [], []>} : vector<4x3xf32>, vector<3x48xf32>, vector<4x48xf32> -> vector<4x48xf32>
    %129 = vector.extract_strided_slice %128 {offsets = [0, 0], sizes = [2, 48], strides = [1, 1]} : vector<4x48xf32> to vector<2x48xf32>
    %130 = vector.extract_strided_slice %128 {offsets = [2, 0], sizes = [2, 48], strides = [1, 1]} : vector<4x48xf32> to vector<2x48xf32>
    %131 = arith.addf %129, %130 : vector<2x48xf32>
    %132 = arith.negf %131 : vector<2x48xf32>
    %133 = math.exp %132 : vector<2x48xf32>
    %cst_224 = arith.constant 1.000000e+00 : f32
    %134 = vector.broadcast %cst_224 : f32 to vector<2x48xf32>
    %135 = arith.addf %134, %133 : vector<2x48xf32>
    %136 = arith.divf %134, %135 : vector<2x48xf32>
    %137 = vector.shape_cast %136 : vector<2x48xf32> to vector<2x1x48xf32>
    %138 = vector.broadcast %137 : vector<2x1x48xf32> to vector<2x64x48xf32>
    %139 = arith.mulf %117, %138 : vector<2x64x48xf32>
    %140 = vector.shape_cast %139 : vector<2x64x48xf32> to vector<2x8x8x48xf32>
    %141 = vector.extract_strided_slice %140 {offsets = [0, 0, 0, 0], sizes = [2, 8, 8, 16], strides = [1, 1, 1, 1]} : vector<2x8x8x48xf32> to vector<2x8x8x16xf32>
    %cst_225 = arith.constant dense<0.000000e+00> : vector<2x8x8xf32>
    %142 = vector.multi_reduction <add>, %141, %cst_225 [3] : vector<2x8x8x16xf32> to vector<2x8x8xf32>
    %143 = vector.shape_cast %142 : vector<2x8x8xf32> to vector<2x8x8x1xf32>
    %cst_226 = arith.constant 1.600000e+01 : f32
    %144 = vector.broadcast %cst_226 : f32 to vector<2x8x8x1xf32>
    %145 = arith.divf %143, %144 : vector<2x8x8x1xf32>
    %cst_227 = arith.constant dense<0xFF800000> : vector<2x8x8xf32>
    %146 = vector.multi_reduction <maximumf>, %141, %cst_227 [3] : vector<2x8x8x16xf32> to vector<2x8x8xf32>
    %147 = vector.shape_cast %146 : vector<2x8x8xf32> to vector<2x8x8x1xf32>
    %148 = vector.extract_strided_slice %140 {offsets = [0, 0, 0, 16], sizes = [2, 8, 8, 16], strides = [1, 1, 1, 1]} : vector<2x8x8x48xf32> to vector<2x8x8x16xf32>
    %cst_228 = arith.constant dense<0.000000e+00> : vector<2x8x8xf32>
    %149 = vector.multi_reduction <add>, %148, %cst_228 [3] : vector<2x8x8x16xf32> to vector<2x8x8xf32>
    %150 = vector.shape_cast %149 : vector<2x8x8xf32> to vector<2x8x8x1xf32>
    %cst_229 = arith.constant 1.600000e+01 : f32
    %151 = vector.broadcast %cst_229 : f32 to vector<2x8x8x1xf32>
    %152 = arith.divf %150, %151 : vector<2x8x8x1xf32>
    %cst_230 = arith.constant dense<0xFF800000> : vector<2x8x8xf32>
    %153 = vector.multi_reduction <maximumf>, %148, %cst_230 [3] : vector<2x8x8x16xf32> to vector<2x8x8xf32>
    %154 = vector.shape_cast %153 : vector<2x8x8xf32> to vector<2x8x8x1xf32>
    %155 = vector.extract_strided_slice %140 {offsets = [0, 0, 0, 32], sizes = [2, 8, 8, 16], strides = [1, 1, 1, 1]} : vector<2x8x8x48xf32> to vector<2x8x8x16xf32>
    %cst_231 = arith.constant dense<0.000000e+00> : vector<2x8x8xf32>
    %156 = vector.multi_reduction <add>, %155, %cst_231 [3] : vector<2x8x8x16xf32> to vector<2x8x8xf32>
    %157 = vector.shape_cast %156 : vector<2x8x8xf32> to vector<2x8x8x1xf32>
    %cst_232 = arith.constant 1.600000e+01 : f32
    %158 = vector.broadcast %cst_232 : f32 to vector<2x8x8x1xf32>
    %159 = arith.divf %157, %158 : vector<2x8x8x1xf32>
    %cst_233 = arith.constant dense<0xFF800000> : vector<2x8x8xf32>
    %160 = vector.multi_reduction <maximumf>, %155, %cst_233 [3] : vector<2x8x8x16xf32> to vector<2x8x8xf32>
    %161 = vector.shape_cast %160 : vector<2x8x8xf32> to vector<2x8x8x1xf32>
    %162 = tpu.concatenate %145, %147, %152, %154, %159, %161 in 3 : vector<2x8x8x1xf32>, vector<2x8x8x1xf32>, vector<2x8x8x1xf32>, vector<2x8x8x1xf32>, vector<2x8x8x1xf32>, vector<2x8x8x1xf32> -> vector<2x8x8x6xf32>
    %c0_234 = arith.constant 0 : index
    %c1_235 = arith.constant 1 : index
    %c1_236 = arith.constant 1 : index
    %c0_237 = arith.constant 0 : index
    %163 = vector.load %arg17[%c0_234, %c1_235, %c1_236, %c0_237] : memref<2x10x10x6xf32, #tpu.memory_space<vmem>>, vector<2x8x8x6xf32>
    tpu.vector_store %arg17[%c0_234, %c1_235, %c1_236, %c0_237], %162 {strides = array<i32>} : memref<2x10x10x6xf32, #tpu.memory_space<vmem>>, vector<2x8x8x6xf32>,
    %c0_238 = arith.constant 0 : index
    %c0_239 = arith.constant 0 : index
    %c0_240 = arith.constant 0 : index
    %c0_241 = arith.constant 0 : index
    %164 = vector.load %arg17[%c0_238, %c0_239, %c0_240, %c0_241] : memref<2x10x10x6xf32, #tpu.memory_space<vmem>>, vector<2x8x8x6xf32>
    %c0_242 = arith.constant 0 : index
    %c0_243 = arith.constant 0 : index
    %c1_244 = arith.constant 1 : index
    %c0_245 = arith.constant 0 : index
    %165 = vector.load %arg17[%c0_242, %c0_243, %c1_244, %c0_245] : memref<2x10x10x6xf32, #tpu.memory_space<vmem>>, vector<2x8x8x6xf32>
    %c0_246 = arith.constant 0 : index
    %c0_247 = arith.constant 0 : index
    %c2_248 = arith.constant 2 : index
    %c0_249 = arith.constant 0 : index
    %166 = vector.load %arg17[%c0_246, %c0_247, %c2_248, %c0_249] : memref<2x10x10x6xf32, #tpu.memory_space<vmem>>, vector<2x8x8x6xf32>
    %c0_250 = arith.constant 0 : index
    %c1_251 = arith.constant 1 : index
    %c0_252 = arith.constant 0 : index
    %c0_253 = arith.constant 0 : index
    %167 = vector.load %arg17[%c0_250, %c1_251, %c0_252, %c0_253] : memref<2x10x10x6xf32, #tpu.memory_space<vmem>>, vector<2x8x8x6xf32>
    %c0_254 = arith.constant 0 : index
    %c1_255 = arith.constant 1 : index
    %c1_256 = arith.constant 1 : index
    %c0_257 = arith.constant 0 : index
    %168 = vector.load %arg17[%c0_254, %c1_255, %c1_256, %c0_257] : memref<2x10x10x6xf32, #tpu.memory_space<vmem>>, vector<2x8x8x6xf32>
    %c0_258 = arith.constant 0 : index
    %c1_259 = arith.constant 1 : index
    %c2_260 = arith.constant 2 : index
    %c0_261 = arith.constant 0 : index
    %169 = vector.load %arg17[%c0_258, %c1_259, %c2_260, %c0_261] : memref<2x10x10x6xf32, #tpu.memory_space<vmem>>, vector<2x8x8x6xf32>
    %c0_262 = arith.constant 0 : index
    %c2_263 = arith.constant 2 : index
    %c0_264 = arith.constant 0 : index
    %c0_265 = arith.constant 0 : index
    %170 = vector.load %arg17[%c0_262, %c2_263, %c0_264, %c0_265] : memref<2x10x10x6xf32, #tpu.memory_space<vmem>>, vector<2x8x8x6xf32>
    %c0_266 = arith.constant 0 : index
    %c2_267 = arith.constant 2 : index
    %c1_268 = arith.constant 1 : index
    %c0_269 = arith.constant 0 : index
    %171 = vector.load %arg17[%c0_266, %c2_267, %c1_268, %c0_269] : memref<2x10x10x6xf32, #tpu.memory_space<vmem>>, vector<2x8x8x6xf32>
    %c0_270 = arith.constant 0 : index
    %c2_271 = arith.constant 2 : index
    %c2_272 = arith.constant 2 : index
    %c0_273 = arith.constant 0 : index
    %172 = vector.load %arg17[%c0_270, %c2_271, %c2_272, %c0_273] : memref<2x10x10x6xf32, #tpu.memory_space<vmem>>, vector<2x8x8x6xf32>
    %173 = tpu.concatenate %164, %165, %166, %167, %168, %169, %170, %171, %172 in 3 : vector<2x8x8x6xf32>, vector<2x8x8x6xf32>, vector<2x8x8x6xf32>, vector<2x8x8x6xf32>, vector<2x8x8x6xf32>, vector<2x8x8x6xf32>, vector<2x8x8x6xf32>, vector<2x8x8x6xf32>, vector<2x8x8x6xf32> -> vector<2x8x8x54xf32>
    %174 = vector.shape_cast %173 : vector<2x8x8x54xf32> to vector<128x54xf32>
    %c0_274 = arith.constant 0 : index
    %c0_275 = arith.constant 0 : index
    %175 = vector.load %arg10[%c0_274, %c0_275] : memref<54x3xf32, #tpu.memory_space<vmem>>, vector<54x3xf32>
    %cst_276 = arith.constant dense<0.000000e+00> : vector<128x3xf32>
    %176 = tpu.matmul %174, %175, %cst_276 {dimension_numbers = #tpu.dot_dimension_numbers<[1], [0], [0], [1], [0, 0, 1, 1], [], []>} : vector<128x54xf32>, vector<54x3xf32>, vector<128x3xf32> -> vector<128x3xf32>
    %177 = arith.negf %176 : vector<128x3xf32>
    %178 = math.exp %177 : vector<128x3xf32>
    %cst_277 = arith.constant 1.000000e+00 : f32
    %179 = vector.broadcast %cst_277 : f32 to vector<128x3xf32>
    %180 = arith.addf %179, %178 : vector<128x3xf32>
    %181 = arith.divf %179, %180 : vector<128x3xf32>
    %182 = vector.shape_cast %139 : vector<2x64x48xf32> to vector<128x48xf32>
    %183 = vector.extract_strided_slice %182 {offsets = [0, 0], sizes = [128, 16], strides = [1, 1]} : vector<128x48xf32> to vector<128x16xf32>
    %184 = vector.extract_strided_slice %181 {offsets = [0, 0], sizes = [128, 1], strides = [1, 1]} : vector<128x3xf32> to vector<128x1xf32>
    %185 = vector.broadcast %184 : vector<128x1xf32> to vector<128x16xf32>
    %186 = arith.mulf %183, %185 : vector<128x16xf32>
    %187 = vector.extract_strided_slice %182 {offsets = [0, 16], sizes = [128, 16], strides = [1, 1]} : vector<128x48xf32> to vector<128x16xf32>
    %188 = vector.extract_strided_slice %181 {offsets = [0, 1], sizes = [128, 1], strides = [1, 1]} : vector<128x3xf32> to vector<128x1xf32>
    %189 = vector.broadcast %188 : vector<128x1xf32> to vector<128x16xf32>
    %190 = arith.mulf %187, %189 : vector<128x16xf32>
    %191 = vector.extract_strided_slice %182 {offsets = [0, 32], sizes = [128, 16], strides = [1, 1]} : vector<128x48xf32> to vector<128x16xf32>
    %192 = vector.extract_strided_slice %181 {offsets = [0, 2], sizes = [128, 1], strides = [1, 1]} : vector<128x3xf32> to vector<128x1xf32>
    %193 = vector.broadcast %192 : vector<128x1xf32> to vector<128x16xf32>
    %194 = arith.mulf %191, %193 : vector<128x16xf32>
    %195 = tpu.concatenate %186, %190, %194 in 1 : vector<128x16xf32>, vector<128x16xf32>, vector<128x16xf32> -> vector<128x48xf32>
    %c0_278 = arith.constant 0 : index
    %c0_279 = arith.constant 0 : index
    %196 = vector.load %arg11[%c0_278, %c0_279] : memref<24x48xbf16, #tpu.memory_space<vmem>>, vector<24x48xbf16>
    %197 = arith.truncf %195 : vector<128x48xf32> to vector<128x48xbf16>
    %cst_280 = arith.constant dense<0.000000e+00> : vector<24x128xf32>
    %198 = tpu.matmul %196, %197, %cst_280 {dimension_numbers = #tpu.dot_dimension_numbers<[1], [1], [0], [0], [0, 0, 1, 0], [], []>} : vector<24x48xbf16>, vector<128x48xbf16>, vector<24x128xf32> -> vector<24x128xf32>
    %c0_281 = arith.constant 0 : index
    %c0_282 = arith.constant 0 : index
    %199 = vector.load %arg12[%c0_281, %c0_282] : memref<24x1xf32, #tpu.memory_space<vmem>>, vector<24x1xf32>
    %200 = vector.broadcast %199 : vector<24x1xf32> to vector<24x128xf32>
    %201 = arith.addf %198, %200 : vector<24x128xf32>
    %cst_283 = arith.constant 0.000000e+00 : f32
    %202 = vector.broadcast %cst_283 : f32 to vector<24x128xf32>
    %203 = arith.maximumf %201, %202 : vector<24x128xf32>
    %c0_284 = arith.constant 0 : index
    %c0_285 = arith.constant 0 : index
    %c0_286 = arith.constant 0 : index
    %204 = vector.load %arg13[%c0_284, %c0_285, %c0_286] : memref<1x24x128xf32, #tpu.memory_space<vmem>>, vector<1x24x128xf32>
    %205 = vector.shape_cast %204 : vector<1x24x128xf32> to vector<24x128xf32>
    %206 = vector.shape_cast %203 : vector<24x128xf32> to vector<1x24x128xf32>
    tpu.vector_store %arg13[%c0_284, %c0_285, %c0_286], %206 {strides = array<i32>} : memref<1x24x128xf32, #tpu.memory_space<vmem>>, vector<1x24x128xf32>,
    return
  }
  func.func @transform_0(%arg0: i32) -> (i32, i32, i32, i32) {
    %c0_i32 = arith.constant 0 : i32
    %c0_i32_0 = arith.constant 0 : i32
    %c0_i32_1 = arith.constant 0 : i32
    %c0_i32_2 = arith.constant 0 : i32
    return %arg0, %c0_i32, %c0_i32_0, %c0_i32_1 : i32, i32, i32, i32
  }
  func.func @transform_1(%arg0: i32) -> (i32, i32) {
    %c0_i32 = arith.constant 0 : i32
    %c0_i32_0 = arith.constant 0 : i32
    %c0_i32_1 = arith.constant 0 : i32
    return %c0_i32, %c0_i32_0 : i32, i32
  }
  func.func @transform_2(%arg0: i32) -> (i32, i32) {
    %c0_i32 = arith.constant 0 : i32
    %c0_i32_0 = arith.constant 0 : i32
    %c0_i32_1 = arith.constant 0 : i32
    return %c0_i32, %c0_i32_0 : i32, i32
  }
  func.func @transform_3(%arg0: i32) -> (i32, i32) {
    %c0_i32 = arith.constant 0 : i32
    %c0_i32_0 = arith.constant 0 : i32
    %c0_i32_1 = arith.constant 0 : i32
    return %c0_i32, %c0_i32_0 : i32, i32
  }
  func.func @transform_4(%arg0: i32) -> (i32, i32) {
    %c0_i32 = arith.constant 0 : i32
    %c0_i32_0 = arith.constant 0 : i32
    %c0_i32_1 = arith.constant 0 : i32
    return %c0_i32, %c0_i32_0 : i32, i32
  }
  func.func @transform_5(%arg0: i32) -> (i32, i32) {
    %c0_i32 = arith.constant 0 : i32
    %c0_i32_0 = arith.constant 0 : i32
    %c0_i32_1 = arith.constant 0 : i32
    return %c0_i32, %c0_i32_0 : i32, i32
  }
  func.func @transform_6(%arg0: i32) -> (i32, i32) {
    %c0_i32 = arith.constant 0 : i32
    %c0_i32_0 = arith.constant 0 : i32
    %c0_i32_1 = arith.constant 0 : i32
    return %c0_i32, %c0_i32_0 : i32, i32
  }
  func.func @transform_7(%arg0: i32) -> (i32, i32) {
    %c0_i32 = arith.constant 0 : i32
    %c0_i32_0 = arith.constant 0 : i32
    %c0_i32_1 = arith.constant 0 : i32
    return %c0_i32, %c0_i32_0 : i32, i32
  }
  func.func @transform_8(%arg0: i32) -> (i32, i32) {
    %c0_i32 = arith.constant 0 : i32
    %c0_i32_0 = arith.constant 0 : i32
    %c0_i32_1 = arith.constant 0 : i32
    return %c0_i32, %c0_i32_0 : i32, i32
  }
  func.func @transform_9(%arg0: i32) -> (i32, i32) {
    %c0_i32 = arith.constant 0 : i32
    %c0_i32_0 = arith.constant 0 : i32
    %c0_i32_1 = arith.constant 0 : i32
    return %c0_i32, %c0_i32_0 : i32, i32
  }
  func.func @transform_10(%arg0: i32) -> (i32, i32) {
    %c0_i32 = arith.constant 0 : i32
    %c0_i32_0 = arith.constant 0 : i32
    %c0_i32_1 = arith.constant 0 : i32
    return %c0_i32, %c0_i32_0 : i32, i32
  }
  func.func @transform_11(%arg0: i32) -> (i32, i32) {
    %c0_i32 = arith.constant 0 : i32
    %c0_i32_0 = arith.constant 0 : i32
    %c0_i32_1 = arith.constant 0 : i32
    return %c0_i32, %c0_i32_0 : i32, i32
  }
  func.func @transform_12(%arg0: i32) -> (i32, i32, i32) {
    %c0_i32 = arith.constant 0 : i32
    %c0_i32_0 = arith.constant 0 : i32
    %c0_i32_1 = arith.constant 0 : i32
    return %arg0, %c0_i32, %c0_i32_0 : i32, i32, i32
  }
}

</mosaic_0001>

<bundles_post_ra>
// kernel: stm_renet2_cbam1_block.1
= control target key start
LH: loop header
LB: loop body
LE: loop exit
PB: predicated region body
PF: predicated region fallthrough
CT: control target
= control target key end

     0   :  { %s12264_s21 = smov 0   ;;  %s17079_s0 = inlined_call_operand.vmem [shape: bf16[4,16,16,4], index: 0, kind: input, shape index: {}]   ;;  %s17080_s1 = inlined_call_operand.vmem [shape: bf16[36,48], index: 1, kind: input, shape index: {}]   ;;  %s17081_s2 = inlined_call_operand.vmem [shape: f32[1,48], index: 2, kind: input, shape index: {}]   ;;  %s17082_s3 = inlined_call_operand.vmem [shape: f32[1,48], index: 3, kind: input, shape index: {}]   ;;  %s17083_s4 = inlined_call_operand.vmem [shape: bf16[144,16], index: 4, kind: input, shape index: {}]   ;;  %s17084_s5 = inlined_call_operand.vmem [shape: f32[1,16], index: 5, kind: input, shape index: {}]   ;;  %s17085_s6 = inlined_call_operand.vmem [shape: f32[1,16], index: 6, kind: input, shape index: {}]   ;;  %s17086_s7 = inlined_call_operand.vmem [shape: f32[48,3], index: 7, kind: input, shape index: {}]   ;;  %s17087_s8 = inlined_call_operand.vmem [shape: f32[3,48], index: 8, kind: input, shape index: {}]   ;;  %s17088_s9 = inlined_call_operand.vmem [shape: f32[54,3], index: 9, kind: input, shape index: {}]   ;;  %s17089_s10 = inlined_call_operand.vmem [shape: bf16[24,48], index: 10, kind: input, shape index: {}]   ;;  %s17090_s11 = inlined_call_operand.vmem [shape: f32[24,1], index: 11, kind: input, shape index: {}]   ;;  %s17091_s12 = inlined_call_operand.vmem [shape: f32[2,24,128], index: 12, kind: output, shape index: {}]  }
   0x1 LB: > { %s12270_s22 = sadd.s32 4294967295, %s12173_s21   ;;  %p10475_p0 = scmp.ge.s32.totalorder %s12173_s21, 1  ;;  %s12173_s21 = sphi %s12264_s21, %s22_s21  }
   0x2   : > { %p364_p1 = scmp.lt.s32.totalorder %s12173_s21, 3 }
   0x4   : > { %p365_p2 = pnand %p10475_p0, %p364_p1 }
   0x6   : > { %368 = sbr.rel (%p365_p2) target bundleno = 3206 (0xc86), region = 68 }
   0xb   : > { %vm17093_vm0 = vcmask 27648   ;;  %vm423_vm1 = vcmask 25600   ;;  %v17101_v0 = vmov 0   ;;  %s10476_s23 = sshll.u32 %s12270_s22, 1  ;;  %vm447_vm2 = vcmask 24576   ;;  %s12176_s29 = smov 8  }
   0xc   : > { %421 = vst.msk [vmem:[#allocation2] sm:$0xf] %vm17093_vm0, %v17101_v0  ;;  %422 = vst.msk [vmem:[#allocation2 + $0x4] sm:$0xf] %vm17093_vm0, %v17101_v0  ;;  %7570 = vmatprep.subr.bf16.mxu1 %v17101_v0  ;;  %11503 = vset.pattern.permute.xlu1 %v17101_v0  ;;  %p12327_p3 = scmp.lt.s32.totalorder %s10476_s23, 3  ;;  %vm2467_vm3 = vcmask 1045504  }
   0xd   : > { %424 = vst.msk [vmem:[#allocation2 + $0x8] sm:$0x3] %vm423_vm1, %v17101_v0  ;;  %427 = vst.msk [vmem:[#allocation2 + $0x14] sm:$0x3] %vm423_vm1, %v17101_v0  ;;  %11505 = vset.pattern.permute.xlu0 %v17101_v0  ;;  %vm17097_vm4 = vcmask 1046528   ;;  %vm828_vm5 = vcmask 1040384  }
   0xe   : > { %425 = vst.msk [vmem:[#allocation2 + $0xc] sm:$0xf] %vm17093_vm0, %v17101_v0  ;;  %426 = vst.msk [vmem:[#allocation2 + $0x10] sm:$0xf] %vm17093_vm0, %v17101_v0  ;;  %s17632_s23 = smov (!%p12327_p3, %s10476_s23), 3  ;;  %vm829_vm6 = vcmask 1044484  }
   0xf   : > { %428 = vst.msk [vmem:[#allocation2 + $0xf0] sm:$0xf] %vm17093_vm0, %v17101_v0  ;;  %429 = vst.msk [vmem:[#allocation2 + $0xf4] sm:$0xf] %vm17093_vm0, %v17101_v0  ;;  %s11219_s25 = sshll.u32 %s17632_s23, 7  ;;  %vm1088_vm7 = vcmask 27649  }
  0x10   : > { %430 = vst.msk [vmem:[#allocation2 + $0xf8] sm:$0x3] %vm423_vm1, %v17101_v0  ;;  %433 = vst.msk [vmem:[#allocation2 + $0x104] sm:$0x3] %vm423_vm1, %v17101_v0  ;;  %s12419_s28 = scalar_lea.vmem %s17079_s0, %s11219_s25  ;;  %s12177_s30 = smov 4   ;;  %vm17092_vm9 = vcmask 1041408  }
  0x11   : > { %431 = vst.msk [vmem:[#allocation2 + $0xfc] sm:$0xf] %vm17093_vm0, %v17101_v0  ;;  %432 = vst.msk [vmem:[#allocation2 + $0x100] sm:$0xf] %vm17093_vm0, %v17101_v0  ;;  %v702_v23 = vld [vmem:[%s12419_s28 + $0x8] sm:$0xf] }
  0x12   : > { %435 = vst.msk [vmem:[#allocation2 + $0xd8] sm:$0xf] %vm17093_vm0, %v17101_v0  ;;  %436 = vst.msk [vmem:[#allocation2 + $0xdc] sm:$0xf] %vm17093_vm0, %v17101_v0  ;;  %v703_v24 = vld [vmem:[%s12419_s28 + $0xc] sm:$0xf] }
  0x13   : > { %437 = vst.msk [vmem:[#allocation2 + $0xe0] sm:$0x3] %vm423_vm1, %v17101_v0  ;;  %440 = vst.msk [vmem:[#allocation2 + $0xec] sm:$0x3] %vm423_vm1, %v17101_v0  ;;  %v1186_v1 = vld [vmem:[#allocation2 + $0x4] sm:$0xf] }
  0x14   : > { %438 = vst.msk [vmem:[#allocation2 + $0xe4] sm:$0xf] %vm17093_vm0, %v17101_v0  ;;  %439 = vst.msk [vmem:[#allocation2 + $0xe8] sm:$0xf] %vm17093_vm0, %v17101_v0  ;;  %v1313_v2 = vld [vmem:[#allocation2] sm:$0xc] }
  0x15   : > { %441 = vst.msk [vmem:[#allocation2 + $0x1c8] sm:$0xf] %vm17093_vm0, %v17101_v0  ;;  %442 = vst.msk [vmem:[#allocation2 + $0x1cc] sm:$0xf] %vm17093_vm0, %v17101_v0  ;;  %v1249_v3 = vld [vmem:[#allocation2] sm:$0xe]  ;;  %v10576_v4 = vcombine.low %v1313_v2, %v1186_v1 }
  0x16   : > { %443 = vst.msk [vmem:[#allocation2 + $0x1d0] sm:$0x3] %vm423_vm1, %v17101_v0  ;;  %446 = vst.msk [vmem:[#allocation2 + $0x1dc] sm:$0x3] %vm423_vm1, %v17101_v0  ;;  %v10512_v6 = vcombine.low %v1249_v3, %v1186_v1  ;;  %v1188_v11 = vld [vmem:[#allocation2 + $0x10] sm:$0xf] }
  0x17   : > { %444 = vst.msk [vmem:[#allocation2 + $0x1d4] sm:$0xf] %vm17093_vm0, %v17101_v0  ;;  %445 = vst.msk [vmem:[#allocation2 + $0x1d8] sm:$0xf] %vm17093_vm0, %v17101_v0  ;;  %v2468_v8 = vrot.slane %v10576_v4, 2  ;;  %v836_v27 = vrot.slane %v702_v23, 7 }
  0x18   : > { %451 = vst.msk [vmem:[#allocation2 + $0x24] sm:$0x1] %vm447_vm2, %v17101_v0  ;;  %448 = vst.msk [vmem:[#allocation2] sm:$0x1] %vm447_vm2, %v17101_v0  ;;  %v2115_v10 = vrot.slane %v10512_v6, 1  ;;  %v838_v28 = vrot.slane %v703_v24, 7 }
  0x19   : > { %449 = vst.msk [vmem:[#allocation2 + $0xc] sm:$0x1] %vm447_vm2, %v17101_v0  ;;  %450 = vst.msk [vmem:[#allocation2 + $0x18] sm:$0x1] %vm447_vm2, %v17101_v0  ;;  %v1315_v13 = vld [vmem:[#allocation2 + $0xc] sm:$0xc] }
  0x1a   : > { %452 = vst.msk [vmem:[#allocation2 + $0x30] sm:$0x1] %vm447_vm2, %v17101_v0  ;;  %453 = vst.msk [vmem:[#allocation2 + $0x3c] sm:$0x1] %vm447_vm2, %v17101_v0  ;;  %v10578_v15 = vcombine.low %v1315_v13, %v1188_v11  ;;  %v1251_v17 = vld [vmem:[#allocation2 + $0xc] sm:$0xe] }
  0x1b   : > { %454 = vst.msk [vmem:[#allocation2 + $0x48] sm:$0x1] %vm447_vm2, %v17101_v0  ;;  %455 = vst.msk [vmem:[#allocation2 + $0x54] sm:$0x1] %vm447_vm2, %v17101_v0  ;;  %v10514_v19 = vcombine.low %v1251_v17, %v1188_v11  ;;  %v700_v29 = vld [vmem:[%s12419_s28] sm:$0xf] }
  0x1c   : > { %456 = vst.msk [vmem:[#allocation2 + $0x60] sm:$0x1] %vm447_vm2, %v17101_v0  ;;  %457 = vst.msk [vmem:[#allocation2 + $0x6c] sm:$0x1] %vm447_vm2, %v17101_v0  ;;  %v2471_v21 = vrot.slane %v10578_v15, 2  ;;  %v831_v33 = vrot.slane %v700_v29, 7 }
  0x1d   : > { %458 = vst.msk [vmem:[#allocation2 + $0x78] sm:$0x1] %vm447_vm2, %v17101_v0  ;;  %459 = vst.msk [vmem:[#allocation2 + $0x84] sm:$0x1] %vm447_vm2, %v17101_v0  ;;  %v2118_v25 = vrot.slane %v10514_v19, 1  ;;  %v837_v36 = vrot.slane %v836_v27, 4 }
  0x1e   : > { %460 = vst.msk [vmem:[#allocation2 + $0x90] sm:$0x1] %vm447_vm2, %v17101_v0  ;;  %461 = vst.msk [vmem:[#allocation2 + $0x9c] sm:$0x1] %vm447_vm2, %v17101_v0  ;;  %v701_v32 = vld [vmem:[%s12419_s28 + $0x4] sm:$0xf] }
  0x1f   : > { %462 = vst.msk [vmem:[#allocation2 + $0xa8] sm:$0x1] %vm447_vm2, %v17101_v0  ;;  %463 = vst.msk [vmem:[#allocation2 + $0xb4] sm:$0x1] %vm447_vm2, %v17101_v0  ;;  %v706_v34 = vld [vmem:[%s12419_s28 + $0x18] sm:$0xf] }
  0x20   : > { %464 = vst.msk [vmem:[#allocation2 + $0xc0] sm:$0x1] %vm447_vm2, %v17101_v0  ;;  %465 = vst.msk [vmem:[#allocation2 + $0xcc] sm:$0x1] %vm447_vm2, %v17101_v0  ;;  %v833_v37 = vrot.slane %v701_v32, 7  ;;  %v846_v39 = vrot.slane %v706_v34, 7 }
  0x21   : > { %466 = vst.msk [vmem:[#allocation2 + $0xd8] sm:$0x1] %vm447_vm2, %v17101_v0  ;;  %467 = vst.msk [vmem:[#allocation2 + $0xe4] sm:$0x1] %vm447_vm2, %v17101_v0  ;;  %v707_v38 = vld [vmem:[%s12419_s28 + $0x1c] sm:$0xf] }
  0x22   : > { %468 = vst.msk [vmem:[#allocation2 + $0xf0] sm:$0x1] %vm447_vm2, %v17101_v0  ;;  %469 = vst.msk [vmem:[#allocation2 + $0xfc] sm:$0x1] %vm447_vm2, %v17101_v0  ;;  %v832_v40 = vrot.slane %v831_v33, 4  ;;  %v848_v41 = vrot.slane %v707_v38, 7 }
  0x23   : > { %470 = vst.msk [vmem:[#allocation2 + $0x108] sm:$0x1] %vm447_vm2, %v17101_v0  ;;  %471 = vst.msk [vmem:[#allocation2 + $0x114] sm:$0x1] %vm447_vm2, %v17101_v0  ;;  %v704_v42 = vld [vmem:[%s12419_s28 + $0x10] sm:$0xf] }
  0x24   : > { %472 = vst.msk [vmem:[#allocation2 + $0x120] sm:$0x1] %vm447_vm2, %v17101_v0  ;;  %473 = vst.msk [vmem:[#allocation2 + $0x12c] sm:$0x1] %vm447_vm2, %v17101_v0  ;;  %v705_v43 = vld [vmem:[%s12419_s28 + $0x14] sm:$0xf] }
  0x25   : > { %474 = vst.msk [vmem:[#allocation2 + $0x138] sm:$0x1] %vm447_vm2, %v17101_v0  ;;  %475 = vst.msk [vmem:[#allocation2 + $0x144] sm:$0x1] %vm447_vm2, %v17101_v0  ;;  %v847_v45 = vrot.slane %v846_v39, 4  ;;  %v841_v46 = vrot.slane %v704_v42, 7 }
  0x26   : > { %476 = vst.msk [vmem:[#allocation2 + $0x150] sm:$0x1] %vm447_vm2, %v17101_v0  ;;  %477 = vst.msk [vmem:[#allocation2 + $0x15c] sm:$0x1] %vm447_vm2, %v17101_v0  ;;  %v843_v47 = vrot.slane %v705_v43, 7  ;;  %v840_v50 = vrot.slane %v838_v28, 4 }
  0x27   : > { %478 = vst.msk [vmem:[#allocation2 + $0x168] sm:$0x1] %vm447_vm2, %v17101_v0  ;;  %479 = vst.msk [vmem:[#allocation2 + $0x174] sm:$0x1] %vm447_vm2, %v17101_v0  ;;  %v708_v48 = vld [vmem:[%s12419_s28 + $0x20] sm:$0xf] }
  0x28   : > { %480 = vst.msk [vmem:[#allocation2 + $0x180] sm:$0x1] %vm447_vm2, %v17101_v0  ;;  %481 = vst.msk [vmem:[#allocation2 + $0x18c] sm:$0x1] %vm447_vm2, %v17101_v0  ;;  %v835_v51 = vrot.slane %v833_v37, 4  ;;  %v850_v52 = vrot.slane %v848_v41, 4 }
  0x29   : > { %482 = vst.msk [vmem:[#allocation2 + $0x198] sm:$0x1] %vm447_vm2, %v17101_v0  ;;  %483 = vst.msk [vmem:[#allocation2 + $0x1a4] sm:$0x1] %vm447_vm2, %v17101_v0  ;;  %v12453_v53 = vld [vmem:[%s12419_s28 + $0x24] sm:$0xf] }
  0x2a   : > { %484 = vst.msk [vmem:[#allocation2 + $0x1b0] sm:$0x1] %vm447_vm2, %v17101_v0  ;;  %485 = vst.msk [vmem:[#allocation2 + $0x1bc] sm:$0x1] %vm447_vm2, %v17101_v0  ;;  %v842_v55 = vrot.slane %v841_v46, 4  ;;  %v845_v56 = vrot.slane %v843_v47, 4 }
  0x2b   : > { %486 = vst.msk [vmem:[#allocation2 + $0x1c8] sm:$0x1] %vm447_vm2, %v17101_v0  ;;  %487 = vst.msk [vmem:[#allocation2 + $0x1d4] sm:$0x1] %vm447_vm2, %v17101_v0  ;;  %v851_v57 = vrot.slane %v708_v48, 7  ;;  %v853_v59 = vrot.slane %v12453_v53, 7 }
  0x2c   : > { %v11539_v5 = vld [vmem:[#allocation2 + $0x8] ss:$0 sps:$4 sm:$0x33]   ;;  %v11542_v16 = vld [vmem:[#allocation2 + $0x14] ss:$0 sps:$4 sm:$0x33]   ;;  %vm12431_vm8 = vmor %vm828_vm5, %vm829_vm6 }
  0x2d   : > { %v11540_v7 = vld [vmem:[#allocation2 + $0x8] ss:$0 sps:$4 sm:$0x11]   ;;  %v2469_v9 = vrot.slane %v11539_v5, 2  ;;  %v2472_v22 = vrot.slane %v11542_v16, 2  ;;  %v839_v44 = vsel %vm12431_vm8, %v837_v36, %v838_v28  ;;  %v834_v49 = vsel %vm12431_vm8, %v832_v40, %v833_v37  ;;  %s12178_s13 = smov 12  }
  0x2e   : > { %v2116_v12 = vrot.slane %v11540_v7, 1  ;;  %v11544_v20 = vld [vmem:[#allocation2 + $0x14] ss:$0 sps:$4 sm:$0x11]   ;;  %1092 = vst.msk [vmem:[#allocation2 + $0x24] sm:$0xe] %vm1088_vm7, %v836_v27  ;;  %v849_v54 = vsel %vm12431_vm8, %v847_v45, %v848_v41  ;;  %v844_v62 = vsel %vm12431_vm8, %v842_v55, %v843_v47 }
  0x2f   : > { %v2470_v14 = vsel %vm2467_vm3, %v2468_v8, %v2469_v9  ;;  %v2119_v26 = vrot.slane %v11544_v20, 1  ;;  %v2473_v30 = vsel %vm2467_vm3, %v2471_v21, %v2472_v22  ;;  %1089 = vst.msk [vmem:[#allocation2 + $0x18] sm:$0xe] %vm1088_vm7, %v831_v33  ;;  %1098 = vst.msk [vmem:[#allocation2 + $0x3c] sm:$0xe] %vm1088_vm7, %v846_v39  ;;  %v852_v63 = vrot.slane %v851_v57, 4 }
  0x30   : > { %2564 = vrot.lane.b32.xlu1 %v2470_v14, %s12176_s29  ;;  %v2117_v18 = vsel %vm17097_vm4, %v2115_v10, %v2116_v12  ;;  %1093 = vst.msk [vmem:[#allocation2 + $0x28] sm:$0xf] %vm17093_vm0, %v839_v44  ;;  %1090 = vst.msk [vmem:[#allocation2 + $0x1c] sm:$0xf] %vm17093_vm0, %v834_v49  ;;  %v12460_v58 = vld [vmem:[%s12419_s28 + $0x28] sm:$0xf] }
  0x31   : > { %2211 = vrot.lane.b32.xlu0 %v2117_v18, %s12177_s30  ;;  %v2120_v35 = vsel %vm17097_vm4, %v2118_v25, %v2119_v26  ;;  %1095 = vst.msk [vmem:[#allocation2 + $0x30] sm:$0xe] %vm1088_vm7, %v841_v46  ;;  %v856_v60 = vrot.slane %v12460_v58, 7  ;;  %v12469_v61 = vld [vmem:[%s12419_s28 + $0x30] sm:$0xf]  ;;  %v854_v4 = vsel %vm12431_vm8, %v852_v63, %v853_v59  ;;  %s12179_s14 = smov 24  }
  0x32   : > { %1099 = vst.msk [vmem:[#allocation2 + $0x40] sm:$0xf] %vm17093_vm0, %v849_v54  ;;  %v861_v1 = vrot.slane %v12469_v61, 7  ;;  %1096 = vst.msk [vmem:[#allocation2 + $0x34] sm:$0xf] %vm17093_vm0, %v844_v62  ;;  %s12180_s15 = smov 16  }
  0x33   : > { %1094 = vst.msk [vmem:[#allocation2 + $0x2c] sm:$0x1] %vm447_vm2, %v840_v50  ;;  %1091 = vst.msk [vmem:[#allocation2 + $0x20] sm:$0x1] %vm447_vm2, %v835_v51  ;;  %v711_v11 = vld [vmem:[%s12419_s28 + $0x2c] sm:$0xf] }
  0x34   : > { %2566 = vrot.lane.b32.xlu1 %v2473_v30, %s12176_s29  ;;  %1100 = vst.msk [vmem:[#allocation2 + $0x44] sm:$0x1] %vm447_vm2, %v850_v52  ;;  %1097 = vst.msk [vmem:[#allocation2 + $0x38] sm:$0x1] %vm447_vm2, %v845_v56  ;;  %v858_v33 = vrot.slane %v711_v11, 7  ;;  %v857_v55 = vrot.slane %v856_v60, 4 }
  0x35   : > { %2213 = vrot.lane.b32.xlu0 %v2120_v35, %s12177_s30  ;;  %1101 = vst.msk [vmem:[#allocation2 + $0x48] sm:$0xe] %vm1088_vm7, %v851_v57  ;;  %1104 = vst.msk [vmem:[#allocation2 + $0x54] sm:$0xe] %vm1088_vm7, %v856_v60  ;;  %v1379_v2 = vld [vmem:[#allocation2 + $0x24] sm:$0xf] }
  0x36   : > { %v1443_v3 = vld [vmem:[#allocation2 + $0x24] sm:$0xe]  ;;  %1107 = vst.msk [vmem:[#allocation2 + $0x60] sm:$0xe] %vm1088_vm7, %v861_v1  ;;  %v1377_v5 = vld [vmem:[#allocation2 + $0x18] sm:$0xf] }
  0x37   : > { %v1441_v6 = vld [vmem:[#allocation2 + $0x18] sm:$0xe]  ;;  %v1507_v7 = vld [vmem:[#allocation2 + $0x24] sm:$0xc]  ;;  %1102 = vst.msk [vmem:[#allocation2 + $0x4c] sm:$0xf] %vm17093_vm0, %v854_v4 }
  0x38   : > { %v1380_v8 = vld [vmem:[#allocation2 + $0x28] sm:$0xf]  ;;  %v1572_v9 = vld [vmem:[#allocation2 + $0x3c] sm:$0xf]  ;;  %v1505_v10 = vld [vmem:[#allocation2 + $0x18] sm:$0xc] }
  0x39   : > { %v10641_v12 = vcombine.low %v1379_v2, %v1380_v8  ;;  %v1378_v13 = vld [vmem:[#allocation2 + $0x1c] sm:$0xf]  ;;  %v1570_v14 = vld [vmem:[#allocation2 + $0x30] sm:$0xf]  ;;  %v10674_v15 = vcombine.low %v1443_v3, %v1380_v8  ;;  %v12489_v18 = vld [vmem:[#allocation2 + $0x40] sm:$0xf]  ;;  %v10738_v23 = vcombine.low %v1507_v7, %v1380_v8 }
  0x3a   : > { %v1636_v16 = vld [vmem:[#allocation2 + $0x3c] sm:$0xe]  ;;  %v10640_v17 = vcombine.low %v1377_v5, %v1378_v13  ;;  %v10672_v19 = vcombine.low %v1441_v6, %v1378_v13  ;;  %v1634_v20 = vld [vmem:[#allocation2 + $0x30] sm:$0xe]  ;;  %v10801_v21 = vcombine.low %v1572_v9, %v12489_v18  ;;  %v10736_v24 = vcombine.low %v1505_v10, %v1378_v13  ;;  %v1571_v25 = vld [vmem:[#allocation2 + $0x34] sm:$0xf] }
  0x3b   : > { %2790 = vrot.lane.b32.xlu1 %v10641_v12, %s12178_s13  ;;  %v11549_v22 = vld [vmem:[#allocation2 + $0x2c] ss:$0 sps:$4 sm:$0x11]   ;;  %v3047_v26 = vrot.slane %v10674_v15, 1  ;;  %v10800_v28 = vcombine.low %v1570_v14, %v1571_v25  ;;  %v10834_v36 = vcombine.low %v1636_v16, %v12489_v18  ;;  %v3399_v37 = vrot.slane %v10738_v23, 2  ;;  %s12181_s16 = smov 20  }
  0x3c   : > { %2788 = vrot.lane.b32.xlu0 %v10640_v17, %s12178_s13  ;;  %v11550_v27 = vld [vmem:[#allocation2 + $0x20] ss:$0 sps:$4 sm:$0x11]   ;;  %v3048_v29 = vrot.slane %v11549_v22, 1  ;;  %v3044_v30 = vrot.slane %v10672_v19, 1  ;;  %v3396_v38 = vrot.slane %v10736_v24, 2  ;;  %v10832_v39 = vcombine.low %v1634_v20, %v1571_v25 }
  0x3d   : > { %v11551_v32 = vld [vmem:[#allocation2 + $0x2c] ss:$0 sps:$4 sm:$0x33]   ;;  %v3045_v34 = vrot.slane %v11550_v27, 1  ;;  %v1253_v40 = vld [vmem:[#allocation2 + $0x18] sm:$0xe]  ;;  %v859_v6 = vsel %vm12431_vm8, %v857_v55, %v858_v33 }
  0x3e   : > { %v11552_v35 = vld [vmem:[#allocation2 + $0x20] ss:$0 sps:$4 sm:$0x33]   ;;  %v3049_v41 = vsel %vm17097_vm4, %v3047_v26, %v3048_v29  ;;  %v3400_v42 = vrot.slane %v11551_v32, 2  ;;  %v1698_v47 = vld [vmem:[#allocation2 + $0x30] sm:$0xc] }
  0x3f   : > { %3718 = vrot.lane.b32.xlu1 %v10801_v21, %s12179_s14  ;;  %v11553_v43 = vld [vmem:[#allocation2 + $0x44] ss:$0 sps:$4 sm:$0x11]   ;;  %v3046_v44 = vsel %vm17097_vm4, %v3044_v30, %v3045_v34  ;;  %v3397_v45 = vrot.slane %v11552_v35, 2  ;;  %v3975_v48 = vrot.slane %v10834_v36, 1  ;;  %v3972_v50 = vrot.slane %v10832_v39, 1 }
  0x40   : > { %3716 = vrot.lane.b32.xlu0 %v10800_v28, %s12179_s14  ;;  %v11554_v46 = vld [vmem:[#allocation2 + $0x38] ss:$0 sps:$4 sm:$0x11]   ;;  %v1700_v49 = vld [vmem:[#allocation2 + $0x3c] sm:$0xc]  ;;  %v10896_v51 = vcombine.low %v1698_v47, %v1571_v25  ;;  %v3401_v56 = vsel %vm2467_vm3, %v3399_v37, %v3400_v42  ;;  %v3976_v57 = vrot.slane %v11553_v43, 1 }
  0x41   : > { %v11555_v52 = vld [vmem:[#allocation2 + $0x38] ss:$0 sps:$4 sm:$0x33]   ;;  %v1190_v54 = vld [vmem:[#allocation2 + $0x1c] sm:$0xf]  ;;  %v855_v2 = vrot.slane %v853_v59, 4  ;;  %v3398_v3 = vsel %vm2467_vm3, %v3396_v38, %v3397_v45  ;;  %v10898_v59 = vcombine.low %v1700_v49, %v12489_v18 }
  0x42   : > { %v10516_v62 = vcombine.low %v1253_v40, %v1190_v54  ;;  %v11557_v63 = vld [vmem:[#allocation2 + $0x20] ss:$0 sps:$4 sm:$0x11]   ;;  %v3973_v4 = vrot.slane %v11554_v46, 1  ;;  %v1192_v5 = vld [vmem:[#allocation2 + $0x28] sm:$0xf]  ;;  %v3977_v10 = vsel %vm17097_vm4, %v3975_v48, %v3976_v57 }
  0x43   : > { %3142 = vrot.lane.b32.xlu1 %v3049_v41, %s12180_s15  ;;  %v860_v58 = vrot.slane %v858_v33, 4  ;;  %v1255_v7 = vld [vmem:[#allocation2 + $0x24] sm:$0xe]  ;;  %1105 = vst.msk [vmem:[#allocation2 + $0x58] sm:$0xf] %vm17093_vm0, %v859_v6  ;;  %v4324_v8 = vrot.slane %v10896_v51, 2 }
  0x44   : > { %3140 = vrot.lane.b32.xlu0 %v3046_v44, %s12180_s15  ;;  %1103 = vst.msk [vmem:[#allocation2 + $0x50] sm:$0x1] %vm447_vm2, %v855_v2  ;;  %v713_v60 = vld [vmem:[%s12419_s28 + $0x34] sm:$0xf]  ;;  %v2121_v53 = vrot.slane %v10516_v62, 1  ;;  %v2122_v11 = vrot.slane %v11557_v63, 1  ;;  %v10518_v12 = vcombine.low %v1255_v7, %v1192_v5  ;;  %v3974_v14 = vsel %vm17097_vm4, %v3972_v50, %v3973_v4 }
  0x45   : > { %v11558_v9 = vld [vmem:[#allocation2 + $0x44] ss:$0 sps:$4 sm:$0x33]   ;;  %1106 = vst.msk [vmem:[#allocation2 + $0x5c] sm:$0x1] %vm447_vm2, %v860_v58  ;;  %v4325_v15 = vrot.slane %v11555_v52, 2 }
  0x46   : > { %v11560_v13 = vld [vmem:[#allocation2 + $0x2c] ss:$0 sps:$4 sm:$0x11]   ;;  %v1319_v16 = vld [vmem:[#allocation2 + $0x24] sm:$0xc]  ;;  %v862_v17 = vrot.slane %v861_v1, 4  ;;  %v2123_v23 = vsel %vm17097_vm4, %v2121_v53, %v2122_v11 }
  0x47   : > { %3494 = vrot.lane.b32.xlu1 %v3401_v56, %s12181_s16  ;;  %v1317_v19 = vld [vmem:[#allocation2 + $0x18] sm:$0xc]  ;;  %v863_v20 = vrot.slane %v713_v60, 7  ;;  %s12182_s17 = smov 28   ;;  %v4327_v18 = vrot.slane %v10898_v59, 2  ;;  %v10582_v21 = vcombine.low %v1319_v16, %v1192_v5  ;;  %v4328_v24 = vrot.slane %v11558_v9, 2 }
  0x48   : > { %3492 = vrot.lane.b32.xlu0 %v3398_v3, %s12181_s16  ;;  %v11564_v22 = vld [vmem:[#allocation2 + $0x2c] ss:$0 sps:$4 sm:$0x33]   ;;  %v2124_v25 = vrot.slane %v10518_v12, 1  ;;  %v2125_v26 = vrot.slane %v11560_v13, 1  ;;  %v4326_v27 = vsel %vm2467_vm3, %v4324_v8, %v4325_v15  ;;  %v10580_v28 = vcombine.low %v1317_v19, %v1190_v54  ;;  %s12183_s18 = smov 32  }
  0x49   : > { %v11562_v61 = vld [vmem:[#allocation2 + $0x20] ss:$0 sps:$4 sm:$0x33]   ;;  %v864_v1 = vsel %vm12431_vm8, %v862_v17, %v863_v20  ;;  %v865_v29 = vrot.slane %v863_v20, 4  ;;  %v2477_v30 = vrot.slane %v10582_v21, 2  ;;  %v2478_v32 = vrot.slane %v11564_v22, 2 }
  0x4a   : > { %1108 = vst.msk [vmem:[#allocation2 + $0x64] sm:$0xf] %vm17093_vm0, %v864_v1  ;;  %v2126_v33 = vsel %vm17097_vm4, %v2124_v25, %v2125_v26  ;;  %v1384_v34 = vld [vmem:[#allocation2 + $0x40] sm:$0xf]  ;;  %v1447_v35 = vld [vmem:[#allocation2 + $0x3c] sm:$0xe]  ;;  %v4329_v36 = vsel %vm2467_vm3, %v4327_v18, %v4328_v24 }
  0x4b   : > { %4070 = vrot.lane.b32.xlu1 %v3977_v10, %s12182_s17  ;;  %1109 = vst.msk [vmem:[#allocation2 + $0x68] sm:$0x1] %vm447_vm2, %v865_v29  ;;  %v2474_v37 = vrot.slane %v10580_v28, 2  ;;  %v2475_v38 = vrot.slane %v11562_v61, 2  ;;  %v1382_v39 = vld [vmem:[#allocation2 + $0x34] sm:$0xf]  ;;  %v10678_v42 = vcombine.low %v1447_v35, %v1384_v34  ;;  %v2479_v43 = vsel %vm2467_vm3, %v2477_v30, %v2478_v32 }
  0x4c   : > { %4068 = vrot.lane.b32.xlu0 %v3974_v14, %s12182_s17  ;;  %v1445_v40 = vld [vmem:[#allocation2 + $0x30] sm:$0xe]  ;;  %v1383_v41 = vld [vmem:[#allocation2 + $0x3c] sm:$0xf]  ;;  %v1577_v4 = vld [vmem:[#allocation2 + $0x58] sm:$0xf] }
  0x4d   : > { %v11568_v44 = vld [vmem:[#allocation2 + $0x38] ss:$0 sps:$4 sm:$0x11]   ;;  %v11570_v45 = vld [vmem:[#allocation2 + $0x44] ss:$0 sps:$4 sm:$0x11]   ;;  %v2476_v46 = vsel %vm2467_vm3, %v2474_v37, %v2475_v38  ;;  %v10676_v48 = vcombine.low %v1445_v40, %v1382_v39  ;;  %v10643_v51 = vcombine.low %v1383_v41, %v1384_v34 }
  0x4e   : > { %v1381_v47 = vld [vmem:[#allocation2 + $0x30] sm:$0xf]  ;;  %v1511_v49 = vld [vmem:[#allocation2 + $0x3c] sm:$0xc]  ;;  %v3053_v52 = vrot.slane %v10678_v42, 1  ;;  %v3054_v55 = vrot.slane %v11570_v45, 1 }
  0x4f   : > { %2215 = vrot.lane.b32.xlu1 %v2123_v23, %s12177_s30  ;;  %v1509_v50 = vld [vmem:[#allocation2 + $0x30] sm:$0xc]  ;;  %v10642_v54 = vcombine.low %v1381_v47, %v1382_v39  ;;  %v10742_v56 = vcombine.low %v1511_v49, %v1384_v34  ;;  %v11574_v57 = vld [vmem:[#allocation2 + $0x44] ss:$0 sps:$4 sm:$0x33]   ;;  %v3050_v62 = vrot.slane %v10676_v48, 1 }
  0x50   : > { %4420 = vrot.lane.b32.xlu0 %v4326_v27, %s12183_s18  ;;  %v3051_v63 = vrot.slane %v11568_v44, 1  ;;  %v10740_v2 = vcombine.low %v1509_v50, %v1382_v39  ;;  %v11572_v3 = vld [vmem:[#allocation2 + $0x38] ss:$0 sps:$4 sm:$0x33]   ;;  %v1640_v5 = vld [vmem:[#allocation2 + $0x54] sm:$0xe]  ;;  %v3055_v6 = vsel %vm17097_vm4, %v3053_v52, %v3054_v55 }
  0x51   : > { %v3405_v58 = vrot.slane %v10742_v56, 2  ;;  %v3406_v7 = vrot.slane %v11574_v57, 2  ;;  %v3403_v53 = vrot.slane %v11572_v3, 2  ;;  %v1575_v59 = vld [vmem:[#allocation2 + $0x4c] sm:$0xf]  ;;  %v10838_v11 = vcombine.low %v1640_v5, %v1577_v4  ;;  %s12186_s19 = smov 80  }
  0x52   : > { %v3052_v60 = vsel %vm17097_vm4, %v3050_v62, %v3051_v63  ;;  %v3402_v8 = vrot.slane %v10740_v2, 2  ;;  %v1576_v9 = vld [vmem:[#allocation2 + $0x54] sm:$0xf]  ;;  %v1638_v10 = vld [vmem:[#allocation2 + $0x48] sm:$0xe]  ;;  %vm4484_vm10 = vcmask 31744  }
  0x53   : > { %2217 = vrot.lane.b32.xlu1 %v2126_v33, %s12177_s30  ;;  %v1574_v12 = vld [vmem:[#allocation2 + $0x48] sm:$0xf]  ;;  %v11578_v13 = vld [vmem:[#allocation2 + $0x5c] ss:$0 sps:$4 sm:$0x11]   ;;  %v3407_v14 = vsel %vm2467_vm3, %v3405_v58, %v3406_v7  ;;  %v10836_v19 = vcombine.low %v1638_v10, %v1575_v59  ;;  %v3981_v21 = vrot.slane %v10838_v11, 1  ;;  %v10803_v23 = vcombine.low %v1576_v9, %v1577_v4 }
  0x54   : > { %4422 = vrot.lane.b32.xlu0 %v4329_v36, %s12183_s18  ;;  %v11577_v15 = vld [vmem:[#allocation2 + $0x50] ss:$0 sps:$4 sm:$0x11]   ;;  %v1702_v16 = vld [vmem:[#allocation2 + $0x48] sm:$0xc]  ;;  %v3404_v17 = vsel %vm2467_vm3, %v3402_v8, %v3403_v53  ;;  %v3982_v24 = vrot.slane %v11578_v13, 1  ;;  %v10802_v28 = vcombine.low %v1574_v12, %v1575_v59 }
  0x55   : > { %v1194_v20 = vld [vmem:[#allocation2 + $0x34] sm:$0xf]  ;;  %v1257_v18 = vld [vmem:[#allocation2 + $0x30] sm:$0xe]  ;;  %v10900_v25 = vcombine.low %v1702_v16, %v1575_v59  ;;  %v1196_v1 = vld [vmem:[#allocation2 + $0x40] sm:$0xf] }
  0x56   : > { %v11579_v22 = vld [vmem:[#allocation2 + $0x50] ss:$0 sps:$4 sm:$0x33]   ;;  %v11581_v26 = vld [vmem:[#allocation2 + $0x38] ss:$0 sps:$4 sm:$0x11]   ;;  %v10520_v61 = vcombine.low %v1257_v18, %v1194_v20  ;;  %v3983_v37 = vsel %vm17097_vm4, %v3981_v21, %v3982_v24 }
  0x57   : > { %2570 = vrot.lane.b32.xlu1 %v2479_v43, %s12176_s29  ;;  %v1704_v27 = vld [vmem:[#allocation2 + $0x54] sm:$0xc]  ;;  %v1259_v29 = vld [vmem:[#allocation2 + $0x3c] sm:$0xe]  ;;  %v3978_v30 = vrot.slane %v10836_v19, 1  ;;  %v3979_v32 = vrot.slane %v11577_v15, 1 }
  0x58   : > { %2568 = vrot.lane.b32.xlu0 %v2476_v46, %s12176_s29  ;;  %v4330_v33 = vrot.slane %v10900_v25, 2  ;;  %v10902_v34 = vcombine.low %v1704_v27, %v1577_v4  ;;  %v11582_v35 = vld [vmem:[#allocation2 + $0x5c] ss:$0 sps:$4 sm:$0x33]   ;;  %v10522_v36 = vcombine.low %v1259_v29, %v1196_v1  ;;  %v4331_v38 = vrot.slane %v11579_v22, 2  ;;  %s12192_s27 = smov 36  }
  0x59   : > { %v2127_v39 = vrot.slane %v10520_v61, 1  ;;  %v2128_v40 = vrot.slane %v11581_v26, 1  ;;  %v11584_v41 = vld [vmem:[#allocation2 + $0x44] ss:$0 sps:$4 sm:$0x11]   ;;  %v3980_v42 = vsel %vm17097_vm4, %v3978_v30, %v3979_v32  ;;  %v4334_v55 = vrot.slane %v11582_v35, 2 }
  0x5a   : > { %v1323_v43 = vld [vmem:[#allocation2 + $0x3c] sm:$0xc]  ;;  %v1321_v44 = vld [vmem:[#allocation2 + $0x30] sm:$0xc]  ;;  %v4333_v45 = vrot.slane %v10902_v34, 2  ;;  %v2130_v46 = vrot.slane %v10522_v36, 1  ;;  %v4332_v49 = vsel %vm2467_vm3, %v4330_v33, %v4331_v38 }
  0x5b   : > { %2794 = vrot.lane.b32.xlu1 %v10643_v51, %s12178_s13  ;;  %v714_v47 = vld [vmem:[%s12419_s28 + $0x38] sm:$0xf]  ;;  %v715_v48 = vld [vmem:[%s12419_s28 + $0x3c] sm:$0xf]  ;;  %v2129_v50 = vsel %vm17097_vm4, %v2127_v39, %v2128_v40  ;;  %v2131_v51 = vrot.slane %v11584_v41, 1  ;;  %v10586_v52 = vcombine.low %v1323_v43, %v1196_v1  ;;  %v10584_v56 = vcombine.low %v1321_v44, %v1194_v20  ;;  %s12193_s20 = smov 42  }
  0x5c   : > { %2792 = vrot.lane.b32.xlu0 %v10642_v54, %s12178_s13  ;;  %v11588_v54 = vld [vmem:[#allocation2 + $0x44] ss:$0 sps:$4 sm:$0x33]   ;;  %v11586_v57 = vld [vmem:[#allocation2 + $0x38] ss:$0 sps:$4 sm:$0x33]  }
  0x5d   : > { %v866_v62 = vrot.slane %v714_v47, 7  ;;  %v868_v63 = vrot.slane %v715_v48, 7  ;;  %v1388_v2 = vld [vmem:[#allocation2 + $0x58] sm:$0xf]  ;;  %v1451_v3 = vld [vmem:[#allocation2 + $0x54] sm:$0xe] }
  0x5e   : > { %v2483_v58 = vrot.slane %v10586_v52, 2  ;;  %v2484_v7 = vrot.slane %v11588_v54, 2  ;;  %v2480_v8 = vrot.slane %v10584_v56, 2  ;;  %v2481_v53 = vrot.slane %v11586_v57, 2  ;;  %v1386_v9 = vld [vmem:[#allocation2 + $0x4c] sm:$0xf] }
  0x5f   : > { %3146 = vrot.lane.b32.xlu1 %v3055_v6, %s12180_s15  ;;  %v867_v4 = vrot.slane %v866_v62, 4  ;;  %1110 = vst.msk [vmem:[#allocation2 + $0x6c] sm:$0xe] %vm1088_vm7, %v866_v62  ;;  %v870_v5 = vrot.slane %v868_v63, 4  ;;  %v2132_v6 = vsel %vm17097_vm4, %v2130_v46, %v2131_v51  ;;  %v1387_v10 = vld [vmem:[#allocation2 + $0x54] sm:$0xf]  ;;  %v10682_v12 = vcombine.low %v1451_v3, %v1388_v2 }
  0x60   : > { %3144 = vrot.lane.b32.xlu0 %v3052_v60, %s12180_s15  ;;  %v4335_v60 = vsel %vm2467_vm3, %v4333_v45, %v4334_v55  ;;  %v1449_v11 = vld [vmem:[#allocation2 + $0x48] sm:$0xe]  ;;  %v11594_v13 = vld [vmem:[#allocation2 + $0x5c] ss:$0 sps:$4 sm:$0x11]   ;;  %v2482_v16 = vsel %vm2467_vm3, %v2480_v8, %v2481_v53  ;;  %v10645_v22 = vcombine.low %v1387_v10, %v1388_v2  ;;  %vm4581_vm11 = vcmask 64512  }
  0x61   : > { %v869_v59 = vsel %vm12431_vm8, %v867_v4, %v868_v63  ;;  %1112 = vst.msk [vmem:[#allocation2 + $0x74] sm:$0x1] %vm447_vm2, %v870_v5  ;;  %v11592_v15 = vld [vmem:[#allocation2 + $0x50] ss:$0 sps:$4 sm:$0x11]   ;;  %v10680_v19 = vcombine.low %v1449_v11, %v1386_v9  ;;  %v3059_v21 = vrot.slane %v10682_v12, 1 }
  0x62   : > { %1111 = vst.msk [vmem:[#allocation2 + $0x70] sm:$0xf] %vm17093_vm0, %v869_v59  ;;  %v1513_v20 = vld [vmem:[#allocation2 + $0x48] sm:$0xc]  ;;  %v1515_v18 = vld [vmem:[#allocation2 + $0x54] sm:$0xc] }
  0x63   : > { %3498 = vrot.lane.b32.xlu1 %v3407_v14, %s12181_s16  ;;  %v2485_v14 = vsel %vm2467_vm3, %v2483_v58, %v2484_v7  ;;  %v11596_v24 = vld [vmem:[#allocation2 + $0x50] ss:$0 sps:$4 sm:$0x33]   ;;  %v10744_v26 = vcombine.low %v1513_v20, %v1386_v9  ;;  %v10746_v27 = vcombine.low %v1515_v18, %v1388_v2  ;;  %v3056_v61 = vrot.slane %v10680_v19, 1  ;;  %v1579_v29 = vld [vmem:[#allocation2 + $0x64] sm:$0xf] }
  0x64   : > { %3496 = vrot.lane.b32.xlu0 %v3404_v17, %s12181_s16  ;;  %v1385_v17 = vld [vmem:[#allocation2 + $0x48] sm:$0xf]  ;;  %v3057_v1 = vrot.slane %v11592_v15, 1  ;;  %v1642_v30 = vld [vmem:[#allocation2 + $0x60] sm:$0xe]  ;;  %v3409_v34 = vrot.slane %v11596_v24, 2 }
  0x65   : > { %v10644_v25 = vcombine.low %v1385_v17, %v1386_v9  ;;  %v3408_v33 = vrot.slane %v10744_v26, 2  ;;  %v3411_v35 = vrot.slane %v10746_v27, 2  ;;  %v10840_v39 = vcombine.low %v1642_v30, %v1579_v29  ;;  %v11601_v41 = vld [vmem:[#allocation2 + $0x68] ss:$0 sps:$4 sm:$0x11]   ;;  %p414_p4 = scmp.lt.s32.totalorder %s12270_s22, 1 }
  0x66   : > { %v1644_v40 = vld [vmem:[#allocation2 + $0x6c] sm:$0xe]  ;;  %v1706_v44 = vld [vmem:[#allocation2 + $0x60] sm:$0xc]  ;;  %v1261_v51 = vld [vmem:[#allocation2 + $0x48] sm:$0xe] }
  0x67   : > { %3722 = vrot.lane.b32.xlu1 %v10803_v23, %s12179_s14  ;;  %v3060_v23 = vrot.slane %v11594_v13, 1  ;;  %v1580_v43 = vld [vmem:[#allocation2 + $0x6c] sm:$0xf]  ;;  %v3985_v52 = vrot.slane %v11601_v41, 1  ;;  %v10904_v54 = vcombine.low %v1706_v44, %v1579_v29  ;;  %v1200_v56 = vld [vmem:[#allocation2 + $0x58] sm:$0xf] }
  0x68   : > { %3720 = vrot.lane.b32.xlu0 %v10802_v28, %s12179_s14  ;;  %v11598_v28 = vld [vmem:[#allocation2 + $0x5c] ss:$0 sps:$4 sm:$0x33]   ;;  %v12580_v45 = vld [vmem:[#allocation2 + $0x4c] sm:$0xf]  ;;  %vm4646_vm12 = vcmask 97280  }
  0x69   : > { %v3061_v32 = vsel %vm17097_vm4, %v3059_v21, %v3060_v23  ;;  %v3412_v36 = vrot.slane %v11598_v28, 2  ;;  %v12577_v38 = vld [vmem:[#allocation2 + $0x70] sm:$0xf]  ;;  %v11602_v48 = vld [vmem:[#allocation2 + $0x74] ss:$0 sps:$4 sm:$0x11]   ;;  %v10524_v58 = vcombine.low %v1261_v51, %v12580_v45 }
  0x6a   : > { %v10842_v47 = vcombine.low %v1644_v40, %v12577_v38  ;;  %v11605_v55 = vld [vmem:[#allocation2 + $0x50] ss:$0 sps:$4 sm:$0x11]   ;;  %v10805_v57 = vcombine.low %v1580_v43, %v12577_v38  ;;  %v11603_v62 = vld [vmem:[#allocation2 + $0x68] ss:$0 sps:$4 sm:$0x33]  }
  0x6b   : > { %4074 = vrot.lane.b32.xlu1 %v3983_v37, %s12182_s17  ;;  %v3058_v37 = vsel %vm17097_vm4, %v3056_v61, %v3057_v1  ;;  %v3413_v46 = vsel %vm2467_vm3, %v3411_v35, %v3412_v36  ;;  %v1263_v63 = vld [vmem:[#allocation2 + $0x54] sm:$0xe]  ;;  %v716_v2 = vld [vmem:[%s12419_s28 + $0x40] sm:$0xf]  ;;  %v717_v3 = vld [vmem:[%s12419_s28 + $0x44] sm:$0xf] }
  0x6c   : > { %4072 = vrot.lane.b32.xlu0 %v3980_v42, %s12182_s17  ;;  %v1578_v42 = vld [vmem:[#allocation2 + $0x60] sm:$0xf]  ;;  %v3987_v5 = vrot.slane %v10842_v47, 1  ;;  %v718_v7 = vld [vmem:[%s12419_s28 + $0x48] sm:$0xf]  ;;  %v871_v53 = vrot.slane %v716_v2, 7  ;;  %v10526_v13 = vcombine.low %v1263_v63, %v1200_v56 }
  0x6d   : > { %v10804_v4 = vcombine.low %v1578_v42, %v1579_v29  ;;  %v11608_v8 = vld [vmem:[#allocation2 + $0x5c] ss:$0 sps:$4 sm:$0x11]   ;;  %v873_v59 = vrot.slane %v717_v3, 7  ;;  %v876_v9 = vrot.slane %v718_v7, 7  ;;  %v4336_v11 = vrot.slane %v10904_v54, 2 }
  0x6e   : > { %v1708_v12 = vld [vmem:[#allocation2 + $0x6c] sm:$0xc]  ;;  %1113 = vst.msk [vmem:[#allocation2 + $0x78] sm:$0xe] %vm1088_vm7, %v871_v53  ;;  %v2133_v18 = vrot.slane %v10524_v58, 1  ;;  %v2134_v21 = vrot.slane %v11605_v55, 1 }
  0x6f   : > { %2219 = vrot.lane.b32.xlu1 %v2129_v50, %s12177_s30  ;;  %v3984_v50 = vrot.slane %v10840_v39, 1  ;;  %v877_v15 = vrot.slane %v876_v9, 4  ;;  %1116 = vst.msk [vmem:[#allocation2 + $0x84] sm:$0xe] %vm1088_vm7, %v876_v9  ;;  %v1327_v23 = vld [vmem:[#allocation2 + $0x54] sm:$0xc] }
  0x70   : > { %4424 = vrot.lane.b32.xlu0 %v4332_v49, %s12183_s18  ;;  %v3410_v49 = vsel %vm2467_vm3, %v3408_v33, %v3409_v34  ;;  %v4337_v24 = vrot.slane %v11603_v62, 2  ;;  %v11606_v26 = vld [vmem:[#allocation2 + $0x74] ss:$0 sps:$4 sm:$0x33]   ;;  %v2136_v61 = vrot.slane %v10526_v13, 1  ;;  %v2137_v1 = vrot.slane %v11608_v8, 1 }
  0x71   : > { %v3986_v19 = vsel %vm17097_vm4, %v3984_v50, %v3985_v52  ;;  %v11610_v29 = vld [vmem:[#allocation2 + $0x50] ss:$0 sps:$4 sm:$0x33]   ;;  %v2135_v30 = vsel %vm17097_vm4, %v2133_v18, %v2134_v21  ;;  %v10590_v33 = vcombine.low %v1327_v23, %v1200_v56  ;;  %v11612_v34 = vld [vmem:[#allocation2 + $0x5c] ss:$0 sps:$4 sm:$0x33]  }
  0x72   : > { %v4338_v35 = vsel %vm2467_vm3, %v4336_v11, %v4337_v24  ;;  %v2487_v40 = vrot.slane %v11610_v29, 2  ;;  %v2490_v42 = vrot.slane %v11612_v34, 2  ;;  %v1392_v44 = vld [vmem:[#allocation2 + $0x70] sm:$0xf]  ;;  %v1453_v47 = vld [vmem:[#allocation2 + $0x60] sm:$0xe] }
  0x73   : > { %2221 = vrot.lane.b32.xlu1 %v2132_v6, %s12177_s30  ;;  %v3988_v6 = vrot.slane %v11602_v48, 1  ;;  %v2489_v41 = vrot.slane %v10590_v33, 2  ;;  %v1389_v48 = vld [vmem:[#allocation2 + $0x60] sm:$0xf]  ;;  %v1519_v54 = vld [vmem:[#allocation2 + $0x6c] sm:$0xc] }
  0x74   : > { %4426 = vrot.lane.b32.xlu0 %v4335_v60, %s12183_s18  ;;  %v719_v60 = vld [vmem:[%s12419_s28 + $0x4c] sm:$0xf]  ;;  %v11618_v52 = vld [vmem:[#allocation2 + $0x74] ss:$0 sps:$4 sm:$0x11]   ;;  %vm598_vm13 = vcmask 130048  }
  0x75   : > { %v878_v10 = vrot.slane %v719_v60, 7  ;;  %v3989_v20 = vsel %vm17097_vm4, %v3987_v5, %v3988_v6  ;;  %v2491_v50 = vsel %vm2467_vm3, %v2489_v41, %v2490_v42  ;;  %v1517_v62 = vld [vmem:[#allocation2 + $0x60] sm:$0xc]  ;;  %v11637_v63 = vld [vmem:[%s17080_s1 + $0x10] ss:$0 sps:$4 sm:$0x33]   ;;  %v10750_v6 = vcombine.low %v1519_v54, %v1392_v44 }
  0x76   : > { %v11640_v2 = vld [vmem:[%s17080_s1 + $0x8] sm:$0xff]   ;;  %v11622_v58 = vld [vmem:[#allocation2 + $0x74] ss:$0 sps:$4 sm:$0x33]   ;;  %v3066_v60 = vrot.slane %v11618_v52, 1  ;;  %11461 = vmatprep.subr.msk.bf16.mxu0 %vm17092_vm9, %v11637_v63  ;;  %vm4775_vm14 = vcmask 162816  }
  0x77   : > { %2574 = vrot.lane.b32.xlu1 %v2485_v14, %s12176_s29  ;;  %v872_v14 = vrot.slane %v871_v53, 4  ;;  %v880_v17 = vrot.slane %v878_v10, 4  ;;  %v879_v28 = vsel %vm12431_vm8, %v877_v15, %v878_v10  ;;  %v11620_v5 = vld [vmem:[#allocation2 + $0x68] ss:$0 sps:$4 sm:$0x33]   ;;  %v5122_v53 = vsel %vm17092_vm9, %v11637_v63, 0 }
  0x78   : > { %2572 = vrot.lane.b32.xlu0 %v2482_v16, %s12176_s29  ;;  %v875_v16 = vrot.slane %v873_v59, 4  ;;  %1117 = vst.msk [vmem:[#allocation2 + $0x88] sm:$0xf] %vm17093_vm0, %v879_v28  ;;  %11314 = vmatpush3.bf16.msra.mxu0 %v5122_v53  ;;  %v11645_v10 = vld [vmem:[%s17080_s1] sm:$0xff]   ;;  %v3417_v11 = vrot.slane %v10750_v6, 2  ;;  %v3415_v15 = vrot.slane %v11620_v5, 2 }
  0x79   : > { %v874_v27 = vsel %vm12431_vm8, %v872_v14, %v873_v59  ;;  %1118 = vst.msk [vmem:[#allocation2 + $0x8c] sm:$0x1] %vm447_vm2, %v880_v17  ;;  %11315 = vmatprep.subr.bf16.mxu0 %v11640_v2  ;;  %v1648_v18 = vld [vmem:[#allocation2 + $0x84] sm:$0xe]  ;;  %v1582_v23 = vld [vmem:[#allocation2 + $0x78] sm:$0xf] }
  0x7a   : > { %1115 = vst.msk [vmem:[#allocation2 + $0x80] sm:$0x1] %vm447_vm2, %v875_v16  ;;  %v1646_v16 = vld [vmem:[#allocation2 + $0x78] sm:$0xe]  ;;  %v12643_v21 = vld [vmem:[#allocation2 + $0x64] sm:$0xf] }
  0x7b   : > { %2798 = vrot.lane.b32.xlu1 %v10645_v22, %s12178_s13  ;;  %v1325_v22 = vld [vmem:[#allocation2 + $0x48] sm:$0xc]  ;;  %1114 = vst.msk [vmem:[#allocation2 + $0x7c] sm:$0xf] %vm17093_vm0, %v874_v27  ;;  %v1584_v28 = vld [vmem:[#allocation2 + $0x84] sm:$0xf] }
  0x7c   : > { %2796 = vrot.lane.b32.xlu0 %v10644_v25, %s12178_s13  ;;  %v10906_v25 = vcombine.low %v1708_v12, %v12577_v38  ;;  %v2138_v38 = vsel %vm17097_vm4, %v2136_v61, %v2137_v1  ;;  %v3418_v12 = vrot.slane %v11622_v58, 2  ;;  %11316 = vmatpush3.bf16.msra.mxu0 %v11640_v2  ;;  %v722_v61 = vld [vmem:[%s12419_s28 + $0x58] sm:$0xf]  ;;  %v723_v1 = vld [vmem:[%s12419_s28 + $0x5c] sm:$0xf]  ;;  %vm17103_vm15 = vcmask 195584  }
  0x7d   : > { %11317 = vmatprep.subr.bf16.mxu0 %v11645_v10  ;;  %v886_v34 = vrot.slane %v722_v61, 7  ;;  %v12659_v42 = vld [vmem:[#allocation2 + $0x70] sm:$0xf]  ;;  %v1267_v54 = vld [vmem:[#allocation2 + $0x6c] sm:$0xe]  ;;  %vm4905_vm1 = vcmask 228352  }
  0x7e   : > { %v4339_v36 = vrot.slane %v10906_v25, 2  ;;  %v720_v25 = vld [vmem:[%s12419_s28 + $0x50] sm:$0xf]  ;;  %v3419_v27 = vsel %vm2467_vm3, %v3417_v11, %v3418_v12  ;;  %v1712_v2 = vld [vmem:[#allocation2 + $0x84] sm:$0xc]  ;;  %vm17099_vm5 = vcmask 261120  }
  0x7f   : > { %3150 = vrot.lane.b32.xlu1 %v3061_v32, %s12180_s15  ;;  %v10588_v32 = vcombine.low %v1325_v22, %v12580_v45  ;;  %v1455_v45 = vld [vmem:[#allocation2 + $0x6c] sm:$0xe]  ;;  %v1265_v22 = vld [vmem:[#allocation2 + $0x60] sm:$0xe]  ;;  %1122 = vst.msk [vmem:[#allocation2 + $0x9c] sm:$0xe] %vm1088_vm7, %v886_v34 }
  0x80   : > { %3148 = vrot.lane.b32.xlu0 %v3058_v37, %s12180_s15  ;;  %v4340_v37 = vrot.slane %v11606_v26, 2  ;;  %v10686_v51 = vcombine.low %v1455_v45, %v1392_v44  ;;  %v721_v26 = vld [vmem:[%s12419_s28 + $0x54] sm:$0xf]  ;;  %11318 = vmatpush3.bf16.msra.mxu0 %v11645_v10  ;;  %v10528_v41 = vcombine.low %v1265_v22, %v12643_v21  ;;  %v11630_v11 = vld [vmem:[#allocation2 + $0x8c] ss:$0 sps:$4 sm:$0x33]  }
  0x81   : > { %v2486_v39 = vrot.slane %v10588_v32, 2  ;;  %v881_v32 = vrot.slane %v720_v25, 7  ;;  %v883_v33 = vrot.slane %v721_v26, 7  ;;  %v11627_v63 = vld [vmem:[#allocation2 + $0x80] ss:$0 sps:$4 sm:$0x33]  }
  0x82   : > { %v4341_v43 = vsel %vm2467_vm3, %v4339_v36, %v4340_v37  ;;  %v3065_v7 = vrot.slane %v10686_v51, 1  ;;  %v1583_v24 = vld [vmem:[#allocation2 + $0x7c] sm:$0xf]  ;;  %v11632_v5 = vld [vmem:[#allocation2 + $0x74] ss:$0 sps:$4 sm:$0x11]  }
  0x83   : > { %3502 = vrot.lane.b32.xlu1 %v3413_v46, %s12181_s16  ;;  %v1390_v46 = vld [vmem:[#allocation2 + $0x64] sm:$0xf]  ;;  %v2488_v55 = vsel %vm2467_vm3, %v2486_v39, %v2487_v40  ;;  %v10844_v37 = vcombine.low %v1646_v16, %v1583_v24  ;;  %v1710_v40 = vld [vmem:[#allocation2 + $0x78] sm:$0xc]  ;;  %1119 = vst.msk [vmem:[#allocation2 + $0x90] sm:$0xe] %vm1088_vm7, %v881_v32 }
  0x84   : > { %3500 = vrot.lane.b32.xlu0 %v3410_v49, %s12181_s16  ;;  %v1391_v49 = vld [vmem:[#allocation2 + $0x6c] sm:$0xf]  ;;  %v10684_v56 = vcombine.low %v1453_v47, %v1390_v46  ;;  %v10646_v3 = vcombine.low %v1389_v48, %v1390_v46  ;;  %v10748_v8 = vcombine.low %v1517_v62, %v1390_v46  ;;  %v3067_v13 = vsel %vm17097_vm4, %v3065_v7, %v3066_v60  ;;  %v1329_v12 = vld [vmem:[#allocation2 + $0x60] sm:$0xc]  ;;  %v12696_v26 = vld [vmem:[#allocation2 + $0x88] sm:$0xf] }
  0x85   : > { %v885_v45 = vrot.slane %v883_v33, 4  ;;  %v10806_v46 = vcombine.low %v1582_v23, %v1583_v24  ;;  %v10908_v62 = vcombine.low %v1710_v40, %v1583_v24  ;;  %v2139_v7 = vrot.slane %v10528_v41, 1  ;;  %v11644_v40 = vld [vmem:[#allocation2 + $0x8c] ss:$0 sps:$4 sm:$0x11]   ;;  %s17634_s22 = smov (!%p414_p4, %s12270_s22), 1 }
  0x86   : > { %v3062_v59 = vrot.slane %v10684_v56, 1  ;;  %v3414_v14 = vrot.slane %v10748_v8, 2  ;;  %v1331_v8 = vld [vmem:[#allocation2 + $0x6c] sm:$0xc]  ;;  %v2143_v16 = vrot.slane %v11632_v5, 1  ;;  %v10592_v24 = vcombine.low %v1329_v12, %v12643_v21  ;;  %s11470_s23 = smul.u32 24, %s17634_s22 }
  0x87   : > { %3726 = vrot.lane.b32.xlu1 %v10805_v57, %s12179_s14  ;;  %v11616_v57 = vld [vmem:[#allocation2 + $0x68] ss:$0 sps:$4 sm:$0x11]   ;;  %1121 = vst.msk [vmem:[#allocation2 + $0x98] sm:$0x1] %vm447_vm2, %v885_v45  ;;  %vm17098_vm6 = vcmask 293888  }
  0x88   : > { %3724 = vrot.lane.b32.xlu0 %v10804_v4, %s12179_s14  ;;  %v10647_v4 = vcombine.low %v1391_v49, %v1392_v44  ;;  %v3063_v9 = vrot.slane %v11616_v57, 1  ;;  %v887_v44 = vrot.slane %v886_v34, 4  ;;  %v11629_v49 = vld [vmem:[#allocation2 + $0x68] ss:$0 sps:$4 sm:$0x11]   ;;  %v3990_v57 = vrot.slane %v10844_v37, 1  ;;  %s418_s26 = scalar_lea.vmem %s17091_s12, %s11470_s23 }
  0x89   : > { %v2140_v60 = vrot.slane %v11629_v49, 1  ;;  %v1394_v34 = vld [vmem:[#allocation2 + $0x7c] sm:$0xf]  ;;  %v12127_v41 = vld [vmem:[#allocation2 + $0x4] sm:$0xf]  ;;  %vm17095_vm9 = vcmask 122880  }
  0x8a   : > { %v3064_v17 = vsel %vm17097_vm4, %v3062_v59, %v3063_v9  ;;  %v4342_v59 = vrot.slane %v10908_v62, 2  ;;  %v4343_v9 = vrot.slane %v11627_v63, 2  ;;  %v1187_v49 = vld [vmem:[#allocation2 + $0xc] sm:$0xf]  ;;  %551 = vst.msk [vmem:[#allocation3 + $0x10] sm:$0x1] %vm17095_vm9, %v17101_v0 }
  0x8b   : > { %4078 = vrot.lane.b32.xlu1 %v3989_v20, %s12182_s17  ;;  %v12641_v20 = vld [vmem:[#allocation2 + $0x80] ss:$0 sps:$4 sm:$0x11]   ;;  %v11649_v5 = vld [vmem:[#allocation2 + $0x8c] ss:$0 sps:$4 sm:$0x33]  }
  0x8c   : > { %4076 = vrot.lane.b32.xlu0 %v3986_v19, %s12182_s17  ;;  %v12639_v19 = vld [vmem:[#allocation2 + $0x88] sm:$0xf]  ;;  %v3991_v48 = vrot.slane %v12641_v20, 1  ;;  %v11636_v20 = vld [vmem:[#allocation2 + $0x74] ss:$0 sps:$4 sm:$0x33]   ;;  %v4344_v22 = vsel %vm2467_vm3, %v4342_v59, %v4343_v9 }
  0x8d   : > { %v10846_v29 = vcombine.low %v1648_v18, %v12639_v19  ;;  %v10807_v47 = vcombine.low %v1584_v28, %v12639_v19  ;;  %v10910_v10 = vcombine.low %v1712_v2, %v12639_v19  ;;  %v4346_v19 = vrot.slane %v11630_v11, 2  ;;  %v1185_v28 = vld [vmem:[#allocation2] sm:$0xf]  ;;  %v725_v9 = vld [vmem:[%s12419_s28 + $0x64] sm:$0xf] }
  0x8e   : > { %v3992_v53 = vsel %vm17097_vm4, %v3990_v57, %v3991_v48  ;;  %v1523_v48 = vld [vmem:[#allocation2 + $0x84] sm:$0xc]  ;;  %v12712_v62 = vld [vmem:[#allocation2 + $0x80] ss:$0 sps:$4 sm:$0x33]  }
  0x8f   : > { %2223 = vrot.lane.b32.xlu1 %v2135_v30, %s12177_s30  ;;  %v11626_v30 = vld [vmem:[#allocation2 + $0x8c] ss:$0 sps:$4 sm:$0x11]   ;;  %v3993_v51 = vrot.slane %v10846_v29, 1  ;;  %v4345_v23 = vrot.slane %v10910_v10, 2  ;;  %v2496_v29 = vrot.slane %v11636_v20, 2 }
  0x90   : > { %4428 = vrot.lane.b32.xlu0 %v4338_v35, %s12183_s18  ;;  %v3416_v35 = vsel %vm2467_vm3, %v3414_v14, %v3415_v15  ;;  %v3994_v52 = vrot.slane %v11626_v30, 1  ;;  %v11634_v14 = vld [vmem:[#allocation2 + $0x68] ss:$0 sps:$4 sm:$0x33]   ;;  %v2141_v15 = vsel %vm17097_vm4, %v2139_v7, %v2140_v60  ;;  %v724_v59 = vld [vmem:[%s12419_s28 + $0x60] sm:$0xf] }
  0x91   : > { %v4347_v21 = vsel %vm2467_vm3, %v4345_v23, %v4346_v19  ;;  %v726_v10 = vld [vmem:[%s12419_s28 + $0x68] sm:$0xf]  ;;  %v3424_v20 = vrot.slane %v11649_v5, 2  ;;  %v893_v23 = vrot.slane %v725_v9, 7  ;;  %552 = vst.msk [vmem:[#allocation3 + $0x18] sm:$0x1] %vm17095_vm9, %v17101_v0 }
  0x92   : > { %v3995_v58 = vsel %vm17097_vm4, %v3993_v51, %v3994_v52  ;;  %v1393_v52 = vld [vmem:[#allocation2 + $0x78] sm:$0xf]  ;;  %553 = vst.msk [vmem:[#allocation3 + $0x20] sm:$0x1] %vm17095_vm9, %v17101_v0  ;;  %554 = vst.msk [vmem:[#allocation3 + $0x28] sm:$0x1] %vm17095_vm9, %v17101_v0 }
  0x93   : > { %2225 = vrot.lane.b32.xlu1 %v2138_v38, %s12177_s30  ;;  %v888_v38 = vrot.slane %v723_v1, 7  ;;  %v10648_v60 = vcombine.low %v1393_v52, %v1394_v34  ;;  %555 = vst.msk [vmem:[#allocation3 + $0x30] sm:$0x1] %vm17095_vm9, %v17101_v0  ;;  %556 = vst.msk [vmem:[#allocation3 + $0x38] sm:$0x1] %vm17095_vm9, %v17101_v0 }
  0x94   : > { %4430 = vrot.lane.b32.xlu0 %v4341_v43, %s12183_s18  ;;  %v882_v43 = vrot.slane %v881_v32, 4  ;;  %v2492_v32 = vrot.slane %v10592_v24, 2  ;;  %557 = vst.msk [vmem:[#allocation3 + $0x40] sm:$0x1] %vm17095_vm9, %v17101_v0  ;;  %558 = vst.msk [vmem:[#allocation3 + $0x48] sm:$0x1] %vm17095_vm9, %v17101_v0 }
  0x95   : > { %v889_v56 = vsel %vm12431_vm8, %v887_v44, %v888_v38  ;;  %v1521_v44 = vld [vmem:[#allocation2 + $0x78] sm:$0xc]  ;;  %563 = vst.msk [vmem:[#allocation3 + $0x70] sm:$0x1] %vm17095_vm9, %v17101_v0  ;;  %564 = vst.msk [vmem:[#allocation3 + $0x78] sm:$0x1] %vm17095_vm9, %v17101_v0 }
  0x96   : > { %1123 = vst.msk [vmem:[#allocation2 + $0xa0] sm:$0xf] %vm17093_vm0, %v889_v56  ;;  %v3072_v56 = vrot.slane %v11644_v40, 1  ;;  %v10752_v57 = vcombine.low %v1521_v44, %v1394_v34  ;;  %v1269_v44 = vld [vmem:[#allocation2 + $0x78] sm:$0xe] }
  0x97   : > { %2578 = vrot.lane.b32.xlu1 %v2491_v50, %s12176_s29  ;;  %v890_v50 = vrot.slane %v888_v38, 4  ;;  %565 = vst.msk [vmem:[#allocation3 + $0x80] sm:$0x1] %vm17095_vm9, %v17101_v0  ;;  %566 = vst.msk [vmem:[#allocation3 + $0x88] sm:$0x1] %vm17095_vm9, %v17101_v0 }
  0x98   : > { %2576 = vrot.lane.b32.xlu0 %v2488_v55, %s12176_s29  ;;  %v884_v55 = vsel %vm12431_vm8, %v882_v43, %v883_v33  ;;  %v2493_v33 = vrot.slane %v11634_v14, 2  ;;  %v11642_v43 = vld [vmem:[#allocation2 + $0x80] ss:$0 sps:$4 sm:$0x11]   ;;  %v3420_v14 = vrot.slane %v10752_v57, 2 }
  0x99   : > { %1120 = vst.msk [vmem:[#allocation2 + $0x94] sm:$0xf] %vm17093_vm0, %v884_v55 }
  0x9a   : > { %1124 = vst.msk [vmem:[#allocation2 + $0xa4] sm:$0x1] %vm447_vm2, %v890_v50  ;;  %v2494_v51 = vsel %vm2467_vm3, %v2492_v32, %v2493_v33 }
  0x9b   : > { %2802 = vrot.lane.b32.xlu1 %v10647_v4, %s12178_s13  ;;  %v10530_v4 = vcombine.low %v1267_v54, %v12659_v42  ;;  %567 = vst.msk [vmem:[#allocation3 + $0x90] sm:$0x1] %vm17095_vm9, %v17101_v0  ;;  %568 = vst.msk [vmem:[#allocation3 + $0x98] sm:$0x1] %vm17095_vm9, %v17101_v0 }
  0x9c   : > { %2800 = vrot.lane.b32.xlu0 %v10646_v3, %s12178_s13  ;;  %569 = vst.msk [vmem:[#allocation3 + $0xa0] sm:$0x1] %vm17095_vm9, %v17101_v0  ;;  %570 = vst.msk [vmem:[#allocation3 + $0xa8] sm:$0x1] %vm17095_vm9, %v17101_v0 }
  0x9f   : > { %3154 = vrot.lane.b32.xlu1 %v3067_v13, %s12180_s15  ;;  %v2142_v13 = vrot.slane %v10530_v4, 1  ;;  %v10754_v4 = vcombine.low %v1523_v48, %v12696_v26 }
  0xa0   : > { %3152 = vrot.lane.b32.xlu0 %v3064_v17, %s12180_s15  ;;  %v10594_v17 = vcombine.low %v1331_v8, %v12659_v42  ;;  %v10480_v42 = vcombine.low %v1185_v28, %v12127_v41  ;;  %v1586_v41 = vld [vmem:[#allocation2 + $0x90] sm:$0xf] }
  0xa1   : > { %v2144_v61 = vsel %vm17097_vm4, %v2142_v13, %v2143_v16  ;;  %v727_v16 = vld [vmem:[%s12419_s28 + $0x6c] sm:$0xf]  ;;  %v11653_v48 = vld [vmem:[#allocation2 + $0xa4] ss:$0 sps:$4 sm:$0x11]  }
  0xa2   : > { %v12654_v36 = vpop.permute.xlu1 %2564  ;;  %v2495_v1 = vrot.slane %v10594_v17, 2  ;;  %v3423_v17 = vrot.slane %v10754_v4, 2  ;;  %v11656_v4 = vld [vmem:[#allocation2 + $0x80] ss:$0 sps:$4 sm:$0x11]  }
  0xa3   : > { %v12656_v39 = vpop.permute.xlu0 %2211  ;;  %3506 = vrot.lane.b32.xlu1 %v3419_v27, %s12181_s16  ;;  %v1459_v27 = vld [vmem:[#allocation2 + $0x84] sm:$0xe] }
  0xa4   : > { %3504 = vrot.lane.b32.xlu0 %v3416_v35, %s12181_s16  ;;  %v1457_v35 = vld [vmem:[#allocation2 + $0x78] sm:$0xe]  ;;  %v10690_v38 = vcombine.low %v1459_v27, %v12696_v26  ;;  %v2497_v45 = vsel %vm2467_vm3, %v2495_v1, %v2496_v29  ;;  %v4487_v63 = vsel %vm4484_vm10, %v10480_v42, %v12656_v39  ;;  %v898_v27 = vrot.slane %v727_v16, 7  ;;  %v12736_v29 = vld [vmem:[#allocation2 + $0xa0] sm:$0xf] }
  0xa5   : > { %v4583_v11 = vsel %vm4581_vm11, %v4487_v63, %v12654_v36  ;;  %v1650_v36 = vld [vmem:[#allocation2 + $0x90] sm:$0xe]  ;;  %v1588_v42 = vld [vmem:[#allocation2 + $0x9c] sm:$0xf]  ;;  %v2146_v16 = vrot.slane %v11656_v4, 1 }
  0xa6   : > { %v12676_v3 = vpop.permute.xlu1 %2566  ;;  %v3071_v55 = vrot.slane %v10690_v38, 1  ;;  %v900_v38 = vrot.slane %v898_v27, 4  ;;  %v729_v4 = vld [vmem:[%s12419_s28 + $0x74] sm:$0xf] }
  0xa7   : > { %3730 = vrot.lane.b32.xlu1 %v10807_v47, %s12179_s14  ;;  %v12680_v6 = vpop.permute.xlu0 %2213  ;;  %v10688_v47 = vcombine.low %v1457_v35, %v1394_v34  ;;  %v12740_v34 = vld [vmem:[#allocation2 + $0x94] sm:$0xf] }
  0xa8   : > { %3728 = vrot.lane.b32.xlu0 %v10806_v46, %s12179_s14  ;;  %v1395_v46 = vld [vmem:[#allocation2 + $0x84] sm:$0xf]  ;;  %v3073_v13 = vsel %vm17097_vm4, %v3071_v55, %v3072_v56  ;;  %1130 = vst.msk [vmem:[#allocation2 + $0xbc] sm:$0x1] %vm447_vm2, %v900_v38  ;;  %v10848_v55 = vcombine.low %v1650_v36, %v12740_v34  ;;  %v10808_v5 = vcombine.low %v1586_v41, %v12740_v34 }
  0xa9   : > { %v10649_v2 = vcombine.low %v1395_v46, %v12696_v26  ;;  %v3068_v8 = vrot.slane %v10688_v47, 1  ;;  %v896_v26 = vrot.slane %v726_v10, 7  ;;  %v3425_v47 = vsel %vm2467_vm3, %v3423_v17, %v3424_v20  ;;  %v11652_v56 = vld [vmem:[#allocation2 + $0x98] ss:$0 sps:$4 sm:$0x11]  }
  0xaa   : > { %v3996_v9 = vrot.slane %v10848_v55, 1  ;;  %v3997_v10 = vrot.slane %v11652_v56, 1  ;;  %v1716_v17 = vld [vmem:[#allocation2 + $0x9c] sm:$0xc]  ;;  %v1335_v36 = vld [vmem:[#allocation2 + $0x84] sm:$0xc] }
  0xab   : > { %4082 = vrot.lane.b32.xlu1 %v3995_v58, %s12182_s17  ;;  %v12128_v58 = vld [vmem:[#allocation2 + $0x10] sm:$0xf]  ;;  %v897_v35 = vrot.slane %v896_v26, 4  ;;  %1128 = vst.msk [vmem:[#allocation2 + $0xb4] sm:$0xe] %vm1088_vm7, %v896_v26 }
  0xac   : > { %4080 = vrot.lane.b32.xlu0 %v3992_v53, %s12182_s17  ;;  %v10481_v7 = vcombine.low %v1187_v49, %v12128_v58  ;;  %v3069_v53 = vrot.slane %v11642_v43, 1  ;;  %v12746_v43 = vld [vmem:[#allocation2 + $0x7c] sm:$0xf]  ;;  %v1398_v56 = vld [vmem:[#allocation2 + $0x94] sm:$0xf] }
  0xad   : > { %v12689_v18 = vpop.permute.xlu1 %2790  ;;  %v899_v49 = vsel %vm12431_vm8, %v897_v35, %v898_v27  ;;  %v3998_v27 = vsel %vm17097_vm4, %v3996_v9, %v3997_v10 }
  0xae   : > { %v12693_v25 = vpop.permute.xlu0 %2788  ;;  %v4490_v19 = vsel %vm4484_vm10, %v10481_v7, %v12680_v6  ;;  %v3070_v1 = vsel %vm17097_vm4, %v3068_v8, %v3069_v53  ;;  %v895_v6 = vrot.slane %v893_v23, 4  ;;  %1129 = vst.msk [vmem:[#allocation2 + $0xb8] sm:$0xf] %vm17093_vm0, %v899_v49  ;;  %v4000_v7 = vrot.slane %v11653_v48, 1  ;;  %v1208_v8 = vld [vmem:[#allocation2 + $0x88] sm:$0xf] }
  0xaf   : > { %2227 = vrot.lane.b32.xlu1 %v2141_v15, %s12177_s30  ;;  %v3421_v15 = vrot.slane %v12712_v62, 2  ;;  %v4648_v24 = vsel %vm4646_vm12, %v4583_v11, %v12693_v25  ;;  %v4585_v40 = vsel %vm4581_vm11, %v4490_v19, %v12676_v3  ;;  %v1271_v53 = vld [vmem:[#allocation2 + $0x84] sm:$0xe]  ;;  %v10598_v38 = vcombine.low %v1335_v36, %v1208_v8  ;;  %v11671_v36 = vld [vmem:[#allocation2 + $0x98] ss:$0 sps:$4 sm:$0x33]  }
  0xb0   : > { %4432 = vrot.lane.b32.xlu0 %v4344_v22, %s12183_s18  ;;  %v891_v22 = vrot.slane %v724_v59, 7  ;;  %1127 = vst.msk [vmem:[#allocation2 + $0xb0] sm:$0x1] %vm447_vm2, %v895_v6  ;;  %v4650_v46 = vsel %vm4646_vm12, %v4585_v40, %v12689_v18  ;;  %v11663_v40 = vld [vmem:[#allocation2 + $0x8c] ss:$0 sps:$4 sm:$0x33]  }
  0xb1   : > { %v12700_v30 = vpop.permute.xlu1 %3718 }
  0xb2   : > { %v12703_v37 = vpop.permute.xlu0 %3716  ;;  %v892_v32 = vrot.slane %v891_v22, 4  ;;  %1125 = vst.msk [vmem:[#allocation2 + $0xa8] sm:$0xe] %vm1088_vm7, %v891_v22  ;;  %v10534_v22 = vcombine.low %v1271_v53, %v1208_v8  ;;  %v903_v8 = vrot.slane %v729_v4, 7  ;;  %v730_v53 = vld [vmem:[%s12419_s28 + $0x78] sm:$0xf] }
  0xb3   : > { %2229 = vrot.lane.b32.xlu1 %v2144_v61, %s12177_s30  ;;  %v12853_v4 = vld [vmem:[#allocation2 + $0x94] sm:$0xf] }
  0xb4   : > { %4434 = vrot.lane.b32.xlu0 %v4347_v21, %s12183_s18  ;;  %v1652_v21 = vld [vmem:[#allocation2 + $0x9c] sm:$0xe]  ;;  %v2148_v6 = vrot.slane %v10534_v22, 1 }
  0xb5   : > { %v12709_v50 = vpop.permute.xlu1 %3142  ;;  %v10850_v3 = vcombine.low %v1652_v21, %v12736_v29  ;;  %v728_v21 = vld [vmem:[%s12419_s28 + $0x70] sm:$0xf] }
  0xb6   : > { %v3141_v54 = vpop.permute.xlu0 %3140  ;;  %v901_v41 = vrot.slane %v728_v21, 7 }
  0xb7   : > { %2582 = vrot.lane.b32.xlu1 %v2497_v45, %s12176_s29  ;;  %v4712_v28 = vsel %vm598_vm13, %v4648_v24, %v3141_v54  ;;  %v894_v45 = vsel %vm12431_vm8, %v892_v32, %v893_v23  ;;  %v3422_v54 = vsel %vm2467_vm3, %v3420_v14, %v3421_v15  ;;  %v3999_v58 = vrot.slane %v10850_v3, 1  ;;  %v11657_v24 = vld [vmem:[#allocation2 + $0xa4] ss:$0 sps:$4 sm:$0x33]   ;;  %v12808_v3 = vld [vmem:[#allocation2 + $0xa0] sm:$0xf] }
  0xb8   : > { %2580 = vrot.lane.b32.xlu0 %v2494_v51, %s12176_s29  ;;  %1126 = vst.msk [vmem:[#allocation2 + $0xac] sm:$0xf] %vm17093_vm0, %v894_v45  ;;  %v4714_v51 = vsel %vm598_vm13, %v4650_v46, %v12709_v50  ;;  %v4352_v45 = vrot.slane %v11657_v24, 2 }
  0xb9   : > { %v3495_v39 = vpop.permute.xlu1 %3494  ;;  %v4001_v23 = vsel %vm17097_vm4, %v3999_v58, %v4000_v7  ;;  %1131 = vst.msk [vmem:[#allocation2 + $0xc0] sm:$0xe] %vm1088_vm7, %v901_v41  ;;  %v11669_v58 = vld [vmem:[#allocation2 + $0xa4] ss:$0 sps:$4 sm:$0x11]  }
  0xba   : > { %v3493_v12 = vpop.permute.xlu0 %3492  ;;  %v4779_v57 = vsel %vm4775_vm14, %v4714_v51, %v3495_v39  ;;  %v2501_v51 = vrot.slane %v10598_v38, 2  ;;  %v1525_v7 = vld [vmem:[#allocation2 + $0x90] sm:$0xc] }
  0xbb   : > { %2806 = vrot.lane.b32.xlu1 %v10649_v2, %s12178_s13  ;;  %v4777_v33 = vsel %vm4775_vm14, %v4712_v28, %v3493_v12  ;;  %v1714_v2 = vld [vmem:[#allocation2 + $0x90] sm:$0xc]  ;;  %v4844_v39 = vsel %vm17103_vm15, %v4779_v57, %v12700_v30  ;;  %v11654_v12 = vld [vmem:[#allocation2 + $0x98] ss:$0 sps:$4 sm:$0x33]   ;;  %v10756_v24 = vcombine.low %v1525_v7, %v1398_v56 }
  0xbc   : > { %2804 = vrot.lane.b32.xlu0 %v10648_v60, %s12178_s13  ;;  %v4842_v18 = vsel %vm17103_vm15, %v4777_v33, %v12703_v37  ;;  %v10809_v37 = vcombine.low %v1588_v42, %v12736_v29  ;;  %v10532_v60 = vcombine.low %v1269_v44, %v12746_v43  ;;  %v10912_v11 = vcombine.low %v1714_v2, %v12740_v34  ;;  %v1333_v30 = vld [vmem:[#allocation2 + $0x78] sm:$0xc]  ;;  %v1399_v57 = vld [vmem:[#allocation2 + $0x9c] sm:$0xf] }
  0xbd   : > { %v4071_v61 = vpop.permute.xlu1 %4070  ;;  %v10596_v35 = vcombine.low %v1333_v30, %v12746_v43  ;;  %v1463_v43 = vld [vmem:[#allocation2 + $0x9c] sm:$0xe] }
  0xbe   : > { %v4069_v25 = vpop.permute.xlu0 %4068  ;;  %v4909_v14 = vsel %vm4905_vm1, %v4844_v39, %v4071_v61  ;;  %v2145_v19 = vrot.slane %v10532_v60, 1  ;;  %v4348_v28 = vrot.slane %v10912_v11, 2  ;;  %v4349_v61 = vrot.slane %v11654_v12, 2  ;;  %v731_v39 = vld [vmem:[%s12419_s28 + $0x7c] sm:$0xf] }
  0xbf   : > { %3158 = vrot.lane.b32.xlu1 %v3073_v13, %s12180_s15  ;;  %v4907_v62 = vsel %vm4905_vm1, %v4842_v18, %v4069_v25  ;;  %v11659_v13 = vld [vmem:[#allocation2 + $0x8c] ss:$0 sps:$4 sm:$0x11]   ;;  %v11661_v25 = vld [vmem:[#allocation2 + $0x80] ss:$0 sps:$4 sm:$0x33]   ;;  %v10694_v2 = vcombine.low %v1463_v43, %v12808_v3 }
  0xc0   : > { %3156 = vrot.lane.b32.xlu0 %v3070_v1, %s12180_s15  ;;  %v10914_v1 = vcombine.low %v1716_v17, %v12736_v29  ;;  %v2149_v33 = vrot.slane %v11659_v13, 1  ;;  %v2147_v34 = vsel %vm17097_vm4, %v2145_v19, %v2146_v16  ;;  %v4350_v29 = vsel %vm2467_vm3, %v4348_v28, %v4349_v61  ;;  %v1397_v11 = vld [vmem:[#allocation2 + $0x90] sm:$0xf]  ;;  %v1527_v13 = vld [vmem:[#allocation2 + $0x9c] sm:$0xc] }
  0xc1   : > { %v12764_v52 = vpop.permute.xlu1 %2215  ;;  %v2498_v48 = vrot.slane %v10596_v35, 2  ;;  %v2499_v49 = vrot.slane %v11661_v25, 2  ;;  %v2502_v18 = vrot.slane %v11663_v40, 2  ;;  %v1191_v16 = vld [vmem:[#allocation2 + $0x24] sm:$0xf]  ;;  %v3077_v22 = vrot.slane %v10694_v2, 1 }
  0xc2   : > { %v4421_v63 = vpop.permute.xlu0 %4420  ;;  %v4351_v44 = vrot.slane %v10914_v1, 2  ;;  %v3078_v19 = vrot.slane %v11669_v58, 1  ;;  %v12129_v61 = vld [vmem:[#allocation2 + $0x1c] sm:$0xf]  ;;  %v10650_v21 = vcombine.low %v1397_v11, %v1398_v56  ;;  %v1591_v2 = vld [vmem:[#allocation2 + $0xac] sm:$0xf] }
  0xc3   : > { %v4972_v50 = vsel %vm17099_vm5, %v4907_v62, %v4421_v63  ;;  %3510 = vrot.lane.b32.xlu1 %v3425_v47, %s12181_s16  ;;  %v2150_v47 = vsel %vm17097_vm4, %v2148_v6, %v2149_v33  ;;  %v1461_v62 = vld [vmem:[#allocation2 + $0x90] sm:$0xe]  ;;  %v2503_v60 = vsel %vm2467_vm3, %v2501_v51, %v2502_v18  ;;  %v2500_v10 = vsel %vm2467_vm3, %v2498_v48, %v2499_v49  ;;  %v11673_v33 = vld [vmem:[#allocation2 + $0xa4] ss:$0 sps:$4 sm:$0x33]  }
  0xc4   : > { %11319 = vmatprep.mubr.msk.bf16.mxu0 %vm17098_vm6, %v4972_v50  ;;  %3508 = vrot.lane.b32.xlu0 %v3422_v54, %s12181_s16  ;;  %v4353_v55 = vsel %vm2467_vm3, %v4351_v44, %v4352_v45  ;;  %v902_v50 = vrot.slane %v901_v41, 4  ;;  %v10692_v12 = vcombine.low %v1461_v62, %v1398_v56  ;;  %v10758_v6 = vcombine.low %v1527_v13, %v12808_v3  ;;  %v12130_v41 = vld [vmem:[#allocation2 + $0x28] sm:$0xf]  ;;  %v1656_v56 = vld [vmem:[#allocation2 + $0xb4] sm:$0xe] }
  0xc5   : > { %v12780_v59 = vpop.permute.xlu1 %2217  ;;  %v3079_v44 = vsel %vm17097_vm4, %v3077_v22, %v3078_v19  ;;  %v3426_v45 = vrot.slane %v10756_v24, 2  ;;  %v3430_v48 = vrot.slane %v11673_v33, 2 }
  0xc6   : > { %v4423_v15 = vpop.permute.xlu0 %4422  ;;  %v904_v30 = vsel %vm12431_vm8, %v902_v50, %v903_v8  ;;  %v3429_v43 = vrot.slane %v10758_v6, 2  ;;  %v1273_v50 = vld [vmem:[#allocation2 + $0x90] sm:$0xe]  ;;  %v11678_v6 = vld [vmem:[#allocation2 + $0xb0] ss:$0 sps:$4 sm:$0x33]  }
  0xc7   : > { %v4974_v20 = vsel %vm17099_vm5, %v4909_v14, %v4423_v15  ;;  %3734 = vrot.lane.b32.xlu1 %v10809_v37, %s12179_s14  ;;  %v1189_v37 = vld [vmem:[#allocation2 + $0x18] sm:$0xf]  ;;  %v906_v14 = vrot.slane %v730_v53, 7  ;;  %v908_v15 = vrot.slane %v731_v39, 7  ;;  %1132 = vst.msk [vmem:[#allocation2 + $0xc4] sm:$0xf] %vm17093_vm0, %v904_v30  ;;  %v10536_v22 = vcombine.low %v1273_v50, %v12853_v4 }
  0xc8   : > { %11320 = vmatmul.mubr.msk.bf16.vlgmr.msra.gmra.mxu0 %vm17098_vm6, %v4974_v20  ;;  %3732 = vrot.lane.b32.xlu0 %v10808_v5, %s12179_s14  ;;  %v11667_v5 = vld [vmem:[#allocation2 + $0x98] ss:$0 sps:$4 sm:$0x11]   ;;  %v10651_v20 = vcombine.low %v1399_v57, %v12808_v3  ;;  %v10482_v1 = vcombine.low %v1189_v37, %v12129_v61  ;;  %v3427_v3 = vrot.slane %v11671_v36, 2  ;;  %v1212_v30 = vld [vmem:[#allocation2 + $0xa0] sm:$0xf] }
  0xc9   : > { %v12789_v26 = vpop.permute.xlu1 %2570  ;;  %1134 = vst.msk [vmem:[#allocation2 + $0xcc] sm:$0xe] %vm1088_vm7, %v906_v14  ;;  %v910_v28 = vrot.slane %v908_v15, 4  ;;  %v3075_v35 = vrot.slane %v11667_v5, 1  ;;  %v1592_v5 = vld [vmem:[#allocation2 + $0xb4] sm:$0xf] }
  0xca   : > { %v12794_v32 = vpop.permute.xlu0 %2568  ;;  %v1275_v36 = vld [vmem:[#allocation2 + $0x9c] sm:$0xe]  ;;  %v11687_v50 = vld [vmem:[#allocation2 + $0xa4] ss:$0 sps:$4 sm:$0x33]  }
  0xcb   : > { %4086 = vrot.lane.b32.xlu1 %v4001_v23, %s12182_s17  ;;  %v905_v23 = vrot.slane %v903_v8, 4  ;;  %1136 = vst.msk [vmem:[#allocation2 + $0xd4] sm:$0x1] %vm447_vm2, %v910_v28  ;;  %v11677_v8 = vld [vmem:[#allocation2 + $0xbc] ss:$0 sps:$4 sm:$0x11]  }
  0xcc   : > { %4084 = vrot.lane.b32.xlu0 %v3998_v27, %s12182_s17  ;;  %v907_v27 = vrot.slane %v906_v14, 4  ;;  %v4006_v24 = vrot.slane %v11677_v8, 1  ;;  %v11691_v8 = vld [vmem:[#allocation2 + $0xb0] ss:$0 sps:$4 sm:$0x11]  }
  0xcd   : > { %v12800_v42 = vpop.permute.xlu1 %2794  ;;  %1133 = vst.msk [vmem:[#allocation2 + $0xc8] sm:$0x1] %vm447_vm2, %v905_v23 }
  0xce   : > { %v12803_v46 = vpop.permute.xlu0 %2792  ;;  %v909_v38 = vsel %vm12431_vm8, %v907_v27, %v908_v15  ;;  %v1718_v15 = vld [vmem:[#allocation2 + $0xa8] sm:$0xc] }
  0xcf   : > { %2231 = vrot.lane.b32.xlu1 %v2147_v34, %s12177_s30  ;;  %v3074_v34 = vrot.slane %v10692_v12, 1  ;;  %1135 = vst.msk [vmem:[#allocation2 + $0xd0] sm:$0xf] %vm17093_vm0, %v909_v38  ;;  %v2151_v38 = vrot.slane %v10536_v22, 1 }
  0xd0   : > { %4436 = vrot.lane.b32.xlu0 %v4350_v29, %s12183_s18  ;;  %v10483_v29 = vcombine.low %v1191_v16, %v12130_v41  ;;  %v11680_v16 = vld [vmem:[#allocation2 + $0x98] ss:$0 sps:$4 sm:$0x11]   ;;  %v11683_v41 = vld [vmem:[#allocation2 + $0xa4] ss:$0 sps:$4 sm:$0x11]  }
  0xd1   : > { %v12811_v54 = vpop.permute.xlu1 %3146  ;;  %v3076_v18 = vsel %vm17097_vm4, %v3074_v34, %v3075_v35  ;;  %v2152_v34 = vrot.slane %v11680_v16, 1 }
  0xd2   : > { %v12814_v63 = vpop.permute.xlu0 %3144  ;;  %v4496_v58 = vsel %vm4484_vm10, %v10483_v29, %v12780_v59  ;;  %v11676_v59 = vld [vmem:[#allocation2 + $0xb0] ss:$0 sps:$4 sm:$0x11]  }
  0xd3   : > { %2233 = vrot.lane.b32.xlu1 %v2150_v47, %s12177_s30  ;;  %v4493_v47 = vsel %vm4484_vm10, %v10482_v1, %v12764_v52  ;;  %v1654_v52 = vld [vmem:[#allocation2 + $0xa8] sm:$0xe]  ;;  %v4589_v53 = vsel %vm4581_vm11, %v4496_v58, %v12789_v26  ;;  %v4003_v1 = vrot.slane %v11676_v59, 1  ;;  %v12906_v58 = vld [vmem:[#allocation2 + $0xac] sm:$0xf]  ;;  %v2508_v59 = vrot.slane %v11687_v50, 2 }
  0xd4   : > { %4438 = vrot.lane.b32.xlu0 %v4353_v55, %s12183_s18  ;;  %v4587_v49 = vsel %vm4581_vm11, %v4493_v47, %v12794_v32  ;;  %v12849_v55 = vld [vmem:[#allocation2 + $0xb8] sm:$0xf]  ;;  %v1590_v32 = vld [vmem:[#allocation2 + $0xa8] sm:$0xf]  ;;  %v10852_v11 = vcombine.low %v1654_v52, %v1591_v2  ;;  %v4654_v12 = vsel %vm4646_vm12, %v4589_v53, %v12800_v42  ;;  %v1467_v53 = vld [vmem:[#allocation2 + $0xb4] sm:$0xe] }
  0xd5   : > { %v12823_v9 = vpop.permute.xlu1 %3498  ;;  %v4652_v57 = vsel %vm4646_vm12, %v4587_v49, %v12803_v46  ;;  %v3431_v46 = vsel %vm2467_vm3, %v3429_v43, %v3430_v48  ;;  %v10810_v23 = vcombine.low %v1590_v32, %v1591_v2  ;;  %v4355_v43 = vrot.slane %v11678_v6, 2  ;;  %v1339_v48 = vld [vmem:[#allocation2 + $0x9c] sm:$0xc] }
  0xd6   : > { %v3497_v17 = vpop.permute.xlu0 %3496  ;;  %v4716_v37 = vsel %vm598_vm13, %v4652_v57, %v12814_v63  ;;  %v4002_v61 = vrot.slane %v10852_v11, 1  ;;  %v11685_v57 = vld [vmem:[#allocation2 + $0x98] ss:$0 sps:$4 sm:$0x33]   ;;  %v10602_v52 = vcombine.low %v1339_v48, %v1212_v30  ;;  %v12936_v48 = vld [vmem:[#allocation2 + $0xac] sm:$0xf] }
  0xd7   : > { %2586 = vrot.lane.b32.xlu1 %v2503_v60, %s12176_s29  ;;  %v4781_v7 = vsel %vm4775_vm14, %v4716_v37, %v3497_v17  ;;  %v10854_v60 = vcombine.low %v1656_v56, %v12849_v55  ;;  %v4718_v17 = vsel %vm598_vm13, %v4654_v12, %v12811_v54  ;;  %v1720_v54 = vld [vmem:[#allocation2 + $0xb4] sm:$0xc]  ;;  %v2505_v16 = vrot.slane %v11685_v57, 2  ;;  %v12943_v57 = vld [vmem:[#allocation2 + $0xc8] ss:$0 sps:$4 sm:$0x11]  }
  0xd8   : > { %2584 = vrot.lane.b32.xlu0 %v2500_v10, %s12176_s29  ;;  %v3428_v10 = vsel %vm2467_vm3, %v3426_v45, %v3427_v3  ;;  %v4783_v42 = vsel %vm4775_vm14, %v4718_v17, %v12823_v9  ;;  %v10918_v29 = vcombine.low %v1720_v54, %v12849_v55  ;;  %v4004_v47 = vsel %vm17097_vm4, %v4002_v61, %v4003_v1  ;;  %v1531_v12 = vld [vmem:[#allocation2 + $0xb4] sm:$0xc]  ;;  %v1195_v54 = vld [vmem:[#allocation2 + $0x3c] sm:$0xf] }
  0xd9   : > { %v12835_v25 = vpop.permute.xlu1 %3722  ;;  %v4005_v19 = vrot.slane %v10854_v60, 1  ;;  %v2507_v11 = vrot.slane %v10602_v52, 2  ;;  %v3081_v1 = vrot.slane %v11691_v8, 1  ;;  %v12947_v52 = vld [vmem:[#allocation2 + $0xc0] sm:$0xc] }
  0xda   : > { %v3721_v40 = vpop.permute.xlu0 %3720  ;;  %v4848_v27 = vsel %vm17103_vm15, %v4783_v42, %v12835_v25  ;;  %v11695_v42 = vld [vmem:[#allocation2 + $0xb0] ss:$0 sps:$4 sm:$0x33]  }
  0xdb   : > { %2810 = vrot.lane.b32.xlu1 %v10651_v20, %s12178_s13  ;;  %v4846_v63 = vsel %vm17103_vm15, %v4781_v7, %v3721_v40  ;;  %v10811_v20 = vcombine.low %v1592_v5, %v12849_v55  ;;  %v10538_v40 = vcombine.low %v1275_v36, %v1212_v30  ;;  %v4007_v25 = vsel %vm17097_vm4, %v4005_v19, %v4006_v24  ;;  %v12908_v7 = vld [vmem:[#allocation2 + $0xb8] sm:$0xf]  ;;  %v11697_v24 = vld [vmem:[#allocation2 + $0xbc] ss:$0 sps:$4 sm:$0x33]  }
  0xdc   : > { %2808 = vrot.lane.b32.xlu0 %v10650_v21, %s12178_s13  ;;  %v10916_v21 = vcombine.low %v1718_v15, %v1591_v2  ;;  %v4357_v55 = vrot.slane %v10918_v29, 2  ;;  %v2155_v2 = vrot.slane %v11683_v41, 1  ;;  %v10698_v17 = vcombine.low %v1467_v53, %v12908_v7  ;;  %v12131_v29 = vld [vmem:[#allocation2 + $0x34] sm:$0xf] }
  0xdd   : > { %v4075_v51 = vpop.permute.xlu1 %4074  ;;  %v2154_v56 = vrot.slane %v10538_v40, 1  ;;  %v10762_v19 = vcombine.low %v1531_v12, %v12908_v7  ;;  %v2509_v36 = vsel %vm2467_vm3, %v2507_v11, %v2508_v59  ;;  %v3433_v41 = vrot.slane %v11695_v42, 2  ;;  %v732_v11 = vld [vmem:[%s12419_s28 + $0x80] sm:$0xf] }
  0xde   : > { %v4073_v62 = vpop.permute.xlu0 %4072  ;;  %v4913_v9 = vsel %vm4905_vm1, %v4848_v27, %v4075_v51  ;;  %v4354_v3 = vrot.slane %v10916_v21, 2  ;;  %v1337_v51 = vld [vmem:[#allocation2 + $0x90] sm:$0xc]  ;;  %v1403_v27 = vld [vmem:[#allocation2 + $0xb4] sm:$0xf] }
  0xdf   : > { %3162 = vrot.lane.b32.xlu1 %v3079_v44, %s12180_s15  ;;  %v4911_v13 = vsel %vm4905_vm1, %v4846_v63, %v4073_v62  ;;  %v11681_v44 = vld [vmem:[#allocation2 + $0xbc] ss:$0 sps:$4 sm:$0x33]   ;;  %v10600_v5 = vcombine.low %v1337_v51, %v12853_v4  ;;  %v1529_v63 = vld [vmem:[#allocation2 + $0xa8] sm:$0xc] }
  0xe0   : > { %3160 = vrot.lane.b32.xlu0 %v3076_v18, %s12180_s15  ;;  %v2153_v18 = vsel %vm17097_vm4, %v2151_v38, %v2152_v34  ;;  %v4358_v62 = vrot.slane %v11681_v44, 2  ;;  %v4356_v32 = vsel %vm2467_vm3, %v4354_v3, %v4355_v43  ;;  %v10760_v30 = vcombine.low %v1529_v63, %v12906_v58  ;;  %v12930_v34 = vld [vmem:[#allocation2 + $0xc4] sm:$0xf]  ;;  %v12938_v51 = vld [vmem:[#allocation2 + $0xa8] sm:$0xe] }
  0xe1   : > { %v12867_v39 = vpop.permute.xlu1 %2219  ;;  %v2504_v15 = vrot.slane %v10600_v5, 2  ;;  %v3435_v3 = vrot.slane %v10762_v19, 2  ;;  %v3436_v43 = vrot.slane %v11697_v24, 2  ;;  %v12962_v63 = vld [vmem:[#allocation2 + $0xd0] sm:$0xf]  ;;  %v10920_v12 = vcombine.low %v12947_v52, %v12930_v34 }
  0xe2   : > { %v4425_v14 = vpop.permute.xlu0 %4424  ;;  %v3432_v40 = vrot.slane %v10760_v30, 2  ;;  %v734_v30 = vld [vmem:[%s12419_s28 + $0x88] sm:$0xf]  ;;  %v11709_v52 = vld [vmem:[#allocation2 + $0xb0] ss:$0 sps:$4 sm:$0x33]  }
  0xe3   : > { %v4976_v26 = vsel %vm17099_vm5, %v4911_v13, %v4425_v14  ;;  %3514 = vrot.lane.b32.xlu1 %v3431_v46, %s12181_s16  ;;  %v1465_v46 = vld [vmem:[#allocation2 + $0xa8] sm:$0xe]  ;;  %v4359_v14 = vsel %vm2467_vm3, %v4357_v55, %v4358_v62  ;;  %v2506_v6 = vsel %vm2467_vm3, %v2504_v15, %v2505_v16  ;;  %v12132_v55 = vld [vmem:[#allocation2 + $0x40] sm:$0xf]  ;;  %v3437_v8 = vsel %vm2467_vm3, %v3435_v3, %v3436_v43 }
  0xe4   : > { %3512 = vrot.lane.b32.xlu0 %v3428_v10, %s12181_s16  ;;  %11323 = vmatprep.mubr.msk.bf16.mxu0 %vm17098_vm6, %v4976_v26  ;;  %v2156_v10 = vsel %vm17097_vm4, %v2154_v56, %v2155_v2  ;;  %v10696_v4 = vcombine.low %v1465_v46, %v12906_v58  ;;  %v11693_v26 = vld [vmem:[#allocation2 + $0xbc] ss:$0 sps:$4 sm:$0x11]   ;;  %v10485_v62 = vcombine.low %v1195_v54, %v12132_v55  ;;  %v1279_v55 = vld [vmem:[#allocation2 + $0xb4] sm:$0xe] }
  0xe5   : > { %v12885_v28 = vpop.permute.xlu1 %2221 }
  0xe6   : > { %v4427_v33 = vpop.permute.xlu0 %4426  ;;  %v3080_v61 = vrot.slane %v10696_v4, 1  ;;  %v4009_v4 = vrot.slane %v12943_v57, 1  ;;  %v4502_v15 = vsel %vm4484_vm10, %v10485_v62, %v12885_v28  ;;  %v735_v28 = vld [vmem:[%s12419_s28 + $0x8c] sm:$0xf] }
  0xe7   : > { %v4978_v35 = vsel %vm17099_vm5, %v4913_v9, %v4427_v33  ;;  %3738 = vrot.lane.b32.xlu1 %v10811_v20, %s12179_s14  ;;  %v1193_v20 = vld [vmem:[#allocation2 + $0x30] sm:$0xf]  ;;  %v3083_v9 = vrot.slane %v10698_v17, 1  ;;  %v3084_v33 = vrot.slane %v11693_v26, 1  ;;  %v911_v26 = vrot.slane %v732_v11, 7 }
  0xe8   : > { %3736 = vrot.lane.b32.xlu0 %v10810_v23, %s12179_s14  ;;  %11324 = vmatmul.mubr.msk.bf16.gmra.mxu0 %vm17098_vm6, %v4978_v35  ;;  %v1401_v23 = vld [vmem:[#allocation2 + $0xa8] sm:$0xf]  ;;  %v1658_v35 = vld [vmem:[#allocation2 + $0xc0] sm:$0xe]  ;;  %v10484_v44 = vcombine.low %v1193_v20, %v12131_v29 }
  0xe9   : > { %v12894_v45 = vpop.permute.xlu1 %2574  ;;  %v10856_v56 = vcombine.low %v1658_v35, %v12930_v34  ;;  %v3085_v5 = vsel %vm17097_vm4, %v3083_v9, %v3084_v33  ;;  %1137 = vst.msk [vmem:[#allocation2 + $0x108] sm:$0xe] %vm1088_vm7, %v911_v26  ;;  %v736_v33 = vld [vmem:[%s12419_s28 + $0x90] sm:$0xf]  ;;  %v737_v35 = vld [vmem:[%s12419_s28 + $0x94] sm:$0xf] }
  0xea   : > { %v12897_v49 = vpop.permute.xlu0 %2572  ;;  %v4499_v46 = vsel %vm4484_vm10, %v10484_v44, %v12867_v39  ;;  %v4593_v42 = vsel %vm4581_vm11, %v4502_v15, %v12894_v45  ;;  %v918_v45 = vrot.slane %v735_v28, 7  ;;  %v921_v29 = vrot.slane %v736_v33, 7 }
  0xeb   : > { %4090 = vrot.lane.b32.xlu1 %v4007_v25, %s12182_s17  ;;  %v12932_v25 = vld [vmem:[#allocation2 + $0xc0] sm:$0xf]  ;;  %v4591_v59 = vsel %vm4581_vm11, %v4499_v46, %v12897_v49  ;;  %v12970_v39 = vrot.slane %v10856_v56, 1  ;;  %v1660_v49 = vld [vmem:[#allocation2 + $0xcc] sm:$0xe]  ;;  %v923_v44 = vrot.slane %v737_v35, 7 }
  0xec   : > { %4088 = vrot.lane.b32.xlu0 %v4004_v47, %s12182_s17  ;;  %v10653_v47 = vcombine.low %v1403_v27, %v12908_v7  ;;  %v12952_v7 = vsel %vm2467_vm3, %v3432_v40, %v3433_v41  ;;  %v10812_v53 = vcombine.low %v12932_v25, %v12930_v34  ;;  %v912_v27 = vrot.slane %v911_v26, 4  ;;  %v13005_v40 = vld [vmem:[#allocation2 + $0xb0] ss:$0 sps:$4 sm:$0x11]   ;;  %v13014_v56 = vld [vmem:[#allocation2 + $0xb8] sm:$0xf] }
  0xed   : > { %v12902_v37 = vpop.permute.xlu1 %2798  ;;  %v11702_v46 = vld [vmem:[#allocation2 + $0xc8] ss:$0 sps:$4 sm:$0x33]   ;;  %1143 = vst.msk [vmem:[#allocation2 + $0x120] sm:$0xe] %vm1088_vm7, %v921_v29 }
  0xee   : > { %v12910_v60 = vpop.permute.xlu0 %2796 }
  0xef   : > { %2235 = vrot.lane.b32.xlu1 %v2153_v18, %s12177_s30  ;;  %v10652_v18 = vcombine.low %v1401_v23, %v12906_v58  ;;  %v12954_v58 = vld [vmem:[#allocation2 + $0xcc] sm:$0xf]  ;;  %v4656_v16 = vsel %vm4646_vm12, %v4591_v59, %v12910_v60  ;;  %v916_v60 = vrot.slane %v734_v30, 7  ;;  %v925_v59 = vrot.slane %v923_v44, 4  ;;  %v741_v30 = vld [vmem:[%s12419_s28 + $0xa4] sm:$0xf] }
  0xf0   : > { %4440 = vrot.lane.b32.xlu0 %v4356_v32, %s12183_s18  ;;  %v3082_v32 = vsel %vm17097_vm4, %v3080_v61, %v3081_v1  ;;  %v10813_v24 = vcombine.low %v12954_v58, %v12962_v63 }
  0xf1   : > { %v12916_v13 = vpop.permute.xlu1 %3150  ;;  %v917_v9 = vrot.slane %v916_v60, 4  ;;  %1140 = vst.msk [vmem:[#allocation2 + $0x114] sm:$0xe] %vm1088_vm7, %v916_v60  ;;  %v1724_v60 = vld [vmem:[#allocation2 + $0xcc] sm:$0xc] }
  0xf2   : > { %v12920_v22 = vpop.permute.xlu0 %3148  ;;  %1145 = vst.msk [vmem:[#allocation2 + $0x128] sm:$0x1] %vm447_vm2, %v925_v59  ;;  %v10922_v25 = vcombine.low %v1724_v60, %v12962_v63  ;;  %v1407_v59 = vld [vmem:[#allocation2 + $0xcc] sm:$0xf] }
  0xf3   : > { %2237 = vrot.lane.b32.xlu1 %v2156_v10, %s12177_s30  ;;  %v10540_v10 = vcombine.low %v12938_v51, %v12936_v48  ;;  %v4720_v23 = vsel %vm598_vm13, %v4656_v16, %v12920_v22  ;;  %v4658_v22 = vsel %vm4646_vm12, %v4593_v42, %v12902_v37  ;;  %v920_v37 = vrot.slane %v918_v45, 4  ;;  %v1343_v51 = vld [vmem:[#allocation2 + $0xb4] sm:$0xc] }
  0xf4   : > { %4442 = vrot.lane.b32.xlu0 %v4359_v14, %s12183_s18  ;;  %v733_v14 = vld [vmem:[%s12419_s28 + $0x84] sm:$0xf]  ;;  %v4722_v3 = vsel %vm598_vm13, %v4658_v22, %v12916_v13  ;;  %v919_v62 = vsel %vm12431_vm8, %v917_v9, %v918_v45  ;;  %v922_v13 = vrot.slane %v921_v29, 4  ;;  %v933_v45 = vrot.slane %v741_v30, 7  ;;  %v1341_v9 = vld [vmem:[#allocation2 + $0xa8] sm:$0xc] }
  0xf5   : > { %v12927_v21 = vpop.permute.xlu1 %3502  ;;  %v913_v20 = vrot.slane %v733_v14, 7  ;;  %1141 = vst.msk [vmem:[#allocation2 + $0x118] sm:$0xf] %vm17093_vm0, %v919_v62  ;;  %v2157_v28 = vrot.slane %v10540_v10, 1  ;;  %v4360_v10 = vrot.slane %v10920_v12, 2  ;;  %v4010_v22 = vsel %vm17097_vm4, %v12970_v39, %v4009_v4 }
  0xf6   : > { %v3501_v38 = vpop.permute.xlu0 %3500  ;;  %1142 = vst.msk [vmem:[#allocation2 + $0x11c] sm:$0x1] %vm447_vm2, %v920_v37  ;;  %v4787_v14 = vsel %vm4775_vm14, %v4722_v3, %v12927_v21  ;;  %v924_v21 = vsel %vm12431_vm8, %v922_v13, %v923_v44  ;;  %v10606_v12 = vcombine.low %v1343_v51, %v13014_v56  ;;  %v11711_v39 = vld [vmem:[#allocation2 + $0xbc] ss:$0 sps:$4 sm:$0x33]   ;;  %v10604_v37 = vcombine.low %v1341_v9, %v12936_v48 }
  0xf7   : > { %2590 = vrot.lane.b32.xlu1 %v2509_v36, %s12176_s29  ;;  %v4785_v54 = vsel %vm4775_vm14, %v4720_v23, %v3501_v38  ;;  %v12992_v36 = vld [vmem:[#allocation2 + $0xd4] ss:$0 sps:$4 sm:$0x11]   ;;  %v915_v61 = vrot.slane %v913_v20, 4  ;;  %v914_v41 = vsel %vm12431_vm8, %v912_v27, %v913_v20  ;;  %1144 = vst.msk [vmem:[#allocation2 + $0x124] sm:$0xf] %vm17093_vm0, %v924_v21 }
  0xf8   : > { %2588 = vrot.lane.b32.xlu0 %v2506_v6, %s12176_s29  ;;  %v10858_v6 = vcombine.low %v1660_v49, %v12962_v63  ;;  %1138 = vst.msk [vmem:[#allocation2 + $0x10c] sm:$0xf] %vm17093_vm0, %v914_v41  ;;  %v4012_v15 = vrot.slane %v12992_v36, 1  ;;  %v740_v49 = vld [vmem:[%s12419_s28 + $0xa0] sm:$0xf]  ;;  %v10542_v36 = vcombine.low %v1279_v55, %v13014_v56 }
  0xf9   : > { %v12945_v2 = vpop.permute.xlu1 %3726  ;;  %1139 = vst.msk [vmem:[#allocation2 + $0x110] sm:$0x1] %vm447_vm2, %v915_v61  ;;  %v931_v42 = vrot.slane %v740_v49, 7  ;;  %v11707_v27 = vld [vmem:[#allocation2 + $0xbc] ss:$0 sps:$4 sm:$0x11]  }
  0xfa   : > { %v3725_v50 = vpop.permute.xlu0 %3724  ;;  %v4852_v26 = vsel %vm17103_vm15, %v4787_v14, %v12945_v2  ;;  %v2160_v34 = vrot.slane %v10542_v36, 1  ;;  %v2161_v33 = vrot.slane %v11707_v27, 1  ;;  %v13089_v29 = vld [vmem:[%s12419_s28 + $0xa8] sm:$0xf]  ;;  %v1471_v56 = vld [vmem:[#allocation2 + $0xcc] sm:$0xe] }
  0xfb   : > { %2814 = vrot.lane.b32.xlu1 %v10653_v47, %s12178_s13  ;;  %v4850_v1 = vsel %vm17103_vm15, %v4785_v54, %v3725_v50  ;;  %v738_v47 = vld [vmem:[%s12419_s28 + $0x98] sm:$0xf]  ;;  %v739_v50 = vld [vmem:[%s12419_s28 + $0x9c] sm:$0xf]  ;;  %1149 = vst.msk [vmem:[#allocation2 + $0x138] sm:$0xe] %vm1088_vm7, %v931_v42 }
  0xfc   : > { %2812 = vrot.lane.b32.xlu0 %v10652_v18, %s12178_s13  ;;  %v928_v11 = vrot.slane %v739_v50, 7  ;;  %v2162_v3 = vsel %vm17097_vm4, %v2160_v34, %v2161_v33  ;;  %v936_v55 = vrot.slane %v13089_v29, 7  ;;  %v2510_v50 = vrot.slane %v10604_v37, 2  ;;  %v1406_v13 = vld [vmem:[#allocation2 + $0xc4] sm:$0xf] }
  0xfd   : > { %v12980_v17 = vpop.permute.xlu1 %4078  ;;  %v11715_v14 = vld [vmem:[#allocation2 + $0xc8] ss:$0 sps:$4 sm:$0x11]  }
  0xfe   : > { %v4077_v19 = vpop.permute.xlu0 %4076  ;;  %v4917_v23 = vsel %vm4905_vm1, %v4852_v26, %v12980_v17  ;;  %v2158_v17 = vrot.slane %v13005_v40, 1  ;;  %v4363_v40 = vrot.slane %v10922_v25, 2  ;;  %1152 = vst.msk [vmem:[#allocation2 + $0x144] sm:$0xe] %vm1088_vm7, %v936_v55  ;;  %v1197_v49 = vld [vmem:[#allocation2 + $0x48] sm:$0xf] }
  0xff   : > { %3166 = vrot.lane.b32.xlu1 %v3085_v5, %s12180_s15  ;;  %v4915_v43 = vsel %vm4905_vm1, %v4850_v1, %v4077_v19  ;;  %v4361_v1 = vrot.slane %v11702_v46, 2  ;;  %v13115_v34 = vld [vmem:[#allocation2 + $0xe8] sm:$0xf] }
 0x100   : > { %3164 = vrot.lane.b32.xlu0 %v3082_v32, %s12180_s15  ;;  %v926_v32 = vrot.slane %v738_v47, 7  ;;  %v2159_v57 = vsel %vm17097_vm4, %v2157_v28, %v2158_v17  ;;  %v2513_v47 = vrot.slane %v10606_v12, 2  ;;  %v1199_v28 = vld [vmem:[#allocation2 + $0x54] sm:$0xf]  ;;  %v12133_v17 = vld [vmem:[#allocation2 + $0x4c] sm:$0xf] }
 0x101   : > { %v13003_v38 = vpop.permute.xlu1 %2223  ;;  %v4362_v35 = vsel %vm2467_vm3, %v4360_v10, %v4361_v1  ;;  %v10486_v36 = vcombine.low %v1197_v49, %v12133_v17  ;;  %v11721_v10 = vld [vmem:[#allocation2 + $0xd4] ss:$0 sps:$4 sm:$0x33]   ;;  %v11719_v1 = vld [vmem:[#allocation2 + $0xc8] ss:$0 sps:$4 sm:$0x33]  }
 0x102   : > { %v4429_v18 = vpop.permute.xlu0 %4428  ;;  %v927_v16 = vrot.slane %v926_v32, 4  ;;  %1146 = vst.msk [vmem:[#allocation2 + $0x12c] sm:$0xe] %vm1088_vm7, %v926_v32  ;;  %v2511_v32 = vrot.slane %v11709_v52, 2  ;;  %v1664_v52 = vld [vmem:[#allocation2 + $0xe4] sm:$0xe] }
 0x103   : > { %v4980_v5 = vsel %vm17099_vm5, %v4915_v43, %v4429_v18  ;;  %3518 = vrot.lane.b32.xlu1 %v3437_v8, %s12181_s16  ;;  %v4011_v8 = vrot.slane %v10858_v6, 1  ;;  %v2514_v43 = vrot.slane %v11711_v39, 2  ;;  %v1408_v18 = vld [vmem:[#allocation2 + $0xd0] sm:$0xf]  ;;  %v4505_v12 = vsel %vm4484_vm10, %v10486_v36, %v13003_v38  ;;  %v1599_v38 = vld [vmem:[#allocation2 + $0xdc] sm:$0xf] }
 0x104   : > { %3516 = vrot.lane.b32.xlu0 %v12952_v7, %s12181_s16  ;;  %11327 = vmatprep.mubr.msk.bf16.mxu0 %vm17098_vm6, %v4980_v5  ;;  %v930_v7 = vrot.slane %v928_v11, 4  ;;  %v929_v2 = vsel %vm12431_vm8, %v927_v16, %v928_v11  ;;  %v935_v5 = vrot.slane %v933_v45, 4  ;;  %v1469_v11 = vld [vmem:[#allocation2 + $0xc0] sm:$0xe]  ;;  %v2512_v21 = vsel %vm2467_vm3, %v2510_v50, %v2511_v32  ;;  %v1283_v36 = vld [vmem:[#allocation2 + $0xfc] sm:$0xe] }
 0x105   : > { %v13035_v20 = vpop.permute.xlu1 %2225  ;;  %1147 = vst.msk [vmem:[#allocation2 + $0x130] sm:$0xf] %vm17093_vm0, %v929_v2  ;;  %v4013_v58 = vsel %vm17097_vm4, %v4011_v8, %v4012_v15  ;;  %v10702_v8 = vcombine.low %v1471_v56, %v1408_v18  ;;  %v2515_v15 = vsel %vm2467_vm3, %v2513_v47, %v2514_v43  ;;  %v11717_v16 = vld [vmem:[#allocation2 + $0xd4] ss:$0 sps:$4 sm:$0x11]   ;;  %v10700_v30 = vcombine.low %v1469_v11, %v1406_v13 }
 0x106   : > { %v4431_v19 = vpop.permute.xlu0 %4430  ;;  %1148 = vst.msk [vmem:[#allocation2 + $0x134] sm:$0x1] %vm447_vm2, %v930_v7  ;;  %1151 = vst.msk [vmem:[#allocation2 + $0x140] sm:$0x1] %vm447_vm2, %v935_v5  ;;  %v1405_v7 = vld [vmem:[#allocation2 + $0xc0] sm:$0xf]  ;;  %v10655_v60 = vcombine.low %v1407_v59, %v1408_v18  ;;  %v10862_v56 = vcombine.low %v1664_v52, %v13115_v34 }
 0x107   : > { %v4982_v54 = vsel %vm17099_vm5, %v4917_v23, %v4431_v19  ;;  %3742 = vrot.lane.b32.xlu1 %v10813_v24, %s12179_s14  ;;  %v932_v24 = vrot.slane %v931_v42, 4  ;;  %v1535_v42 = vld [vmem:[#allocation2 + $0xcc] sm:$0xc]  ;;  %v1533_v19 = vld [vmem:[#allocation2 + $0xc0] sm:$0xc]  ;;  %v3087_v2 = vrot.slane %v11715_v14, 1  ;;  %v10654_v27 = vcombine.low %v1405_v7, %v1406_v13 }
 0x108   : > { %3740 = vrot.lane.b32.xlu0 %v10812_v53, %s12179_s14  ;;  %11328 = vmatmul.mubr.msk.bf16.gmra.mxu0 %vm17098_vm6, %v4982_v54  ;;  %v11705_v53 = vld [vmem:[#allocation2 + $0xd4] ss:$0 sps:$4 sm:$0x33]   ;;  %v3089_v54 = vrot.slane %v10702_v8, 1  ;;  %v3090_v51 = vrot.slane %v11717_v16, 1  ;;  %v3442_v39 = vrot.slane %v11721_v10, 2 }
 0x109   : > { %v13068_v61 = vpop.permute.xlu1 %2578  ;;  %v934_v63 = vsel %vm12431_vm8, %v932_v24, %v933_v45  ;;  %v4364_v41 = vrot.slane %v11705_v53, 2  ;;  %v3086_v45 = vrot.slane %v10700_v30, 1  ;;  %v12134_v53 = vld [vmem:[#allocation2 + $0x58] sm:$0xf]  ;;  %v3439_v37 = vrot.slane %v11719_v1, 2 }
 0x10a   : > { %v13075_v6 = vpop.permute.xlu0 %2576  ;;  %1150 = vst.msk [vmem:[#allocation2 + $0x13c] sm:$0xf] %vm17093_vm0, %v934_v63  ;;  %v10487_v9 = vcombine.low %v1199_v28, %v12134_v53  ;;  %v1598_v47 = vld [vmem:[#allocation2 + $0xd8] sm:$0xf]  ;;  %v13140_v16 = vld [vmem:[#allocation2 + $0xf4] sm:$0xf] }
 0x10b   : > { %4094 = vrot.lane.b32.xlu1 %v4013_v58, %s12182_s17  ;;  %v4365_v48 = vsel %vm2467_vm3, %v4363_v40, %v4364_v41  ;;  %v10766_v58 = vcombine.low %v1535_v42, %v1408_v18  ;;  %v4595_v63 = vsel %vm4581_vm11, %v4505_v12, %v13075_v6  ;;  %v3088_v40 = vsel %vm17097_vm4, %v3086_v45, %v3087_v2  ;;  %v1662_v18 = vld [vmem:[#allocation2 + $0xd8] sm:$0xe]  ;;  %v11725_v50 = vld [vmem:[#allocation2 + $0xe0] ss:$0 sps:$4 sm:$0x11]  }
 0x10c   : > { %4092 = vrot.lane.b32.xlu0 %v4010_v22, %s12182_s17  ;;  %v10764_v22 = vcombine.low %v1533_v19, %v1406_v13  ;;  %v11727_v6 = vld [vmem:[#allocation2 + $0xec] ss:$0 sps:$4 sm:$0x11]   ;;  %v4508_v32 = vsel %vm4484_vm10, %v10487_v9, %v13035_v20  ;;  %v1600_v13 = vld [vmem:[#allocation2 + $0xe4] sm:$0xf]  ;;  %v10814_v30 = vcombine.low %v1598_v47, %v1599_v38  ;;  %v4017_v42 = vrot.slane %v10862_v56, 1 }
 0x10d   : > { %v13083_v4 = vpop.permute.xlu1 %2802  ;;  %v3441_v33 = vrot.slane %v10766_v58, 2  ;;  %v1726_v11 = vld [vmem:[#allocation2 + $0xd8] sm:$0xc]  ;;  %v4597_v59 = vsel %vm4581_vm11, %v4508_v32, %v13068_v61  ;;  %v1281_v20 = vld [vmem:[#allocation2 + $0xf0] sm:$0xe]  ;;  %v10815_v28 = vcombine.low %v1600_v13, %v13115_v34  ;;  %v4015_v10 = vrot.slane %v11725_v50, 1 }
 0x10e   : > { %v13091_v44 = vpop.permute.xlu0 %2800  ;;  %v3438_v41 = vrot.slane %v10764_v22, 2  ;;  %v4662_v49 = vsel %vm4646_vm12, %v4597_v59, %v13083_v4  ;;  %v11731_v2 = vld [vmem:[#allocation2 + $0xf8] ss:$0 sps:$4 sm:$0x11]   ;;  %v10544_v17 = vcombine.low %v1281_v20, %v13140_v16  ;;  %v743_v45 = vld [vmem:[%s12419_s28 + $0xac] sm:$0xf] }
 0x10f   : > { %2239 = vrot.lane.b32.xlu1 %v2159_v57, %s12177_s30  ;;  %v3091_v57 = vsel %vm17097_vm4, %v3089_v54, %v3090_v51  ;;  %v10924_v54 = vcombine.low %v1726_v11, %v1599_v38  ;;  %v13169_v52 = vld [vmem:[#allocation2 + $0x104] ss:$0 sps:$4 sm:$0x11]   ;;  %v1345_v12 = vld [vmem:[#allocation2 + $0xf0] sm:$0xc] }
 0x110   : > { %4444 = vrot.lane.b32.xlu0 %v4362_v35, %s12183_s18  ;;  %v3440_v8 = vsel %vm2467_vm3, %v3438_v41, %v3439_v37  ;;  %v13177_v41 = vld [vmem:[#allocation2 + $0xec] ss:$0 sps:$4 sm:$0x33]   ;;  %v13179_v37 = vld [vmem:[#allocation2 + $0xfc] sm:$0xc]  ;;  %v2167_v56 = vrot.slane %v13169_v52, 1 }
 0x111   : > { %v13097_v62 = vpop.permute.xlu1 %3154  ;;  %v4366_v29 = vrot.slane %v10924_v54, 2  ;;  %v13194_v50 = vld [vmem:[#allocation2 + $0x104] ss:$0 sps:$4 sm:$0x33]  }
 0x112   : > { %v3153_v46 = vpop.permute.xlu0 %3152  ;;  %v4726_v61 = vsel %vm598_vm13, %v4662_v49, %v13097_v62  ;;  %v13155_v62 = vld [vmem:[#allocation2 + $0x100] sm:$0xf]  ;;  %v13200_v13 = vld [vmem:[#allocation2 + $0xf8] ss:$0 sps:$4 sm:$0x33]  }
 0x113   : > { %2241 = vrot.lane.b32.xlu1 %v2162_v3, %s12177_s30  ;;  %v4660_v3 = vsel %vm4646_vm12, %v4595_v63, %v13091_v44  ;;  %v3443_v44 = vsel %vm2467_vm3, %v3441_v33, %v3442_v39  ;;  %v2163_v33 = vrot.slane %v10544_v17, 1  ;;  %v2164_v39 = vrot.slane %v11731_v2, 1  ;;  %v11743_v54 = vld [vmem:[#allocation2 + $0x11c] ss:$0 sps:$4 sm:$0x11]  }
 0x114   : > { %4446 = vrot.lane.b32.xlu0 %v4365_v48, %s12183_s18  ;;  %v4724_v48 = vsel %vm598_vm13, %v4660_v3, %v3153_v46  ;;  %v1409_v17 = vld [vmem:[#allocation2 + $0x108] sm:$0xf]  ;;  %v3096_v52 = vrot.slane %v11743_v54, 1 }
 0x115   : > { %v13107_v26 = vpop.permute.xlu1 %3506 }
 0x116   : > { %v3505_v23 = vpop.permute.xlu0 %3504  ;;  %v4791_v4 = vsel %vm4775_vm14, %v4726_v61, %v13107_v26  ;;  %v937_v26 = vrot.slane %v936_v55, 4  ;;  %v11742_v61 = vld [vmem:[#allocation2 + $0x110] ss:$0 sps:$4 sm:$0x11]  }
 0x117   : > { %2594 = vrot.lane.b32.xlu1 %v2515_v15, %s12176_s29  ;;  %v4789_v5 = vsel %vm4775_vm14, %v4724_v48, %v3505_v23  ;;  %v10860_v15 = vcombine.low %v1662_v18, %v1599_v38  ;;  %v11729_v23 = vld [vmem:[#allocation2 + $0xe0] ss:$0 sps:$4 sm:$0x33]   ;;  %v10608_v38 = vcombine.low %v1345_v12, %v13140_v16  ;;  %v10610_v48 = vcombine.low %v13179_v37, %v13155_v62  ;;  %v1475_v16 = vld [vmem:[#allocation2 + $0x114] sm:$0xe] }
 0x118   : > { %2592 = vrot.lane.b32.xlu0 %v2512_v21, %s12176_s29  ;;  %v4367_v55 = vrot.slane %v11729_v23, 2  ;;  %v2517_v23 = vrot.slane %v13200_v13, 2  ;;  %v12135_v12 = vld [vmem:[#allocation2 + $0x64] sm:$0xf] }
 0x119   : > { %v13112_v24 = vpop.permute.xlu1 %3730  ;;  %v4014_v58 = vrot.slane %v10860_v15, 1  ;;  %v2516_v59 = vrot.slane %v10608_v38, 2  ;;  %v1412_v15 = vld [vmem:[#allocation2 + $0x118] sm:$0xf]  ;;  %v2519_v49 = vrot.slane %v10610_v48, 2 }
 0x11a   : > { %v3729_v25 = vpop.permute.xlu0 %3728  ;;  %v4368_v32 = vsel %vm2467_vm3, %v4366_v29, %v4367_v55  ;;  %v1668_v38 = vld [vmem:[#allocation2 + $0x12c] sm:$0xe] }
 0x11b   : > { %2818 = vrot.lane.b32.xlu1 %v10655_v60, %s12178_s13  ;;  %v4854_v46 = vsel %vm17103_vm15, %v4789_v5, %v3729_v25  ;;  %v4018_v60 = vrot.slane %v11727_v6, 1  ;;  %v1728_v25 = vld [vmem:[#allocation2 + $0xe4] sm:$0xc] }
 0x11c   : > { %2816 = vrot.lane.b32.xlu0 %v10654_v27, %s12178_s13  ;;  %v4856_v27 = vsel %vm17103_vm15, %v4791_v4, %v13112_v24  ;;  %v10546_v24 = vcombine.low %v1283_v36, %v13155_v62  ;;  %v10706_v4 = vcombine.low %v1475_v16, %v1412_v15  ;;  %v1411_v62 = vld [vmem:[#allocation2 + $0x114] sm:$0xf]  ;;  %v744_v16 = vld [vmem:[%s12419_s28 + $0xb0] sm:$0xf] }
 0x11d   : > { %v4083_v35 = vpop.permute.xlu1 %4082  ;;  %v4019_v9 = vsel %vm17097_vm4, %v4017_v42, %v4018_v60  ;;  %v10657_v55 = vcombine.low %v1411_v62, %v1412_v15  ;;  %v1602_v62 = vld [vmem:[#allocation2 + $0x120] sm:$0xf] }
 0x11e   : > { %v4081_v43 = vpop.permute.xlu0 %4080  ;;  %v4921_v22 = vsel %vm4905_vm1, %v4856_v27, %v4083_v35  ;;  %v4016_v35 = vsel %vm17097_vm4, %v4014_v58, %v4015_v10  ;;  %v2166_v18 = vrot.slane %v10546_v24, 1  ;;  %v11744_v58 = vld [vmem:[#allocation2 + $0x110] ss:$0 sps:$4 sm:$0x33]   ;;  %v3095_v24 = vrot.slane %v10706_v4, 1 }
 0x11f   : > { %3170 = vrot.lane.b32.xlu1 %v3091_v57, %s12180_s15  ;;  %v4919_v21 = vsel %vm4905_vm1, %v4854_v46, %v4081_v43  ;;  %v938_v57 = vrot.slane %v743_v45, 7  ;;  %v1473_v46 = vld [vmem:[#allocation2 + $0x108] sm:$0xe]  ;;  %v11745_v45 = vld [vmem:[#allocation2 + $0x11c] ss:$0 sps:$4 sm:$0x33]  }
 0x120   : > { %3168 = vrot.lane.b32.xlu0 %v3088_v40, %s12180_s15  ;;  %v10926_v40 = vcombine.low %v1728_v25, %v13115_v34  ;;  %v2165_v34 = vsel %vm17097_vm4, %v2163_v33, %v2164_v39  ;;  %v2168_v20 = vsel %vm17097_vm4, %v2166_v18, %v2167_v56  ;;  %v13283_v33 = vld [vmem:[#allocation2 + $0x124] sm:$0xf]  ;;  %v1666_v39 = vld [vmem:[#allocation2 + $0x120] sm:$0xe]  ;;  %v3448_v37 = vrot.slane %v11745_v45, 2 }
 0x121   : > { %v13137_v14 = vpop.permute.xlu1 %2227  ;;  %v939_v47 = vsel %vm12431_vm8, %v937_v26, %v938_v57  ;;  %v940_v3 = vrot.slane %v938_v57, 4  ;;  %v1203_v26 = vld [vmem:[#allocation2 + $0x6c] sm:$0xf]  ;;  %v12136_v18 = vld [vmem:[#allocation2 + $0x70] sm:$0xf]  ;;  %v10864_v48 = vcombine.low %v1666_v39, %v13283_v33 }
 0x122   : > { %v4433_v7 = vpop.permute.xlu0 %4432  ;;  %1153 = vst.msk [vmem:[#allocation2 + $0x148] sm:$0xf] %vm17093_vm0, %v939_v47  ;;  %v4369_v5 = vrot.slane %v10926_v40, 2  ;;  %vm17094_vm0 = vcmask 123905   ;;  %v3445_v40 = vrot.slane %v11744_v58, 2  ;;  %v10489_v56 = vcombine.low %v1203_v26, %v12136_v18 }
 0x123   : > { %v4984_v19 = vsel %vm17099_vm5, %v4919_v21, %v4433_v7  ;;  %3522 = vrot.lane.b32.xlu1 %v3443_v44, %s12181_s16  ;;  %1154 = vst.msk [vmem:[#allocation2 + $0x14c] sm:$0x1] %vm447_vm2, %v940_v3  ;;  %v4370_v44 = vrot.slane %v13177_v41, 2  ;;  %v2520_v21 = vrot.slane %v13194_v50, 2  ;;  %v1537_v7 = vld [vmem:[#allocation2 + $0x108] sm:$0xc] }
 0x124   : > { %3520 = vrot.lane.b32.xlu0 %v3440_v8, %s12181_s16  ;;  %11331 = vmatprep.mubr.msk.bf16.mxu0 %vm17098_vm6, %v4984_v19  ;;  %578 = vst.msk [vmem:[#allocation3 + $0x24] sm:$0x2] %vm17094_vm0, %v17101_v0  ;;  %579 = vst.msk [vmem:[#allocation3 + $0x2c] sm:$0x2] %vm17094_vm0, %v17101_v0  ;;  %v1410_v8 = vld [vmem:[#allocation2 + $0x10c] sm:$0xf] }
 0x125   : > { %v13159_v51 = vpop.permute.xlu1 %2229  ;;  %576 = vst.msk [vmem:[#allocation3 + $0x14] sm:$0x2] %vm17094_vm0, %v17101_v0  ;;  %577 = vst.msk [vmem:[#allocation3 + $0x1c] sm:$0x2] %vm17094_vm0, %v17101_v0  ;;  %v4371_v42 = vsel %vm2467_vm3, %v4369_v5, %v4370_v44  ;;  %v1539_v19 = vld [vmem:[#allocation2 + $0x114] sm:$0xc]  ;;  %v10704_v2 = vcombine.low %v1473_v46, %v1410_v8  ;;  %v2521_v36 = vsel %vm2467_vm3, %v2519_v49, %v2520_v21 }
 0x126   : > { %v4435_v1 = vpop.permute.xlu0 %4434  ;;  %580 = vst.msk [vmem:[#allocation3 + $0x34] sm:$0x2] %vm17094_vm0, %v17101_v0  ;;  %581 = vst.msk [vmem:[#allocation3 + $0x3c] sm:$0x2] %vm17094_vm0, %v17101_v0  ;;  %v10768_v27 = vcombine.low %v1537_v7, %v1410_v8  ;;  %v10770_v10 = vcombine.low %v1539_v19, %v1412_v15  ;;  %v10656_v29 = vcombine.low %v1409_v17, %v1410_v8  ;;  %v13288_v3 = vld [vmem:[#allocation2 + $0x130] sm:$0xf] }
 0x127   : > { %v4986_v53 = vsel %vm17099_vm5, %v4921_v22, %v4435_v1  ;;  %3746 = vrot.lane.b32.xlu1 %v10815_v28, %s12179_s14  ;;  %582 = vst.msk [vmem:[#allocation3 + $0x44] sm:$0x2] %vm17094_vm0, %v17101_v0  ;;  %583 = vst.msk [vmem:[#allocation3 + $0x4c] sm:$0x2] %vm17094_vm0, %v17101_v0  ;;  %v1201_v28 = vld [vmem:[#allocation2 + $0x60] sm:$0xf]  ;;  %v2518_v1 = vsel %vm2467_vm3, %v2516_v59, %v2517_v23  ;;  %v3097_v5 = vsel %vm17097_vm4, %v3095_v24, %v3096_v52 }
 0x128   : > { %3744 = vrot.lane.b32.xlu0 %v10814_v30, %s12179_s14  ;;  %11332 = vmatmul.mubr.msk.bf16.gmra.mxu0 %vm17098_vm6, %v4986_v53  ;;  %588 = vst.msk [vmem:[#allocation3 + $0x74] sm:$0x2] %vm17094_vm0, %v17101_v0  ;;  %589 = vst.msk [vmem:[#allocation3 + $0x7c] sm:$0x2] %vm17094_vm0, %v17101_v0  ;;  %v3092_v53 = vrot.slane %v10704_v2, 1  ;;  %v10488_v57 = vcombine.low %v1201_v28, %v12135_v12  ;;  %v3447_v41 = vrot.slane %v10770_v10, 2 }
 0x129   : > { %v13173_v63 = vpop.permute.xlu1 %2582  ;;  %590 = vst.msk [vmem:[#allocation3 + $0x84] sm:$0x2] %vm17094_vm0, %v17101_v0  ;;  %591 = vst.msk [vmem:[#allocation3 + $0x8c] sm:$0x2] %vm17094_vm0, %v17101_v0  ;;  %v13292_v50 = vld [vmem:[#allocation2 + $0x12c] sm:$0xf]  ;;  %v10866_v44 = vcombine.low %v1668_v38, %v13288_v3 }
 0x12a   : > { %v13183_v43 = vpop.permute.xlu0 %2580  ;;  %592 = vst.msk [vmem:[#allocation3 + $0x94] sm:$0x2] %vm17094_vm0, %v17101_v0  ;;  %593 = vst.msk [vmem:[#allocation3 + $0x9c] sm:$0x2] %vm17094_vm0, %v17101_v0  ;;  %v3449_v15 = vsel %vm2467_vm3, %v3447_v41, %v3448_v37  ;;  %v13315_v7 = vrot.slane %v10864_v48, 1 }
 0x12b   : > { %4098 = vrot.lane.b32.xlu1 %v4019_v9, %s12182_s17  ;;  %594 = vst.msk [vmem:[#allocation3 + $0xa4] sm:$0x2] %vm17094_vm0, %v17101_v0  ;;  %595 = vst.msk [vmem:[#allocation3 + $0xac] sm:$0x2] %vm17094_vm0, %v17101_v0  ;;  %v3093_v9 = vrot.slane %v11742_v61, 1  ;;  %vm17172_vm0 = vcmask 27648  }
 0x12c   : > { %4096 = vrot.lane.b32.xlu0 %v4016_v35, %s12182_s17  ;;  %v3444_v35 = vrot.slane %v10768_v27, 2  ;;  %v746_v23 = vld [vmem:[%s12419_s28 + $0xb8] sm:$0xf]  ;;  %v13321_v19 = vld [vmem:[#allocation2 + $0x128] ss:$0 sps:$4 sm:$0x11]   ;;  %vm17173_vm9 = vmmov %vm17172_vm0 }
 0x12d   : > { %v13196_v6 = vpop.permute.xlu1 %2806  ;;  %v3094_v46 = vsel %vm17097_vm4, %v3092_v53, %v3093_v9  ;;  %v13323_v28 = vld [vmem:[#allocation2 + $0x10c] sm:$0xf]  ;;  %v747_v4 = vld [vmem:[%s12419_s28 + $0xbc] sm:$0xf]  ;;  %v1730_v24 = vld [vmem:[#allocation2 + $0x120] sm:$0xc] }
 0x12e   : > { %v13234_v11 = vpop.permute.xlu0 %2804  ;;  %v3446_v8 = vsel %vm2467_vm3, %v3444_v35, %v3445_v40  ;;  %v948_v27 = vrot.slane %v747_v4, 7  ;;  %v1732_v40 = vld [vmem:[#allocation2 + $0x12c] sm:$0xc]  ;;  %v1224_v41 = vld [vmem:[#allocation2 + $0x118] sm:$0xf]  ;;  %v4021_v18 = vrot.slane %v13321_v19, 1 }
 0x12f   : > { %2243 = vrot.lane.b32.xlu1 %v2165_v34, %s12177_s30  ;;  %v1287_v37 = vld [vmem:[#allocation2 + $0x114] sm:$0xe] }
 0x130   : > { %4448 = vrot.lane.b32.xlu0 %v4368_v32, %s12183_s18  ;;  %v4511_v32 = vsel %vm4484_vm10, %v10488_v57, %v13137_v14  ;;  %v13306_v14 = vld [vmem:[#allocation2 + $0x134] ss:$0 sps:$4 sm:$0x11]   ;;  %v950_v52 = vrot.slane %v948_v27, 4 }
 0x131   : > { %v13272_v30 = vpop.permute.xlu1 %3158  ;;  %v4599_v13 = vsel %vm4581_vm11, %v4511_v32, %v13183_v43  ;;  %v10817_v43 = vcombine.low %v13292_v50, %v13288_v3  ;;  %v4024_v9 = vrot.slane %v13306_v14, 1 }
 0x132   : > { %v3157_v60 = vpop.permute.xlu0 %3156  ;;  %v4664_v49 = vsel %vm4646_vm12, %v4599_v13, %v13234_v11  ;;  %v946_v11 = vrot.slane %v746_v23, 7  ;;  %1160 = vst.msk [vmem:[#allocation2 + $0x164] sm:$0x1] %vm447_vm2, %v950_v52  ;;  %v10550_v13 = vcombine.low %v1287_v37, %v1224_v41  ;;  %v11765_v52 = vld [vmem:[#allocation2 + $0x134] ss:$0 sps:$4 sm:$0x11]  }
 0x133   : > { %2245 = vrot.lane.b32.xlu1 %v2168_v20, %s12177_s30  ;;  %v4514_v20 = vsel %vm4484_vm10, %v10489_v56, %v13159_v51  ;;  %v4728_v61 = vsel %vm598_vm13, %v4664_v49, %v3157_v60  ;;  %v941_v51 = vrot.slane %v744_v16, 7  ;;  %v1285_v60 = vld [vmem:[#allocation2 + $0x108] sm:$0xe]  ;;  %v10928_v56 = vcombine.low %v1730_v24, %v13283_v33 }
 0x134   : > { %4450 = vrot.lane.b32.xlu0 %v4371_v42, %s12183_s18  ;;  %v745_v42 = vld [vmem:[%s12419_s28 + $0xb4] sm:$0xf]  ;;  %v4601_v54 = vsel %vm4581_vm11, %v4514_v20, %v13173_v63  ;;  %v947_v26 = vrot.slane %v946_v11, 4  ;;  %1158 = vst.msk [vmem:[#allocation2 + $0x15c] sm:$0xe] %vm1088_vm7, %v946_v11  ;;  %v10548_v35 = vcombine.low %v1285_v60, %v13323_v28 }
 0x135   : > { %v13279_v22 = vpop.permute.xlu1 %3510  ;;  %v943_v2 = vrot.slane %v745_v42, 7  ;;  %v942_v45 = vrot.slane %v941_v51, 4  ;;  %1155 = vst.msk [vmem:[#allocation2 + $0x150] sm:$0xe] %vm1088_vm7, %v941_v51  ;;  %v4666_v63 = vsel %vm4646_vm12, %v4601_v54, %v13196_v6  ;;  %v4372_v14 = vrot.slane %v10928_v56, 2 }
 0x136   : > { %v3509_v25 = vpop.permute.xlu0 %3508  ;;  %v4730_v12 = vsel %vm598_vm13, %v4666_v63, %v13272_v30  ;;  %v949_v6 = vsel %vm12431_vm8, %v947_v26, %v948_v27  ;;  %v10816_v30 = vcombine.low %v1602_v62, %v13283_v33  ;;  %v2169_v33 = vrot.slane %v10548_v35, 1  ;;  %v1349_v20 = vld [vmem:[#allocation2 + $0x108] sm:$0xc]  ;;  %v11759_v51 = vld [vmem:[#allocation2 + $0x11c] ss:$0 sps:$4 sm:$0x33]  }
 0x137   : > { %2598 = vrot.lane.b32.xlu1 %v2521_v36, %s12176_s29  ;;  %v4793_v17 = vsel %vm4775_vm14, %v4728_v61, %v3509_v25  ;;  %v4023_v36 = vrot.slane %v10866_v44, 1  ;;  %v4795_v39 = vsel %vm4775_vm14, %v4730_v12, %v13279_v22  ;;  %1159 = vst.msk [vmem:[#allocation2 + $0x160] sm:$0xf] %vm17173_vm9, %v949_v6  ;;  %v11753_v44 = vld [vmem:[#allocation2 + $0x134] ss:$0 sps:$4 sm:$0x33]   ;;  %v10612_v61 = vcombine.low %v1349_v20, %v13323_v28  ;;  %vm17174_vm9 = vmmov %vm17172_vm0 }
 0x138   : > { %2596 = vrot.lane.b32.xlu0 %v2518_v1, %s12176_s29  ;;  %v945_v1 = vrot.slane %v943_v2, 4  ;;  %v4376_v4 = vrot.slane %v11753_v44, 2  ;;  %v11757_v11 = vld [vmem:[#allocation2 + $0x110] ss:$0 sps:$4 sm:$0x33]  }
 0x139   : > { %v13286_v47 = vpop.permute.xlu1 %3734  ;;  %v1477_v62 = vld [vmem:[#allocation2 + $0x120] sm:$0xe]  ;;  %v1479_v60 = vld [vmem:[#allocation2 + $0x12c] sm:$0xe]  ;;  %v2522_v27 = vrot.slane %v10612_v61, 2  ;;  %v2523_v63 = vrot.slane %v11757_v11, 2 }
 0x13a   : > { %v3733_v34 = vpop.permute.xlu0 %3732  ;;  %1157 = vst.msk [vmem:[#allocation2 + $0x158] sm:$0x1] %vm447_vm2, %v945_v1  ;;  %v4860_v22 = vsel %vm17103_vm15, %v4795_v39, %v13286_v47  ;;  %v4025_v47 = vsel %vm17097_vm4, %v4023_v36, %v4024_v9  ;;  %v1416_v36 = vld [vmem:[#allocation2 + $0x130] sm:$0xf]  ;;  %v1541_v12 = vld [vmem:[#allocation2 + $0x120] sm:$0xc] }
 0x13b   : > { %2822 = vrot.lane.b32.xlu1 %v10657_v55, %s12178_s13  ;;  %v4858_v58 = vsel %vm17103_vm15, %v4793_v17, %v3733_v34  ;;  %v944_v55 = vsel %vm12431_vm8, %v942_v45, %v943_v2  ;;  %v11750_v34 = vld [vmem:[#allocation2 + $0x128] ss:$0 sps:$4 sm:$0x33]   ;;  %v13386_v17 = vld [vmem:[#allocation2 + $0x124] sm:$0xf]  ;;  %v2526_v45 = vrot.slane %v11759_v51, 2  ;;  %v10710_v24 = vcombine.low %v1479_v60, %v1416_v36 }
 0x13c   : > { %2820 = vrot.lane.b32.xlu0 %v10656_v29, %s12178_s13  ;;  %v11752_v29 = vld [vmem:[#allocation2 + $0x110] ss:$0 sps:$4 sm:$0x11]   ;;  %1156 = vst.msk [vmem:[#allocation2 + $0x154] sm:$0xf] %vm17172_vm0, %v944_v55  ;;  %v4373_v16 = vrot.slane %v11750_v34, 2  ;;  %v2524_v35 = vsel %vm2467_vm3, %v2522_v27, %v2523_v63  ;;  %v10772_v37 = vcombine.low %v1541_v12, %v13386_v17 }
 0x13d   : > { %v13301_v59 = vpop.permute.xlu1 %4086  ;;  %v1415_v6 = vld [vmem:[#allocation2 + $0x12c] sm:$0xf]  ;;  %v13400_v39 = vld [vmem:[#allocation2 + $0x84] sm:$0xf]  ;;  %v3101_v56 = vrot.slane %v10710_v24, 1  ;;  %v3102_v34 = vrot.slane %v11765_v52, 1 }
 0x13e   : > { %v4085_v21 = vpop.permute.xlu0 %4084  ;;  %v4925_v48 = vsel %vm4905_vm1, %v4860_v22, %v13301_v59  ;;  %v4022_v59 = vsel %vm17097_vm4, %v13315_v7, %v4021_v18  ;;  %v4374_v2 = vsel %vm2467_vm3, %v4372_v14, %v4373_v16  ;;  %v12137_v44 = vld [vmem:[#allocation2 + $0x7c] sm:$0xf]  ;;  %v750_v20 = vld [vmem:[%s12419_s28 + $0xc8] sm:$0xf]  ;;  %v751_v61 = vld [vmem:[%s12419_s28 + $0xcc] sm:$0xf] }
 0x13f   : > { %3174 = vrot.lane.b32.xlu1 %v3097_v5, %s12180_s15  ;;  %v4923_v25 = vsel %vm4905_vm1, %v4858_v58, %v4085_v21  ;;  %v10930_v5 = vcombine.low %v1732_v40, %v13288_v3  ;;  %v1351_v3 = vld [vmem:[#allocation2 + $0x114] sm:$0xc]  ;;  %v1413_v40 = vld [vmem:[#allocation2 + $0x120] sm:$0xf]  ;;  %v13433_v63 = vld [vmem:[#allocation2 + $0x148] sm:$0xf] }
 0x140   : > { %3172 = vrot.lane.b32.xlu0 %v3094_v46, %s12180_s15  ;;  %v2170_v46 = vrot.slane %v11752_v29, 1  ;;  %v10614_v19 = vcombine.low %v1351_v3, %v1224_v41  ;;  %v1205_v29 = vld [vmem:[#allocation2 + $0x78] sm:$0xf]  ;;  %v12138_v3 = vld [vmem:[#allocation2 + $0x88] sm:$0xf] }
 0x141   : > { %v13331_v10 = vpop.permute.xlu1 %2231  ;;  %v4375_v21 = vrot.slane %v10930_v5, 2  ;;  %v11769_v5 = vld [vmem:[#allocation2 + $0x134] ss:$0 sps:$4 sm:$0x33]  }
 0x142   : > { %v4437_v53 = vpop.permute.xlu0 %4436  ;;  %v2171_v42 = vsel %vm17097_vm4, %v2169_v33, %v2170_v46  ;;  %v2525_v58 = vrot.slane %v10614_v19, 2  ;;  %v748_v33 = vld [vmem:[%s12419_s28 + $0xc0] sm:$0xf]  ;;  %v749_v46 = vld [vmem:[%s12419_s28 + $0xc4] sm:$0xf]  ;;  %v956_v19 = vrot.slane %v750_v20, 7 }
 0x143   : > { %v4988_v57 = vsel %vm17099_vm5, %v4923_v25, %v4437_v53  ;;  %3526 = vrot.lane.b32.xlu1 %v3449_v15, %s12181_s16  ;;  %v4377_v1 = vsel %vm2467_vm3, %v4375_v21, %v4376_v4  ;;  %v10708_v25 = vcombine.low %v1477_v62, %v13386_v17  ;;  %v11763_v53 = vld [vmem:[#allocation2 + $0x128] ss:$0 sps:$4 sm:$0x11]   ;;  %v951_v14 = vrot.slane %v748_v33, 7  ;;  %v1670_v4 = vld [vmem:[#allocation2 + $0x138] sm:$0xe] }
 0x144   : > { %3524 = vrot.lane.b32.xlu0 %v3446_v8, %s12181_s16  ;;  %11335 = vmatprep.mubr.msk.bf16.mxu0 %vm17098_vm6, %v4988_v57  ;;  %v11755_v8 = vld [vmem:[#allocation2 + $0x11c] ss:$0 sps:$4 sm:$0x11]   ;;  %v1543_v57 = vld [vmem:[#allocation2 + $0x12c] sm:$0xc]  ;;  %v2527_v55 = vsel %vm2467_vm3, %v2525_v58, %v2526_v45  ;;  %v3099_v18 = vrot.slane %v11763_v53, 1  ;;  %v10491_v21 = vcombine.low %v13400_v39, %v12138_v3 }
 0x145   : > { %v13359_v38 = vpop.permute.xlu1 %2233  ;;  %v2173_v23 = vrot.slane %v11755_v8, 1  ;;  %v3098_v41 = vrot.slane %v10708_v25, 1  ;;  %v953_v16 = vrot.slane %v749_v46, 7  ;;  %v952_v11 = vrot.slane %v951_v14, 4  ;;  %1161 = vst.msk [vmem:[#allocation2 + $0x168] sm:$0xe] %vm1088_vm7, %v951_v14 }
 0x146   : > { %v4439_v50 = vpop.permute.xlu0 %4438  ;;  %v957_v60 = vrot.slane %v956_v19, 4  ;;  %1164 = vst.msk [vmem:[#allocation2 + $0x174] sm:$0xe] %vm1088_vm7, %v956_v19  ;;  %v1672_v25 = vld [vmem:[#allocation2 + $0x144] sm:$0xe] }
 0x147   : > { %v4990_v32 = vsel %vm17099_vm5, %v4925_v48, %v4439_v50  ;;  %3750 = vrot.lane.b32.xlu1 %v10817_v43, %s12179_s14  ;;  %v2172_v43 = vrot.slane %v10550_v13, 1  ;;  %v10774_v48 = vcombine.low %v1543_v57, %v1416_v36  ;;  %v10659_v50 = vcombine.low %v1415_v6, %v1416_v36  ;;  %v11772_v57 = vld [vmem:[#allocation2 + $0x140] ss:$0 sps:$4 sm:$0x11]   ;;  %v13447_v6 = vld [vmem:[#allocation2 + $0x124] sm:$0xf] }
 0x148   : > { %3748 = vrot.lane.b32.xlu0 %v10816_v30, %s12179_s14  ;;  %11336 = vmatmul.mubr.msk.bf16.gmra.mxu0 %vm17098_vm6, %v4990_v32  ;;  %v13409_v32 = vld [vmem:[#allocation2 + $0x128] ss:$0 sps:$4 sm:$0x33]   ;;  %v10490_v13 = vcombine.low %v1205_v29, %v12137_v44  ;;  %v3100_v51 = vsel %vm17097_vm4, %v3098_v41, %v3099_v18  ;;  %v3454_v36 = vrot.slane %v11769_v5, 2  ;;  %v1289_v41 = vld [vmem:[#allocation2 + $0x120] sm:$0xe] }
 0x149   : > { %v13371_v15 = vpop.permute.xlu1 %2586  ;;  %v2174_v28 = vsel %vm17097_vm4, %v2172_v43, %v2173_v23  ;;  %v13419_v23 = vld [vmem:[#allocation2 + $0x13c] sm:$0xf]  ;;  %v3451_v45 = vrot.slane %v13409_v32, 2  ;;  %v1734_v5 = vld [vmem:[#allocation2 + $0x138] sm:$0xc]  ;;  %v10552_v33 = vcombine.low %v1289_v41, %v13447_v6 }
 0x14a   : > { %v13375_v49 = vpop.permute.xlu0 %2584  ;;  %v4517_v62 = vsel %vm4484_vm10, %v10490_v13, %v13331_v10  ;;  %v954_v10 = vsel %vm12431_vm8, %v952_v11, %v953_v16  ;;  %v10868_v12 = vcombine.low %v1670_v4, %v13419_v23  ;;  %v1481_v41 = vld [vmem:[#allocation2 + $0x138] sm:$0xe] }
 0x14b   : > { %4102 = vrot.lane.b32.xlu1 %v4025_v47, %s12182_s17  ;;  %v10658_v47 = vcombine.low %v1413_v40, %v13386_v17  ;;  %v958_v17 = vrot.slane %v751_v61, 7  ;;  %v4603_v27 = vsel %vm4581_vm11, %v4517_v62, %v13375_v49  ;;  %1162 = vst.msk [vmem:[#allocation2 + $0x16c] sm:$0xf] %vm17172_vm0, %v954_v10  ;;  %v11773_v40 = vld [vmem:[#allocation2 + $0x14c] ss:$0 sps:$4 sm:$0x11]  }
 0x14c   : > { %4100 = vrot.lane.b32.xlu0 %v4022_v59, %s12182_s17  ;;  %v3450_v59 = vrot.slane %v10772_v37, 2  ;;  %v4026_v32 = vrot.slane %v10868_v12, 1 }
 0x14d   : > { %v13381_v7 = vpop.permute.xlu1 %2810  ;;  %v960_v53 = vrot.slane %v958_v17, 4  ;;  %v959_v49 = vsel %vm12431_vm8, %v957_v60, %v958_v17  ;;  %v1355_v17 = vld [vmem:[#allocation2 + $0x12c] sm:$0xc] }
 0x14e   : > { %v13384_v54 = vpop.permute.xlu0 %2808  ;;  %1165 = vst.msk [vmem:[#allocation2 + $0x178] sm:$0xf] %vm17174_vm9, %v959_v49  ;;  %vm17175_vm9 = vmmov %vm17172_vm0 }
 0x14f   : > { %2247 = vrot.lane.b32.xlu1 %v2171_v42, %s12177_s30  ;;  %v3453_v42 = vrot.slane %v10774_v48, 2  ;;  %v4668_v24 = vsel %vm4646_vm12, %v4603_v27, %v13384_v54  ;;  %1166 = vst.msk [vmem:[#allocation2 + $0x17c] sm:$0x1] %vm447_vm2, %v960_v53  ;;  %v4520_v54 = vsel %vm4484_vm10, %v10491_v21, %v13359_v38  ;;  %v3452_v38 = vsel %vm2467_vm3, %v3450_v59, %v3451_v45  ;;  %v11777_v27 = vld [vmem:[#allocation2 + $0x14c] ss:$0 sps:$4 sm:$0x33]  }
 0x150   : > { %4452 = vrot.lane.b32.xlu0 %v4374_v2, %s12183_s18  ;;  %v3103_v2 = vsel %vm17097_vm4, %v3101_v56, %v3102_v34  ;;  %v4605_v37 = vsel %vm4581_vm11, %v4520_v54, %v13371_v15  ;;  %v4027_v59 = vrot.slane %v11772_v57, 1  ;;  %v10932_v21 = vcombine.low %v1734_v5, %v13419_v23  ;;  %v1353_v45 = vld [vmem:[#allocation2 + $0x120] sm:$0xc]  ;;  %v1419_v5 = vld [vmem:[#allocation2 + $0x144] sm:$0xf] }
 0x151   : > { %v13391_v26 = vpop.permute.xlu1 %3162  ;;  %v10616_v49 = vcombine.low %v1353_v45, %v13447_v6  ;;  %v1209_v6 = vld [vmem:[#allocation2 + $0x90] sm:$0xf]  ;;  %v11793_v45 = vld [vmem:[#allocation2 + $0x14c] ss:$0 sps:$4 sm:$0x33]  }
 0x152   : > { %v13395_v9 = vpop.permute.xlu0 %3160  ;;  %v4378_v60 = vrot.slane %v10932_v21, 2 }
 0x153   : > { %2249 = vrot.lane.b32.xlu1 %v2174_v28, %s12177_s30  ;;  %v955_v28 = vrot.slane %v953_v16, 4  ;;  %v4732_v29 = vsel %vm598_vm13, %v4668_v24, %v13395_v9  ;;  %v10870_v9 = vcombine.low %v1672_v25, %v13433_v63  ;;  %v1228_v16 = vld [vmem:[#allocation2 + $0x130] sm:$0xf]  ;;  %v11783_v25 = vld [vmem:[#allocation2 + $0x134] ss:$0 sps:$4 sm:$0x33]  }
 0x154   : > { %4454 = vrot.lane.b32.xlu0 %v4377_v1, %s12183_s18  ;;  %v1606_v1 = vld [vmem:[#allocation2 + $0x138] sm:$0xf] }
 0x155   : > { %v13402_v30 = vpop.permute.xlu1 %3514  ;;  %1163 = vst.msk [vmem:[#allocation2 + $0x170] sm:$0x1] %vm447_vm2, %v955_v28  ;;  %v4029_v14 = vrot.slane %v10870_v9, 1  ;;  %v13507_v9 = vld [vmem:[#allocation2 + $0x148] sm:$0xf] }
 0x156   : > { %v13406_v22 = vpop.permute.xlu0 %3512  ;;  %v11837_v31 = vld [vmem:[#allocation2 + $0x17c] ss:$0 sps:$4 sm:$0x11]  }
 0x157   : > { %2602 = vrot.lane.b32.xlu1 %v2527_v55, %s12176_s29  ;;  %v1608_v55 = vld [vmem:[#allocation2 + $0x144] sm:$0xf]  ;;  %v4797_v39 = vsel %vm4775_vm14, %v4732_v29, %v13406_v22  ;;  %v4670_v22 = vsel %vm4646_vm12, %v4605_v37, %v13381_v7  ;;  %v11776_v7 = vld [vmem:[#allocation2 + $0x128] ss:$0 sps:$4 sm:$0x11]  }
 0x158   : > { %2600 = vrot.lane.b32.xlu0 %v2524_v35, %s12176_s29  ;;  %v3455_v35 = vsel %vm2467_vm3, %v3453_v42, %v3454_v36  ;;  %v4734_v44 = vsel %vm598_vm13, %v4670_v22, %v13391_v26  ;;  %v10819_v13 = vcombine.low %v1608_v55, %v13433_v63  ;;  %v4030_v26 = vrot.slane %v11773_v40, 1  ;;  %v11781_v29 = vld [vmem:[#allocation2 + $0x128] ss:$0 sps:$4 sm:$0x33]   ;;  %v1483_v37 = vld [vmem:[#allocation2 + $0x144] sm:$0xe] }
 0x159   : > { %v13415_v8 = vpop.permute.xlu1 %3738  ;;  %v4799_v46 = vsel %vm4775_vm14, %v4734_v44, %v13402_v30  ;;  %v1736_v30 = vld [vmem:[#allocation2 + $0x144] sm:$0xc]  ;;  %v2176_v4 = vrot.slane %v11776_v7, 1  ;;  %v4028_v36 = vsel %vm17097_vm4, %v4026_v32, %v4027_v59  ;;  %v2528_v22 = vrot.slane %v10616_v49, 2  ;;  %v12140_v49 = vld [vmem:[#allocation2 + $0xa0] sm:$0xf] }
 0x15a   : > { %v3737_v43 = vpop.permute.xlu0 %3736  ;;  %v4864_v20 = vsel %vm17103_vm15, %v4799_v46, %v13415_v8  ;;  %v4031_v8 = vsel %vm17097_vm4, %v4029_v14, %v4030_v26  ;;  %v10934_v28 = vcombine.low %v1736_v30, %v13433_v63  ;;  %v4382_v63 = vrot.slane %v11777_v27, 2  ;;  %v11789_v32 = vld [vmem:[#allocation2 + $0x14c] ss:$0 sps:$4 sm:$0x11]   ;;  %v754_v14 = vld [vmem:[%s12419_s28 + $0xd8] sm:$0xf] }
 0x15b   : > { %2826 = vrot.lane.b32.xlu1 %v10659_v50, %s12178_s13  ;;  %v4862_v18 = vsel %vm17103_vm15, %v4797_v39, %v3737_v43  ;;  %v10818_v50 = vcombine.low %v1606_v1, %v13419_v23  ;;  %v1291_v43 = vld [vmem:[#allocation2 + $0x12c] sm:$0xe]  ;;  %v11779_v23 = vld [vmem:[#allocation2 + $0x134] ss:$0 sps:$4 sm:$0x11]   ;;  %v10618_v1 = vcombine.low %v1355_v17, %v1228_v16  ;;  %v2532_v39 = vrot.slane %v11783_v25, 2 }
 0x15c   : > { %2824 = vrot.lane.b32.xlu0 %v10658_v47, %s12178_s13  ;;  %v11774_v47 = vld [vmem:[#allocation2 + $0x140] ss:$0 sps:$4 sm:$0x33]   ;;  %v10554_v11 = vcombine.low %v1291_v43, %v1228_v16  ;;  %v2179_v24 = vrot.slane %v11779_v23, 1  ;;  %v4381_v57 = vrot.slane %v10934_v28, 2  ;;  %v3108_v28 = vrot.slane %v11789_v32, 1 }
 0x15d   : > { %v4091_v58 = vpop.permute.xlu1 %4090  ;;  %v2531_v54 = vrot.slane %v10618_v1, 2  ;;  %v12139_v26 = vld [vmem:[#allocation2 + $0x94] sm:$0xf]  ;;  %v1547_v43 = vld [vmem:[#allocation2 + $0x144] sm:$0xc] }
 0x15e   : > { %v4089_v52 = vpop.permute.xlu0 %4088  ;;  %v4929_v42 = vsel %vm4905_vm1, %v4864_v20, %v4091_v58  ;;  %v2178_v53 = vrot.slane %v10554_v11, 1  ;;  %v10492_v16 = vcombine.low %v1209_v6, %v12139_v26  ;;  %v1211_v11 = vld [vmem:[#allocation2 + $0x9c] sm:$0xf]  ;;  %v10778_v27 = vcombine.low %v1547_v43, %v13507_v9  ;;  %v13558_v32 = vld [vmem:[#allocation2 + $0x154] sm:$0xf] }
 0x15f   : > { %3178 = vrot.lane.b32.xlu1 %v3103_v2, %s12180_s15  ;;  %v4927_v34 = vsel %vm4905_vm1, %v4862_v18, %v4089_v52  ;;  %v2175_v2 = vrot.slane %v10552_v33, 1  ;;  %v753_v33 = vld [vmem:[%s12419_s28 + $0xd4] sm:$0xf]  ;;  %v2533_v7 = vsel %vm2467_vm3, %v2531_v54, %v2532_v39 }
 0x160   : > { %3176 = vrot.lane.b32.xlu0 %v3100_v51, %s12180_s15  ;;  %v4379_v51 = vrot.slane %v11774_v47, 2  ;;  %v2180_v40 = vsel %vm17097_vm4, %v2178_v53, %v2179_v24  ;;  %v752_v47 = vld [vmem:[%s12419_s28 + $0xd0] sm:$0xf]  ;;  %v963_v59 = vrot.slane %v753_v33, 7 }
 0x161   : > { %v13461_v56 = vpop.permute.xlu1 %2235  ;;  %v2177_v10 = vsel %vm17097_vm4, %v2175_v2, %v2176_v4  ;;  %v961_v46 = vrot.slane %v752_v47, 7  ;;  %v1545_v2 = vld [vmem:[#allocation2 + $0x138] sm:$0xc] }
 0x162   : > { %v4441_v48 = vpop.permute.xlu0 %4440  ;;  %v4380_v12 = vsel %vm2467_vm3, %v4378_v60, %v4379_v51  ;;  %v10661_v51 = vcombine.low %v1419_v5, %v13507_v9  ;;  %v965_v60 = vrot.slane %v963_v59, 4  ;;  %v4523_v54 = vsel %vm4484_vm10, %v10492_v16, %v13461_v56  ;;  %v1674_v5 = vld [vmem:[#allocation2 + $0x150] sm:$0xe] }
 0x163   : > { %v4992_v15 = vsel %vm17099_vm5, %v4927_v34, %v4441_v48  ;;  %3530 = vrot.lane.b32.xlu1 %v3455_v35, %s12181_s16  ;;  %v13505_v35 = vld [vmem:[#allocation2 + $0x13c] sm:$0xf]  ;;  %v2529_v34 = vrot.slane %v11781_v29, 2  ;;  %1167 = vst.msk [vmem:[#allocation2 + $0x180] sm:$0xe] %vm1088_vm7, %v961_v46  ;;  %v10493_v29 = vcombine.low %v1211_v11, %v12140_v49 }
 0x164   : > { %3528 = vrot.lane.b32.xlu0 %v3452_v38, %s12181_s16  ;;  %11339 = vmatprep.mubr.msk.bf16.mxu0 %vm17098_vm6, %v4992_v15  ;;  %v4383_v38 = vsel %vm2467_vm3, %v4381_v57, %v4382_v63  ;;  %v10712_v44 = vcombine.low %v1481_v41, %v13505_v35  ;;  %v11787_v15 = vld [vmem:[#allocation2 + $0x140] ss:$0 sps:$4 sm:$0x11]   ;;  %v10776_v24 = vcombine.low %v1545_v2, %v13505_v35  ;;  %v1610_v16 = vld [vmem:[#allocation2 + $0x150] sm:$0xf] }
 0x165   : > { %v13480_v3 = vpop.permute.xlu1 %2237  ;;  %v2530_v21 = vsel %vm2467_vm3, %v2528_v22, %v2529_v34  ;;  %v3105_v53 = vrot.slane %v11787_v15, 1  ;;  %1169 = vst.msk [vmem:[#allocation2 + $0x188] sm:$0x1] %vm447_vm2, %v965_v60  ;;  %v13554_v22 = vld [vmem:[#allocation2 + $0x160] sm:$0xf] }
 0x166   : > { %v4443_v61 = vpop.permute.xlu0 %4442  ;;  %v3104_v23 = vrot.slane %v10712_v44, 1  ;;  %v3456_v6 = vrot.slane %v10776_v24, 2  ;;  %v1676_v34 = vld [vmem:[#allocation2 + $0x15c] sm:$0xe]  ;;  %v4526_v47 = vsel %vm4484_vm10, %v10493_v29, %v13480_v3  ;;  %v10872_v3 = vcombine.low %v1674_v5, %v13558_v32  ;;  %v1295_v11 = vld [vmem:[#allocation2 + $0x144] sm:$0xe] }
 0x167   : > { %v4994_v19 = vsel %vm17099_vm5, %v4929_v42, %v4443_v61  ;;  %3754 = vrot.lane.b32.xlu1 %v10819_v13, %s12179_s14  ;;  %v10714_v13 = vcombine.low %v1483_v37, %v13507_v9  ;;  %v755_v42 = vld [vmem:[%s12419_s28 + $0xdc] sm:$0xf]  ;;  %v966_v61 = vrot.slane %v754_v14, 7  ;;  %v3460_v9 = vrot.slane %v11793_v45, 2  ;;  %v1357_v49 = vld [vmem:[#allocation2 + $0x138] sm:$0xc] }
 0x168   : > { %3752 = vrot.lane.b32.xlu0 %v10818_v50, %s12179_s14  ;;  %11340 = vmatmul.mubr.msk.bf16.gmra.mxu0 %vm17098_vm6, %v4994_v19  ;;  %v1417_v50 = vld [vmem:[#allocation2 + $0x138] sm:$0xf]  ;;  %v968_v4 = vrot.slane %v755_v42, 7  ;;  %v3106_v37 = vsel %vm17097_vm4, %v3104_v23, %v3105_v53  ;;  %v13560_v44 = vld [vmem:[#allocation2 + $0x13c] sm:$0xf]  ;;  %v10820_v23 = vcombine.low %v1610_v16, %v13558_v32 }
 0x169   : > { %v13489_v62 = vpop.permute.xlu1 %2590  ;;  %v10660_v19 = vcombine.low %v1417_v50, %v13505_v35  ;;  %v3107_v17 = vrot.slane %v10714_v13, 1  ;;  %1170 = vst.msk [vmem:[#allocation2 + $0x18c] sm:$0xe] %vm1088_vm7, %v966_v61  ;;  %v3459_v35 = vrot.slane %v10778_v27, 2  ;;  %v1293_v13 = vld [vmem:[#allocation2 + $0x138] sm:$0xe]  ;;  %v10620_v5 = vcombine.low %v1357_v49, %v13560_v44 }
 0x16a   : > { %v13493_v58 = vpop.permute.xlu0 %2588  ;;  %v970_v25 = vrot.slane %v968_v4, 4  ;;  %v11797_v15 = vld [vmem:[#allocation2 + $0x164] ss:$0 sps:$4 sm:$0x11]   ;;  %v1740_v60 = vld [vmem:[#allocation2 + $0x15c] sm:$0xc] }
 0x16b   : > { %4106 = vrot.lane.b32.xlu1 %v4031_v8, %s12182_s17  ;;  %v962_v8 = vrot.slane %v961_v46, 4  ;;  %v3109_v39 = vsel %vm17097_vm4, %v3107_v17, %v3108_v28  ;;  %v10874_v46 = vcombine.low %v1676_v34, %v13554_v22  ;;  %v1359_v29 = vld [vmem:[#allocation2 + $0x144] sm:$0xc]  ;;  %v1485_v49 = vld [vmem:[#allocation2 + $0x150] sm:$0xe] }
 0x16c   : > { %4104 = vrot.lane.b32.xlu0 %v4028_v36, %s12182_s17  ;;  %v967_v36 = vrot.slane %v966_v61, 4  ;;  %1172 = vst.msk [vmem:[#allocation2 + $0x194] sm:$0x1] %vm447_vm2, %v970_v25  ;;  %v11798_v25 = vld [vmem:[#allocation2 + $0x158] ss:$0 sps:$4 sm:$0x33]  }
 0x16d   : > { %v13498_v52 = vpop.permute.xlu1 %2814  ;;  %v964_v1 = vsel %vm12431_vm8, %v962_v8, %v963_v59  ;;  %v4609_v59 = vsel %vm4581_vm11, %v4526_v47, %v13489_v62  ;;  %v10556_v8 = vcombine.low %v1293_v13, %v13560_v44  ;;  %v4035_v17 = vrot.slane %v10874_v46, 1 }
 0x16e   : > { %v13502_v55 = vpop.permute.xlu0 %2812  ;;  %1168 = vst.msk [vmem:[#allocation2 + $0x184] sm:$0xf] %vm17172_vm0, %v964_v1  ;;  %v969_v57 = vsel %vm12431_vm8, %v967_v36, %v968_v4  ;;  %v4674_v43 = vsel %vm4646_vm12, %v4609_v59, %v13498_v52  ;;  %v13587_v4 = vld [vmem:[#allocation2 + $0x148] sm:$0xf]  ;;  %v4036_v36 = vrot.slane %v11797_v15, 1  ;;  %vm17096_vm0 = vcmask 392192  }
 0x16f   : > { %2251 = vrot.lane.b32.xlu1 %v2177_v10, %s12177_s30  ;;  %1171 = vst.msk [vmem:[#allocation2 + $0x190] sm:$0xf] %vm17175_vm9, %v969_v57  ;;  %v11803_v57 = vld [vmem:[#allocation2 + $0x14c] ss:$0 sps:$4 sm:$0x11]   ;;  %v10622_v15 = vcombine.low %v1359_v29, %v13587_v4 }
 0x170   : > { %4456 = vrot.lane.b32.xlu0 %v4380_v12, %s12183_s18  ;;  %v11791_v12 = vld [vmem:[#allocation2 + $0x140] ss:$0 sps:$4 sm:$0x33]   ;;  %v11807_v59 = vld [vmem:[#allocation2 + $0x14c] ss:$0 sps:$4 sm:$0x33]  }
 0x171   : > { %v13511_v18 = vpop.permute.xlu1 %3166 }
 0x172   : > { %v13514_v48 = vpop.permute.xlu0 %3164  ;;  %v4738_v62 = vsel %vm598_vm13, %v4674_v43, %v13511_v18  ;;  %v13596_v18 = vld [vmem:[%s17081_s2] ss:$0 sm:$0xff] }
 0x173   : > { %2253 = vrot.lane.b32.xlu1 %v2180_v40, %s12177_s30  ;;  %v4607_v40 = vsel %vm4581_vm11, %v4523_v54, %v13493_v58 }
 0x174   : > { %4458 = vrot.lane.b32.xlu0 %v4383_v38, %s12183_s18  ;;  %v3457_v38 = vrot.slane %v11791_v12, 2  ;;  %v4672_v56 = vsel %vm4646_vm12, %v4607_v40, %v13502_v55  ;;  %v3461_v55 = vsel %vm2467_vm3, %v3459_v35, %v3460_v9  ;;  %v13608_v12 = vld [vmem:[%s17082_s3] ss:$0 sm:$0xff]  ;;  %v2181_v35 = vrot.slane %v10556_v8, 1 }
 0x175   : > { %v13524_v20 = vpop.permute.xlu1 %3518  ;;  %v4736_v58 = vsel %vm598_vm13, %v4672_v56, %v13514_v48  ;;  %v10938_v40 = vcombine.low %v1740_v60, %v13554_v22  ;;  %v4385_v56 = vrot.slane %v11798_v25, 2  ;;  %v758_v60 = vld [vmem:[%s12419_s28 + $0xe8] sm:$0xf] }
 0x176   : > { %v3517_v30 = vpop.permute.xlu0 %3516  ;;  %v3458_v26 = vsel %vm2467_vm3, %v3456_v6, %v3457_v38  ;;  %v4803_v52 = vsel %vm4775_vm14, %v4738_v62, %v13524_v20  ;;  %v4032_v20 = vrot.slane %v10872_v3, 1  ;;  %v13638_v62 = vld [vmem:[#allocation2 + $0x160] sm:$0xf] }
 0x177   : > { %2606 = vrot.lane.b32.xlu1 %v2533_v7, %s12176_s29  ;;  %v4801_v33 = vsel %vm4775_vm14, %v4736_v58, %v3517_v30  ;;  %v1612_v7 = vld [vmem:[#allocation2 + $0x15c] sm:$0xf]  ;;  %v1738_v30 = vld [vmem:[#allocation2 + $0x150] sm:$0xc]  ;;  %v4387_v46 = vrot.slane %v10938_v40, 2 }
 0x178   : > { %2604 = vrot.lane.b32.xlu0 %v2530_v21, %s12176_s29  ;;  %v11796_v21 = vld [vmem:[#allocation2 + $0x158] ss:$0 sps:$4 sm:$0x11]   ;;  %v10821_v2 = vcombine.low %v1612_v7, %v13554_v22  ;;  %v10936_v1 = vcombine.low %v1738_v30, %v13558_v32  ;;  %v11805_v58 = vld [vmem:[#allocation2 + $0x140] ss:$0 sps:$4 sm:$0x33]  }
 0x179   : > { %v13537_v10 = vpop.permute.xlu1 %3742  ;;  %v4033_v45 = vrot.slane %v11796_v21, 1  ;;  %v756_v21 = vld [vmem:[%s12419_s28 + $0xe0] sm:$0xf]  ;;  %v2535_v30 = vrot.slane %v11805_v58, 2 }
 0x17a   : > { %v3741_v63 = vpop.permute.xlu0 %3740  ;;  %v4868_v28 = vsel %vm17103_vm15, %v4803_v52, %v13537_v10  ;;  %v10558_v10 = vcombine.low %v1295_v11, %v13587_v4  ;;  %v4384_v34 = vrot.slane %v10936_v1, 2  ;;  %v1487_v11 = vld [vmem:[#allocation2 + $0x15c] sm:$0xe]  ;;  %v757_v52 = vld [vmem:[%s12419_s28 + $0xe4] sm:$0xf] }
 0x17b   : > { %2830 = vrot.lane.b32.xlu1 %v10661_v51, %s12178_s13  ;;  %v4866_v48 = vsel %vm17103_vm15, %v4801_v33, %v3741_v63  ;;  %v4034_v38 = vsel %vm17097_vm4, %v4032_v20, %v4033_v45  ;;  %v2185_v33 = vrot.slane %v11803_v57, 1  ;;  %v759_v57 = vld [vmem:[%s12419_s28 + $0xec] sm:$0xf]  ;;  %v10718_v29 = vcombine.low %v1487_v11, %v13638_v62  ;;  %v11817_v11 = vld [vmem:[#allocation2 + $0x164] ss:$0 sps:$4 sm:$0x33]  }
 0x17c   : > { %2828 = vrot.lane.b32.xlu0 %v10660_v19, %s12178_s13  ;;  %v11800_v19 = vld [vmem:[#allocation2 + $0x140] ss:$0 sps:$4 sm:$0x11]   ;;  %v2184_v47 = vrot.slane %v10558_v10, 1  ;;  %v4386_v16 = vsel %vm2467_vm3, %v4384_v34, %v4385_v56  ;;  %v976_v34 = vrot.slane %v758_v60, 7  ;;  %v978_v58 = vrot.slane %v759_v57, 7 }
 0x17d   : > { %v4095_v41 = vpop.permute.xlu1 %4094  ;;  %v2182_v9 = vrot.slane %v11800_v19, 1  ;;  %v2537_v19 = vrot.slane %v10622_v15, 2 }
 0x17e   : > { %v4093_v50 = vpop.permute.xlu0 %4092  ;;  %v4933_v53 = vsel %vm4905_vm1, %v4868_v28, %v4095_v41  ;;  %v11801_v41 = vld [vmem:[#allocation2 + $0x164] ss:$0 sps:$4 sm:$0x33]   ;;  %1176 = vst.msk [vmem:[#allocation2 + $0x1a4] sm:$0xe] %vm1088_vm7, %v976_v34 }
 0x17f   : > { %3182 = vrot.lane.b32.xlu1 %v3109_v39, %s12180_s15  ;;  %v4931_v42 = vsel %vm4905_vm1, %v4866_v48, %v4093_v50  ;;  %v4037_v39 = vsel %vm17097_vm4, %v4035_v17, %v4036_v36  ;;  %v2183_v7 = vsel %vm17097_vm4, %v2181_v35, %v2182_v9  ;;  %v4388_v3 = vrot.slane %v11801_v41, 2  ;;  %v1213_v35 = vld [vmem:[#allocation2 + $0xa8] sm:$0xf] }
 0x180   : > { %3180 = vrot.lane.b32.xlu0 %v3106_v37, %s12180_s15  ;;  %v2538_v17 = vrot.slane %v11807_v59, 2  ;;  %v971_v36 = vrot.slane %v756_v21, 7  ;;  %v3113_v21 = vrot.slane %v10718_v29, 1  ;;  %v1297_v29 = vld [vmem:[#allocation2 + $0x150] sm:$0xe] }
 0x181   : > { %v13574_v14 = vpop.permute.xlu1 %2239  ;;  %v4389_v25 = vsel %vm2467_vm3, %v4387_v46, %v4388_v3  ;;  %v977_v46 = vrot.slane %v976_v34, 4  ;;  %v1678_v34 = vld [vmem:[#allocation2 + $0x168] sm:$0xe] }
 0x182   : > { %v4445_v61 = vpop.permute.xlu0 %4444  ;;  %1173 = vst.msk [vmem:[#allocation2 + $0x198] sm:$0xe] %vm1088_vm7, %v971_v36  ;;  %v2539_v56 = vsel %vm2467_vm3, %v2537_v19, %v2538_v17  ;;  %v12141_v19 = vld [vmem:[#allocation2 + $0xac] sm:$0xf] }
 0x183   : > { %v4996_v51 = vsel %vm17099_vm5, %v4931_v42, %v4445_v61  ;;  %3534 = vrot.lane.b32.xlu1 %v3461_v55, %s12181_s16  ;;  %v2534_v61 = vrot.slane %v10620_v5, 2 }
 0x184   : > { %3532 = vrot.lane.b32.xlu0 %v3458_v26, %s12181_s16  ;;  %11343 = vmatprep.mubr.msk.bf16.mxu0 %vm17098_vm6, %v4996_v51 }
 0x185   : > { %v13601_v27 = vpop.permute.xlu1 %2241  ;;  %v2536_v10 = vsel %vm2467_vm3, %v2534_v61, %v2535_v30  ;;  %v11815_v61 = vld [vmem:[#allocation2 + $0x158] ss:$0 sps:$4 sm:$0x33]   ;;  %v979_v30 = vsel %vm12431_vm8, %v977_v46, %v978_v58 }
 0x186   : > { %v4447_v24 = vpop.permute.xlu0 %4446  ;;  %1177 = vst.msk [vmem:[#allocation2 + $0x1a8] sm:$0xf] %vm17175_vm9, %v979_v30 }
 0x187   : > { %v4998_v63 = vsel %vm17099_vm5, %v4933_v53, %v4447_v24  ;;  %3758 = vrot.lane.b32.xlu1 %v10821_v2, %s12179_s14  ;;  %v13651_v53 = vld [vmem:[#allocation2 + $0x154] sm:$0xf]  ;;  %v1423_v24 = vld [vmem:[#allocation2 + $0x15c] sm:$0xf] }
 0x188   : > { %v11321_v54 = vpop.f32.mrf.mxu0  ;;  %3756 = vrot.lane.b32.xlu0 %v10820_v23, %s12179_s14  ;;  %11344 = vmatmul.mubr.msk.bf16.gmra.mxu0 %vm17098_vm6, %v4998_v63  ;;  %v2186_v23 = vsel %vm17097_vm4, %v2184_v47, %v2185_v33  ;;  %v10716_v33 = vcombine.low %v1485_v49, %v13651_v53  ;;  %v13692_v49 = vld [vmem:[#allocation2 + $0x154] sm:$0xf] }
 0x189   : > { %v5422_v37 = vmul.f32 %v11321_v54, %v13596_v18  ;;  %v13618_v6 = vpop.permute.xlu1 %2594  ;;  %v972_v54 = vrot.slane %v971_v36, 4 }
 0x18a   : > { %v5158_v50 = vpop.f32.mrf.mxu0  ;;  %v13621_v32 = vpop.permute.xlu0 %2592  ;;  %v3110_v17 = vrot.slane %v10716_v33, 1  ;;  %v11821_v33 = vld [vmem:[#allocation2 + $0x17c] ss:$0 sps:$4 sm:$0x11]  }
 0x18b   : > { %v5493_v22 = vadd.f32 %v13608_v12, %v5422_v37  ;;  %v5420_v13 = vmul.f32 %v13596_v18, %v5158_v50  ;;  %4110 = vrot.lane.b32.xlu1 %v4037_v39, %s12182_s17  ;;  %v973_v39 = vrot.slane %v757_v52, 7  ;;  %v1421_v37 = vld [vmem:[#allocation2 + $0x150] sm:$0xf] }
 0x18c   : > { %v11322_v55 = vpop.f32.mrf.mxu0  ;;  %4108 = vrot.lane.b32.xlu0 %v4034_v38, %s12182_s17  ;;  %v11813_v38 = vld [vmem:[#allocation2 + $0x164] ss:$0 sps:$4 sm:$0x11]   ;;  %v1549_v50 = vld [vmem:[#allocation2 + $0x150] sm:$0xc] }
 0x18d   : > { %v5491_v44 = vadd.f32 %v13608_v12, %v5420_v13  ;;  %v5423_v48 = vmul.f32 %v11322_v55, %v13596_v18  ;;  %v13632_v26 = vpop.permute.xlu1 %2818  ;;  %v5557_v51 = vmax.f32 %v5493_v22, 0.0  ;;  %v974_v5 = vsel %vm12431_vm8, %v972_v54, %v973_v39  ;;  %v11811_v55 = vld [vmem:[#allocation2 + $0x158] ss:$0 sps:$4 sm:$0x11]   ;;  %v760_v52 = vld [vmem:[%s12419_s28 + $0xf0] sm:$0xf] }
 0x18e   : > { %v5161_v43 = vpop.f32.mrf.mxu0  ;;  %v13636_v42 = vpop.permute.xlu0 %2816  ;;  %v975_v15 = vrot.slane %v973_v39, 4  ;;  %1174 = vst.msk [vmem:[#allocation2 + $0x19c] sm:$0xf] %vm17175_vm9, %v974_v5  ;;  %v3111_v36 = vrot.slane %v11811_v55, 1 }
 0x18f   : > { %v5555_v2 = vmax.f32 %v5491_v44, 0.0  ;;  %v5494_v8 = vadd.f32 %v13608_v12, %v5423_v48  ;;  %v5421_v4 = vmul.f32 %v13596_v18, %v5161_v43  ;;  %2255 = vrot.lane.b32.xlu1 %v2183_v7, %s12177_s30  ;;  %v1551_v7 = vld [vmem:[#allocation2 + $0x15c] sm:$0xc]  ;;  %v10663_v44 = vcombine.low %v1423_v24, %v13638_v62  ;;  %v13720_v55 = vld [vmem:[#allocation2 + $0x158] ss:$0 sps:$4 sm:$0x11]  }
 0x190   : > { %4460 = vrot.lane.b32.xlu0 %v4386_v16, %s12183_s18  ;;  %1175 = vst.msk [vmem:[#allocation2 + $0x1a0] sm:$0x1] %vm447_vm2, %v975_v15  ;;  %v980_v48 = vrot.slane %v978_v58, 4  ;;  %v1215_v16 = vld [vmem:[#allocation2 + $0xb4] sm:$0xf]  ;;  %v10780_v43 = vcombine.low %v1549_v50, %v13651_v53 }
 0x191   : > { %v5619_v28 = vadd.f32 %v5557_v51, %v5555_v2  ;;  %v5651_v20 = vmax.f32 %v5555_v2, %v5557_v51  ;;  %v5492_v45 = vadd.f32 %v13608_v12, %v5421_v4  ;;  %v13648_v1 = vpop.permute.xlu1 %3170  ;;  %v5558_v40 = vmax.f32 %v5494_v8, 0.0  ;;  %v1616_v58 = vld [vmem:[#allocation2 + $0x174] sm:$0xf] }
 0x192   : > { %v13654_v63 = vpop.permute.xlu0 %3168  ;;  %v10494_v51 = vcombine.low %v1213_v35, %v12141_v19  ;;  %v10662_v2 = vcombine.low %v1421_v37, %v13651_v53  ;;  %v3114_v8 = vrot.slane %v11813_v38, 1  ;;  %v10782_v4 = vcombine.low %v1551_v7, %v13638_v62  ;;  %1178 = vst.msk [vmem:[#allocation2 + $0x1ac] sm:$0x1] %vm447_vm2, %v980_v48  ;;  %v13704_v38 = vld [vmem:[#allocation2 + $0x16c] sm:$0xf] }
 0x193   : > { %v5683_v9 = vsel %vm17099_vm5, %v5619_v28, %v5651_v20  ;;  %v5556_v41 = vmax.f32 %v5492_v45, 0.0  ;;  %2257 = vrot.lane.b32.xlu1 %v2186_v23, %s12177_s30  ;;  %v12142_v28 = vld [vmem:[#allocation2 + $0xb8] sm:$0xf]  ;;  %v3462_v45 = vrot.slane %v10780_v43, 2  ;;  %v981_v53 = vrot.slane %v760_v52, 7 }
 0x194   : > { %5716 = vst.msk [vmem:[#allocation6] sm:$0xff] %vm17096_vm0, %v5683_v9  ;;  %4462 = vrot.lane.b32.xlu0 %v4389_v25, %s12183_s18  ;;  %v10495_v20 = vcombine.low %v1215_v16, %v12142_v28  ;;  %v3463_v25 = vrot.slane %v11815_v61, 2  ;;  %v4529_v62 = vsel %vm4484_vm10, %v10494_v51, %v13574_v14  ;;  %v3115_v24 = vsel %vm17097_vm4, %v3113_v21, %v3114_v8  ;;  %v13697_v9 = vld [vmem:[#allocation2 + $0x168] sm:$0xf]  ;;  %v1680_v14 = vld [vmem:[#allocation2 + $0x174] sm:$0xe] }
 0x195   : > { %v5620_v22 = vadd.f32 %v5558_v40, %v5556_v41  ;;  %v5652_v13 = vmax.f32 %v5556_v41, %v5558_v40  ;;  %v13666_v47 = vpop.permute.xlu1 %3522  ;;  %v3465_v57 = vrot.slane %v10782_v4, 2  ;;  %v4611_v54 = vsel %vm4581_vm11, %v4529_v62, %v13621_v32  ;;  %v13699_v40 = vld [vmem:[#allocation2 + $0x178] sm:$0xf]  ;;  %1179 = vst.msk [vmem:[#allocation2 + $0x1b0] sm:$0xe] %vm1088_vm7, %v981_v53 }
 0x196   : > { %v3521_v59 = vpop.permute.xlu0 %3520  ;;  %v3112_v35 = vsel %vm17097_vm4, %v3110_v17, %v3111_v36  ;;  %v4676_v41 = vsel %vm4646_vm12, %v4611_v54, %v13636_v42  ;;  %v3464_v5 = vsel %vm2467_vm3, %v3462_v45, %v3463_v25  ;;  %v4532_v15 = vsel %vm4484_vm10, %v10495_v20, %v13601_v27  ;;  %v1744_v17 = vld [vmem:[#allocation2 + $0x174] sm:$0xc]  ;;  %v11822_v45 = vld [vmem:[#allocation2 + $0x170] ss:$0 sps:$4 sm:$0x33]  }
 0x197   : > { %v5684_v3 = vsel %vm17099_vm5, %v5620_v22, %v5652_v13  ;;  %2610 = vrot.lane.b32.xlu1 %v2539_v56, %s12176_s29  ;;  %v4740_v50 = vsel %vm598_vm13, %v4676_v41, %v13654_v63  ;;  %v10878_v13 = vcombine.low %v1680_v14, %v13699_v40  ;;  %v4613_v63 = vsel %vm4581_vm11, %v4532_v15, %v13618_v6  ;;  %v761_v6 = vld [vmem:[%s12419_s28 + $0xf4] sm:$0xf]  ;;  %v13764_v41 = vld [vmem:[#allocation2 + $0x158] ss:$0 sps:$4 sm:$0x33]  }
 0x198   : > { %5717 = vst.msk [vmem:[#allocation6 + $0x8] sm:$0xff] %vm17096_vm0, %v5684_v3  ;;  %2608 = vrot.lane.b32.xlu0 %v2536_v10, %s12176_s29  ;;  %v3466_v10 = vrot.slane %v11817_v11, 2  ;;  %v4805_v42 = vsel %vm4775_vm14, %v4740_v50, %v3521_v59  ;;  %v10876_v27 = vcombine.low %v1678_v34, %v13704_v38  ;;  %v11820_v59 = vld [vmem:[#allocation2 + $0x170] ss:$0 sps:$4 sm:$0x11]   ;;  %v10560_v48 = vcombine.low %v1297_v29, %v13692_v49 }
 0x199   : > { %v13685_v23 = vpop.permute.xlu1 %3746  ;;  %v4678_v16 = vsel %vm4646_vm12, %v4613_v63, %v13632_v26  ;;  %v10822_v43 = vcombine.low %v13697_v9, %v13704_v38  ;;  %v10823_v51 = vcombine.low %v1616_v58, %v13699_v40  ;;  %v13742_v26 = vld [vmem:[#allocation2 + $0x160] sm:$0xf]  ;;  %v982_v8 = vrot.slane %v981_v53, 4  ;;  %v11825_v15 = vld [vmem:[#allocation2 + $0x17c] ss:$0 sps:$4 sm:$0x33]  }
 0x19a   : > { %v3745_v60 = vpop.permute.xlu0 %3744  ;;  %v3467_v22 = vsel %vm2467_vm3, %v3465_v57, %v3466_v10  ;;  %v4742_v30 = vsel %vm598_vm13, %v4678_v16, %v13648_v1  ;;  %v4041_v11 = vrot.slane %v10878_v13, 1  ;;  %v4042_v52 = vrot.slane %v11821_v33, 1  ;;  %v1361_v57 = vld [vmem:[#allocation2 + $0x150] sm:$0xc]  ;;  %v762_v33 = vld [vmem:[%s12419_s28 + $0xf8] sm:$0xf] }
 0x19b   : > { %2834 = vrot.lane.b32.xlu1 %v10663_v44, %s12178_s13  ;;  %v4870_v7 = vsel %vm17103_vm15, %v4805_v42, %v3745_v60  ;;  %v1742_v44 = vld [vmem:[#allocation2 + $0x168] sm:$0xc]  ;;  %v4807_v4 = vsel %vm4775_vm14, %v4742_v30, %v13666_v47  ;;  %v4038_v28 = vrot.slane %v10876_v27, 1  ;;  %v4039_v20 = vrot.slane %v11820_v59, 1 }
 0x19c   : > { %2832 = vrot.lane.b32.xlu0 %v10662_v2, %s12178_s13  ;;  %v1299_v2 = vld [vmem:[#allocation2 + $0x15c] sm:$0xe]  ;;  %v10940_v1 = vcombine.low %v1742_v44, %v13704_v38  ;;  %v4872_v36 = vsel %vm17103_vm15, %v4807_v4, %v13685_v23  ;;  %v983_v25 = vrot.slane %v761_v6, 7  ;;  %v2187_v62 = vrot.slane %v10560_v48, 1 }
 0x19d   : > { %v4099_v39 = vpop.permute.xlu1 %4098  ;;  %v10562_v29 = vcombine.low %v1299_v2, %v13742_v26  ;;  %v11827_v23 = vld [vmem:[#allocation2 + $0x164] ss:$0 sps:$4 sm:$0x11]   ;;  %v10942_v14 = vcombine.low %v1744_v17, %v13699_v40  ;;  %v4391_v58 = vrot.slane %v11822_v45, 2  ;;  %v10624_v40 = vcombine.low %v1361_v57, %v13692_v49 }
 0x19e   : > { %v4097_v37 = vpop.permute.xlu0 %4096  ;;  %v4937_v47 = vsel %vm4905_vm1, %v4872_v36, %v4099_v39  ;;  %v984_v54 = vsel %vm12431_vm8, %v982_v8, %v983_v25  ;;  %v4043_v39 = vsel %vm17097_vm4, %v4041_v11, %v4042_v52  ;;  %v4390_v9 = vrot.slane %v10940_v1, 2 }
 0x19f   : > { %v13706_v56 = vld [vmem:[#allocation6] ss:$2 sm:$0xff]  ;;  %v13708_v32 = vld [vmem:[#allocation6 + $0x1] ss:$2 sm:$0xff]  ;;  %3186 = vrot.lane.b32.xlu1 %v3115_v24, %s12180_s15  ;;  %v4935_v3 = vsel %vm4905_vm1, %v4870_v7, %v4097_v37  ;;  %v2188_v24 = vrot.slane %v13720_v55, 1  ;;  %v985_v38 = vrot.slane %v983_v25, 4 }
 0x1a0   : > { %3184 = vrot.lane.b32.xlu0 %v3112_v35, %s12180_s15  ;;  %v1363_v37 = vld [vmem:[#allocation2 + $0x15c] sm:$0xc]  ;;  %1180 = vst.msk [vmem:[#allocation2 + $0x1b4] sm:$0xf] %vm17175_vm9, %v984_v54  ;;  %v2190_v27 = vrot.slane %v10562_v29, 1  ;;  %v2191_v59 = vrot.slane %v11827_v23, 1 }
 0x1a1   : > { %v13725_v46 = vpop.permute.xlu1 %2243  ;;  %v2189_v13 = vsel %vm17097_vm4, %v2187_v62, %v2188_v24  ;;  %v763_v55 = vld [vmem:[%s12419_s28 + $0xfc] sm:$0xf]  ;;  %1181 = vst.msk [vmem:[#allocation2 + $0x1b8] sm:$0x1] %vm447_vm2, %v985_v38  ;;  %v4393_v48 = vrot.slane %v10942_v14, 2  ;;  %v10626_v16 = vcombine.low %v1363_v37, %v13742_v26  ;;  %v986_v49 = vrot.slane %v762_v33, 7 }
 0x1a2   : > { %v4449_v21 = vpop.permute.xlu0 %4448  ;;  %v2540_v4 = vrot.slane %v10624_v40, 2  ;;  %v2541_v11 = vrot.slane %v13764_v41, 2  ;;  %v1489_v54 = vld [vmem:[#allocation2 + $0x168] sm:$0xe]  ;;  %v1217_v14 = vld [vmem:[#allocation2 + $0xf0] sm:$0xf] }
 0x1a3   : > { %v5000_v19 = vsel %vm17099_vm5, %v4935_v3, %v4449_v21  ;;  %3538 = vrot.lane.b32.xlu1 %v3467_v22, %s12181_s16  ;;  %v11831_v3 = vld [vmem:[#allocation2 + $0x164] ss:$0 sps:$4 sm:$0x33]   ;;  %v988_v21 = vrot.slane %v763_v55, 7  ;;  %v987_v52 = vrot.slane %v986_v49, 4  ;;  %v2543_v45 = vrot.slane %v10626_v16, 2 }
 0x1a4   : > { %3536 = vrot.lane.b32.xlu0 %v3464_v5, %s12181_s16  ;;  %11347 = vmatprep.mubr.msk.bf16.mxu0 %vm17098_vm6, %v5000_v19  ;;  %v4040_v5 = vsel %vm17097_vm4, %v4038_v28, %v4039_v20  ;;  %v4392_v19 = vsel %vm2467_vm3, %v4390_v9, %v4391_v58  ;;  %1182 = vst.msk [vmem:[#allocation2 + $0x1bc] sm:$0xe] %vm1088_vm7, %v986_v49  ;;  %v2544_v25 = vrot.slane %v11831_v3, 2  ;;  %vm17176_vm7 = vmmov %vm17175_vm9  ;;  %v13826_v16 = vld [vmem:[#allocation2 + $0x17c] ss:$0 sps:$4 sm:$0x33]  }
 0x1a5   : > { %v13751_v60 = vpop.permute.xlu1 %2245  ;;  %v990_v26 = vrot.slane %v988_v21, 4  ;;  %v2192_v20 = vsel %vm17097_vm4, %v2190_v27, %v2191_v59  ;;  %v989_v62 = vsel %vm12431_vm8, %v987_v52, %v988_v21  ;;  %v11835_v27 = vld [vmem:[#allocation2 + $0x170] ss:$0 sps:$4 sm:$0x11]   ;;  %v3120_v52 = vrot.slane %v11837_v31, 1  ;;  %s12187_s28 = smov 96  }
 0x1a6   : > { %v4451_v53 = vpop.permute.xlu0 %4450  ;;  %1183 = vst.msk [vmem:[#allocation2 + $0x1c0] sm:$0xf] %vm17176_vm7, %v989_v62  ;;  %v2545_v58 = vsel %vm2467_vm3, %v2543_v45, %v2544_v25  ;;  %v13820_v59 = vld [vmem:[#allocation2 + $0x170] ss:$0 sps:$4 sm:$0x33]   ;;  %v3472_v62 = vrot.slane %v13826_v16, 2 }
 0x1a7   : > { %v5002_v10 = vsel %vm17099_vm5, %v4937_v47, %v4451_v53  ;;  %3762 = vrot.lane.b32.xlu1 %v10823_v51, %s12179_s14  ;;  %v4394_v51 = vrot.slane %v11825_v15, 2  ;;  %v13797_v47 = vld [vmem:[#allocation2 + $0x16c] sm:$0xf]  ;;  %v1428_v53 = vld [vmem:[#allocation2 + $0x178] sm:$0xf]  ;;  %vm5988_vm8 = vcmask 125953  }
 0x1a8   : > { %3760 = vrot.lane.b32.xlu0 %v10822_v43, %s12179_s14  ;;  %v11325_v35 = vpop.f32.mrf.mxu0  ;;  %11348 = vmatmul.mubr.msk.bf16.gmra.mxu0 %vm17098_vm6, %v5002_v10  ;;  %1184 = vst.msk [vmem:[#allocation2 + $0x1c4] sm:$0x1] %vm447_vm2, %v990_v26  ;;  %v13836_v26 = vld [vmem:[#allocation2 + $0xfc] sm:$0xf]  ;;  %vm529_vm2 = vcmask 125952   ;;  %vm17100_vm9 = vcmask 123904  }
 0x1a9   : > { %v5426_v34 = vmul.f32 %v11325_v35, %v13596_v18  ;;  %v13768_v50 = vpop.permute.xlu1 %2598  ;;  %v4395_v23 = vsel %vm2467_vm3, %v4393_v48, %v4394_v51  ;;  %v1491_v35 = vld [vmem:[#allocation2 + $0x174] sm:$0xe]  ;;  %530 = vst.msk [vmem:[#allocation3] sm:$0xf] %vm529_vm2, %v17101_v0  ;;  %533 = vst.msk [vmem:[#allocation3 + $0x8] sm:$0xf] %vm529_vm2, %v17101_v0 }
 0x1aa   : > { %v13771_v42 = vpop.permute.xlu0 %2596  ;;  %v5174_v22 = vpop.f32.mrf.mxu0  ;;  %v10722_v15 = vcombine.low %v1491_v35, %v1428_v53  ;;  %v12143_v51 = vld [vmem:[#allocation2 + $0xf4] sm:$0xf]  ;;  %v13855_v35 = vld [vmem:[#allocation2 + $0x190] sm:$0xf]  ;;  %535 = vst.msk [vmem:[#allocation3 + $0x60] sm:$0xf] %vm529_vm2, %v17101_v0 }
 0x1ab   : > { %v5497_v63 = vadd.f32 %v13608_v12, %v5426_v34  ;;  %v5424_v7 = vmul.f32 %v13596_v18, %v5174_v22  ;;  %4114 = vrot.lane.b32.xlu1 %v4043_v39, %s12182_s17  ;;  %v5811_v39 = vadd.f32 %v13708_v32, %v13706_v56  ;;  %v1425_v34 = vld [vmem:[#allocation2 + $0x168] sm:$0xf]  ;;  %537 = vst.msk [vmem:[#allocation3 + $0x68] sm:$0xf] %vm529_vm2, %v17101_v0  ;;  %540 = vst.msk [vmem:[#allocation3 + $0x50] sm:$0xf] %vm529_vm2, %v17101_v0 }
 0x1ac   : > { %4112 = vrot.lane.b32.xlu0 %v4040_v5, %s12182_s17  ;;  %v11326_v44 = vpop.f32.mrf.mxu0  ;;  %v1427_v5 = vld [vmem:[#allocation2 + $0x174] sm:$0xf]  ;;  %v1553_v22 = vld [vmem:[#allocation2 + $0x168] sm:$0xc]  ;;  %542 = vst.msk [vmem:[#allocation3 + $0x58] sm:$0xf] %vm529_vm2, %v17101_v0 }
 0x1ad   : > { %v5495_v43 = vadd.f32 %v13608_v12, %v5424_v7  ;;  %v5427_v6 = vmul.f32 %v11326_v44, %v13596_v18  ;;  %v13785_v30 = vpop.permute.xlu1 %2822  ;;  %v5561_v1 = vmax.f32 %v5497_v63, 0.0  ;;  %v2542_v63 = vsel %vm2467_vm3, %v2540_v4, %v2541_v11  ;;  %544 = vst.msk [vmem:[#allocation3 + $0xb0] sm:$0xf] %vm529_vm2, %v17101_v0  ;;  %546 = vst.msk [vmem:[#allocation3 + $0xb8] sm:$0xf] %vm529_vm2, %v17101_v0 }
 0x1ae   : > { %v13788_v2 = vpop.permute.xlu0 %2820  ;;  %v5177_v8 = vpop.f32.mrf.mxu0  ;;  %v10720_v7 = vcombine.low %v1489_v54, %v13797_v47  ;;  %v13822_v44 = vmul.f32 0.25, %v5811_v39  ;;  %v10665_v49 = vcombine.low %v1427_v5, %v1428_v53  ;;  %v10784_v21 = vcombine.low %v1553_v22, %v13797_v47  ;;  %532 = vst.msk [vmem:[#allocation3 + $0x4] sm:$0x3] %vm17100_vm9, %v17101_v0  ;;  %534 = vst.msk [vmem:[#allocation3 + $0xc] sm:$0x3] %vm17100_vm9, %v17101_v0 }
 0x1af   : > { %v5559_v17 = vmax.f32 %v5495_v43, 0.0  ;;  %v5498_v36 = vadd.f32 %v13608_v12, %v5427_v6  ;;  %v5425_v28 = vmul.f32 %v13596_v18, %v5177_v8  ;;  %2259 = vrot.lane.b32.xlu1 %v2189_v13, %s12177_s30  ;;  %v1555_v13 = vld [vmem:[#allocation2 + $0x174] sm:$0xc]  ;;  %v13831_v6 = vld [vmem:[#allocation2 + $0x16c] sm:$0xf]  ;;  %v10496_v8 = vcombine.low %v1217_v14, %v12143_v51 }
 0x1b0   : > { %4464 = vrot.lane.b32.xlu0 %v4392_v19, %s12183_s18  ;;  %v10786_v43 = vcombine.low %v1555_v13, %v1428_v53  ;;  %v1301_v19 = vld [vmem:[#allocation2 + $0x168] sm:$0xe]  ;;  %v10664_v4 = vcombine.low %v1425_v34, %v13797_v47  ;;  %v3119_v11 = vrot.slane %v10722_v15, 1  ;;  %v11220_v45 = vpack.c.bf16 %v13822_v44, %v13822_v44  ;;  %v13886_v34 = vld [vmem:[#allocation2 + $0x184] sm:$0xf] }
 0x1b1   : > { %v5621_v24 = vadd.f32 %v5561_v1, %v5559_v17  ;;  %v5653_v57 = vmax.f32 %v5559_v17, %v5561_v1  ;;  %v5496_v10 = vadd.f32 %v13608_v12, %v5425_v28  ;;  %v13803_v29 = vpop.permute.xlu1 %3174  ;;  %v5562_v37 = vmax.f32 %v5498_v36, 0.0  ;;  %536 = vst.msk [vmem:[#allocation3 + $0x64] sm:$0x3] %vm17100_vm9, %v17101_v0  ;;  %538 = vst.msk [vmem:[#allocation3 + $0x6c] sm:$0x3] %vm17100_vm9, %v17101_v0 }
 0x1b2   : > { %v13809_v9 = vpop.permute.xlu0 %3172  ;;  %v3116_v17 = vrot.slane %v10720_v7, 1  ;;  %v3117_v36 = vrot.slane %v11835_v27, 1  ;;  %v3468_v25 = vrot.slane %v10784_v21, 2  ;;  %v3469_v47 = vrot.slane %v13820_v59, 2  ;;  %541 = vst.msk [vmem:[#allocation3 + $0x54] sm:$0x3] %vm17100_vm9, %v17101_v0 }
 0x1b3   : > { %v5685_v41 = vsel %vm17099_vm5, %v5621_v24, %v5653_v57  ;;  %v5560_v38 = vmax.f32 %v5496_v10, 0.0  ;;  %2261 = vrot.lane.b32.xlu1 %v2192_v20, %s12177_s30  ;;  %v10564_v20 = vcombine.low %v1301_v19, %v13831_v6  ;;  %v3471_v53 = vrot.slane %v10786_v43, 2  ;;  %v13848_v24 = vld [vmem:[#allocation2 + $0x18c] sm:$0xe]  ;;  %v12144_v10 = vld [vmem:[#allocation2 + $0x100] sm:$0xf] }
 0x1b4   : > { %5718 = vst.msk [vmem:[#allocation6 + $0x10] sm:$0xff] %vm17096_vm0, %v5685_v41  ;;  %4466 = vrot.lane.b32.xlu0 %v4395_v23, %s12183_s18  ;;  %v4535_v57 = vsel %vm4484_vm10, %v10496_v8, %v13725_v46  ;;  %v10497_v23 = vcombine.low %v13836_v26, %v12144_v10  ;;  %v3121_v54 = vsel %vm17097_vm4, %v3119_v11, %v3120_v52  ;;  %v13862_v41 = vld [vmem:[#allocation2 + $0x180] sm:$0xe]  ;;  %v13864_v46 = vld [vmem:[#allocation2 + $0x178] sm:$0xf]  ;;  %vm17177_vm7 = vcmask 122880  }
 0x1b5   : > { %v5622_v40 = vadd.f32 %v5562_v37, %v5560_v38  ;;  %v5654_v33 = vmax.f32 %v5560_v38, %v5562_v37  ;;  %v13816_v55 = vpop.permute.xlu1 %3526  ;;  %v4615_v39 = vsel %vm4581_vm11, %v4535_v57, %v13771_v42  ;;  %v3118_v14 = vsel %vm17097_vm4, %v3116_v17, %v3117_v36  ;;  %v13866_v37 = vld [vmem:[#allocation2 + $0x174] sm:$0xe]  ;;  %543 = vst.msk [vmem:[#allocation3 + $0x5c] sm:$0x3] %vm17100_vm9, %v17101_v0  ;;  %vm17178_vm2 = vmmov %vm17177_vm7  ;;  %v1620_v59 = vld [vmem:[#allocation2 + $0x18c] sm:$0xf] }
 0x1b6   : > { %v13824_v48 = vpop.permute.xlu0 %3524  ;;  %v4680_v42 = vsel %vm4646_vm12, %v4615_v39, %v13788_v2  ;;  %v13888_v5 = vrot.slane %v10564_v20, 1  ;;  %545 = vst.msk [vmem:[#allocation3 + $0xb4] sm:$0x3] %vm17100_vm9, %v17101_v0  ;;  %547 = vst.msk [vmem:[#allocation3 + $0xbc] sm:$0x3] %vm17100_vm9, %v17101_v0  ;;  %v5923_v2 = vrot.slane %v11220_v45, 7  ;;  %v3470_v13 = vsel %vm2467_vm3, %v3468_v25, %v3469_v47 }
 0x1b7   : > { %v5686_v3 = vsel %vm17099_vm5, %v5622_v40, %v5654_v33  ;;  %2614 = vrot.lane.b32.xlu1 %v2545_v58, %s12176_s29  ;;  %549 = vst.msk [vmem:[#allocation3] sm:$0x1] %vm17177_vm7, %v17101_v0  ;;  %v4744_v22 = vsel %vm598_vm13, %v4680_v42, %v13809_v9  ;;  %v3473_v40 = vsel %vm2467_vm3, %v3471_v53, %v3472_v62  ;;  %v13931_v33 = vld [vmem:[#allocation2 + $0x180] sm:$0xf]  ;;  %v1365_v51 = vld [vmem:[#allocation2 + $0x168] sm:$0xc] }
 0x1b8   : > { %5719 = vst.msk [vmem:[#allocation6 + $0x18] sm:$0xff] %vm17096_vm0, %v5686_v3  ;;  %2612 = vrot.lane.b32.xlu0 %v2542_v63, %s12176_s29  ;;  %vm17179_vm0 = vmmov %vm17178_vm2  ;;  %v10882_v63 = vcombine.low %v13848_v24, %v13855_v35  ;;  %v4538_v9 = vsel %vm4484_vm10, %v10497_v23, %v13751_v60  ;;  %v4809_v27 = vsel %vm4775_vm14, %v4744_v22, %v13824_v48  ;;  %v11845_v16 = vld [vmem:[#allocation2 + $0x194] ss:$0 sps:$4 sm:$0x11]   ;;  %v5924_v8 = vrot.slane %v5923_v2, 4 }
 0x1b9   : > { %v13838_v1 = vpop.permute.xlu1 %3750  ;;  %550 = vst.msk [vmem:[#allocation3 + $0x8] sm:$0x1] %vm17178_vm2, %v17101_v0  ;;  %vm17180_vm4 = vmmov %vm17179_vm0  ;;  %v13958_v3 = vld [vmem:[#allocation2 + $0x170] ss:$0 sps:$4 sm:$0x11]   ;;  %v4617_v60 = vsel %vm4581_vm11, %v4538_v9, %v13768_v50  ;;  %v10880_v48 = vcombine.low %v13862_v41, %v13886_v34  ;;  %v10566_v17 = vcombine.low %v13866_v37, %v13864_v46  ;;  %v10824_v20 = vcombine.low %v13931_v33, %v13886_v34 }
 0x1ba   : > { %v13840_v28 = vpop.permute.xlu0 %3748  ;;  %559 = vst.msk [vmem:[#allocation3 + $0x50] sm:$0x1] %vm17179_vm0, %v17101_v0  ;;  %vm17181_vm6 = vmmov %vm17179_vm0  ;;  %v11844_v19 = vld [vmem:[#allocation2 + $0x188] ss:$0 sps:$4 sm:$0x11]   ;;  %v4048_v53 = vrot.slane %v11845_v16, 1 }
 0x1bb   : > { %2838 = vrot.lane.b32.xlu1 %v10665_v49, %s12178_s13  ;;  %560 = vst.msk [vmem:[#allocation3 + $0x58] sm:$0x1] %vm17180_vm4, %v17101_v0  ;;  %vm17182_vm5 = vmmov %vm17179_vm0  ;;  %vm17185_vm4 = vcmask 123905   ;;  %v4874_v21 = vsel %vm17103_vm15, %v4809_v27, %v13840_v28  ;;  %v1746_v50 = vld [vmem:[#allocation2 + $0x180] sm:$0xc]  ;;  %v4045_v39 = vrot.slane %v11844_v19, 1 }
 0x1bc   : > { %2836 = vrot.lane.b32.xlu0 %v10664_v4, %s12178_s13  ;;  %561 = vst.msk [vmem:[#allocation3 + $0x60] sm:$0x1] %vm17181_vm6, %v17101_v0  ;;  %vm17183_vm9 = vmmov %vm17179_vm0  ;;  %v4682_v4 = vsel %vm4646_vm12, %v4617_v60, %v13785_v30  ;;  %v10825_v30 = vcombine.low %v1620_v59, %v13855_v35  ;;  %v13985_v45 = vld [vmem:[#allocation2 + $0x17c] ss:$0 sps:$4 sm:$0x11]   ;;  %v2194_v42 = vrot.slane %v13958_v3, 1 }
 0x1bd   : > { %v13859_v31 = vpop.permute.xlu1 %4102  ;;  %562 = vst.msk [vmem:[#allocation3 + $0x68] sm:$0x1] %vm17182_vm5, %v17101_v0  ;;  %vm17184_vm7 = vmmov %vm17179_vm0  ;;  %v4746_v36 = vsel %vm598_vm13, %v4682_v4, %v13803_v29  ;;  %v1367_v25 = vld [vmem:[#allocation2 + $0x174] sm:$0xc]  ;;  %v4047_v29 = vrot.slane %v10882_v63, 1  ;;  %v2197_v63 = vrot.slane %v13985_v45, 1 }
 0x1be   : > { %v4101_v38 = vpop.permute.xlu0 %4100  ;;  %571 = vst.msk [vmem:[#allocation3 + $0xb0] sm:$0x1] %vm17183_vm9, %v17101_v0  ;;  %vm17186_vm5 = vmmov %vm17185_vm4  ;;  %v4811_v47 = vsel %vm4775_vm14, %v4746_v36, %v13816_v55  ;;  %v1748_v62 = vld [vmem:[#allocation2 + $0x18c] sm:$0xc]  ;;  %v10944_v55 = vcombine.low %v1746_v50, %v13886_v34  ;;  %v14011_v34 = vld [vmem:[#allocation2 + $0x184] sm:$0xf] }
 0x1bf   : > { %572 = vst.msk [vmem:[#allocation3 + $0xb8] sm:$0x1] %vm17184_vm7, %v17101_v0  ;;  %v13922_v58 = vld [vmem:[#allocation6 + $0x10] ss:$2 sm:$0xff]  ;;  %v13924_v15 = vld [vmem:[#allocation6 + $0x11] ss:$2 sm:$0xff]  ;;  %3190 = vrot.lane.b32.xlu1 %v3121_v54, %s12180_s15  ;;  %vm17187_vm6 = vmmov %vm17185_vm4  ;;  %v4939_v52 = vsel %vm4905_vm1, %v4874_v21, %v4101_v38  ;;  %v4876_v10 = vsel %vm17103_vm15, %v4811_v47, %v13838_v1  ;;  %v10628_v38 = vcombine.low %v1365_v51, %v13831_v6 }
 0x1c0   : > { %574 = vst.msk [vmem:[#allocation3 + $0x4] sm:$0x2] %vm17185_vm4, %v17101_v0  ;;  %vm17188_vm0 = vmmov %vm17185_vm4  ;;  %v5812_v7 = vadd.f32 %v13924_v15, %v13922_v58  ;;  %3188 = vrot.lane.b32.xlu0 %v3118_v14, %s12180_s15  ;;  %v13992_v24 = vld [vmem:[#allocation2 + $0x170] ss:$0 sps:$4 sm:$0x33]   ;;  %v4044_v54 = vrot.slane %v10880_v48, 1  ;;  %v4941_v41 = vsel %vm4905_vm1, %v4876_v10, %v13859_v31 }
 0x1c1   : > { %575 = vst.msk [vmem:[#allocation3 + $0xc] sm:$0x2] %vm17186_vm5, %v17101_v0  ;;  %vm17189_vm9 = vmmov %vm17188_vm0  ;;  %v13967_v43 = vpop.permute.xlu1 %2247  ;;  %vm17193_vm5 = vcmask 261120   ;;  %v11846_v14 = vld [vmem:[#allocation2 + $0x188] ss:$0 sps:$4 sm:$0x33]  }
 0x1c2   : > { %584 = vst.msk [vmem:[#allocation3 + $0x54] sm:$0x2] %vm17187_vm6, %v17101_v0  ;;  %vm17190_vm2 = vmmov %vm17188_vm0  ;;  %v13973_v11 = vmul.f32 0.25, %v5812_v7  ;;  %v4453_v26 = vpop.permute.xlu0 %4452  ;;  %vm17194_vm6 = vcmask 122880   ;;  %v4396_v59 = vrot.slane %v10944_v55, 2  ;;  %v4397_v16 = vrot.slane %v11846_v14, 2 }
 0x1c3   : > { %585 = vst.msk [vmem:[#allocation3 + $0x5c] sm:$0x2] %vm17188_vm0, %v17101_v0  ;;  %vm17191_vm7 = vmmov %vm17188_vm0  ;;  %v5004_v28 = vsel %vm17193_vm5, %v4939_v52, %v4453_v26  ;;  %3542 = vrot.lane.b32.xlu1 %v3473_v40, %s12181_s16  ;;  %v14006_v22 = vld [vmem:[#allocation2 + $0x17c] ss:$0 sps:$4 sm:$0x33]   ;;  %v14023_v21 = vrot.slane %v10628_v38, 2 }
 0x1c4   : > { %586 = vst.msk [vmem:[#allocation3 + $0x64] sm:$0x2] %vm17189_vm9, %v17101_v0  ;;  %vm17192_vm4 = vmmov %vm17188_vm0  ;;  %3540 = vrot.lane.b32.xlu0 %v3470_v13, %s12181_s16  ;;  %vm17195_vm0 = vcmask 293888   ;;  %v11221_v57 = vpack.c.bf16 %v13973_v11, %v13973_v11  ;;  %v10946_v13 = vcombine.low %v1748_v62, %v13855_v35  ;;  %v1493_v40 = vld [vmem:[#allocation2 + $0x180] sm:$0xe]  ;;  %v2547_v48 = vrot.slane %v13992_v24, 2 }
 0x1c5   : > { %587 = vst.msk [vmem:[#allocation3 + $0x6c] sm:$0x2] %vm17190_vm2, %v17101_v0  ;;  %11351 = vmatprep.mubr.msk.bf16.mxu0 %vm17195_vm0, %v5004_v28  ;;  %v13998_v23 = vpop.permute.xlu1 %2249  ;;  %vm17196_vm9 = vmmov %vm17193_vm5  ;;  %v11849_v33 = vld [vmem:[#allocation2 + $0x194] ss:$0 sps:$4 sm:$0x33]   ;;  %v10724_v51 = vcombine.low %v1493_v40, %v14011_v34  ;;  %v4398_v47 = vsel %vm2467_vm3, %v4396_v59, %v4397_v16 }
 0x1c6   : > { %596 = vst.msk [vmem:[#allocation3 + $0xb4] sm:$0x2] %vm17191_vm7, %v17101_v0  ;;  %v4455_v37 = vpop.permute.xlu0 %4454  ;;  %vm17197_vm2 = vmmov %vm17195_vm0  ;;  %vm17198_vm7 = vcmask 1046528   ;;  %v5925_v9 = vrot.slane %v11221_v57, 7  ;;  %v4399_v52 = vrot.slane %v10946_v13, 2  ;;  %v4400_v28 = vrot.slane %v11849_v33, 2 }
 0x1c7   : > { %597 = vst.msk [vmem:[#allocation3 + $0xbc] sm:$0x2] %vm17192_vm4, %v17101_v0  ;;  %v5006_v1 = vsel %vm17196_vm9, %v4941_v41, %v4455_v37  ;;  %3766 = vrot.lane.b32.xlu1 %v10825_v30, %s12179_s14  ;;  %v4049_v6 = vsel %vm17198_vm7, %v4047_v29, %v4048_v53  ;;  %vm17199_vm4 = vmmov %vm17198_vm7  ;;  %v14033_v26 = vld [vmem:[#allocation2 + $0x190] sm:$0xf]  ;;  %v1495_v29 = vld [vmem:[#allocation2 + $0x18c] sm:$0xe] }
 0x1c8   : > { %5989 = vst.msk [vmem:[#allocation3 + $0x10] sm:$0xe] %vm5988_vm8, %v5923_v2  ;;  %v10630_v2 = vcombine.low %v1367_v25, %v13864_v46  ;;  %3764 = vrot.lane.b32.xlu0 %v10824_v20, %s12179_s14  ;;  %v11329_v31 = vpop.f32.mrf.mxu0  ;;  %11352 = vmatmul.mubr.msk.bf16.gmra.mxu0 %vm17197_vm2, %v5006_v1  ;;  %v2196_v46 = vrot.slane %v10566_v17, 1  ;;  %v4046_v35 = vsel %vm17199_vm4, %v4044_v54, %v4045_v39  ;;  %5991 = vst.msk [vmem:[#allocation3 + $0x18] sm:$0xe] %vm5988_vm8, %v5925_v9  ;;  %vm17202_vm0 = vcmask 122880  }
 0x1c9   : > { %5990 = vst.msk [vmem:[#allocation3 + $0x14] sm:$0x1] %vm17194_vm6, %v5924_v8  ;;  %v5430_v7 = vmul.f32 %v11329_v31, %v13596_v18  ;;  %v14018_v27 = vpop.permute.xlu1 %2602  ;;  %v14035_v50 = vld [vmem:[#allocation2 + $0x188] ss:$0 sps:$4 sm:$0x11]   ;;  %vm17200_vm5 = vmmov %vm17199_vm4  ;;  %v2550_v20 = vrot.slane %v14006_v22, 2  ;;  %v10726_v22 = vcombine.low %v1495_v29, %v14033_v26 }
 0x1ca   : > { %v14021_v3 = vpop.permute.xlu0 %2600  ;;  %v5190_v60 = vpop.f32.mrf.mxu0  ;;  %v14026_v19 = vrot.slane %v10630_v2, 2  ;;  %v2195_v36 = vsel %vm17200_vm5, %v13888_v5, %v2194_v42  ;;  %v1557_v53 = vld [vmem:[#allocation2 + $0x180] sm:$0xc]  ;;  %v14053_v57 = vrot.slane %v10724_v51, 1  ;;  %v5926_v54 = vrot.slane %v5925_v9, 4  ;;  %vm17201_vm6 = vmmov %vm17199_vm4 }
 0x1cb   : > { %v5501_v8 = vadd.f32 %v13608_v12, %v5430_v7  ;;  %v5428_v4 = vmul.f32 %v13596_v18, %v5190_v60  ;;  %4118 = vrot.lane.b32.xlu1 %v4049_v6, %s12182_s17  ;;  %v14045_v18 = vld [vmem:[%s17081_s2] ss:$0 sm:$0xff]  ;;  %v14055_v10 = vld [vmem:[#allocation2 + $0x194] ss:$0 sps:$4 sm:$0x11]   ;;  %v4401_v42 = vsel %vm2467_vm3, %v4399_v52, %v4400_v28  ;;  %v2198_v38 = vsel %vm17201_vm6, %v2196_v46, %v2197_v63  ;;  %vm17204_vm7 = vmmov %vm17196_vm9 }
 0x1cc   : > { %4116 = vrot.lane.b32.xlu0 %v4046_v35, %s12182_s17  ;;  %v11330_v17 = vpop.f32.mrf.mxu0  ;;  %v14060_v14 = vld [vmem:[%s17082_s3] ss:$0 sm:$0xff]  ;;  %v3123_v2 = vrot.slane %v14035_v50, 1  ;;  %v14070_v1 = vld [vmem:[#allocation2 + $0x188] ss:$0 sps:$4 sm:$0x33]   ;;  %v10788_v33 = vcombine.low %v1557_v53, %v14011_v34  ;;  %v2551_v28 = vsel %vm2467_vm3, %v14026_v19, %v2550_v20  ;;  %vm17206_vm6 = vmmov %vm17200_vm5 }
 0x1cd   : > { %v5499_v30 = vadd.f32 %v13608_v12, %v5428_v4  ;;  %v5431_v45 = vmul.f32 %v14045_v18, %v11330_v17  ;;  %v14048_v25 = vpop.permute.xlu1 %2826  ;;  %v1559_v12 = vld [vmem:[#allocation2 + $0x18c] sm:$0xc]  ;;  %v5565_v39 = vmax.f32 %v5501_v8, 0.0  ;;  %5992 = vst.msk [vmem:[#allocation3 + $0x1c] sm:$0x1] %vm17202_vm0, %v5926_v54  ;;  %vm17203_vm2 = vcmask 392192   ;;  %vm17207_vm0 = vmmov %vm17204_vm7 }
 0x1ce   : > { %v14051_v62 = vpop.permute.xlu0 %2824  ;;  %v5193_v5 = vpop.f32.mrf.mxu0  ;;  %v14077_v9 = vld [vmem:[#allocation2 + $0x184] sm:$0xf]  ;;  %v1431_v46 = vld [vmem:[#allocation2 + $0x18c] sm:$0xf]  ;;  %v10790_v63 = vcombine.low %v1559_v12, %v14033_v26  ;;  %v1305_v35 = vld [vmem:[#allocation2 + $0x180] sm:$0xe] }
 0x1cf   : > { %v5563_v55 = vmax.f32 %v5499_v30, 0.0  ;;  %v5502_v41 = vadd.f32 %v14060_v14, %v5431_v45  ;;  %v5429_v37 = vmul.f32 %v14045_v18, %v5193_v5  ;;  %2263 = vrot.lane.b32.xlu1 %v2195_v36, %s12177_s30  ;;  %v14082_v59 = vld [vmem:[#allocation2 + $0x190] sm:$0xf]  ;;  %v1221_v16 = vld [vmem:[#allocation2 + $0x108] sm:$0xf]  ;;  %v2548_v36 = vsel %vm2467_vm3, %v14023_v21, %v2547_v48  ;;  %vm17205_vm4 = vmmov %vm17203_vm2 }
 0x1d0   : > { %4468 = vrot.lane.b32.xlu0 %v4398_v47, %s12183_s18  ;;  %v1429_v4 = vld [vmem:[#allocation2 + $0x180] sm:$0xf]  ;;  %v11865_v52 = vld [vmem:[#allocation2 + $0x194] ss:$0 sps:$4 sm:$0x33]   ;;  %v3125_v30 = vrot.slane %v10726_v22, 1 }
 0x1d1   : > { %v5623_v13 = vadd.f32 %v5565_v39, %v5563_v55  ;;  %v5655_v40 = vmax.f32 %v5563_v55, %v5565_v39  ;;  %v5500_v31 = vadd.f32 %v14060_v14, %v5429_v37  ;;  %v14074_v6 = vpop.permute.xlu1 %3178  ;;  %v5566_v51 = vmax.f32 %v5502_v41, 0.0  ;;  %v1307_v17 = vld [vmem:[#allocation2 + $0x18c] sm:$0xe]  ;;  %v14095_v47 = vld [vmem:[#allocation2 + $0x188] ss:$0 sps:$4 sm:$0x11]  }
 0x1d2   : > { %v14079_v7 = vpop.permute.xlu0 %3176  ;;  %v3126_v45 = vrot.slane %v14055_v10, 1  ;;  %v3474_v12 = vrot.slane %v10788_v33, 2  ;;  %v3475_v54 = vrot.slane %v14070_v1, 2  ;;  %v3477_v24 = vrot.slane %v10790_v63, 2  ;;  %v1223_v19 = vld [vmem:[#allocation2 + $0x114] sm:$0xf] }
 0x1d3   : > { %v5687_v60 = vsel %vm17196_vm9, %v5623_v13, %v5655_v40  ;;  %v5564_v8 = vmax.f32 %v5500_v31, 0.0  ;;  %2265 = vrot.lane.b32.xlu1 %v2198_v38, %s12177_s30  ;;  %v10568_v55 = vcombine.low %v1305_v35, %v14077_v9  ;;  %v10570_v21 = vcombine.low %v1307_v17, %v14082_v59  ;;  %v14102_v48 = vld [vmem:[#allocation2 + $0x194] ss:$0 sps:$4 sm:$0x11]   ;;  %v1369_v41 = vld [vmem:[#allocation2 + $0x180] sm:$0xc] }
 0x1d4   : > { %5720 = vst.msk [vmem:[#allocation6 + $0x20] sm:$0xff] %vm17203_vm2, %v5687_v60  ;;  %4470 = vrot.lane.b32.xlu0 %v4401_v42, %s12183_s18  ;;  %v10667_v10 = vcombine.low %v1431_v46, %v14033_v26  ;;  %v12147_v37 = vld [vmem:[#allocation2 + $0x10c] sm:$0xf]  ;;  %v10666_v38 = vcombine.low %v1429_v4, %v14011_v34  ;;  %v14110_v22 = vld [vmem:[#allocation2 + $0x19c] sm:$0xf]  ;;  %v3478_v40 = vrot.slane %v11865_v52, 2  ;;  %v10632_v60 = vcombine.low %v1369_v41, %v14077_v9  ;;  %vm17209_vm2 = vmmov %vm17207_vm0 }
 0x1d5   : > { %v5624_v29 = vadd.f32 %v5566_v51, %v5564_v8  ;;  %v5656_v53 = vmax.f32 %v5564_v8, %v5566_v51  ;;  %v14097_v5 = vpop.permute.xlu1 %3530  ;;  %v10498_v42 = vcombine.low %v1221_v16, %v12147_v37  ;;  %v1686_v1 = vld [vmem:[#allocation2 + $0x198] sm:$0xe]  ;;  %v14114_v31 = vld [vmem:[#allocation2 + $0x188] ss:$0 sps:$4 sm:$0x33]   ;;  %v14116_v63 = vrot.slane %v10568_v55, 1 }
 0x1d6   : > { %v3529_v39 = vpop.permute.xlu0 %3528  ;;  %v2200_v26 = vrot.slane %v14095_v47, 1  ;;  %v14119_v46 = vrot.slane %v10570_v21, 1  ;;  %v2203_v35 = vrot.slane %v14102_v48, 1  ;;  %v10884_v34 = vcombine.low %v1686_v1, %v14110_v22  ;;  %v1688_v16 = vld [vmem:[#allocation2 + $0x1a4] sm:$0xe] }
 0x1d7   : > { %v5688_v20 = vsel %vm17204_vm7, %v5624_v29, %v5656_v53  ;;  %2618 = vrot.lane.b32.xlu1 %v2551_v28, %s12176_s29  ;;  %v4541_v51 = vsel %vm4484_vm10, %v10498_v42, %v13967_v43  ;;  %v12148_v8 = vld [vmem:[#allocation2 + $0x118] sm:$0xf]  ;;  %v3127_v52 = vsel %vm17200_vm5, %v3125_v30, %v3126_v45  ;;  %v14129_v17 = vld [vmem:[#allocation2 + $0x1a8] sm:$0xf]  ;;  %v3124_v43 = vsel %vm17206_vm6, %v14053_v57, %v3123_v2 }
 0x1d8   : > { %5721 = vst.msk [vmem:[#allocation6 + $0x28] sm:$0xff] %vm17205_vm4, %v5688_v20  ;;  %2616 = vrot.lane.b32.xlu0 %v2548_v36, %s12176_s29  ;;  %v10499_v4 = vcombine.low %v1223_v19, %v12148_v8  ;;  %v14131_v36 = vld [vmem:[#allocation2 + $0x1a0] ss:$0 sps:$4 sm:$0x11]   ;;  %v1750_v28 = vld [vmem:[#allocation2 + $0x198] sm:$0xc]  ;;  %v4619_v29 = vsel %vm4581_vm11, %v4541_v51, %v14021_v3  ;;  %v3476_v21 = vsel %vm2467_vm3, %v3474_v12, %v3475_v54  ;;  %vm17211_vm4 = vmmov %vm17200_vm5 }
 0x1d9   : > { %v14112_v13 = vpop.permute.xlu1 %3754  ;;  %v11869_v9 = vld [vmem:[#allocation2 + $0x1ac] ss:$0 sps:$4 sm:$0x11]   ;;  %v2553_v55 = vrot.slane %v14114_v31, 2  ;;  %v4684_v30 = vsel %vm4646_vm12, %v4619_v29, %v14051_v62  ;;  %v3479_v19 = vsel %vm2467_vm3, %v3477_v24, %v3478_v40  ;;  %v1624_v20 = vld [vmem:[#allocation2 + $0x1a4] sm:$0xf]  ;;  %v10886_v2 = vcombine.low %v1688_v16, %v14129_v17  ;;  %vm17212_vm5 = vmmov %vm17211_vm4 }
 0x1da   : > { %v3753_v33 = vpop.permute.xlu0 %3752  ;;  %v4748_v50 = vsel %vm598_vm13, %v4684_v30, %v14079_v7  ;;  %v4050_v57 = vrot.slane %v10884_v34, 1  ;;  %v14152_v41 = vrot.slane %v10632_v60, 2  ;;  %v4544_v62 = vsel %vm4484_vm10, %v10499_v4, %v13998_v23  ;;  %v1622_v54 = vld [vmem:[#allocation2 + $0x198] sm:$0xf]  ;;  %v1371_v24 = vld [vmem:[#allocation2 + $0x18c] sm:$0xc] }
 0x1db   : > { %2842 = vrot.lane.b32.xlu1 %v10667_v10, %s12178_s13  ;;  %v4813_v12 = vsel %vm4775_vm14, %v4748_v50, %v3529_v39  ;;  %v14158_v37 = vld [vmem:[#allocation2 + $0x194] ss:$0 sps:$4 sm:$0x33]   ;;  %v10827_v39 = vcombine.low %v1624_v20, %v14129_v17  ;;  %v10948_v40 = vcombine.low %v1750_v28, %v14110_v22  ;;  %v11870_v34 = vld [vmem:[#allocation2 + $0x1a0] ss:$0 sps:$4 sm:$0x33]  }
 0x1dc   : > { %2840 = vrot.lane.b32.xlu0 %v10666_v38, %s12178_s13  ;;  %v4621_v38 = vsel %vm4581_vm11, %v4544_v62, %v14018_v27  ;;  %v4878_v1 = vsel %vm17103_vm15, %v4813_v12, %v3753_v33  ;;  %v4051_v8 = vrot.slane %v14131_v36, 1  ;;  %v4054_v28 = vrot.slane %v11869_v9, 1  ;;  %v1752_v36 = vld [vmem:[#allocation2 + $0x1a4] sm:$0xc] }
 0x1dd   : > { %v4107_v53 = vpop.permute.xlu1 %4106  ;;  %v4686_v16 = vsel %vm4646_vm12, %v4621_v38, %v14048_v25  ;;  %vm17208_vm9 = vcmask 293888   ;;  %v10826_v25 = vcombine.low %v1622_v54, %v14110_v22  ;;  %v10634_v9 = vcombine.low %v1371_v24, %v14082_v59  ;;  %v11873_v59 = vld [vmem:[#allocation2 + $0x1ac] ss:$0 sps:$4 sm:$0x33]  }
 0x1de   : > { %v4105_v45 = vpop.permute.xlu0 %4104  ;;  %v4750_v27 = vsel %vm598_vm13, %v4686_v16, %v14074_v6  ;;  %v4402_v22 = vrot.slane %v10948_v40, 2  ;;  %v4403_v50 = vrot.slane %v11870_v34, 2  ;;  %vm17210_vm7 = vmmov %vm17208_vm9  ;;  %v4052_v54 = vsel %vm17212_vm5, %v4050_v57, %v4051_v8  ;;  %v11885_v48 = vld [vmem:[#allocation2 + $0x1ac] ss:$0 sps:$4 sm:$0x11]  }
 0x1df   : > { %v14144_v10 = vld [vmem:[#allocation6 + $0x20] ss:$2 sm:$0xff]  ;;  %v14146_v3 = vld [vmem:[#allocation6 + $0x21] ss:$2 sm:$0xff]  ;;  %3194 = vrot.lane.b32.xlu1 %v3127_v52, %s12180_s15  ;;  %v4943_v60 = vsel %vm4905_vm1, %v4878_v1, %v4105_v45  ;;  %v4053_v52 = vrot.slane %v10886_v2, 1  ;;  %v4815_v29 = vsel %vm4775_vm14, %v4750_v27, %v14097_v5  ;;  %v10950_v24 = vcombine.low %v1752_v36, %v14129_v17 }
 0x1e0   : > { %3192 = vrot.lane.b32.xlu0 %v3124_v43, %s12180_s15  ;;  %v5813_v7 = vadd.f32 %v14146_v3, %v14144_v10  ;;  %v4880_v6 = vsel %vm17103_vm15, %v4815_v29, %v14112_v13  ;;  %vm17213_vm6 = vcmask 122880   ;;  %v4404_v16 = vsel %vm2467_vm3, %v4402_v22, %v4403_v50  ;;  %v1434_v36 = vld [vmem:[#allocation2 + $0x19c] sm:$0xf]  ;;  %v1436_v22 = vld [vmem:[#allocation2 + $0x1a8] sm:$0xf] }
 0x1e1   : > { %v14167_v23 = vpop.permute.xlu1 %2251  ;;  %v4945_v45 = vsel %vm4905_vm1, %v4880_v6, %v4107_v53  ;;  %v4055_v13 = vsel %vm17211_vm4, %v4053_v52, %v4054_v28  ;;  %v4405_v8 = vrot.slane %v10950_v24, 2  ;;  %v4406_v27 = vrot.slane %v11873_v59, 2  ;;  %v1499_v50 = vld [vmem:[#allocation2 + $0x1a4] sm:$0xe]  ;;  %v1561_v59 = vld [vmem:[#allocation2 + $0x198] sm:$0xc] }
 0x1e2   : > { %v4457_v51 = vpop.permute.xlu0 %4456  ;;  %v14175_v4 = vmul.f32 0.25, %v5813_v7  ;;  %v2555_v7 = vrot.slane %v10634_v9, 2 }
 0x1e3   : > { %v5008_v33 = vsel %vm17207_vm0, %v4943_v60, %v4457_v51  ;;  %3546 = vrot.lane.b32.xlu1 %v3479_v19, %s12181_s16  ;;  %vm17214_vm0 = vmmov %vm17211_vm4 }
 0x1e4   : > { %3544 = vrot.lane.b32.xlu0 %v3476_v21, %s12181_s16  ;;  %11355 = vmatprep.mubr.msk.bf16.mxu0 %vm17208_vm9, %v5008_v33  ;;  %v11222_v43 = vpack.c.bf16 %v14175_v4, %v14175_v4  ;;  %v2556_v21 = vrot.slane %v14158_v37, 2  ;;  %v2201_v17 = vsel %vm17214_vm0, %v14116_v63, %v2200_v26  ;;  %v1497_v63 = vld [vmem:[#allocation2 + $0x198] sm:$0xe]  ;;  %vm17215_vm9 = vmmov %vm17214_vm0 }
 0x1e5   : > { %v14190_v30 = vpop.permute.xlu1 %2253  ;;  %v2204_v26 = vsel %vm17215_vm9, %v14119_v46, %v2203_v35  ;;  %v10728_v24 = vcombine.low %v1497_v63, %v1434_v36  ;;  %vm17217_vm4 = vmmov %vm17209_vm2 }
 0x1e6   : > { %v4459_v5 = vpop.permute.xlu0 %4458  ;;  %v5927_v19 = vrot.slane %v11222_v43, 7  ;;  %v1225_v43 = vld [vmem:[#allocation2 + $0x120] sm:$0xf]  ;;  %vm17220_vm9 = vmmov %vm17209_vm2 }
 0x1e7   : > { %v5010_v20 = vsel %vm17209_vm2, %v4945_v45, %v4459_v5  ;;  %3770 = vrot.lane.b32.xlu1 %v10827_v39, %s12179_s14  ;;  %v3128_v31 = vrot.slane %v10728_v24, 1  ;;  %v14271_v24 = vld [vmem:[#allocation2 + $0x19c] sm:$0xf] }
 0x1e8   : > { %3768 = vrot.lane.b32.xlu0 %v10826_v25, %s12179_s14  ;;  %v11333_v2 = vpop.f32.mrf.mxu0  ;;  %11356 = vmatmul.mubr.msk.bf16.gmra.mxu0 %vm17210_vm7, %v5010_v20  ;;  %v5928_v62 = vrot.slane %v5927_v19, 4  ;;  %5993 = vst.msk [vmem:[#allocation3 + $0x20] sm:$0xe] %vm5988_vm8, %v5927_v19  ;;  %v4407_v19 = vsel %vm2467_vm3, %v4405_v8, %v4406_v27  ;;  %v1433_v20 = vld [vmem:[#allocation2 + $0x198] sm:$0xf]  ;;  %vm17216_vm7 = vcmask 392192  }
 0x1e9   : > { %v5434_v53 = vmul.f32 %v14045_v18, %v11333_v2  ;;  %v14202_v12 = vpop.permute.xlu1 %2606  ;;  %v10668_v37 = vcombine.low %v1433_v20, %v1434_v36  ;;  %vm17218_vm5 = vmmov %vm17216_vm7 }
 0x1ea   : > { %v14206_v38 = vpop.permute.xlu0 %2604  ;;  %v5206_v1 = vpop.f32.mrf.mxu0  ;;  %5994 = vst.msk [vmem:[#allocation3 + $0x24] sm:$0x1] %vm17213_vm6, %v5928_v62  ;;  %vm17219_vm6 = vmmov %vm17214_vm0 }
 0x1eb   : > { %v5505_v39 = vadd.f32 %v14060_v14, %v5434_v53  ;;  %v5432_v40 = vmul.f32 %v14045_v18, %v5206_v1  ;;  %4122 = vrot.lane.b32.xlu1 %v4055_v13, %s12182_s17  ;;  %v11883_v13 = vld [vmem:[#allocation2 + $0x1a0] ss:$0 sps:$4 sm:$0x11]   ;;  %v2557_v53 = vsel %vm2467_vm3, %v2555_v7, %v2556_v21  ;;  %v10730_v1 = vcombine.low %v1499_v50, %v1436_v22 }
 0x1ec   : > { %4120 = vrot.lane.b32.xlu0 %v4052_v54, %s12182_s17  ;;  %v11334_v34 = vpop.f32.mrf.mxu0  ;;  %v1435_v54 = vld [vmem:[#allocation2 + $0x1a4] sm:$0xf]  ;;  %v14262_v50 = vld [vmem:[#allocation2 + $0x1c0] sm:$0xf] }
 0x1ed   : > { %v5503_v57 = vadd.f32 %v14060_v14, %v5432_v40  ;;  %v5435_v60 = vmul.f32 %v14045_v18, %v11334_v34  ;;  %v14220_v51 = vpop.permute.xlu1 %2830  ;;  %v5569_v28 = vmax.f32 %v5505_v39, 0.0  ;;  %v1563_v39 = vld [vmem:[#allocation2 + $0x1a4] sm:$0xc]  ;;  %v10669_v7 = vcombine.low %v1435_v54, %v1436_v22  ;;  %v1627_v54 = vld [vmem:[#allocation2 + $0x1b4] sm:$0xf] }
 0x1ee   : > { %v14222_v33 = vpop.permute.xlu0 %2828  ;;  %v5209_v52 = vpop.f32.mrf.mxu0 }
 0x1ef   : > { %v5567_v29 = vmax.f32 %v5503_v57, 0.0  ;;  %v5506_v25 = vadd.f32 %v14060_v14, %v5435_v60  ;;  %v5433_v47 = vmul.f32 %v14045_v18, %v5209_v52  ;;  %2267 = vrot.lane.b32.xlu1 %v2201_v17, %s12177_s30  ;;  %v2554_v17 = vsel %vm2467_vm3, %v14152_v41, %v2553_v55  ;;  %v11887_v57 = vld [vmem:[#allocation2 + $0x1a0] ss:$0 sps:$4 sm:$0x33]   ;;  %v12149_v60 = vld [vmem:[#allocation2 + $0x124] sm:$0xf] }
 0x1f0   : > { %4472 = vrot.lane.b32.xlu0 %v4404_v16, %s12183_s18  ;;  %v10500_v8 = vcombine.low %v1225_v43, %v12149_v60  ;;  %v11889_v52 = vld [vmem:[#allocation2 + $0x1ac] ss:$0 sps:$4 sm:$0x33]   ;;  %v3129_v55 = vrot.slane %v11883_v13, 1  ;;  %v3131_v41 = vrot.slane %v10730_v1, 1 }
 0x1f1   : > { %v5625_v6 = vadd.f32 %v5569_v28, %v5567_v29  ;;  %v5657_v9 = vmax.f32 %v5567_v29, %v5569_v28  ;;  %v5504_v45 = vadd.f32 %v14060_v14, %v5433_v47  ;;  %v14233_v5 = vpop.permute.xlu1 %3182  ;;  %v5570_v35 = vmax.f32 %v5506_v25, 0.0  ;;  %v1227_v25 = vld [vmem:[#allocation2 + $0x12c] sm:$0xf]  ;;  %v1692_v13 = vld [vmem:[#allocation2 + $0x1bc] sm:$0xe] }
 0x1f2   : > { %v14236_v2 = vpop.permute.xlu0 %3180  ;;  %v10792_v28 = vcombine.low %v1561_v59, %v1434_v36  ;;  %v10794_v29 = vcombine.low %v1563_v39, %v1436_v22  ;;  %v3132_v47 = vrot.slane %v11885_v48, 1  ;;  %v4547_v36 = vsel %vm4484_vm10, %v10500_v8, %v14167_v23  ;;  %v1309_v1 = vld [vmem:[#allocation2 + $0x198] sm:$0xe] }
 0x1f3   : > { %v5689_v46 = vsel %vm17209_vm2, %v5625_v6, %v5657_v9  ;;  %v5568_v62 = vmax.f32 %v5504_v45, 0.0  ;;  %2269 = vrot.lane.b32.xlu1 %v2204_v26, %s12177_s30  ;;  %v3481_v6 = vrot.slane %v11887_v57, 2  ;;  %v3484_v45 = vrot.slane %v11889_v52, 2  ;;  %v1754_v57 = vld [vmem:[#allocation2 + $0x1b0] sm:$0xc] }
 0x1f4   : > { %5722 = vst.msk [vmem:[#allocation6 + $0x30] sm:$0xff] %vm17216_vm7, %v5689_v46  ;;  %4474 = vrot.lane.b32.xlu0 %v4407_v19, %s12183_s18  ;;  %v3480_v43 = vrot.slane %v10792_v28, 2  ;;  %v3483_v9 = vrot.slane %v10794_v29, 2  ;;  %v12150_v19 = vld [vmem:[#allocation2 + $0x130] sm:$0xf]  ;;  %v3133_v22 = vsel %vm17219_vm6, %v3131_v41, %v3132_v47  ;;  %v4623_v48 = vsel %vm4581_vm11, %v4547_v36, %v14206_v38  ;;  %vm17222_vm7 = vmmov %vm17217_vm4 }
 0x1f5   : > { %v5626_v40 = vadd.f32 %v5570_v35, %v5568_v62  ;;  %v5658_v34 = vmax.f32 %v5568_v62, %v5570_v35  ;;  %v14245_v16 = vpop.permute.xlu1 %3534  ;;  %v10501_v20 = vcombine.low %v1227_v25, %v12150_v19  ;;  %v3130_v46 = vsel %vm17214_vm0, %v3128_v31, %v3129_v55  ;;  %v14267_v35 = vld [vmem:[#allocation2 + $0x1b0] sm:$0xf]  ;;  %v11893_v52 = vld [vmem:[#allocation2 + $0x1c4] ss:$0 sps:$4 sm:$0x11]   ;;  %vm17225_vm6 = vmmov %vm17214_vm0 }
 0x1f6   : > { %v3533_v27 = vpop.permute.xlu0 %3532  ;;  %v1690_v62 = vld [vmem:[#allocation2 + $0x1b0] sm:$0xe]  ;;  %v4688_v23 = vsel %vm4646_vm12, %v4623_v48, %v14222_v33  ;;  %v10890_v33 = vcombine.low %v1692_v13, %v14262_v50  ;;  %v11892_v25 = vld [vmem:[#allocation2 + $0x1b8] ss:$0 sps:$4 sm:$0x11]   ;;  %v10828_v47 = vcombine.low %v14267_v35, %v1627_v54  ;;  %vm17221_vm2 = vcmask 293888  }
 0x1f7   : > { %v5690_v21 = vsel %vm17217_vm4, %v5626_v40, %v5658_v34  ;;  %2622 = vrot.lane.b32.xlu1 %v2557_v53, %s12176_s29  ;;  %v4752_v38 = vsel %vm598_vm13, %v4688_v23, %v14236_v2  ;;  %v3482_v34 = vsel %vm2467_vm3, %v3480_v43, %v3481_v6  ;;  %v4550_v60 = vsel %vm4484_vm10, %v10501_v20, %v14190_v30  ;;  %v11896_v36 = vld [vmem:[#allocation2 + $0x1a0] ss:$0 sps:$4 sm:$0x11]   ;;  %vm17223_vm4 = vmmov %vm17221_vm2 }
 0x1f8   : > { %5723 = vst.msk [vmem:[#allocation6 + $0x38] sm:$0xff] %vm17218_vm5, %v5690_v21  ;;  %2620 = vrot.lane.b32.xlu0 %v2554_v17, %s12176_s29  ;;  %v3485_v17 = vsel %vm2467_vm3, %v3483_v9, %v3484_v45  ;;  %v4817_v8 = vsel %vm4775_vm14, %v4752_v38, %v3533_v27  ;;  %v10888_v30 = vcombine.low %v1690_v62, %v1627_v54  ;;  %v11894_v45 = vld [vmem:[#allocation2 + $0x1b8] ss:$0 sps:$4 sm:$0x33]   ;;  %v4059_v19 = vrot.slane %v10890_v33, 1  ;;  %vm17224_vm5 = vmmov %vm17214_vm0 }
 0x1f9   : > { %v14255_v63 = vpop.permute.xlu1 %3758  ;;  %v10572_v27 = vcombine.low %v1309_v1, %v14271_v24  ;;  %v10952_v9 = vcombine.low %v1754_v57, %v1627_v54  ;;  %v4060_v20 = vrot.slane %v11893_v52, 1  ;;  %v4057_v62 = vrot.slane %v11892_v25, 1  ;;  %v11899_v54 = vld [vmem:[#allocation2 + $0x1ac] ss:$0 sps:$4 sm:$0x11]  }
 0x1fa   : > { %v3757_v26 = vpop.permute.xlu0 %3756  ;;  %v4056_v35 = vrot.slane %v10888_v30, 1  ;;  %v1373_v57 = vld [vmem:[#allocation2 + $0x198] sm:$0xc]  ;;  %v11897_v25 = vld [vmem:[#allocation2 + $0x1c4] ss:$0 sps:$4 sm:$0x33]  }
 0x1fb   : > { %2846 = vrot.lane.b32.xlu1 %v10669_v7, %s12178_s13  ;;  %v4625_v7 = vsel %vm4581_vm11, %v4550_v60, %v14202_v12  ;;  %v4882_v28 = vsel %vm17103_vm15, %v4817_v8, %v3757_v26  ;;  %v2205_v60 = vrot.slane %v10572_v27, 1  ;;  %v2206_v8 = vrot.slane %v11896_v36, 1  ;;  %v11901_v27 = vld [vmem:[#allocation2 + $0x1a0] ss:$0 sps:$4 sm:$0x33]  }
 0x1fc   : > { %2844 = vrot.lane.b32.xlu0 %v10668_v37, %s12178_s13  ;;  %v1628_v37 = vld [vmem:[#allocation2 + $0x1bc] sm:$0xf]  ;;  %v4690_v31 = vsel %vm4646_vm12, %v4625_v7, %v14220_v51  ;;  %vm17226_vm0 = vcmask 122880   ;;  %v11903_v36 = vld [vmem:[#allocation2 + $0x1ac] ss:$0 sps:$4 sm:$0x33]  }
 0x1fd   : > { %v4111_v59 = vpop.permute.xlu1 %4110  ;;  %v4754_v12 = vsel %vm598_vm13, %v4690_v31, %v14233_v5  ;;  %v10829_v6 = vcombine.low %v1628_v37, %v14262_v50  ;;  %v1311_v5 = vld [vmem:[#allocation2 + $0x1a4] sm:$0xe] }
 0x1fe   : > { %v4109_v53 = vpop.permute.xlu0 %4108  ;;  %v4819_v51 = vsel %vm4775_vm14, %v4754_v12, %v14245_v16  ;;  %v1375_v37 = vld [vmem:[#allocation2 + $0x1a4] sm:$0xc] }
 0x1ff   : > { %v14273_v39 = vld [vmem:[#allocation6 + $0x30] ss:$2 sm:$0xff]  ;;  %v14275_v40 = vld [vmem:[#allocation6 + $0x31] ss:$2 sm:$0xff]  ;;  %3198 = vrot.lane.b32.xlu1 %v3133_v22, %s12180_s15  ;;  %v4947_v55 = vsel %vm4905_vm1, %v4882_v28, %v4109_v53  ;;  %v14312_v22 = vld [vmem:[#allocation2 + $0x1a8] sm:$0xf]  ;;  %v4884_v48 = vsel %vm17103_vm15, %v4819_v51, %v14255_v63  ;;  %v4058_v28 = vsel %vm17225_vm6, %v4056_v35, %v4057_v62 }
 0x200   : > { %3196 = vrot.lane.b32.xlu0 %v3130_v46, %s12180_s15  ;;  %v5814_v2 = vadd.f32 %v14275_v40, %v14273_v39  ;;  %v4949_v16 = vsel %vm4905_vm1, %v4884_v48, %v4111_v59  ;;  %v1756_v53 = vld [vmem:[#allocation2 + $0x1bc] sm:$0xc]  ;;  %v10574_v33 = vcombine.low %v1311_v5, %v14312_v22  ;;  %v4061_v59 = vsel %vm17224_vm5, %v4059_v19, %v4060_v20 }
 0x201   : > { %v14294_v29 = vpop.permute.xlu1 %2255  ;;  %v10954_v30 = vcombine.low %v1756_v53, %v14262_v50  ;;  %v2559_v62 = vrot.slane %v11901_v27, 2 }
 0x202   : > { %v4461_v41 = vpop.permute.xlu0 %4460  ;;  %v14301_v43 = vmul.f32 0.25, %v5814_v2 }
 0x203   : > { %v5012_v26 = vsel %vm17220_vm9, %v4947_v55, %v4461_v41  ;;  %3550 = vrot.lane.b32.xlu1 %v3485_v17, %s12181_s16  ;;  %v4409_v17 = vrot.slane %v11894_v45, 2  ;;  %v10636_v41 = vcombine.low %v1373_v57, %v14271_v24  ;;  %vm17227_vm9 = vmmov %vm17224_vm5  ;;  %v2208_v45 = vrot.slane %v10574_v33, 1  ;;  %v14355_v57 = vld [vmem:[#allocation2 + $0x1b4] sm:$0xf] }
 0x204   : > { %3548 = vrot.lane.b32.xlu0 %v3482_v34, %s12181_s16  ;;  %11359 = vmatprep.mubr.msk.bf16.mxu0 %vm17221_vm2, %v5012_v26  ;;  %v11223_v13 = vpack.c.bf16 %v14301_v43, %v14301_v43  ;;  %v4408_v34 = vrot.slane %v10952_v9, 2  ;;  %v10638_v26 = vcombine.low %v1375_v37, %v14312_v22  ;;  %v2207_v9 = vsel %vm17227_vm9, %v2205_v60, %v2206_v8  ;;  %vm17228_vm2 = vmmov %vm17224_vm5 }
 0x205   : > { %v14318_v46 = vpop.permute.xlu1 %2257  ;;  %v2209_v24 = vrot.slane %v11899_v54, 1  ;;  %v4411_v5 = vrot.slane %v10954_v30, 2  ;;  %v2558_v35 = vrot.slane %v10636_v41, 2  ;;  %v2562_v33 = vrot.slane %v11903_v36, 2  ;;  %v1229_v41 = vld [vmem:[#allocation2 + $0x138] sm:$0xf]  ;;  %vm17230_vm5 = vmmov %vm17222_vm7 }
 0x206   : > { %v4463_v23 = vpop.permute.xlu0 %4462  ;;  %v5929_v1 = vrot.slane %v11223_v13, 7  ;;  %v4412_v13 = vrot.slane %v11897_v25, 2  ;;  %v1501_v25 = vld [vmem:[#allocation2 + $0x1b0] sm:$0xe] }
 0x207   : > { %v5014_v38 = vsel %vm17222_vm7, %v4949_v16, %v4463_v23  ;;  %3774 = vrot.lane.b32.xlu1 %v10829_v6, %s12179_s14  ;;  %v4410_v6 = vsel %vm2467_vm3, %v4408_v34, %v4409_v17  ;;  %v11904_v16 = vld [vmem:[#allocation3 + $0x20] sm:$0x3c]   ;;  %v2210_v34 = vsel %vm17228_vm2, %v2208_v45, %v2209_v24  ;;  %v2561_v17 = vrot.slane %v10638_v26, 2  ;;  %v11909_v26 = vld [vmem:[#allocation2 + $0x1b8] ss:$0 sps:$4 sm:$0x11]  }
 0x208   : > { %3772 = vrot.lane.b32.xlu0 %v10828_v47, %s12179_s14  ;;  %v11337_v63 = vpop.f32.mrf.mxu0  ;;  %11360 = vmatmul.mubr.msk.bf16.gmra.mxu0 %vm17223_vm4, %v5014_v38  ;;  %v5930_v52 = vrot.slane %v5929_v1, 4  ;;  %5995 = vst.msk [vmem:[#allocation3 + $0x28] sm:$0xe] %vm5988_vm8, %v5929_v1  ;;  %v1440_v38 = vld [vmem:[#allocation2 + $0x1c0] sm:$0xf]  ;;  %v4413_v37 = vsel %vm2467_vm3, %v4411_v5, %v4412_v13  ;;  %v7142_v30 = vrot.slane %v11904_v16, 2  ;;  %v10732_v13 = vcombine.low %v1501_v25, %v14355_v57 }
 0x209   : > { %v5438_v2 = vmul.f32 %v14045_v18, %v11337_v63  ;;  %v14329_v7 = vpop.permute.xlu1 %2610  ;;  %vm17229_vm4 = vcmask 392192   ;;  %v1567_v24 = vld [vmem:[#allocation2 + $0x1bc] sm:$0xc] }
 0x20a   : > { %v14333_v31 = vpop.permute.xlu0 %2608  ;;  %v5222_v55 = vpop.f32.mrf.mxu0  ;;  %5996 = vst.msk [vmem:[#allocation3 + $0x2c] sm:$0x1] %vm17226_vm0, %v5930_v52  ;;  %v1503_v52 = vld [vmem:[#allocation2 + $0x1bc] sm:$0xe]  ;;  %vm17231_vm6 = vmmov %vm17229_vm4 }
 0x20b   : > { %v5509_v47 = vadd.f32 %v14060_v14, %v5438_v2  ;;  %v5436_v12 = vmul.f32 %v14045_v18, %v5222_v55  ;;  %4126 = vrot.lane.b32.xlu1 %v4061_v59, %s12182_s17  ;;  %v11911_v55 = vld [vmem:[#allocation2 + $0x1c4] ss:$0 sps:$4 sm:$0x11]   ;;  %v10734_v45 = vcombine.low %v1503_v52, %v1440_v38  ;;  %v11913_v52 = vld [vmem:[#allocation2 + $0x1b8] ss:$0 sps:$4 sm:$0x33]   ;;  %vm17232_vm0 = vmmov %vm17228_vm2 }
 0x20c   : > { %4124 = vrot.lane.b32.xlu0 %v4058_v28, %s12182_s17  ;;  %v11338_v50 = vpop.f32.mrf.mxu0  ;;  %vm17233_vm9 = vmmov %vm17232_vm0 }
 0x20d   : > { %v5507_v51 = vadd.f32 %v14060_v14, %v5436_v12  ;;  %v5439_v19 = vmul.f32 %v14045_v18, %v11338_v50  ;;  %v14346_v20 = vpop.permute.xlu1 %2834  ;;  %v5573_v23 = vmax.f32 %v5509_v47, 0.0  ;;  %v2560_v50 = vsel %vm2467_vm3, %v2558_v35, %v2559_v62  ;;  %vm17234_vm2 = vmmov %vm17230_vm5 }
 0x20e   : > { %v14348_v48 = vpop.permute.xlu0 %2832  ;;  %v5225_v22 = vpop.f32.mrf.mxu0  ;;  %v10798_v62 = vcombine.low %v1567_v24, %v1440_v38  ;;  %v1694_v24 = vld [vmem:[#allocation2 + $0x1c8] sm:$0xe] }
 0x20f   : > { %v5571_v53 = vmax.f32 %v5507_v51, 0.0  ;;  %v5510_v1 = vadd.f32 %v14060_v14, %v5439_v19  ;;  %v5437_v54 = vmul.f32 %v14045_v18, %v5225_v22  ;;  %2271 = vrot.lane.b32.xlu1 %v2207_v9, %s12177_s30  ;;  %v1439_v9 = vld [vmem:[#allocation2 + $0x1bc] sm:$0xf]  ;;  %v1565_v22 = vld [vmem:[#allocation2 + $0x1b0] sm:$0xc] }
 0x210   : > { %4476 = vrot.lane.b32.xlu0 %v4410_v6, %s12183_s18  ;;  %v2563_v6 = vsel %vm2467_vm3, %v2561_v17, %v2562_v33  ;;  %v10671_v35 = vcombine.low %v1439_v9, %v1440_v38  ;;  %v3137_v33 = vrot.slane %v10734_v45, 1  ;;  %v3489_v38 = vrot.slane %v10798_v62, 2  ;;  %v14393_v45 = vld [vmem:[#allocation2 + $0x1cc] sm:$0xf] }
 0x211   : > { %v5627_v63 = vadd.f32 %v5573_v23, %v5571_v53  ;;  %v5659_v59 = vmax.f32 %v5571_v53, %v5573_v23  ;;  %v5508_v60 = vadd.f32 %v14060_v14, %v5437_v54  ;;  %v14358_v8 = vpop.permute.xlu1 %3186  ;;  %v11905_v18 = vld [vmem:[#allocation3 + $0x28] sm:$0x3c]   ;;  %v5574_v2 = vmax.f32 %v5510_v1, 0.0  ;;  %v1437_v14 = vld [vmem:[#allocation2 + $0x1b0] sm:$0xf] }
 0x212   : > { %v14361_v28 = vpop.permute.xlu0 %3184  ;;  %v7143_v12 = vrot.slane %v11905_v18, 2  ;;  %v11915_v23 = vld [vmem:[#allocation2 + $0x1c4] ss:$0 sps:$4 sm:$0x33]   ;;  %v12151_v1 = vld [vmem:[#allocation2 + $0x13c] sm:$0xf]  ;;  %v10670_v17 = vcombine.low %v1437_v14, %v14355_v57  ;;  %v10796_v18 = vcombine.low %v1565_v22, %v14355_v57 }
 0x213   : > { %v5691_v27 = vsel %vm17222_vm7, %v5627_v63, %v5659_v59  ;;  %v5572_v47 = vmax.f32 %v5508_v60, 0.0  ;;  %2273 = vrot.lane.b32.xlu1 %v2210_v34, %s12177_s30  ;;  %v10502_v54 = vcombine.low %v1229_v41, %v12151_v1  ;;  %v1231_v34 = vld [vmem:[#allocation2 + $0x144] sm:$0xf]  ;;  %v3138_v63 = vrot.slane %v11911_v55, 1  ;;  %v12152_v41 = vld [vmem:[#allocation2 + $0x148] sm:$0xf] }
 0x214   : > { %5724 = vst.msk [vmem:[#allocation6 + $0x40] sm:$0xff] %vm17229_vm4, %v5691_v27  ;;  %4478 = vrot.lane.b32.xlu0 %v4413_v37, %s12183_s18  ;;  %v11142_v5 = vcombine.low %v7142_v30, %v7143_v12  ;;  %v3134_v60 = vrot.slane %v10732_v13, 1  ;;  %v3135_v37 = vrot.slane %v11909_v26, 1  ;;  %v3490_v30 = vrot.slane %v11915_v23, 2  ;;  %v1696_v12 = vld [vmem:[#allocation2 + $0x1d4] sm:$0xe]  ;;  %vm17236_vm4 = vmmov %vm17234_vm2 }
 0x215   : > { %v5628_v36 = vadd.f32 %v5574_v2, %v5572_v47  ;;  %v5660_v51 = vmax.f32 %v5572_v47, %v5574_v2  ;;  %v14369_v19 = vpop.permute.xlu1 %3538  ;;  %v4553_v25 = vsel %vm4484_vm10, %v10502_v54, %v14294_v29  ;;  %v10503_v27 = vcombine.low %v1231_v34, %v12152_v41  ;;  %v14386_v47 = vld [vmem:[#allocation2 + $0x1d8] sm:$0xf]  ;;  %v1630_v13 = vld [vmem:[#allocation2 + $0x1c8] sm:$0xf]  ;;  %s12185_s30 = smov 64  }
 0x216   : > { %v3537_v16 = vpop.permute.xlu0 %3536  ;;  %11166 = vmatprep.mubr.msk.bf16.mxu1 %vm598_vm13, %v11142_v5  ;;  %v3139_v55 = vsel %vm17232_vm0, %v3137_v33, %v3138_v63  ;;  %v4627_v57 = vsel %vm4581_vm11, %v4553_v25, %v14333_v31  ;;  %v3136_v26 = vsel %vm17233_vm9, %v3134_v60, %v3135_v37  ;;  %v3491_v31 = vsel %vm2467_vm3, %v3489_v38, %v3490_v30  ;;  %v11919_v62 = vld [vmem:[#allocation2 + $0x1dc] ss:$0 sps:$4 sm:$0x11]   ;;  %v11918_v33 = vld [vmem:[#allocation2 + $0x1d0] ss:$0 sps:$4 sm:$0x11]  }
 0x217   : > { %v5692_v53 = vsel %vm17230_vm5, %v5628_v36, %v5660_v51  ;;  %2626 = vrot.lane.b32.xlu1 %v2563_v6, %s12176_s29  ;;  %v3487_v6 = vrot.slane %v11913_v52, 2  ;;  %v4692_v29 = vsel %vm4646_vm12, %v4627_v57, %v14348_v48  ;;  %v10894_v22 = vcombine.low %v1696_v12, %v14386_v47  ;;  %v1758_v52 = vld [vmem:[#allocation2 + $0x1c8] sm:$0xc]  ;;  %v11921_v12 = vld [vmem:[#allocation2 + $0x1dc] ss:$0 sps:$4 sm:$0x33]  }
 0x218   : > { %5725 = vst.msk [vmem:[#allocation6 + $0x48] sm:$0xff] %vm17231_vm6, %v5692_v53  ;;  %2624 = vrot.lane.b32.xlu0 %v2560_v50, %s12176_s29  ;;  %v3486_v50 = vrot.slane %v10796_v18, 2  ;;  %v4756_v5 = vsel %vm598_vm13, %v4692_v29, %v14361_v28  ;;  %v4556_v48 = vsel %vm4484_vm10, %v10503_v27, %v14318_v46  ;;  %vm17235_vm7 = vcmask 293888   ;;  %v11920_v29 = vld [vmem:[#allocation2 + $0x1d0] ss:$0 sps:$4 sm:$0x33]   ;;  %vm17238_vm6 = vmmov %vm17232_vm0 }
 0x219   : > { %v14378_v59 = vpop.permute.xlu1 %3762  ;;  %v4821_v53 = vsel %vm4775_vm14, %v4756_v5, %v3537_v16  ;;  %v4629_v1 = vsel %vm4581_vm11, %v4556_v48, %v14329_v7  ;;  %v1760_v16 = vld [vmem:[#allocation2 + $0x1d4] sm:$0xc]  ;;  %v10830_v7 = vcombine.low %v1630_v13, %v14393_v45  ;;  %v4065_v25 = vrot.slane %v10894_v22, 1  ;;  %vm17237_vm5 = vmmov %vm17235_vm7  ;;  %v14459_v48 = vld [vmem:[%s17081_s2] ss:$0 sm:$0xff]  ;;  %s12184_s29 = smov 48  }
 0x21a   : > { %v3761_v2 = vpop.permute.xlu0 %3760  ;;  %v3488_v46 = vsel %vm2467_vm3, %v3486_v50, %v3487_v6  ;;  %v4694_v63 = vsel %vm4646_vm12, %v4629_v1, %v14346_v20  ;;  %v4066_v27 = vrot.slane %v11919_v62, 1  ;;  %v4063_v6 = vrot.slane %v11918_v33, 1  ;;  %v11922_v33 = vld [vmem:[#allocation3] sm:$0x1e]  }
 0x21b   : > { %2850 = vrot.lane.b32.xlu1 %v10671_v35, %s12178_s13  ;;  %v1632_v35 = vld [vmem:[#allocation2 + $0x1d4] sm:$0xf]  ;;  %v4886_v54 = vsel %vm17103_vm15, %v4821_v53, %v3761_v2  ;;  %v11972_v2 = vld [vmem:[%s17083_s4 + $0x38] sm:$0xff]   ;;  %v4758_v38 = vsel %vm598_vm13, %v4694_v63, %v14358_v8  ;;  %v4418_v22 = vrot.slane %v11921_v12, 2  ;;  %v4415_v1 = vrot.slane %v11920_v29, 2 }
 0x21c   : > { %2848 = vrot.lane.b32.xlu0 %v10670_v17, %s12178_s13  ;;  %v10892_v17 = vcombine.low %v1694_v24, %v14393_v45  ;;  %v10831_v20 = vcombine.low %v1632_v35, %v14386_v47  ;;  %v4823_v41 = vsel %vm4775_vm14, %v4758_v38, %v14369_v19  ;;  %v10956_v19 = vcombine.low %v1758_v52, %v14393_v45  ;;  %v14475_v63 = vld [vmem:[%s17082_s3] ss:$0 sm:$0xff]  ;;  %v11925_v12 = vld [vmem:[#allocation3 + $0x8] sm:$0x3c]  }
 0x21d   : > { %v4115_v14 = vpop.permute.xlu1 %4114  ;;  %v4888_v57 = vsel %vm17103_vm15, %v4823_v41, %v14378_v59  ;;  %7571 = vmatpush1.bf16.msra.mxu1 %v11972_v2  ;;  %v4067_v45 = vsel %vm17238_vm6, %v4065_v25, %v4066_v27  ;;  %vm17239_vm9 = vcmask 122880   ;;  %v6342_v27 = vrot.slane %v11922_v33, 1  ;;  %v12155_v33 = vld [vmem:[#allocation2 + $0x154] sm:$0xf]  ;;  %vm17244_vm6 = vmmov %vm17234_vm2 }
 0x21e   : > { %v4113_v9 = vpop.permute.xlu0 %4112  ;;  %v4062_v50 = vrot.slane %v10892_v17, 1  ;;  %7572 = vmatprep.subr.bf16.mxu1 %v17101_v0  ;;  %v4414_v62 = vrot.slane %v10956_v19, 2  ;;  %v11924_v19 = vld [vmem:[#allocation3] sm:$0x3c]  }
 0x21f   : > { %v14395_v36 = vld [vmem:[#allocation6 + $0x40] ss:$2 sm:$0xff]  ;;  %v14397_v51 = vld [vmem:[#allocation6 + $0x41] ss:$2 sm:$0xff]  ;;  %3202 = vrot.lane.b32.xlu1 %v3139_v55, %s12180_s15  ;;  %v4951_v37 = vsel %vm4905_vm1, %v4886_v54, %v4113_v9  ;;  %v10958_v55 = vcombine.low %v1760_v16, %v14386_v47  ;;  %v11975_v9 = vld [vmem:[%s17083_s4 + $0x30] sm:$0xff]   ;;  %v4953_v47 = vsel %vm4905_vm1, %v4888_v57, %v4115_v14 }
 0x220   : > { %v5815_v23 = vadd.f32 %v14397_v51, %v14395_v36  ;;  %3200 = vrot.lane.b32.xlu0 %v3136_v26, %s12180_s15  ;;  %v4064_v35 = vsel %vm17232_vm0, %v4062_v50, %v4063_v6  ;;  %v11977_v54 = vld [vmem:[%s17083_s4 + $0x28] sm:$0xff]   ;;  %vm17245_vm0 = vcmask 293888  }
 0x221   : > { %v14415_v34 = vpop.permute.xlu1 %2259  ;;  %v4417_v13 = vrot.slane %v10958_v55, 2  ;;  %7573 = vmatpush1.bf16.msra.mxu1 %v11975_v9  ;;  %v11923_v16 = vld [vmem:[#allocation3 + $0x8] sm:$0x1e]  }
 0x222   : > { %v14421_v60 = vmul.f32 0.25, %v5815_v23  ;;  %v4465_v18 = vpop.permute.xlu0 %4464  ;;  %7574 = vmatprep.subr.bf16.mxu1 %v17101_v0  ;;  %v6343_v55 = vrot.slane %v11923_v16, 1 }
 0x223   : > { %v5016_v30 = vsel %vm17234_vm2, %v4951_v37, %v4465_v18  ;;  %3554 = vrot.lane.b32.xlu1 %v3491_v31, %s12181_s16  ;;  %v4419_v52 = vsel %vm2467_vm3, %v4417_v13, %v4418_v22  ;;  %v6470_v22 = vrot.slane %v11924_v19, 2 }
 0x224   : > { %3552 = vrot.lane.b32.xlu0 %v3488_v46, %s12181_s16  ;;  %11363 = vmatprep.mubr.msk.bf16.mxu0 %vm17235_vm7, %v5016_v30  ;;  %v11224_v8 = vpack.c.bf16 %v14421_v60, %v14421_v60  ;;  %vm17240_vm7 = vcmask 392192  }
 0x225   : > { %v14442_v26 = vpop.permute.xlu1 %2261  ;;  %7575 = vmatpush1.bf16.msra.mxu1 %v11977_v54  ;;  %v11980_v54 = vld [vmem:[%s17083_s4 + $0x20] sm:$0xff]  }
 0x226   : > { %v4467_v24 = vpop.permute.xlu0 %4466  ;;  %v5931_v5 = vrot.slane %v11224_v8, 7  ;;  %7576 = vmatprep.subr.bf16.mxu1 %v17101_v0 }
 0x227   : > { %v5018_v59 = vsel %vm17236_vm4, %v4953_v47, %v4467_v24  ;;  %3778 = vrot.lane.b32.xlu1 %v10831_v20, %s12179_s14  ;;  %v4416_v20 = vsel %vm2467_vm3, %v4414_v62, %v4415_v1  ;;  %vm17241_vm4 = vmmov %vm17234_vm2 }
 0x228   : > { %3776 = vrot.lane.b32.xlu0 %v10830_v7, %s12179_s14  ;;  %v11341_v31 = vpop.f32.mrf.mxu0  ;;  %11364 = vmatmul.mubr.msk.bf16.gmra.mxu0 %vm17237_vm5, %v5018_v59  ;;  %5997 = vst.msk [vmem:[#allocation3 + $0x30] sm:$0xe] %vm5988_vm8, %v5931_v5  ;;  %v5932_v14 = vrot.slane %v5931_v5, 4  ;;  %v6471_v59 = vrot.slane %v11925_v12, 2  ;;  %vm17242_vm5 = vmmov %vm17240_vm7 }
 0x229   : > { %v5442_v23 = vmul.f32 %v14459_v48, %v11341_v31  ;;  %v14462_v53 = vpop.permute.xlu1 %2614  ;;  %7577 = vmatpush1.bf16.msra.mxu1 %v11980_v54 }
 0x22a   : > { %v14468_v46 = vpop.permute.xlu0 %2612  ;;  %v5238_v17 = vpop.f32.mrf.mxu0  ;;  %5998 = vst.msk [vmem:[#allocation3 + $0x34] sm:$0x1] %vm17239_vm9, %v5932_v14  ;;  %v1233_v14 = vld [vmem:[#allocation2 + $0x150] sm:$0xf]  ;;  %7578 = vmatprep.subr.bf16.mxu1 %v17101_v0  ;;  %vm17246_vm9 = vmmov %vm17234_vm2 }
 0x22b   : > { %v5513_v37 = vadd.f32 %v14475_v63, %v5442_v23  ;;  %v5440_v18 = vmul.f32 %v14459_v48, %v5238_v17  ;;  %4130 = vrot.lane.b32.xlu1 %v4067_v45, %s12182_s17  ;;  %v10504_v16 = vcombine.low %v1233_v14, %v12155_v33 }
 0x22c   : > { %4128 = vrot.lane.b32.xlu0 %v4064_v35, %s12182_s17  ;;  %v11342_v7 = vpop.f32.mrf.mxu0  ;;  %s12188_s17 = smov 112  }
 0x22d   : > { %v5511_v2 = vadd.f32 %v14475_v63, %v5440_v18  ;;  %v5443_v38 = vmul.f32 %v14459_v48, %v11342_v7  ;;  %v14484_v30 = vpop.permute.xlu1 %2838  ;;  %v5577_v8 = vmax.f32 %v5513_v37, 0.0  ;;  %v1235_v37 = vld [vmem:[#allocation2 + $0x15c] sm:$0xf]  ;;  %v11927_v7 = vld [vmem:[#allocation3 + $0x18] ss:$0 sps:$4 sm:$0xff]  }
 0x22e   : > { %v2837_v25 = vpop.permute.xlu0 %2836  ;;  %v5241_v41 = vpop.f32.mrf.mxu0 }
 0x22f   : > { %v5575_v57 = vmax.f32 %v5511_v2, 0.0  ;;  %v5514_v50 = vadd.f32 %v14475_v63, %v5443_v38  ;;  %v5441_v6 = vmul.f32 %v14459_v48, %v5241_v41  ;;  %4482 = vrot.lane.b32.xlu1 %v4419_v52, %s12183_s18  ;;  %v11929_v52 = vld [vmem:[#allocation3 + $0x18] sm:$0x1e]   ;;  %v11926_v38 = vld [vmem:[#allocation3 + $0x10] ss:$0 sps:$4 sm:$0xff]   ;;  %v4559_v41 = vsel %vm4484_vm10, %v10504_v16, %v14415_v34 }
 0x230   : > { %4480 = vrot.lane.b32.xlu0 %v4416_v20, %s12183_s18  ;;  %v11928_v20 = vld [vmem:[#allocation3 + $0x10] sm:$0x1e]   ;;  %v4631_v12 = vsel %vm4581_vm11, %v4559_v41, %v14468_v46  ;;  %v11934_v41 = vld [vmem:[#allocation3 + $0x20] sm:$0x1e]  }
 0x231   : > { %v5629_v29 = vadd.f32 %v5577_v8, %v5575_v57  ;;  %v5661_v9 = vmax.f32 %v5575_v57, %v5577_v8  ;;  %v5512_v47 = vadd.f32 %v14475_v63, %v5441_v6  ;;  %v14493_v24 = vpop.permute.xlu1 %3190  ;;  %v5578_v45 = vmax.f32 %v5514_v50, 0.0  ;;  %v11931_v50 = vld [vmem:[#allocation3 + $0x18] sm:$0x3c]  }
 0x232   : > { %v3189_v5 = vpop.permute.xlu0 %3188  ;;  %v6679_v57 = vrot.slane %v11929_v52, 1  ;;  %v4696_v6 = vsel %vm4646_vm12, %v4631_v12, %v2837_v25  ;;  %v6807_v14 = vrot.slane %v11931_v50, 2  ;;  %v11933_v52 = vld [vmem:[#allocation3 + $0x28] ss:$0 sps:$4 sm:$0xff]  }
 0x233   : > { %v5693_v31 = vsel %vm17234_vm2, %v5629_v29, %v5661_v9  ;;  %v5576_v13 = vmax.f32 %v5512_v47, 0.0  ;;  %6360 = vrot.lane.b32.xlu1 %v6343_v55, %s12180_s15  ;;  %v6678_v29 = vrot.slane %v11928_v20, 1  ;;  %v11930_v9 = vld [vmem:[#allocation3 + $0x10] sm:$0x3c]   ;;  %v4760_v34 = vsel %vm598_vm13, %v4696_v6, %v3189_v5  ;;  %v11932_v20 = vld [vmem:[#allocation3 + $0x20] ss:$0 sps:$4 sm:$0xff]   ;;  %vm17247_vm2 = vmmov %vm17245_vm0 }
 0x234   : > { %5726 = vst.msk [vmem:[#allocation6 + $0x50] sm:$0xff] %vm17240_vm7, %v5693_v31  ;;  %6358 = vrot.lane.b32.xlu0 %v6342_v27, %s12180_s15  ;;  %v12156_v27 = vld [vmem:[#allocation2 + $0x160] sm:$0xf]  ;;  %v6806_v54 = vrot.slane %v11930_v9, 2  ;;  %v11937_v6 = vld [vmem:[#allocation3 + $0x18] sm:$0x1e]  }
 0x235   : > { %v5630_v23 = vadd.f32 %v5578_v45, %v5576_v13  ;;  %v5662_v35 = vmax.f32 %v5576_v13, %v5578_v45  ;;  %v3543_v62 = vpop.permute.xlu1 %3542  ;;  %v10505_v55 = vcombine.low %v1235_v37, %v12156_v27  ;;  %vm17248_vm7 = vcmask 122880  }
 0x236   : > { %v3541_v1 = vpop.permute.xlu0 %3540 }
 0x237   : > { %v5694_v17 = vsel %vm17241_vm4, %v5630_v23, %v5662_v35  ;;  %6488 = vrot.lane.b32.xlu1 %v6471_v59, %s12183_s18  ;;  %v4562_v46 = vsel %vm4484_vm10, %v10505_v55, %v14442_v26  ;;  %v4825_v25 = vsel %vm4775_vm14, %v4760_v34, %v3541_v1  ;;  %v7014_v34 = vrot.slane %v11934_v41, 1 }
 0x238   : > { %5727 = vst.msk [vmem:[#allocation6 + $0x58] sm:$0xff] %vm17242_vm5, %v5694_v17  ;;  %6486 = vrot.lane.b32.xlu0 %v6470_v22, %s12183_s18  ;;  %v4633_v13 = vsel %vm4581_vm11, %v4562_v46, %v14462_v53  ;;  %v11983_v17 = vld [vmem:[%s17083_s4 + $0x18] sm:$0xff]   ;;  %v11936_v46 = vld [vmem:[#allocation3 + $0x10] sm:$0x1e]  }
 0x239   : > { %v3767_v18 = vpop.permute.xlu1 %3766  ;;  %v4698_v26 = vsel %vm4646_vm12, %v4633_v13, %v14484_v30  ;;  %7579 = vmatpush1.bf16.msra.mxu1 %v11983_v17 }
 0x23a   : > { %v3765_v2 = vpop.permute.xlu0 %3764  ;;  %v4762_v53 = vsel %vm598_vm13, %v4698_v26, %v14493_v24  ;;  %v11935_v24 = vld [vmem:[#allocation3 + $0x28] sm:$0x1e]   ;;  %7580 = vmatprep.subr.bf16.mxu1 %v17101_v0 }
 0x23b   : > { %6568 = vrot.lane.b32.xlu1 %v11927_v7, %s12184_s29  ;;  %v4890_v5 = vsel %vm17103_vm15, %v4825_v25, %v3765_v2  ;;  %v4827_v30 = vsel %vm4775_vm14, %v4762_v53, %v3543_v62  ;;  %v11986_v2 = vld [vmem:[%s17083_s4 + $0x10] sm:$0xff]   ;;  %v7015_v50 = vrot.slane %v11935_v24, 1 }
 0x23c   : > { %6566 = vrot.lane.b32.xlu0 %v11926_v38, %s12184_s29  ;;  %v4892_v37 = vsel %vm17103_vm15, %v4827_v30, %v3767_v18  ;;  %v11938_v30 = vld [vmem:[#allocation3 + $0x10] sm:$0x3c]  }
 0x23d   : > { %v4119_v8 = vpop.permute.xlu1 %4118  ;;  %7581 = vmatpush1.bf16.msra.mxu1 %v11986_v2 }
 0x23e   : > { %v4117_v19 = vpop.permute.xlu0 %4116  ;;  %v4957_v62 = vsel %vm4905_vm1, %v4892_v37, %v4119_v8  ;;  %7582 = vmatprep.subr.bf16.mxu1 %v17101_v0 }
 0x23f   : > { %v14514_v47 = vld [vmem:[#allocation6 + $0x50] ss:$2 sm:$0xff]  ;;  %v14516_v59 = vld [vmem:[#allocation6 + $0x51] ss:$2 sm:$0xff]  ;;  %6696 = vrot.lane.b32.xlu1 %v6679_v57, %s12185_s30  ;;  %v4955_v35 = vsel %vm4905_vm1, %v4890_v5, %v4117_v19  ;;  %v11988_v19 = vld [vmem:[%s17083_s4 + $0x8] sm:$0xff]  }
 0x240   : > { %17243 = vst [vmem:[#allocation7_spill] sm:$0xff] %v14516_v59  ;;  %v5816_v31 = vadd.f32 %v14516_v59, %v14514_v47  ;;  %6694 = vrot.lane.b32.xlu0 %v6678_v29, %s12185_s30 }
 0x241   : > { %v14531_v22 = vpop.permute.xlu1 %2263  ;;  %7583 = vmatpush1.bf16.msra.mxu1 %v11988_v19  ;;  %v11941_v19 = vld [vmem:[#allocation3 + $0x28] ss:$0 sps:$4 sm:$0xff]  }
 0x242   : > { %v14535_v23 = vmul.f32 0.25, %v5816_v31  ;;  %v4469_v1 = vpop.permute.xlu0 %4468  ;;  %7584 = vmatprep.subr.bf16.mxu1 %v17101_v0 }
 0x243   : > { %v5020_v33 = vsel %vm17244_vm6, %v4955_v35, %v4469_v1  ;;  %6824 = vrot.lane.b32.xlu1 %v6807_v14, %s12186_s19  ;;  %v6345_v35 = vrot.slane %v11937_v6, 1  ;;  %v11939_v1 = vld [vmem:[#allocation3 + $0x18] sm:$0x3c]   ;;  %v1237_v6 = vld [vmem:[#allocation2 + $0x168] sm:$0xf]  ;;  %vm17249_vm6 = vmmov %vm17241_vm4 }
 0x244   : > { %6822 = vrot.lane.b32.xlu0 %v6806_v54, %s12186_s19  ;;  %11367 = vmatprep.mubr.msk.bf16.mxu0 %vm17245_vm0, %v5020_v33  ;;  %v11225_v16 = vpack.c.bf16 %v14535_v23, %v14535_v23  ;;  %v11990_v54 = vld [vmem:[%s17083_s4] sm:$0xff]   ;;  %v6344_v33 = vrot.slane %v11936_v46, 1  ;;  %v6473_v41 = vrot.slane %v11939_v1, 2  ;;  %vm17250_vm0 = vmmov %vm17242_vm5 }
 0x245   : > { %v14551_v7 = vpop.permute.xlu1 %2265  ;;  %7585 = vmatpush1.bf16.msra.mxu1 %v11990_v54  ;;  %v1239_v54 = vld [vmem:[#allocation2 + $0x174] sm:$0xf] }
 0x246   : > { %v4471_v38 = vpop.permute.xlu0 %4470  ;;  %v5933_v27 = vrot.slane %v11225_v16, 7  ;;  %7600 = vmatprep.subr.bf16.mxu1 %v17101_v0 }
 0x247   : > { %v5022_v55 = vsel %vm17246_vm9, %v4957_v62, %v4471_v38  ;;  %6904 = vrot.lane.b32.xlu1 %v11933_v52, %s12187_s28  ;;  %vm17253_vm9 = vmmov %vm17241_vm4 }
 0x248   : > { %11368 = vmatmul.mubr.msk.bf16.gmra.mxu0 %vm17247_vm2, %v5022_v55  ;;  %6902 = vrot.lane.b32.xlu0 %v11932_v20, %s12187_s28  ;;  %v11345_v18 = vpop.f32.mrf.mxu0  ;;  %5999 = vst.msk [vmem:[#allocation3 + $0x38] sm:$0xe] %vm5988_vm8, %v5933_v27  ;;  %v5934_v12 = vrot.slane %v5933_v27, 4  ;;  %v11991_v27 = vld [vmem:[%s17083_s4 + $0x40] sm:$0xff]  }
 0x249   : > { %v5446_v8 = vmul.f32 %v14459_v48, %v11345_v18  ;;  %v14564_v57 = vpop.permute.xlu1 %2618  ;;  %v6472_v18 = vrot.slane %v11938_v30, 2  ;;  %7601 = vmatpush2.bf16.msra.mxu1 %v11991_v27  ;;  %v11945_v30 = vld [vmem:[#allocation3 + $0x28] sm:$0x3c]  }
 0x24a   : > { %v14569_v29 = vpop.permute.xlu0 %2616  ;;  %v5254_v9 = vpop.f32.mrf.mxu0  ;;  %6000 = vst.msk [vmem:[#allocation3 + $0x3c] sm:$0x1] %vm17248_vm7, %v5934_v12  ;;  %v6809_v27 = vrot.slane %v11945_v30, 2  ;;  %vm17254_vm7 = vmmov %vm17241_vm4 }
 0x24b   : > { %v5517_v31 = vadd.f32 %v14475_v63, %v5446_v8  ;;  %v5444_v25 = vmul.f32 %v14459_v48, %v5254_v9  ;;  %7032 = vrot.lane.b32.xlu1 %v7015_v50, %s12188_s17 }
 0x24c   : > { %7030 = vrot.lane.b32.xlu0 %v7014_v34, %s12188_s17  ;;  %v11346_v13 = vpop.f32.mrf.mxu0 }
 0x24d   : > { %v5515_v5 = vadd.f32 %v14475_v63, %v5444_v25  ;;  %v5447_v14 = vmul.f32 %v14459_v48, %v11346_v13  ;;  %v14579_v26 = vpop.permute.xlu1 %2842  ;;  %v5581_v16 = vmax.f32 %v5517_v31, 0.0  ;;  %v11943_v31 = vld [vmem:[#allocation3 + $0x28] sm:$0x1e]   ;;  %v11940_v13 = vld [vmem:[#allocation3 + $0x20] ss:$0 sps:$4 sm:$0xff]  }
 0x24e   : > { %v2841_v17 = vpop.permute.xlu0 %2840  ;;  %v5257_v53 = vpop.f32.mrf.mxu0 }
 0x24f   : > { %v5579_v37 = vmax.f32 %v5515_v5, 0.0  ;;  %v5518_v52 = vadd.f32 %v14475_v63, %v5447_v14  ;;  %v5445_v24 = vmul.f32 %v14459_v48, %v5257_v53  ;;  %6364 = vrot.lane.b32.xlu1 %v6345_v35, %s12180_s15  ;;  %v11942_v5 = vld [vmem:[#allocation3 + $0x20] sm:$0x1e]   ;;  %v12157_v35 = vld [vmem:[#allocation2 + $0x16c] sm:$0xf] }
 0x250   : > { %6362 = vrot.lane.b32.xlu0 %v6344_v33, %s12180_s15  ;;  %v10506_v1 = vcombine.low %v1237_v6, %v12157_v35  ;;  %v6681_v33 = vrot.slane %v11943_v31, 1 }
 0x251   : > { %v5631_v2 = vadd.f32 %v5581_v16, %v5579_v37  ;;  %v5663_v62 = vmax.f32 %v5579_v37, %v5581_v16  ;;  %v5516_v38 = vadd.f32 %v14475_v63, %v5445_v24  ;;  %v14590_v20 = vpop.permute.xlu1 %3194  ;;  %v5582_v8 = vmax.f32 %v5518_v52, 0.0  ;;  %v11944_v52 = vld [vmem:[#allocation3 + $0x20] sm:$0x3c]  }
 0x252   : > { %v3193_v55 = vpop.permute.xlu0 %3192  ;;  %v6680_v37 = vrot.slane %v11942_v5, 1  ;;  %v4565_v24 = vsel %vm4484_vm10, %v10506_v1, %v14531_v22  ;;  %v11949_v5 = vld [vmem:[#allocation3 + $0x38] sm:$0x1e]   ;;  %v11946_v1 = vld [vmem:[#allocation3 + $0x30] ss:$0 sps:$4 sm:$0xff]  }
 0x253   : > { %v5695_v12 = vsel %vm17241_vm4, %v5631_v2, %v5663_v62  ;;  %v5580_v50 = vmax.f32 %v5516_v38, 0.0  ;;  %6492 = vrot.lane.b32.xlu1 %v6473_v41, %s12183_s18  ;;  %v12158_v2 = vld [vmem:[#allocation2 + $0x178] sm:$0xf]  ;;  %v4635_v38 = vsel %vm4581_vm11, %v4565_v24, %v14569_v29  ;;  %v11951_v24 = vld [vmem:[#allocation3 + $0x28] sm:$0x1e]   ;;  %vm17255_vm4 = vmmov %vm17247_vm2 }
 0x254   : > { %5728 = vst.msk [vmem:[#allocation6 + $0x60] sm:$0xff] %vm17242_vm5, %v5695_v12  ;;  %6490 = vrot.lane.b32.xlu0 %v6472_v18, %s12183_s18  ;;  %v10507_v62 = vcombine.low %v1239_v54, %v12158_v2  ;;  %v4700_v18 = vsel %vm4646_vm12, %v4635_v38, %v2841_v17  ;;  %v11948_v54 = vld [vmem:[#allocation3 + $0x30] sm:$0x1e]   ;;  %v11950_v38 = vld [vmem:[#allocation3 + $0x20] sm:$0x1e]   ;;  %vm17256_vm5 = vcmask 122880  }
 0x255   : > { %v5632_v9 = vadd.f32 %v5582_v8, %v5580_v50  ;;  %v5664_v34 = vmax.f32 %v5580_v50, %v5582_v8  ;;  %v3547_v46 = vpop.permute.xlu1 %3546  ;;  %v6808_v8 = vrot.slane %v11944_v52, 2  ;;  %v7017_v52 = vrot.slane %v11949_v5, 1 }
 0x256   : > { %v3545_v25 = vpop.permute.xlu0 %3544  ;;  %v4568_v22 = vsel %vm4484_vm10, %v10507_v62, %v14551_v7  ;;  %v7016_v62 = vrot.slane %v11948_v54, 1 }
 0x257   : > { %v5696_v14 = vsel %vm17249_vm6, %v5632_v9, %v5664_v34  ;;  %6572 = vrot.lane.b32.xlu1 %v11941_v19, %s12184_s29  ;;  %v4764_v19 = vsel %vm598_vm13, %v4700_v18, %v3193_v55  ;;  %v4637_v34 = vsel %vm4581_vm11, %v4568_v22, %v14564_v57 }
 0x258   : > { %5729 = vst.msk [vmem:[#allocation6 + $0x68] sm:$0xff] %vm17250_vm0, %v5696_v14  ;;  %6570 = vrot.lane.b32.xlu0 %v11940_v13, %s12184_s29  ;;  %v4829_v9 = vsel %vm4775_vm14, %v4764_v19, %v3545_v25  ;;  %v11947_v13 = vld [vmem:[#allocation3 + $0x38] ss:$0 sps:$4 sm:$0xff]   ;;  %v4702_v7 = vsel %vm4646_vm12, %v4637_v34, %v14579_v26  ;;  %v11953_v19 = vld [vmem:[#allocation3 + $0x28] sm:$0x3c]  }
 0x259   : > { %v3771_v53 = vpop.permute.xlu1 %3770  ;;  %v11952_v34 = vld [vmem:[#allocation3 + $0x20] sm:$0x3c]  }
 0x25a   : > { %v3769_v16 = vpop.permute.xlu0 %3768 }
 0x25b   : > { %6700 = vrot.lane.b32.xlu1 %v6681_v33, %s12185_s30  ;;  %v4894_v55 = vsel %vm17103_vm15, %v4829_v9, %v3769_v16  ;;  %v4766_v33 = vsel %vm598_vm13, %v4702_v7, %v14590_v20  ;;  %v6346_v9 = vrot.slane %v11950_v38, 1 }
 0x25c   : > { %6698 = vrot.lane.b32.xlu0 %v6680_v37, %s12185_s30  ;;  %v4831_v30 = vsel %vm4775_vm14, %v4766_v33, %v3547_v46 }
 0x25d   : > { %v4123_v41 = vpop.permute.xlu1 %4122  ;;  %v4896_v16 = vsel %vm17103_vm15, %v4831_v30, %v3771_v53 }
 0x25e   : > { %v4121_v12 = vpop.permute.xlu0 %4120  ;;  %v4961_v20 = vsel %vm4905_vm1, %v4896_v16, %v4123_v41  ;;  %v6347_v41 = vrot.slane %v11951_v24, 1  ;;  %v11954_v24 = vld [vmem:[#allocation3 + $0x30] ss:$0 sps:$4 sm:$0xff]  }
 0x25f   : > { %v14611_v50 = vld [vmem:[#allocation6 + $0x60] ss:$2 sm:$0xff]  ;;  %v14613_v6 = vld [vmem:[#allocation6 + $0x61] ss:$2 sm:$0xff]  ;;  %6828 = vrot.lane.b32.xlu1 %v6809_v27, %s12186_s19  ;;  %v4959_v25 = vsel %vm4905_vm1, %v4894_v55, %v4121_v12 }
 0x260   : > { %17251 = vst [vmem:[#allocation8_spill] sm:$0xff] %v14611_v50  ;;  %17252 = vst [vmem:[#allocation9_spill] sm:$0xff] %v14613_v6  ;;  %v5817_v29 = vadd.f32 %v14613_v6, %v14611_v50  ;;  %6826 = vrot.lane.b32.xlu0 %v6808_v8, %s12186_s19 }
 0x261   : > { %v14628_v31 = vpop.permute.xlu1 %2267 }
 0x262   : > { %v14632_v14 = vmul.f32 0.25, %v5817_v29  ;;  %v4473_v35 = vpop.permute.xlu0 %4472 }
 0x263   : > { %v5024_v57 = vsel %vm17253_vm9, %v4959_v25, %v4473_v35  ;;  %6908 = vrot.lane.b32.xlu1 %v11947_v13, %s12187_s28  ;;  %vm17257_vm9 = vmmov %vm17249_vm6 }
 0x264   : > { %11371 = vmatprep.mubr.msk.bf16.mxu0 %vm17247_vm2, %v5024_v57  ;;  %6906 = vrot.lane.b32.xlu0 %v11946_v1, %s12187_s28  ;;  %v11226_v26 = vpack.c.bf16 %v14632_v14, %v14632_v14  ;;  %v6475_v1 = vrot.slane %v11953_v19, 2  ;;  %v6474_v57 = vrot.slane %v11952_v34, 2  ;;  %vm17258_vm2 = vmmov %vm17250_vm0 }
 0x265   : > { %v14645_v37 = vpop.permute.xlu1 %2269 }
 0x266   : > { %v4475_v2 = vpop.permute.xlu0 %4474  ;;  %v5935_v27 = vrot.slane %v11226_v26, 7 }
 0x267   : > { %v5026_v46 = vsel %vm17254_vm7, %v4961_v20, %v4475_v2  ;;  %7036 = vrot.lane.b32.xlu1 %v7017_v52, %s12188_s17  ;;  %vm17262_vm7 = vmmov %vm17249_vm6 }
 0x268   : > { %11372 = vmatmul.mubr.msk.bf16.gmra.mxu0 %vm17255_vm4, %v5026_v46  ;;  %7034 = vrot.lane.b32.xlu0 %v7016_v62, %s12188_s17  ;;  %v11349_v18 = vpop.f32.mrf.mxu0  ;;  %6001 = vst.msk [vmem:[#allocation3 + $0x40] sm:$0xe] %vm5988_vm8, %v5935_v27  ;;  %v5936_v53 = vrot.slane %v5935_v27, 4  ;;  %v11955_v27 = vld [vmem:[#allocation3 + $0x38] ss:$0 sps:$4 sm:$0xff]  }
 0x269   : > { %v5450_v12 = vmul.f32 %v14459_v48, %v11349_v18  ;;  %v14654_v8 = vpop.permute.xlu1 %2622  ;;  %v11957_v46 = vld [vmem:[#allocation3 + $0x38] sm:$0x1e]  }
 0x26a   : > { %v14656_v22 = vpop.permute.xlu0 %2620  ;;  %v5270_v29 = vpop.f32.mrf.mxu0  ;;  %6002 = vst.msk [vmem:[#allocation3 + $0x44] sm:$0x1] %vm17256_vm5, %v5936_v53  ;;  %v11956_v53 = vld [vmem:[#allocation3 + $0x30] sm:$0x1e]   ;;  %vm17263_vm5 = vmmov %vm17249_vm6 }
 0x26b   : > { %v5521_v55 = vadd.f32 %v14475_v63, %v5450_v12  ;;  %v5448_v13 = vmul.f32 %v14459_v48, %v5270_v29  ;;  %6368 = vrot.lane.b32.xlu1 %v6347_v41, %s12180_s15  ;;  %v1241_v29 = vld [vmem:[#allocation2 + $0x180] sm:$0xf] }
 0x26c   : > { %6366 = vrot.lane.b32.xlu0 %v6346_v9, %s12180_s15  ;;  %v11350_v5 = vpop.f32.mrf.mxu0 }
 0x26d   : > { %v5519_v7 = vadd.f32 %v14475_v63, %v5448_v13  ;;  %v5451_v25 = vmul.f32 %v14459_v48, %v11350_v5  ;;  %v14665_v35 = vpop.permute.xlu1 %2846  ;;  %v5585_v30 = vmax.f32 %v5521_v55, 0.0  ;;  %v6683_v13 = vrot.slane %v11957_v46, 1  ;;  %v11959_v5 = vld [vmem:[#allocation3 + $0x38] sm:$0x3c]  }
 0x26e   : > { %v2845_v54 = vpop.permute.xlu0 %2844  ;;  %v5273_v33 = vpop.f32.mrf.mxu0 }
 0x26f   : > { %v5583_v26 = vmax.f32 %v5519_v7, 0.0  ;;  %v5522_v16 = vadd.f32 %v14475_v63, %v5451_v25  ;;  %v5449_v52 = vmul.f32 %v14459_v48, %v5273_v33  ;;  %6496 = vrot.lane.b32.xlu1 %v6475_v1, %s12183_s18  ;;  %v6682_v25 = vrot.slane %v11956_v53, 1  ;;  %v11958_v1 = vld [vmem:[#allocation3 + $0x30] sm:$0x3c]  }
 0x270   : > { %6494 = vrot.lane.b32.xlu0 %v6474_v57, %s12183_s18  ;;  %v12159_v57 = vld [vmem:[#allocation2 + $0x184] sm:$0xf] }
 0x271   : > { %v5633_v20 = vadd.f32 %v5585_v30, %v5583_v26  ;;  %v5665_v2 = vmax.f32 %v5583_v26, %v5585_v30  ;;  %v5520_v62 = vadd.f32 %v14475_v63, %v5449_v52  ;;  %v3199_v38 = vpop.permute.xlu1 %3198  ;;  %v5586_v41 = vmax.f32 %v5522_v16, 0.0  ;;  %v1243_v26 = vld [vmem:[#allocation2 + $0x18c] sm:$0xf] }
 0x272   : > { %v3197_v18 = vpop.permute.xlu0 %3196  ;;  %v10508_v30 = vcombine.low %v1241_v29, %v12159_v57  ;;  %v6811_v52 = vrot.slane %v11959_v5, 2  ;;  %v11961_v29 = vld [vmem:[#allocation3 + $0x40] sm:$0x1e]  }
 0x273   : > { %v5697_v12 = vsel %vm17249_vm6, %v5633_v20, %v5665_v2  ;;  %v5584_v19 = vmax.f32 %v5520_v62, 0.0  ;;  %6576 = vrot.lane.b32.xlu1 %v11955_v27, %s12184_s29  ;;  %v6810_v20 = vrot.slane %v11958_v1, 2  ;;  %v12160_v62 = vld [vmem:[#allocation2 + $0x190] sm:$0xf]  ;;  %vm17264_vm6 = vmmov %vm17255_vm4 }
 0x274   : > { %5730 = vst.msk [vmem:[#allocation6 + $0x70] sm:$0xff] %vm17250_vm0, %v5697_v12  ;;  %6574 = vrot.lane.b32.xlu0 %v11954_v24, %s12184_s29  ;;  %v4571_v2 = vsel %vm4484_vm10, %v10508_v30, %v14628_v31  ;;  %v10509_v27 = vcombine.low %v1243_v26, %v12160_v62  ;;  %v7018_v30 = vrot.slane %v11961_v29, 1  ;;  %v11962_v26 = vld [vmem:[#allocation3 + $0x30] sm:$0x1e]   ;;  %vm17265_vm0 = vcmask 122880  }
 0x275   : > { %v5634_v9 = vadd.f32 %v5586_v41, %v5584_v19  ;;  %v5666_v34 = vmax.f32 %v5584_v19, %v5586_v41  ;;  %v3551_v55 = vpop.permute.xlu1 %3550  ;;  %v4639_v46 = vsel %vm4581_vm11, %v4571_v2, %v14656_v22  ;;  %v11960_v19 = vld [vmem:[#allocation3 + $0x40] ss:$0 sps:$4 sm:$0xff]  }
 0x276   : > { %v3549_v7 = vpop.permute.xlu0 %3548  ;;  %v4704_v12 = vsel %vm4646_vm12, %v4639_v46, %v2845_v54  ;;  %v4574_v31 = vsel %vm4484_vm10, %v10509_v27, %v14645_v37  ;;  %v6348_v46 = vrot.slane %v11962_v26, 1  ;;  %v11964_v26 = vld [vmem:[#allocation3 + $0x40] ss:$0 sps:$4 sm:$0xff]  }
 0x277   : > { %v5698_v33 = vsel %vm17257_vm9, %v5634_v9, %v5666_v34  ;;  %6704 = vrot.lane.b32.xlu1 %v6683_v13, %s12185_s30  ;;  %v4768_v13 = vsel %vm598_vm13, %v4704_v12, %v3197_v18  ;;  %vm17266_vm9 = vmmov %vm17263_vm5 }
 0x278   : > { %5731 = vst.msk [vmem:[#allocation6 + $0x78] sm:$0xff] %vm17258_vm2, %v5698_v33  ;;  %6702 = vrot.lane.b32.xlu0 %v6682_v25, %s12185_s30  ;;  %v4833_v22 = vsel %vm4775_vm14, %v4768_v13, %v3549_v7  ;;  %v4641_v25 = vsel %vm4581_vm11, %v4574_v31, %v14654_v8 }
 0x279   : > { %v3775_v16 = vpop.permute.xlu1 %3774  ;;  %v4706_v37 = vsel %vm4646_vm12, %v4641_v25, %v14665_v35 }
 0x27a   : > { %v3773_v24 = vpop.permute.xlu0 %3772 }
 0x27b   : > { %6832 = vrot.lane.b32.xlu1 %v6811_v52, %s12186_s19  ;;  %v4898_v1 = vsel %vm17103_vm15, %v4833_v22, %v3773_v24  ;;  %v4770_v52 = vsel %vm598_vm13, %v4706_v37, %v3199_v38  ;;  %v11963_v38 = vld [vmem:[#allocation3 + $0x30] sm:$0x3c]  }
 0x27c   : > { %6830 = vrot.lane.b32.xlu0 %v6810_v20, %s12186_s19  ;;  %v4835_v8 = vsel %vm4775_vm14, %v4770_v52, %v3551_v55  ;;  %v6476_v31 = vrot.slane %v11963_v38, 2  ;;  %v11966_v52 = vld [vmem:[#allocation3 + $0x40] sm:$0x1e]  }
 0x27d   : > { %v4127_v53 = vpop.permute.xlu1 %4126  ;;  %v4900_v24 = vsel %vm17103_vm15, %v4835_v8, %v3775_v16 }
 0x27e   : > { %v4125_v41 = vpop.permute.xlu0 %4124  ;;  %v4965_v62 = vsel %vm4905_vm1, %v4900_v24, %v4127_v53 }
 0x27f   : > { %v14687_v9 = vld [vmem:[#allocation6 + $0x70] ss:$2 sm:$0xff]  ;;  %v14689_v34 = vld [vmem:[#allocation6 + $0x71] ss:$2 sm:$0xff]  ;;  %v4963_v57 = vsel %vm4905_vm1, %v4898_v1, %v4125_v41 }
 0x280   : > { %17259 = vst [vmem:[#allocation10_spill] sm:$0xff] %v14687_v9  ;;  %17260 = vst [vmem:[#allocation11_spill] sm:$0xff] %v14689_v34  ;;  %v5818_v5 = vadd.f32 %v14689_v34, %v14687_v9  ;;  %6910 = vrot.lane.b32.xlu0 %v11960_v19, %s12187_s28 }
 0x281   : > { %v14703_v33 = vpop.permute.xlu1 %2271 }
 0x282   : > { %v14707_v18 = vmul.f32 0.25, %v5818_v5  ;;  %v4477_v7 = vpop.permute.xlu0 %4476 }
 0x283   : > { %v5028_v20 = vsel %vm17262_vm7, %v4963_v57, %v4477_v7  ;;  %vm17267_vm7 = vmmov %vm17263_vm5 }
 0x284   : > { %17261 = vst [vmem:[#allocation12_spill] sm:$0xff] %v14707_v18  ;;  %11375 = vmatprep.mubr.msk.bf16.mxu0 %vm17255_vm4, %v5028_v20  ;;  %7038 = vrot.lane.b32.xlu0 %v7018_v30, %s12188_s17  ;;  %v11227_v35 = vpack.c.bf16 %v14707_v18, %v14707_v18  ;;  %vm17268_vm4 = vmmov %vm17258_vm2 }
 0x285   : > { %v14718_v2 = vpop.permute.xlu1 %2273 }
 0x286   : > { %v4479_v27 = vpop.permute.xlu0 %4478  ;;  %v5937_v12 = vrot.slane %v11227_v35, 7 }
 0x287   : > { %v5030_v41 = vsel %vm17263_vm5, %v4965_v62, %v4479_v27  ;;  %v11965_v62 = vld [vmem:[#allocation3 + $0x48] ss:$0 sps:$4 sm:$0xff]  }
 0x288   : > { %11376 = vmatmul.mubr.msk.bf16.gmra.mxu0 %vm17264_vm6, %v5030_v41  ;;  %6370 = vrot.lane.b32.xlu0 %v6348_v46, %s12180_s15  ;;  %v11353_v55 = vpop.f32.mrf.mxu0  ;;  %6003 = vst.msk [vmem:[#allocation3 + $0x48] sm:$0xe] %vm5988_vm8, %v5937_v12  ;;  %v5938_v19 = vrot.slane %v5937_v12, 4 }
 0x289   : > { %v5454_v16 = vmul.f32 %v14459_v48, %v11353_v55  ;;  %v14726_v29 = vpop.permute.xlu1 %2626  ;;  %6912 = vrot.lane.b32.xlu1 %v11965_v62, %s12187_s28  ;;  %v11968_v55 = vld [vmem:[#allocation3 + $0x40] sm:$0x3c]   ;;  %v11971_v62 = vld [vmem:[#allocation3 + $0x38] sm:$0x3c]  }
 0x28a   : > { %v14728_v13 = vpop.permute.xlu0 %2624  ;;  %v5286_v53 = vpop.f32.mrf.mxu0  ;;  %6004 = vst.msk [vmem:[#allocation3 + $0x4c] sm:$0x1] %vm17265_vm0, %v5938_v19  ;;  %v11969_v19 = vld [vmem:[#allocation3 + $0x38] sm:$0x1e]  }
 0x28b   : > { %v5525_v5 = vadd.f32 %v14475_v63, %v5454_v16  ;;  %v5452_v22 = vmul.f32 %v14459_v48, %v5286_v53 }
 0x28c   : > { %6498 = vrot.lane.b32.xlu0 %v6476_v31, %s12183_s18  ;;  %v11354_v25 = vpop.f32.mrf.mxu0  ;;  %v6684_v31 = vrot.slane %v11966_v52, 1 }
 0x28d   : > { %v5523_v1 = vadd.f32 %v14475_v63, %v5452_v22  ;;  %v5455_v37 = vmul.f32 %v14459_v48, %v11354_v25  ;;  %v2851_v57 = vpop.permute.xlu1 %2850  ;;  %v5589_v20 = vmax.f32 %v5525_v5, 0.0  ;;  %v1247_v25 = vld [vmem:[#allocation2 + $0x1a4] sm:$0xf] }
 0x28e   : > { %v2849_v7 = vpop.permute.xlu0 %2848  ;;  %v5289_v30 = vpop.f32.mrf.mxu0 }
 0x28f   : > { %v5587_v8 = vmax.f32 %v5523_v1, 0.0  ;;  %v5526_v35 = vadd.f32 %v14475_v63, %v5455_v37  ;;  %v5453_v24 = vmul.f32 %v14459_v48, %v5289_v30  ;;  %v1245_v1 = vld [vmem:[#allocation2 + $0x198] sm:$0xf] }
 0x290   : > { %6578 = vrot.lane.b32.xlu0 %v11964_v26, %s12184_s29 }
 0x291   : > { %v5635_v27 = vadd.f32 %v5589_v20, %v5587_v8  ;;  %v5667_v46 = vmax.f32 %v5587_v8, %v5589_v20  ;;  %v5524_v38 = vadd.f32 %v14475_v63, %v5453_v24  ;;  %v3203_v12 = vpop.permute.xlu1 %3202  ;;  %v11967_v41 = vld [vmem:[#allocation3 + $0x48] sm:$0x1e]   ;;  %v5590_v16 = vmax.f32 %v5526_v35, 0.0 }
 0x292   : > { %v3201_v53 = vpop.permute.xlu0 %3200  ;;  %v7019_v48 = vrot.slane %v11967_v41, 1  ;;  %v6812_v20 = vrot.slane %v11968_v55, 2  ;;  %v12161_v8 = vld [vmem:[#allocation2 + $0x1a8] sm:$0xf]  ;;  %v6349_v24 = vrot.slane %v11969_v19, 1 }
 0x293   : > { %v5699_v5 = vsel %vm17266_vm9, %v5635_v27, %v5667_v46  ;;  %v5588_v22 = vmax.f32 %v5524_v38, 0.0  ;;  %v10511_v35 = vcombine.low %v1247_v25, %v12161_v8  ;;  %v12162_v27 = vld [vmem:[#allocation2 + $0x19c] sm:$0xf]  ;;  %v11970_v38 = vld [vmem:[#allocation3 + $0x50] ss:$0 sps:$4 sm:$0xff]   ;;  %vm17278_vm9 = vmmov %vm17258_vm2 }
 0x294   : > { %5732 = vst.msk [vmem:[#allocation6 + $0x80] sm:$0xff] %vm17258_vm2, %v5699_v5  ;;  %6706 = vrot.lane.b32.xlu0 %v6684_v31, %s12185_s30  ;;  %7040 = vrot.lane.b32.xlu1 %v7019_v48, %s12188_s17  ;;  %v10510_v46 = vcombine.low %v1245_v1, %v12162_v27  ;;  %v11973_v41 = vld [vmem:[#allocation3 + $0x50] sm:$0x1e]   ;;  %v11978_v5 = vld [vmem:[#allocation3 + $0x60] sm:$0x1e]  }
 0x295   : > { %v5636_v63 = vadd.f32 %v5590_v16, %v5588_v22  ;;  %v5668_v37 = vmax.f32 %v5588_v22, %v5590_v16  ;;  %v3555_v30 = vpop.permute.xlu1 %3554  ;;  %v4580_v55 = vsel %vm4484_vm10, %v10511_v35, %v14718_v2  ;;  %v6477_v22 = vrot.slane %v11971_v62, 2  ;;  %v11976_v62 = vld [vmem:[#allocation3 + $0x48] sm:$0x1e]  }
 0x296   : > { %v3553_v26 = vpop.permute.xlu0 %3552  ;;  %v4577_v19 = vsel %vm4484_vm10, %v10510_v46, %v14703_v33  ;;  %v4645_v48 = vsel %vm4581_vm11, %v4580_v55, %v14726_v29  ;;  %v7020_v25 = vrot.slane %v11973_v41, 1  ;;  %v11974_v33 = vld [vmem:[#allocation3 + $0x48] ss:$0 sps:$4 sm:$0xff]   ;;  %v6350_v35 = vrot.slane %v11978_v5, 1 }
 0x297   : > { %v5700_v52 = vsel %vm17267_vm7, %v5636_v63, %v5668_v37  ;;  %v4643_v1 = vsel %vm4581_vm11, %v4577_v19, %v14728_v13  ;;  %v4710_v63 = vsel %vm4646_vm12, %v4645_v48, %v2851_v57  ;;  %vm17272_vm11 = vmmov %vm17263_vm5  ;;  %v11979_v19 = vld [vmem:[#allocation3 + $0x48] sm:$0x3c]  }
 0x298   : > { %5733 = vst.msk [vmem:[#allocation6 + $0x88] sm:$0xff] %vm17268_vm4, %v5700_v52  ;;  %6834 = vrot.lane.b32.xlu0 %v6812_v20, %s12186_s19  ;;  %6372 = vrot.lane.b32.xlu1 %v6349_v24, %s12180_s15  ;;  %v4708_v2 = vsel %vm4646_vm12, %v4643_v1, %v2849_v7  ;;  %v4774_v20 = vsel %vm598_vm13, %v4710_v63, %v3203_v12  ;;  %v11981_v12 = vld [vmem:[#allocation3 + $0x60] sm:$0x3c]  }
 0x299   : > { %v3779_v16 = vpop.permute.xlu1 %3778  ;;  %v4772_v24 = vsel %vm598_vm13, %v4708_v2, %v3201_v53  ;;  %v4839_v13 = vsel %vm4775_vm14, %v4774_v20, %v3555_v30 }
 0x29a   : > { %v3777_v31 = vpop.permute.xlu0 %3776  ;;  %v4837_v27 = vsel %vm4775_vm14, %v4772_v24, %v3553_v26  ;;  %v4904_v7 = vsel %vm17103_vm15, %v4839_v13, %v3779_v16  ;;  %vm17273_vm14 = vmmov %vm17263_vm5  ;;  %v11982_v24 = vld [vmem:[#allocation3 + $0x58] ss:$0 sps:$4 sm:$0xff]   ;;  %v11984_v13 = vld [vmem:[#allocation3 + $0x58] sm:$0x1e]  }
 0x29b   : > { %vm17274_vm5 = vmmov %vm17264_vm6 }
 0x29c   : > { %6914 = vrot.lane.b32.xlu0 %v11970_v38, %s12187_s28  ;;  %6500 = vrot.lane.b32.xlu1 %v6477_v22, %s12183_s18  ;;  %v4902_v38 = vsel %vm17103_vm15, %v4837_v27, %v3777_v31  ;;  %v6685_v22 = vrot.slane %v11976_v62, 1  ;;  %v6478_v31 = vrot.slane %v11981_v12, 2  ;;  %vm17275_vm6 = vmmov %vm17274_vm5  ;;  %v11994_v27 = vld [vmem:[#allocation3 + $0x68] sm:$0x1e]  }
 0x29d   : > { %v4131_v37 = vpop.permute.xlu1 %4130 }
 0x29e   : > { %v4129_v8 = vpop.permute.xlu0 %4128  ;;  %v4969_v53 = vsel %vm4905_vm1, %v4904_v7, %v4131_v37  ;;  %v6813_v37 = vrot.slane %v11979_v19, 2  ;;  %v14802_v7 = vld [vmem:[%s17082_s3] ss:$0 sm:$0xff]  ;;  %v6351_v19 = vrot.slane %v11994_v27, 1 }
 0x29f   : > { %v14762_v52 = vld [vmem:[#allocation6 + $0x80] ss:$2 sm:$0xff]  ;;  %v14764_v29 = vld [vmem:[#allocation6 + $0x81] ss:$2 sm:$0xff]  ;;  %v4967_v5 = vsel %vm4905_vm1, %v4902_v38, %v4129_v8  ;;  %vm17276_vm1 = vmmov %vm17265_vm0 }
 0x2a0   : > { %17269 = vst [vmem:[#allocation13_spill] sm:$0xff] %v14762_v52  ;;  %17270 = vst [vmem:[#allocation14_spill] sm:$0xff] %v14764_v29  ;;  %v5819_v57 = vadd.f32 %v14764_v29, %v14762_v52  ;;  %7042 = vrot.lane.b32.xlu0 %v7020_v25, %s12188_s17  ;;  %6580 = vrot.lane.b32.xlu1 %v11974_v33, %s12184_s29  ;;  %v14794_v8 = vld [vmem:[%s17081_s2] ss:$0 sm:$0xff] }
 0x2a1   : > { %v4483_v41 = vpop.permute.xlu1 %4482  ;;  %vm17277_vm0 = vmmov %vm17267_vm7 }
 0x2a2   : > { %v14778_v30 = vmul.f32 0.25, %v5819_v57  ;;  %v4481_v26 = vpop.permute.xlu0 %4480  ;;  %v5034_v16 = vsel %vm17272_vm11, %v4969_v53, %v4483_v41  ;;  %vm17279_vm2 = vmmov %vm17277_vm0 }
 0x2a3   : > { %v5032_v55 = vsel %vm17273_vm14, %v4967_v5, %v4481_v26  ;;  %vm17280_vm7 = vmmov %vm17277_vm0  ;;  %vm7270_vm14 = vcmask 523264  }
 0x2a4   : > { %17271 = vst [vmem:[#allocation15_spill] sm:$0xff] %v14778_v30  ;;  %11379 = vmatprep.mubr.msk.bf16.mxu0 %vm17274_vm5, %v5032_v55  ;;  %6374 = vrot.lane.b32.xlu0 %v6350_v35, %s12180_s15  ;;  %v11228_v48 = vpack.c.bf16 %v14778_v30, %v14778_v30  ;;  %vm17281_vm4 = vmmov %vm17277_vm0  ;;  %vm7303_vm5 = vcmask 654336  }
 0x2a5   : > { %11380 = vmatmul.mubr.msk.bf16.gmra.mxu0 %vm17275_vm6, %v5034_v16  ;;  %v6361_v25 = vpop.permute.xlu1 %6360  ;;  %6708 = vrot.lane.b32.xlu1 %v6685_v22, %s12185_s30  ;;  %v7021_v16 = vrot.slane %v11984_v13, 1  ;;  %v11995_v13 = vld [vmem:[#allocation3 + $0x68] sm:$0x3c]   ;;  %vm17282_vm11 = vmmov %vm17278_vm9 }
 0x2a6   : > { %v6359_v1 = vpop.permute.xlu0 %6358  ;;  %v5939_v63 = vrot.slane %v11228_v48, 7  ;;  %vm17283_vm6 = vmmov %vm17278_vm9 }
 0x2a8   : > { %v11357_v2 = vpop.f32.mrf.mxu0  ;;  %6502 = vrot.lane.b32.xlu0 %v6478_v31, %s12183_s18  ;;  %6005 = vst.msk [vmem:[#allocation3 + $0x70] sm:$0xe] %vm5988_vm8, %v5939_v63  ;;  %v5940_v20 = vrot.slane %v5939_v63, 4  ;;  %v6022_v31 = vld [vmem:[#allocation3 + $0x8] sm:$0xf] }
 0x2a9   : > { %v5458_v33 = vmul.f32 %v14794_v8, %v11357_v2  ;;  %v6489_v35 = vpop.permute.xlu1 %6488  ;;  %6836 = vrot.lane.b32.xlu1 %v6813_v37, %s12186_s19  ;;  %v7163_v54 = vsel %vm598_vm13, %v6022_v31, %v6361_v25  ;;  %v11993_v31 = vld [vmem:[#allocation3 + $0x38] sm:$0x3c]  }
 0x2aa   : > { %v6487_v62 = vpop.permute.xlu0 %6486  ;;  %v5302_v57 = vpop.f32.mrf.mxu0  ;;  %6006 = vst.msk [vmem:[#allocation3 + $0x74] sm:$0x1] %vm17276_vm1, %v5940_v20  ;;  %v11985_v20 = vld [vmem:[#allocation3 + $0x70] ss:$0 sps:$4 sm:$0xff]   ;;  %vm7336_vm1 = vcmask 785408  }
 0x2ab   : > { %v5529_v12 = vadd.f32 %v14802_v7, %v5458_v33  ;;  %v5456_v38 = vmul.f32 %v14794_v8, %v5302_v57  ;;  %v6021_v33 = vld [vmem:[#allocation3] sm:$0xf] }
 0x2ac   : > { %v11358_v53 = vpop.f32.mrf.mxu0  ;;  %6582 = vrot.lane.b32.xlu0 %v11985_v20, %s12184_s29 }
 0x2ad   : > { %v5527_v41 = vadd.f32 %v14802_v7, %v5456_v38  ;;  %v5459_v5 = vmul.f32 %v14794_v8, %v11358_v53  ;;  %v6569_v26 = vpop.permute.xlu1 %6568  ;;  %6916 = vrot.lane.b32.xlu1 %v11982_v24, %s12187_s28  ;;  %v5593_v48 = vmax.f32 %v5529_v12, 0.0 }
 0x2ae   : > { %v6567_v55 = vpop.permute.xlu0 %6566  ;;  %v5305_v22 = vpop.f32.mrf.mxu0 }
 0x2af   : > { %v5591_v63 = vmax.f32 %v5527_v41, 0.0  ;;  %v5530_v37 = vadd.f32 %v14802_v7, %v5459_v5  ;;  %v5457_v2 = vmul.f32 %v14794_v8, %v5305_v22 }
 0x2b1   : > { %v5637_v57 = vadd.f32 %v5593_v48, %v5591_v63  ;;  %v5669_v38 = vmax.f32 %v5591_v63, %v5593_v48  ;;  %v5528_v53 = vadd.f32 %v14802_v7, %v5457_v2  ;;  %v6697_v0 = vpop.permute.xlu1 %6696  ;;  %7044 = vrot.lane.b32.xlu1 %v7021_v16, %s12188_s17  ;;  %v11987_v24 = vld [vmem:[#allocation3 + $0x70] sm:$0x1e]   ;;  %v5594_v27 = vmax.f32 %v5530_v37, 0.0 }
 0x2b2   : > { %v6695_v12 = vpop.permute.xlu0 %6694  ;;  %v6686_v46 = vrot.slane %v11987_v24, 1  ;;  %v11989_v22 = vld [vmem:[#allocation3 + $0x70] sm:$0x3c]   ;;  %v7160_v48 = vsel %vm598_vm13, %v6021_v33, %v6359_v1  ;;  %v6479_v37 = vrot.slane %v11995_v13, 2 }
 0x2b3   : > { %v5701_v41 = vsel %vm17277_vm0, %v5637_v57, %v5669_v38  ;;  %v5592_v5 = vmax.f32 %v5528_v53, 0.0  ;;  %v7209_v57 = vsel %vm17279_vm2, %v7163_v54, %v6489_v35  ;;  %v6814_v53 = vrot.slane %v11989_v22, 2  ;;  %vm17284_vm0 = vmmov %vm17283_vm6 }
 0x2b4   : > { %5734 = vst.msk [vmem:[#allocation6 + $0x90] sm:$0xff] %vm17278_vm9, %v5701_v41  ;;  %6710 = vrot.lane.b32.xlu0 %v6686_v46, %s12185_s30  ;;  %v7207_v25 = vsel %vm17281_vm4, %v7160_v48, %v6487_v62  ;;  %v7241_v46 = vsel %vm17283_vm6, %v7209_v57, %v6569_v26  ;;  %vm7369_vm9 = vcmask 916480   ;;  %v11992_v62 = vld [vmem:[#allocation3 + $0x30] sm:$0x3c]   ;;  %vm17288_vm2 = vcmask 122880  }
 0x2b5   : > { %v5638_v63 = vadd.f32 %v5594_v27, %v5592_v5  ;;  %v5670_v2 = vmax.f32 %v5592_v5, %v5594_v27  ;;  %v6825_v16 = vpop.permute.xlu1 %6824  ;;  %6376 = vrot.lane.b32.xlu1 %v6351_v19, %s12180_s15  ;;  %v7239_v54 = vsel %vm17284_vm0, %v7207_v25, %v6567_v55  ;;  %v7274_v35 = vsel %vm7270_vm14, %v7241_v46, %v6697_v0 }
 0x2b6   : > { %v6823_v20 = vpop.permute.xlu0 %6822  ;;  %v7272_v33 = vsel %vm7270_vm14, %v7239_v54, %v6695_v12  ;;  %v7307_v24 = vsel %vm7303_vm5, %v7274_v35, %v6825_v16  ;;  %v7145_v5 = vrot.slane %v11993_v31, 2  ;;  %v7144_v12 = vrot.slane %v11992_v62, 2 }
 0x2b7   : > { %v5702_v38 = vsel %vm17280_vm7, %v5638_v63, %v5670_v2  ;;  %v7305_v13 = vsel %vm7303_vm5, %v7272_v33, %v6823_v20  ;;  %vm17289_vm7 = vmmov %vm17281_vm4 }
 0x2b8   : > { %5735 = vst.msk [vmem:[#allocation6 + $0x98] sm:$0xff] %vm17282_vm11, %v5702_v38  ;;  %6838 = vrot.lane.b32.xlu0 %v6814_v53, %s12186_s19  ;;  %v11144_v57 = vcombine.low %v7144_v12, %v7145_v5  ;;  %vm17290_vm4 = vmmov %vm17284_vm0 }
 0x2b9   : > { %v6905_v1 = vpop.permute.xlu1 %6904  ;;  %6504 = vrot.lane.b32.xlu1 %v6479_v37, %s12183_s18  ;;  %vm17291_vm11 = vmmov %vm17289_vm7 }
 0x2ba   : > { %v6903_v19 = vpop.permute.xlu0 %6902  ;;  %v7340_v27 = vsel %vm7336_vm1, %v7307_v24, %v6905_v1  ;;  %vm17292_vm6 = vmmov %vm17289_vm7 }
 0x2bb   : > { %v7338_v26 = vsel %vm7336_vm1, %v7305_v13, %v6903_v19 }
 0x2bd   : > { %v7033_v41 = vpop.permute.xlu1 %7032 }
 0x2be   : > { %v7031_v22 = vpop.permute.xlu0 %7030  ;;  %v7373_v48 = vsel %vm7369_vm9, %v7340_v27, %v7033_v41 }
 0x2bf   : > { %v14835_v55 = vld [vmem:[#allocation6 + $0x90] ss:$2 sm:$0xff]  ;;  %v14837_v0 = vld [vmem:[#allocation6 + $0x91] ss:$2 sm:$0xff]  ;;  %v7371_v63 = vsel %vm7369_vm9, %v7338_v26, %v7031_v22 }
 0x2c0   : > { %17285 = vst [vmem:[#allocation16_spill] sm:$0xff] %v14835_v55  ;;  %17286 = vst [vmem:[#allocation17_spill] sm:$0xff] %v14837_v0  ;;  %v5820_v2 = vadd.f32 %v14837_v0, %v14835_v55  ;;  %v11141_v16 = vcombine.low %v7371_v63, %v7373_v48 }
 0x2c1   : > { %v6365_v20 = vpop.permute.xlu1 %6364 }
 0x2c2   : > { %v14844_v38 = vmul.f32 0.25, %v5820_v2  ;;  %v6363_v53 = vpop.permute.xlu0 %6362  ;;  %7603 = vmatmul.mubr.bf16.vlgmr.msra.gmra.mxu1 %v11141_v16 }
 0x2c3   : > { %11167 = vmatprep.mubr.msk.bf16.mxu1 %vm598_vm13, %v11144_v57 }
 0x2c4   : > { %17287 = vst [vmem:[#allocation18_spill] sm:$0xff] %v14844_v38  ;;  %v11229_v25 = vpack.c.bf16 %v14844_v38, %v14844_v38 }
 0x2c5   : > { %v6493_v1 = vpop.permute.xlu1 %6492 }
 0x2c6   : > { %v6491_v31 = vpop.permute.xlu0 %6490  ;;  %v5941_v46 = vrot.slane %v11229_v25, 7  ;;  %v11996_v25 = vld [vmem:[#allocation3 + $0x78] ss:$0 sps:$4 sm:$0xff]  }
 0x2c7   : > { %6584 = vrot.lane.b32.xlu1 %v11996_v25, %s12184_s29 }
 0x2c8   : > { %v11361_v19 = vpop.f32.mrf.mxu0  ;;  %6007 = vst.msk [vmem:[#allocation3 + $0x78] sm:$0xe] %vm5988_vm8, %v5941_v46  ;;  %v5942_v54 = vrot.slane %v5941_v46, 4  ;;  %v6024_v46 = vld [vmem:[#allocation3 + $0x18] sm:$0xf] }
 0x2c9   : > { %v5462_v35 = vmul.f32 %v14794_v8, %v11361_v19  ;;  %v6573_v62 = vpop.permute.xlu1 %6572 }
 0x2ca   : > { %v6571_v33 = vpop.permute.xlu0 %6570  ;;  %v5318_v24 = vpop.f32.mrf.mxu0  ;;  %6008 = vst.msk [vmem:[#allocation3 + $0x7c] sm:$0x1] %vm17288_vm2, %v5942_v54  ;;  %vm17293_vm2 = vmmov %vm17284_vm0 }
 0x2cb   : > { %v5533_v13 = vadd.f32 %v14802_v7, %v5462_v35  ;;  %v5460_v27 = vmul.f32 %v14794_v8, %v5318_v24 }
 0x2cc   : > { %v11362_v41 = vpop.f32.mrf.mxu0 }
 0x2cd   : > { %v5531_v5 = vadd.f32 %v14802_v7, %v5460_v27  ;;  %v5463_v26 = vmul.f32 %v14794_v8, %v11362_v41  ;;  %v6701_v22 = vpop.permute.xlu1 %6700  ;;  %v5597_v12 = vmax.f32 %v5533_v13, 0.0 }
 0x2ce   : > { %v6699_v48 = vpop.permute.xlu0 %6698  ;;  %v5321_v63 = vpop.f32.mrf.mxu0 }
 0x2cf   : > { %v5595_v2 = vmax.f32 %v5531_v5, 0.0  ;;  %v5534_v16 = vadd.f32 %v14802_v7, %v5463_v26  ;;  %v5461_v57 = vmul.f32 %v14794_v8, %v5321_v63  ;;  %v6023_v26 = vld [vmem:[#allocation3 + $0x10] sm:$0xf]  ;;  %v7169_v63 = vsel %vm598_vm13, %v6024_v46, %v6365_v20  ;;  %v11999_v46 = vld [vmem:[#allocation3 + $0x40] sm:$0x3c]  }
 0x2d1   : > { %v5639_v19 = vadd.f32 %v5597_v12, %v5595_v2  ;;  %v5671_v54 = vmax.f32 %v5595_v2, %v5597_v12  ;;  %v5532_v35 = vadd.f32 %v14802_v7, %v5461_v57  ;;  %v6829_v24 = vpop.permute.xlu1 %6828  ;;  %v11997_v27 = vld [vmem:[#allocation3 + $0x78] sm:$0x1e]   ;;  %v5598_v41 = vmax.f32 %v5534_v16, 0.0  ;;  %v12000_v16 = vld [vmem:[#allocation3 + $0x48] sm:$0x3c]  }
 0x2d2   : > { %v6827_v37 = vpop.permute.xlu0 %6826  ;;  %v6687_v5 = vrot.slane %v11997_v27, 1  ;;  %v11998_v45 = vld [vmem:[#allocation3 + $0x78] sm:$0x3c]   ;;  %v7166_v12 = vsel %vm598_vm13, %v6023_v26, %v6363_v53  ;;  %v7213_v2 = vsel %vm17291_vm11, %v7169_v63, %v6493_v1  ;;  %vm17299_vm11 = vcmask 122880  }
 0x2d3   : > { %v5703_v17 = vsel %vm17289_vm7, %v5639_v19, %v5671_v54  ;;  %v5596_v13 = vmax.f32 %v5532_v35, 0.0  ;;  %v7211_v19 = vsel %vm17292_vm6, %v7166_v12, %v6491_v31  ;;  %v7245_v54 = vsel %vm17284_vm0, %v7213_v2, %v6573_v62  ;;  %vm17294_vm7 = vmmov %vm17292_vm6 }
 0x2d4   : > { %5736 = vst.msk [vmem:[#allocation6 + $0xa0] sm:$0xff] %vm17290_vm4, %v5703_v17  ;;  %6712 = vrot.lane.b32.xlu1 %v6687_v5, %s12185_s30  ;;  %v7243_v27 = vsel %vm17293_vm2, %v7211_v19, %v6571_v33  ;;  %v7278_v20 = vsel %vm7270_vm14, %v7245_v54, %v6701_v22  ;;  %v6815_v53 = vrot.slane %v11998_v45, 2  ;;  %vm17295_vm4 = vmmov %vm17284_vm0  ;;  %v7147_v33 = vrot.slane %v12000_v16, 2 }
 0x2d5   : > { %v5640_v57 = vadd.f32 %v5598_v41, %v5596_v13  ;;  %v5672_v28 = vmax.f32 %v5596_v13, %v5598_v41  ;;  %v6909_v25 = vpop.permute.xlu1 %6908  ;;  %v7276_v1 = vsel %vm7270_vm14, %v7243_v27, %v6699_v48  ;;  %v7311_v41 = vsel %vm7303_vm5, %v7278_v20, %v6829_v24  ;;  %vm17300_vm2 = vmmov %vm17292_vm6 }
 0x2d6   : > { %v6907_v35 = vpop.permute.xlu0 %6906  ;;  %v7309_v13 = vsel %vm7303_vm5, %v7276_v1, %v6827_v37  ;;  %v7344_v31 = vsel %vm7336_vm1, %v7311_v41, %v6909_v25  ;;  %v7146_v48 = vrot.slane %v11999_v46, 2 }
 0x2d7   : > { %v5704_v17 = vsel %vm17294_vm7, %v5640_v57, %v5672_v28  ;;  %v7342_v22 = vsel %vm7336_vm1, %v7309_v13, %v6907_v35  ;;  %vm17301_vm7 = vmmov %vm17284_vm0 }
 0x2d8   : > { %5737 = vst.msk [vmem:[#allocation6 + $0xa8] sm:$0xff] %vm17295_vm4, %v5704_v17  ;;  %6840 = vrot.lane.b32.xlu1 %v6815_v53, %s12186_s19  ;;  %v11146_v63 = vcombine.low %v7146_v48, %v7147_v33  ;;  %vm17304_vm4 = vcmask 123904  }
 0x2d9   : > { %v7037_v62 = vpop.permute.xlu1 %7036 }
 0x2da   : > { %v7035_v5 = vpop.permute.xlu0 %7034  ;;  %v7377_v28 = vsel %vm7369_vm9, %v7344_v31, %v7037_v62 }
 0x2db   : > { %v7375_v45 = vsel %vm7369_vm9, %v7342_v22, %v7035_v5 }
 0x2dc   : > { %v11143_v26 = vcombine.low %v7375_v45, %v7377_v28 }
 0x2dd   : > { %v14899_v27 = vpop.permute.xlu1 %6368 }
 0x2de   : > { %v14880_v12 = vpop.permute.xlu0 %6366  ;;  %7611 = vmatmul.mubr.bf16.gmra.mxu1 %v11143_v26 }
 0x2df   : > { %v14882_v37 = vld [vmem:[#allocation6 + $0xa0] ss:$2 sm:$0xff]  ;;  %v14884_v24 = vld [vmem:[#allocation6 + $0xa1] ss:$2 sm:$0xff]  ;;  %11168 = vmatprep.mubr.msk.bf16.mxu1 %vm598_vm13, %v11146_v63 }
 0x2e0   : > { %17296 = vst [vmem:[#allocation19_spill] sm:$0xff] %v14882_v37  ;;  %17297 = vst [vmem:[#allocation20_spill] sm:$0xff] %v14884_v24  ;;  %v5821_v2 = vadd.f32 %v14884_v24, %v14882_v37 }
 0x2e1   : > { %v14908_v62 = vpop.permute.xlu1 %6496 }
 0x2e2   : > { %v14891_v25 = vmul.f32 0.25, %v5821_v2  ;;  %v14893_v16 = vpop.permute.xlu0 %6494  ;;  %v12001_v2 = vld [vmem:[#allocation3 + $0x80] ss:$0 sps:$4 sm:$0xff]  }
 0x2e3   : > { %6918 = vrot.lane.b32.xlu0 %v12001_v2, %s12187_s28 }
 0x2e4   : > { %17298 = vst [vmem:[#allocation21_spill] sm:$0xff] %v14891_v25  ;;  %v11230_v19 = vpack.c.bf16 %v14891_v25, %v14891_v25 }
 0x2e6   : > { %v14897_v54 = vpop.permute.xlu0 %6574  ;;  %v5943_v35 = vrot.slane %v11230_v19, 7 }
 0x2e8   : > { %v11365_v20 = vpop.f32.mrf.mxu0  ;;  %6009 = vst.msk [vmem:[#allocation3 + $0x80] sm:$0xe] %vm5988_vm8, %v5943_v35  ;;  %v5944_v17 = vrot.slane %v5943_v35, 4 }
 0x2e9   : > { %v5466_v53 = vmul.f32 %v14794_v8, %v11365_v20 }
 0x2ea   : > { %v14903_v46 = vpop.permute.xlu0 %6702  ;;  %v5334_v1 = vpop.f32.mrf.mxu0  ;;  %6010 = vst.msk [vmem:[#allocation3 + $0x84] sm:$0x1] %vm17299_vm11, %v5944_v17 }
 0x2eb   : > { %v5537_v41 = vadd.f32 %v14802_v7, %v5466_v53  ;;  %v5464_v13 = vmul.f32 %v14794_v8, %v5334_v1  ;;  %v12003_v53 = vld [vmem:[#allocation3 + $0x70] sm:$0x1e]  }
 0x2ec   : > { %v11366_v31 = vpop.f32.mrf.mxu0 }
 0x2ed   : > { %v5535_v33 = vadd.f32 %v14802_v7, %v5464_v13  ;;  %v5467_v22 = vmul.f32 %v14794_v8, %v11366_v31  ;;  %v5601_v45 = vmax.f32 %v5537_v41, 0.0  ;;  %v14920_v31 = vpop.permute.xlu1 %6576 }
 0x2ee   : > { %v14912_v5 = vpop.permute.xlu0 %6830  ;;  %v5337_v28 = vpop.f32.mrf.mxu0 }
 0x2ef   : > { %v5599_v48 = vmax.f32 %v5535_v33, 0.0  ;;  %v5538_v26 = vadd.f32 %v14802_v7, %v5467_v22  ;;  %v5465_v63 = vmul.f32 %v14794_v8, %v5337_v28 }
 0x2f1   : > { %v5641_v19 = vadd.f32 %v5601_v45, %v5599_v48  ;;  %v5673_v35 = vmax.f32 %v5599_v48, %v5601_v45  ;;  %v5536_v20 = vadd.f32 %v14802_v7, %v5465_v63  ;;  %v12002_v17 = vld [vmem:[#allocation3 + $0x80] sm:$0x1e]   ;;  %v5602_v1 = vmax.f32 %v5538_v26, 0.0  ;;  %v12004_v45 = vld [vmem:[#allocation3 + $0x70] sm:$0x3c]   ;;  %v14929_v2 = vpop.permute.xlu1 %6704 }
 0x2f2   : > { %v14918_v13 = vpop.permute.xlu0 %6910  ;;  %v7022_v22 = vrot.slane %v12002_v17, 1  ;;  %v6352_v26 = vrot.slane %v12003_v53, 1  ;;  %v14935_v17 = vld [vmem:[#allocation3 + $0x80] sm:$0x1e]  }
 0x2f3   : > { %v5705_v41 = vsel %vm17292_vm6, %v5641_v19, %v5673_v35  ;;  %v5600_v33 = vmax.f32 %v5536_v20, 0.0  ;;  %v6480_v19 = vrot.slane %v12004_v45, 2  ;;  %v12005_v20 = vld [vmem:[#allocation3 + $0x80] ss:$0 sps:$4 sm:$0xff]   ;;  %vm17305_vm6 = vmmov %vm17299_vm11 }
 0x2f4   : > { %5738 = vst.msk [vmem:[#allocation6 + $0xb0] sm:$0xff] %vm17284_vm0, %v5705_v41  ;;  %7046 = vrot.lane.b32.xlu0 %v7022_v22, %s12188_s17  ;;  %v14947_v22 = vld [vmem:[#allocation3 + $0x58] sm:$0x3c]   ;;  %vm17306_vm0 = vmmov %vm17304_vm4 }
 0x2f5   : > { %v5642_v28 = vadd.f32 %v5602_v1, %v5600_v33  ;;  %v5674_v57 = vmax.f32 %v5600_v33, %v5602_v1  ;;  %v14937_v1 = vld [vmem:[#allocation3 + $0x50] sm:$0x3c]  }
 0x2f6   : > { %v14926_v63 = vpop.permute.xlu0 %7038 }
 0x2f7   : > { %v5706_v48 = vsel %vm17300_vm2, %v5642_v28, %v5674_v57  ;;  %v14939_v57 = vpop.permute.xlu1 %6832  ;;  %v17105_v28 = vmov 0.0   ;;  %vm17307_vm2 = vmmov %vm17306_vm0 }
 0x2f8   : > { %5739 = vst.msk [vmem:[#allocation6 + $0xb8] sm:$0xff] %vm17301_vm7, %v5706_v48  ;;  %6378 = vrot.lane.b32.xlu0 %v6352_v26, %s12180_s15  ;;  %vm17308_vm7 = vmmov %vm17306_vm0  ;;  %11383 = vmatprep.subr.mxu1 %v17105_v28  ;;  %v6025_v48 = vld [vmem:[#allocation3 + $0x20] sm:$0xf]  ;;  %v6026_v26 = vld [vmem:[#allocation3 + $0x28] sm:$0xf] }
 0x2f9   : > { %599 = vst.msk [vmem:[#allocation4] sm:$0xff] %vm598_vm13, %v17105_v28  ;;  %601 = vst.msk [vmem:[#allocation4 + $0xa0] sm:$0xff] %vm598_vm13, %v17105_v28 }
 0x2fa   : > { %v14932_v35 = vpop.permute.xlu0 %6370  ;;  %600 = vst.msk [vmem:[#allocation4 + $0x8] sm:$0x3] %vm17304_vm4, %v17105_v28  ;;  %vm17309_vm4 = vmmov %vm17305_vm6 }
 0x2fb   : > { %609 = vst.msk [vmem:[#allocation4 + $0x10] sm:$0x1] %vm17299_vm11, %v17105_v28  ;;  %vm17310_vm11 = vmmov %vm17309_vm4  ;;  %v6913_v61 = vpop.permute.xlu1 %6912 }
 0x2fc   : > { %6506 = vrot.lane.b32.xlu0 %v6480_v19, %s12183_s18  ;;  %629 = vst.msk [vmem:[#allocation4 + $0x19] sm:$0x1] %vm17305_vm6, %v17105_v28  ;;  %vm17311_vm6 = vmmov %vm17309_vm4  ;;  %v7172_v19 = vsel %vm598_vm13, %v6025_v48, %v14880_v12 }
 0x2fd   : > { %602 = vst.msk [vmem:[#allocation4 + $0xa8] sm:$0x3] %vm17306_vm0, %v17105_v28  ;;  %vm17312_vm0 = vmmov %vm17309_vm4 }
 0x2fe   : > { %604 = vst.msk [vmem:[#allocation4 + $0x90] sm:$0xff] %vm598_vm13, %v17105_v28  ;;  %606 = vst.msk [vmem:[#allocation4 + $0x130] sm:$0xff] %vm598_vm13, %v17105_v28  ;;  %v15059_v49 = vpop.permute.xlu0 %6498 }
 0x2ff   : > { %v14941_v41 = vld [vmem:[#allocation6 + $0xb0] ss:$2 sm:$0xff]  ;;  %v14943_v53 = vld [vmem:[#allocation6 + $0xb1] ss:$2 sm:$0xff]  ;;  %605 = vst.msk [vmem:[#allocation4 + $0x98] sm:$0x3] %vm17307_vm2, %v17105_v28  ;;  %vm17313_vm2 = vmmov %vm17312_vm0 }
 0x300   : > { %17302 = vst [vmem:[#allocation22_spill] sm:$0xff] %v14941_v41  ;;  %17303 = vst [vmem:[#allocation23_spill] sm:$0xff] %v14943_v53  ;;  %v5822_v33 = vadd.f32 %v14943_v53, %v14941_v41  ;;  %6586 = vrot.lane.b32.xlu0 %v12005_v20, %s12184_s29  ;;  %v7175_v20 = vsel %vm598_vm13, %v6026_v26, %v14899_v27  ;;  %v6688_v53 = vrot.slane %v14935_v17, 1  ;;  %v7148_v41 = vrot.slane %v14937_v1, 2 }
 0x301   : > { %607 = vst.msk [vmem:[#allocation4 + $0x138] sm:$0x3] %vm17308_vm7, %v17105_v28  ;;  %vm17314_vm15 = vmmov %vm17312_vm0 }
 0x302   : > { %610 = vst.msk [vmem:[#allocation4 + $0x20] sm:$0x1] %vm17309_vm4, %v17105_v28  ;;  %vm17315_vm7 = vmmov %vm17312_vm0  ;;  %v15053_v45 = vmul.f32 0.25, %v5822_v33  ;;  %v7149_v33 = vrot.slane %v14947_v22, 2 }
 0x303   : > { %611 = vst.msk [vmem:[#allocation4 + $0x30] sm:$0x1] %vm17310_vm11, %v17105_v28  ;;  %vm17316_vm4 = vmmov %vm17312_vm0 }
 0x304   : > { %612 = vst.msk [vmem:[#allocation4 + $0x40] sm:$0x1] %vm17311_vm6, %v17105_v28  ;;  %vm17317_vm11 = vmmov %vm17312_vm0  ;;  %6714 = vrot.lane.b32.xlu0 %v6688_v53, %s12185_s30  ;;  %v11148_v26 = vcombine.low %v7148_v41, %v7149_v33  ;;  %v7770_v55 = vld [vmem:[#allocation4 + $0xa1] sm:$0xff] }
 0x305   : > { %613 = vst.msk [vmem:[#allocation4 + $0x50] sm:$0x1] %vm17312_vm0, %v17105_v28  ;;  %vm17318_vm6 = vmmov %vm17312_vm0 }
 0x306   : > { %614 = vst.msk [vmem:[#allocation4 + $0x60] sm:$0x1] %vm17313_vm2, %v17105_v28  ;;  %vm17319_vm2 = vmmov %vm17312_vm0  ;;  %v7041_v22 = vpop.permute.xlu1 %7040 }
 0x307   : > { %615 = vst.msk [vmem:[#allocation4 + $0x70] sm:$0x1] %vm17314_vm15, %v17105_v28  ;;  %vm17320_vm15 = vmmov %vm17312_vm0 }
 0x308   : > { %616 = vst.msk [vmem:[#allocation4 + $0x80] sm:$0x1] %vm17315_vm7, %v17105_v28  ;;  %vm17321_vm7 = vmmov %vm17312_vm0  ;;  %v11369_v53 = vpop.f32.mrf.mxu0 }
 0x309   : > { %619 = vst.msk [vmem:[#allocation4 + $0xb0] sm:$0x1] %vm17316_vm4, %v17105_v28  ;;  %vm17322_vm4 = vmmov %vm17312_vm0 }
 0x30a   : > { %620 = vst.msk [vmem:[#allocation4 + $0xc0] sm:$0x1] %vm17317_vm11, %v17105_v28  ;;  %vm17323_vm11 = vmmov %vm17312_vm0 }
 0x30b   : > { %621 = vst.msk [vmem:[#allocation4 + $0xd0] sm:$0x1] %vm17318_vm6, %v17105_v28  ;;  %vm17324_vm6 = vmmov %vm17312_vm0 }
 0x30c   : > { %622 = vst.msk [vmem:[#allocation4 + $0xe0] sm:$0x1] %vm17312_vm0, %v17105_v28  ;;  %632 = vst.msk [vmem:[#allocation4 + $0x49] sm:$0x1] %vm17312_vm0, %v17105_v28 }
 0x30d   : > { %623 = vst.msk [vmem:[#allocation4 + $0xf0] sm:$0x1] %vm17319_vm2, %v17105_v28  ;;  %vm17325_vm2 = vmmov %vm17312_vm0 }
 0x30e   : > { %624 = vst.msk [vmem:[#allocation4 + $0x100] sm:$0x1] %vm17320_vm15, %v17105_v28  ;;  %vm17326_vm15 = vmmov %vm17312_vm0 }
 0x30f   : > { %625 = vst.msk [vmem:[#allocation4 + $0x110] sm:$0x1] %vm17321_vm7, %v17105_v28  ;;  %vm17327_vm7 = vmmov %vm17312_vm0 }
 0x310   : > { %626 = vst.msk [vmem:[#allocation4 + $0x120] sm:$0x1] %vm17322_vm4, %v17105_v28  ;;  %vm17328_vm4 = vmmov %vm17312_vm0 }
 0x311   : > { %630 = vst.msk [vmem:[#allocation4 + $0x29] sm:$0x1] %vm17323_vm11, %v17105_v28  ;;  %vm17329_vm11 = vmmov %vm17312_vm0 }
 0x312   : > { %631 = vst.msk [vmem:[#allocation4 + $0x39] sm:$0x1] %vm17324_vm6, %v17105_v28  ;;  %vm17330_vm6 = vmmov %vm17312_vm0 }
 0x313   : > { %633 = vst.msk [vmem:[#allocation4 + $0x59] sm:$0x1] %vm17325_vm2, %v17105_v28  ;;  %vm17331_vm2 = vmmov %vm17312_vm0 }
 0x314   : > { %634 = vst.msk [vmem:[#allocation4 + $0x69] sm:$0x1] %vm17326_vm15, %v17105_v28  ;;  %vm17332_vm15 = vmmov %vm17312_vm0 }
 0x315   : > { %635 = vst.msk [vmem:[#allocation4 + $0x79] sm:$0x1] %vm17327_vm7, %v17105_v28  ;;  %vm17333_vm7 = vmmov %vm17312_vm0 }
 0x316   : > { %636 = vst.msk [vmem:[#allocation4 + $0x89] sm:$0x1] %vm17328_vm4, %v17105_v28  ;;  %vm17334_vm4 = vmmov %vm17312_vm0 }
 0x317   : > { %639 = vst.msk [vmem:[#allocation4 + $0xb9] sm:$0x1] %vm17329_vm11, %v17105_v28  ;;  %vm17335_vm11 = vmmov %vm17312_vm0 }
 0x318   : > { %640 = vst.msk [vmem:[#allocation4 + $0xc9] sm:$0x1] %vm17330_vm6, %v17105_v28  ;;  %vm17336_vm6 = vmmov %vm17312_vm0 }
 0x319   : > { %641 = vst.msk [vmem:[#allocation4 + $0xd9] sm:$0x1] %vm17312_vm0, %v17105_v28  ;;  %628 = vst.msk [vmem:[#allocation4 + $0x9] sm:$0x1] %vm17312_vm0, %v17105_v28 }
 0x31a   : > { %642 = vst.msk [vmem:[#allocation4 + $0xe9] sm:$0x1] %vm17331_vm2, %v17105_v28  ;;  %vm17337_vm2 = vmmov %vm17312_vm0 }
 0x31b   : > { %643 = vst.msk [vmem:[#allocation4 + $0xf9] sm:$0x1] %vm17332_vm15, %v17105_v28  ;;  %vm17338_vm15 = vmmov %vm17312_vm0 }
 0x31c   : > { %644 = vst.msk [vmem:[#allocation4 + $0x109] sm:$0x1] %vm17333_vm7, %v17105_v28  ;;  %vm17339_vm7 = vmmov %vm17312_vm0 }
 0x31d   : > { %645 = vst.msk [vmem:[#allocation4 + $0x119] sm:$0x1] %vm17334_vm4, %v17105_v28  ;;  %vm17340_vm4 = vmmov %vm17312_vm0 }
 0x31e   : > { %646 = vst.msk [vmem:[#allocation4 + $0x129] sm:$0x1] %vm17335_vm11, %v17105_v28  ;;  %vm17341_vm11 = vmmov %vm17312_vm0 }
 0x31f   : > { %608 = vst.msk [vmem:[#allocation4] sm:$0x1] %vm17336_vm6, %v17105_v28  ;;  %vm17342_vm6 = vmmov %vm17312_vm0  ;;  %vm17344_vm0 = vcmask 261120  }
 0x320   : > { %617 = vst.msk [vmem:[#allocation4 + $0x90] sm:$0x1] %vm17337_vm2, %v17105_v28  ;;  %17343 = vst [vmem:[#allocation24_spill] sm:$0xff] %v15053_v45  ;;  %v7215_v21 = vsel %vm17344_vm0, %v7172_v19, %v14893_v16  ;;  %v11231_v16 = vpack.c.bf16 %v15053_v45, %v15053_v45  ;;  %v6579_v19 = vpop.permute.xlu0 %6578 }
 0x321   : > { %618 = vst.msk [vmem:[#allocation4 + $0xa0] sm:$0x1] %vm17338_vm15, %v17105_v28  ;;  %vm17345_vm2 = vmmov %vm17344_vm0  ;;  %vm17346_vm15 = vcmask 392192  }
 0x322   : > { %627 = vst.msk [vmem:[#allocation4 + $0x130] sm:$0x1] %vm17339_vm7, %v17105_v28  ;;  %v7217_v42 = vsel %vm17345_vm2, %v7175_v20, %v14908_v62  ;;  %v7247_v12 = vsel %vm17346_vm15, %v7215_v21, %v14897_v54  ;;  %vm17347_vm7 = vmmov %vm17346_vm15  ;;  %v5470_v20 = vmul.f32 %v14794_v8, %v11369_v53 }
 0x323   : > { %637 = vst.msk [vmem:[#allocation4 + $0x99] sm:$0x1] %vm17340_vm4, %v17105_v28  ;;  %v7249_v27 = vsel %vm17347_vm7, %v7217_v42, %v14920_v31  ;;  %v7280_v62 = vsel %vm7270_vm14, %v7247_v12, %v14903_v46  ;;  %v5945_v42 = vrot.slane %v11231_v16, 7  ;;  %vm17351_vm15 = vmmov %vm17344_vm0 }
 0x324   : > { %638 = vst.msk [vmem:[#allocation4 + $0xa9] sm:$0x1] %vm17341_vm11, %v17105_v28  ;;  %v7282_v17 = vsel %vm7270_vm14, %v7249_v27, %v14929_v2  ;;  %v7313_v1 = vsel %vm7303_vm5, %v7280_v62, %v14912_v5  ;;  %v6707_v33 = vpop.permute.xlu0 %6706  ;;  %vm17348_vm11 = vmmov %vm17344_vm0 }
 0x325   : > { %647 = vst.msk [vmem:[#allocation4 + $0x139] sm:$0x1] %vm17342_vm6, %v17105_v28  ;;  %v12007_v28 = vld [vmem:[#allocation3 + $0x80] sm:$0x3c]   ;;  %v7315_v21 = vsel %vm7303_vm5, %v7282_v17, %v14939_v57  ;;  %v7346_v54 = vsel %vm7336_vm1, %v7313_v1, %v14918_v13  ;;  %v5946_v5 = vrot.slane %v5945_v42, 4  ;;  %v5350_v13 = vpop.f32.mrf.mxu0  ;;  %vm17349_vm6 = vmmov %vm17347_vm7 }
 0x326   : > { %v7348_v31 = vsel %vm7336_vm1, %v7315_v21, %v6913_v61  ;;  %v6816_v48 = vrot.slane %v12007_v28, 2  ;;  %v7379_v46 = vsel %vm7369_vm9, %v7346_v54, %v14926_v63  ;;  %6011 = vst.msk [vmem:[#allocation3 + $0x88] sm:$0xe] %vm5988_vm8, %v5945_v42  ;;  %v5541_v61 = vadd.f32 %v14802_v7, %v5470_v20  ;;  %v6373_v28 = vpop.permute.xlu1 %6372  ;;  %v12008_v54 = vld [vmem:[#allocation3 + $0x88] ss:$0 sps:$4 sm:$0xff]   ;;  %vm17350_vm2 = vmmov %vm17349_vm6 }
 0x327   : > { %v7381_v2 = vsel %vm7369_vm9, %v7348_v31, %v7041_v22  ;;  %6012 = vst.msk [vmem:[#allocation3 + $0x8c] sm:$0x1] %vm17340_vm4, %v5946_v5  ;;  %v5468_v63 = vmul.f32 %v14794_v8, %v5350_v13  ;;  %v11370_v12 = vpop.f32.mrf.mxu0  ;;  %6920 = vrot.lane.b32.xlu1 %v12008_v54, %s12187_s28  ;;  %v6028_v54 = vld [vmem:[#allocation3 + $0x38] sm:$0xf]  ;;  %vm17354_vm7 = vmmov %vm17344_vm0 }
 0x328   : > { %v11145_v57 = vcombine.low %v7379_v46, %v7381_v2  ;;  %6842 = vrot.lane.b32.xlu0 %v6816_v48, %s12186_s19  ;;  %v5471_v27 = vmul.f32 %v14794_v8, %v11370_v12  ;;  %v5605_v62 = vmax.f32 %v5541_v61, 0.0  ;;  %v12010_v2 = vld [vmem:[#allocation3 + $0x78] sm:$0x1e]   ;;  %v6835_v13 = vpop.permute.xlu0 %6834  ;;  %vm17355_vm4 = vmmov %vm17350_vm2 }
 0x329   : > { %v5539_v41 = vadd.f32 %v14802_v7, %v5468_v63  ;;  %v5353_v16 = vpop.f32.mrf.mxu0  ;;  %v12011_v12 = vld [vmem:[#allocation3 + $0x78] sm:$0x3c]  }
 0x32a   : > { %7619 = vmatmul.mubr.bf16.gmra.mxu1 %v11145_v57  ;;  %v5542_v1 = vadd.f32 %v14802_v7, %v5471_v27  ;;  %v5469_v21 = vmul.f32 %v14794_v8, %v5353_v16  ;;  %v6501_v42 = vpop.permute.xlu1 %6500  ;;  %v6353_v16 = vrot.slane %v12010_v2, 1 }
 0x32b   : > { %11169 = vmatprep.mubr.msk.bf16.mxu1 %vm598_vm13, %v11148_v26  ;;  %v5603_v17 = vmax.f32 %v5539_v41, 0.0 }
 0x32c   : > { %v5540_v48 = vadd.f32 %v14802_v7, %v5469_v21  ;;  %v5606_v53 = vmax.f32 %v5542_v1, 0.0  ;;  %v6481_v1 = vrot.slane %v12011_v12, 2  ;;  %v6027_v21 = vld [vmem:[#allocation3 + $0x30] sm:$0xf]  ;;  %v12016_v12 = vld [vmem:[#allocation3 + $0x80] sm:$0x3c]  }
 0x32d   : > { %v5643_v31 = vadd.f32 %v5605_v62, %v5603_v17  ;;  %v5675_v22 = vmax.f32 %v5603_v17, %v5605_v62  ;;  %v6915_v62 = vpop.permute.xlu0 %6914 }
 0x32e   : > { %v12009_v46 = vld [vmem:[#allocation3 + $0x88] sm:$0x1e]   ;;  %v5604_v26 = vmax.f32 %v5540_v48, 0.0  ;;  %v6581_v57 = vpop.permute.xlu1 %6580  ;;  %v12012_v48 = vld [vmem:[#allocation3 + $0x88] ss:$0 sps:$4 sm:$0xff]  }
 0x32f   : > { %v5707_v5 = vsel %vm17348_vm11, %v5643_v31, %v5675_v22  ;;  %v7023_v20 = vrot.slane %v12009_v46, 1  ;;  %v7178_v31 = vsel %vm598_vm13, %v6027_v21, %v14932_v35  ;;  %v7181_v22 = vsel %vm598_vm13, %v6028_v54, %v6373_v28  ;;  %v12017_v46 = vld [vmem:[#allocation3 + $0x88] sm:$0x3c]   ;;  %vm17356_vm11 = vmmov %vm17350_vm2 }
 0x330   : > { %5740 = vst.msk [vmem:[#allocation6 + $0xc0] sm:$0xff] %vm17349_vm6, %v5707_v5  ;;  %v5644_v61 = vadd.f32 %v5606_v53, %v5604_v26  ;;  %v5676_v63 = vmax.f32 %v5604_v26, %v5606_v53  ;;  %v7219_v2 = vsel %vm17351_vm15, %v7178_v31, %v15059_v49  ;;  %v7221_v26 = vsel %vm17354_vm7, %v7181_v22, %v6501_v42  ;;  %vm17359_vm15 = vmmov %vm17344_vm0 }
 0x331   : > { %7048 = vrot.lane.b32.xlu1 %v7023_v20, %s12188_s17  ;;  %v7253_v28 = vsel %vm17356_vm11, %v7221_v26, %v6581_v57  ;;  %v7151_v54 = vrot.slane %v12017_v46, 2  ;;  %v12018_v26 = vld [vmem:[#allocation3 + $0x88] sm:$0x3c]   ;;  %vm17358_vm6 = vcmask 122880   ;;  %vm17360_vm7 = vmmov %vm17350_vm2 }
 0x332   : > { %v5708_v41 = vsel %vm17344_vm0, %v5644_v61, %v5676_v63  ;;  %v6709_v27 = vpop.permute.xlu1 %6708  ;;  %v12013_v61 = vld [vmem:[#allocation3 + $0x88] sm:$0x1e]   ;;  %v7251_v63 = vsel %vm17355_vm4, %v7219_v2, %v6579_v19  ;;  %vm17364_vm4 = vmmov %vm17358_vm6 }
 0x333   : > { %5741 = vst.msk [vmem:[#allocation6 + $0xc8] sm:$0xff] %vm17350_vm2, %v5708_v41  ;;  %v7284_v49 = vsel %vm7270_vm14, %v7251_v63, %v6707_v33  ;;  %v6689_v2 = vrot.slane %v12013_v61, 1  ;;  %v7150_v63 = vrot.slane %v12016_v12, 2  ;;  %vm17365_vm11 = vmmov %vm17344_vm0 }
 0x334   : > { %v7317_v42 = vsel %vm7303_vm5, %v7284_v49, %v6835_v13 }
 0x335   : > { %6380 = vrot.lane.b32.xlu1 %v6353_v16, %s12180_s15  ;;  %v7043_v16 = vpop.permute.xlu0 %7042  ;;  %v7350_v57 = vsel %vm7336_vm1, %v7317_v42, %v6915_v62  ;;  %v6817_v62 = vrot.slane %v12018_v26, 2 }
 0x336   : > { %v6837_v17 = vpop.permute.xlu1 %6836  ;;  %v7383_v33 = vsel %vm7369_vm9, %v7350_v57, %v7043_v16 }
 0x339   : > { %6508 = vrot.lane.b32.xlu1 %v6481_v1, %s12183_s18  ;;  %v7286_v1 = vsel %vm7270_vm14, %v7253_v28, %v6709_v27 }
 0x33a   : > { %v15110_v53 = vld [vmem:[#allocation6 + $0xc0] ss:$2 sm:$0xff]  ;;  %v15112_v5 = vld [vmem:[#allocation6 + $0xc1] ss:$2 sm:$0xff]  ;;  %v6917_v20 = vpop.permute.xlu1 %6916  ;;  %v7319_v19 = vsel %vm7303_vm5, %v7286_v1, %v6837_v17  ;;  %v11150_v17 = vcombine.low %v7150_v63, %v7151_v54 }
 0x33b   : > { %17352 = vst [vmem:[#allocation25_spill] sm:$0xff] %v15110_v53  ;;  %17353 = vst [vmem:[#allocation26_spill] sm:$0xff] %v15112_v5  ;;  %v5823_v35 = vadd.f32 %v15112_v5, %v15110_v53  ;;  %v7352_v31 = vsel %vm7336_vm1, %v7319_v19, %v6917_v20 }
 0x33d   : > { %6588 = vrot.lane.b32.xlu1 %v12012_v48, %s12184_s29  ;;  %v15125_v21 = vmul.f32 0.25, %v5823_v35  ;;  %v11373_v35 = vpop.f32.mrf.mxu0 }
 0x33e   : > { %v7045_v22 = vpop.permute.xlu1 %7044  ;;  %v5474_v61 = vmul.f32 %v14794_v8, %v11373_v35 }
 0x33f   : > { %17357 = vst [vmem:[#allocation27_spill] sm:$0xff] %v15125_v21  ;;  %v7385_v27 = vsel %vm7369_vm9, %v7352_v31, %v7045_v22  ;;  %v11232_v13 = vpack.c.bf16 %v15125_v21, %v15125_v21  ;;  %v5366_v28 = vpop.f32.mrf.mxu0 }
 0x340   : > { %v11147_v48 = vcombine.low %v7383_v33, %v7385_v27  ;;  %v5545_v12 = vadd.f32 %v14802_v7, %v5474_v61  ;;  %v5472_v49 = vmul.f32 %v14794_v8, %v5366_v28  ;;  %v12022_v28 = vld [vmem:[#allocation3 + $0x80] sm:$0x3c]  }
 0x341   : > { %6716 = vrot.lane.b32.xlu1 %v6689_v2, %s12185_s30  ;;  %v5947_v46 = vrot.slane %v11232_v13, 7  ;;  %v11374_v16 = vpop.f32.mrf.mxu0  ;;  %v12019_v2 = vld [vmem:[#allocation3 + $0x90] ss:$0 sps:$4 sm:$0xff]   ;;  %v12021_v13 = vld [vmem:[#allocation3 + $0x80] sm:$0x1e]  }
 0x342   : > { %7627 = vmatmul.mubr.bf16.gmra.mxu1 %v11147_v48  ;;  %v5543_v1 = vadd.f32 %v14802_v7, %v5472_v49  ;;  %v5475_v42 = vmul.f32 %v14794_v8, %v11374_v16  ;;  %v5609_v54 = vmax.f32 %v5545_v12, 0.0  ;;  %6922 = vrot.lane.b32.xlu0 %v12019_v2, %s12187_s28  ;;  %v12023_v12 = vld [vmem:[#allocation3 + $0x90] ss:$0 sps:$4 sm:$0xff]  }
 0x343   : > { %11170 = vmatprep.mubr.msk.bf16.mxu1 %vm598_vm13, %v11150_v17  ;;  %6013 = vst.msk [vmem:[#allocation3 + $0x90] sm:$0xe] %vm5988_vm8, %v5947_v46  ;;  %v5948_v20 = vrot.slane %v5947_v46, 4  ;;  %v5369_v19 = vpop.f32.mrf.mxu0 }
 0x344   : > { %v5607_v57 = vmax.f32 %v5543_v1, 0.0  ;;  %v5546_v31 = vadd.f32 %v14802_v7, %v5475_v42  ;;  %v5473_v22 = vmul.f32 %v14794_v8, %v5369_v19  ;;  %v6354_v8 = vrot.slane %v12021_v13, 1 }
 0x345   : > { %6844 = vrot.lane.b32.xlu1 %v6817_v62, %s12186_s19  ;;  %6014 = vst.msk [vmem:[#allocation3 + $0x94] sm:$0x1] %vm17358_vm6, %v5948_v20  ;;  %vm17366_vm6 = vmmov %vm17350_vm2 }
 0x346   : > { %v5645_v26 = vadd.f32 %v5609_v54, %v5607_v57  ;;  %v5677_v33 = vmax.f32 %v5607_v57, %v5609_v54  ;;  %v5544_v27 = vadd.f32 %v14802_v7, %v5473_v22  ;;  %v5610_v48 = vmax.f32 %v5546_v31, 0.0 }
 0x347   : > { %v6482_v7 = vrot.slane %v12022_v28, 2 }
 0x348   : > { %v5709_v17 = vsel %vm17344_vm0, %v5645_v26, %v5677_v33  ;;  %v5608_v46 = vmax.f32 %v5544_v27, 0.0  ;;  %v11377_v33 = vpop.f32.mrf.mxu0 }
 0x349   : > { %5742 = vst.msk [vmem:[#allocation6 + $0xd0] sm:$0xff] %vm17350_vm2, %v5709_v17  ;;  %v15181_v17 = vld [vmem:[%s17082_s3] ss:$0 sm:$0xff] }
 0x34a   : > { %v5646_v35 = vadd.f32 %v5610_v48, %v5608_v46  ;;  %v5678_v20 = vmax.f32 %v5608_v46, %v5610_v48  ;;  %v5382_v48 = vpop.f32.mrf.mxu0 }
 0x34c   : > { %v12020_v63 = vld [vmem:[#allocation3 + $0x90] sm:$0x1e]   ;;  %v5710_v61 = vsel %vm17359_vm15, %v5646_v35, %v5678_v20  ;;  %v11378_v35 = vpop.f32.mrf.mxu0  ;;  %vm17370_vm15 = vmmov %vm17364_vm4 }
 0x34d   : > { %v7024_v62 = vrot.slane %v12020_v63, 1  ;;  %5743 = vst.msk [vmem:[#allocation6 + $0xd8] sm:$0xff] %vm17360_vm7, %v5710_v61  ;;  %v12024_v1 = vld [vmem:[#allocation3 + $0x90] sm:$0x1e]   ;;  %v15173_v63 = vld [vmem:[%s17081_s2] ss:$0 sm:$0xff]  ;;  %vm17371_vm7 = vmmov %vm17344_vm0 }
 0x34e   : > { %v6690_v57 = vrot.slane %v12024_v1, 1  ;;  %v12025_v31 = vld [vmem:[#allocation3 + $0x90] sm:$0x3c]   ;;  %v5478_v13 = vmul.f32 %v15173_v63, %v11377_v33  ;;  %v5385_v61 = vpop.f32.mrf.mxu0 }
 0x34f   : > { %7050 = vrot.lane.b32.xlu0 %v7024_v62, %s12188_s17  ;;  %v6818_v26 = vrot.slane %v12025_v31, 2  ;;  %v5476_v62 = vmul.f32 %v15173_v63, %v5382_v48  ;;  %v5477_v1 = vmul.f32 %v15173_v63, %v5385_v61 }
 0x350   : > { %v5549_v46 = vadd.f32 %v15181_v17, %v5478_v13 }
 0x351   : > { %v5547_v20 = vadd.f32 %v15181_v17, %v5476_v62 }
 0x352   : > { %v5613_v28 = vmax.f32 %v5549_v46, 0.0 }
 0x353   : > { %6382 = vrot.lane.b32.xlu0 %v6354_v8, %s12180_s15  ;;  %v5479_v8 = vmul.f32 %v15173_v63, %v11378_v35 }
 0x354   : > { %v15155_v49 = vld [vmem:[#allocation6 + $0xd0] ss:$2 sm:$0xff]  ;;  %v15157_v16 = vld [vmem:[#allocation6 + $0xd1] ss:$2 sm:$0xff] }
 0x355   : > { %17361 = vst [vmem:[#allocation28_spill] sm:$0xff] %v15155_v49  ;;  %17362 = vst [vmem:[#allocation29_spill] sm:$0xff] %v15157_v16  ;;  %v5824_v42 = vadd.f32 %v15157_v16, %v15155_v49  ;;  %v12040_v16 = vld [vmem:[#allocation3 + $0x90] sm:$0x3c]  }
 0x357   : > { %6510 = vrot.lane.b32.xlu0 %v6482_v7, %s12183_s18  ;;  %v15164_v54 = vmul.f32 0.25, %v5824_v42  ;;  %v5611_v7 = vmax.f32 %v5547_v20, 0.0  ;;  %v12026_v42 = vld [vmem:[#allocation3 + $0x98] ss:$0 sps:$4 sm:$0xff]  }
 0x358   : > { %6924 = vrot.lane.b32.xlu1 %v12026_v42, %s12187_s28 }
 0x359   : > { %17363 = vst [vmem:[#allocation30_spill] sm:$0xff] %v15164_v54  ;;  %v11233_v22 = vpack.c.bf16 %v15164_v54, %v15164_v54  ;;  %v5679_v31 = vmax.f32 %v5611_v7, %v5613_v28 }
 0x35b   : > { %6590 = vrot.lane.b32.xlu0 %v12023_v12, %s12184_s29  ;;  %v5949_v2 = vrot.slane %v11233_v22, 7  ;;  %v5550_v12 = vadd.f32 %v15181_v17, %v5479_v8  ;;  %v5548_v22 = vadd.f32 %v15181_v17, %v5477_v1  ;;  %v12029_v8 = vld [vmem:[#allocation3 + $0x88] sm:$0x3c]  }
 0x35c   : > { %v6483_v61 = vrot.slane %v12029_v8, 2 }
 0x35d   : > { %6015 = vst.msk [vmem:[#allocation3 + $0x98] sm:$0xe] %vm5988_vm8, %v5949_v2  ;;  %v5950_v27 = vrot.slane %v5949_v2, 4  ;;  %v5614_v33 = vmax.f32 %v5550_v12, 0.0  ;;  %v5612_v13 = vmax.f32 %v5548_v22, 0.0  ;;  %v6375_v22 = vpop.permute.xlu0 %6374 }
 0x35f   : > { %6718 = vrot.lane.b32.xlu0 %v6690_v57, %s12185_s30  ;;  %6016 = vst.msk [vmem:[#allocation3 + $0x9c] sm:$0x1] %vm17364_vm4, %v5950_v27  ;;  %v5647_v57 = vadd.f32 %v5613_v28, %v5611_v7  ;;  %v5648_v46 = vadd.f32 %v5614_v33, %v5612_v13  ;;  %v5680_v62 = vmax.f32 %v5612_v13, %v5614_v33  ;;  %v12030_v28 = vld [vmem:[#allocation3 + $0x98] ss:$0 sps:$4 sm:$0xff]   ;;  %vm17372_vm4 = vmmov %vm17350_vm2 }
 0x361   : > { %v5711_v27 = vsel %vm17365_vm11, %v5647_v57, %v5679_v31  ;;  %v5712_v20 = vsel %vm17344_vm0, %v5648_v46, %v5680_v62  ;;  %v6377_v46 = vpop.permute.xlu1 %6376  ;;  %vm17373_vm11 = vmmov %vm17344_vm0 }
 0x362   : > { %5744 = vst.msk [vmem:[#allocation6 + $0xe0] sm:$0xff] %vm17366_vm6, %v5711_v27  ;;  %vm17374_vm6 = vmmov %vm17350_vm2 }
 0x363   : > { %6846 = vrot.lane.b32.xlu0 %v6818_v26, %s12186_s19  ;;  %v12028_v26 = vld [vmem:[#allocation3 + $0x88] sm:$0x1e]   ;;  %5745 = vst.msk [vmem:[#allocation6 + $0xe8] sm:$0xff] %vm17350_vm2, %v5712_v20  ;;  %vm17378_vm2 = vmmov %vm17344_vm0 }
 0x364   : > { %v6355_v35 = vrot.slane %v12028_v26, 1 }
 0x365   : > { %v11381_v27 = vpop.f32.mrf.mxu0  ;;  %v6505_v57 = vpop.permute.xlu1 %6504 }
 0x366   : > { %v12027_v2 = vld [vmem:[#allocation3 + $0x98] sm:$0x1e]   ;;  %v5482_v13 = vmul.f32 %v15173_v63, %v11381_v27 }
 0x367   : > { %v7025_v48 = vrot.slane %v12027_v2, 1  ;;  %v12031_v1 = vld [vmem:[#allocation3 + $0x98] sm:$0x1e]   ;;  %v5398_v62 = vpop.f32.mrf.mxu0 }
 0x368   : > { %v6691_v2 = vrot.slane %v12031_v1, 1  ;;  %v12032_v26 = vld [vmem:[#allocation3 + $0x98] sm:$0x3c]   ;;  %v5553_v20 = vadd.f32 %v15181_v17, %v5482_v13  ;;  %v5480_v8 = vmul.f32 %v15173_v63, %v5398_v62 }
 0x369   : > { %7052 = vrot.lane.b32.xlu1 %v7025_v48, %s12188_s17  ;;  %v11382_v1 = vpop.f32.mrf.mxu0 }
 0x36a   : > { %v15198_v7 = vld [vmem:[#allocation6 + $0xe0] ss:$2 sm:$0xff]  ;;  %v15200_v12 = vld [vmem:[#allocation6 + $0xe1] ss:$2 sm:$0xff]  ;;  %v5617_v27 = vmax.f32 %v5553_v20, 0.0 }
 0x36b   : > { %17367 = vst [vmem:[#allocation31_spill] sm:$0xff] %v15198_v7  ;;  %17368 = vst [vmem:[#allocation32_spill] sm:$0xff] %v15200_v12  ;;  %v5825_v42 = vadd.f32 %v15200_v12, %v15198_v7 }
 0x36d   : > { %6384 = vrot.lane.b32.xlu1 %v6355_v35, %s12180_s15  ;;  %v15207_v31 = vmul.f32 0.25, %v5825_v42  ;;  %v6819_v35 = vrot.slane %v12032_v26, 2  ;;  %v5551_v42 = vadd.f32 %v15181_v17, %v5480_v8 }
 0x36f   : > { %17369 = vst [vmem:[#allocation33_spill] sm:$0xff] %v15207_v31  ;;  %v11234_v33 = vpack.c.bf16 %v15207_v31, %v15207_v31  ;;  %v5615_v26 = vmax.f32 %v5551_v42, 0.0 }
 0x371   : > { %6512 = vrot.lane.b32.xlu1 %v6483_v61, %s12183_s18  ;;  %v5951_v48 = vrot.slane %v11234_v33, 7  ;;  %v5401_v33 = vpop.f32.mrf.mxu0  ;;  %v5649_v19 = vadd.f32 %v5617_v27, %v5615_v26 }
 0x372   : > { %v5481_v62 = vmul.f32 %v15173_v63, %v5401_v33  ;;  %v12035_v33 = vld [vmem:[#allocation3 + $0x90] sm:$0x1e]  }
 0x373   : > { %6017 = vst.msk [vmem:[#allocation3 + $0xa0] sm:$0xe] %vm5988_vm8, %v5951_v48  ;;  %v5952_v61 = vrot.slane %v5951_v48, 4  ;;  %v5681_v48 = vmax.f32 %v5615_v26, %v5617_v27 }
 0x374   : > { %v5552_v41 = vadd.f32 %v15181_v17, %v5481_v62 }
 0x375   : > { %6592 = vrot.lane.b32.xlu1 %v12030_v28, %s12184_s29  ;;  %v6503_v28 = vpop.permute.xlu0 %6502  ;;  %6018 = vst.msk [vmem:[#allocation3 + $0xa4] sm:$0x1] %vm17370_vm15, %v5952_v61  ;;  %v5713_v8 = vsel %vm17371_vm7, %v5649_v19, %v5681_v48  ;;  %v6356_v19 = vrot.slane %v12035_v33, 1  ;;  %v6030_v48 = vld [vmem:[#allocation3 + $0x68] sm:$0xf]  ;;  %vm17379_vm15 = vmmov %vm17372_vm4 }
 0x376   : > { %5746 = vst.msk [vmem:[#allocation6 + $0xf0] sm:$0xff] %vm17372_vm4, %v5713_v8  ;;  %vm17380_vm7 = vmmov %vm17372_vm4  ;;  %vm17381_vm4 = vcmask 122880  }
 0x379   : > { %6720 = vrot.lane.b32.xlu1 %v6691_v2, %s12185_s30  ;;  %v5483_v2 = vmul.f32 %v15173_v63, %v11382_v1  ;;  %v6583_v12 = vpop.permute.xlu0 %6582  ;;  %v5616_v1 = vmax.f32 %v5552_v41, 0.0 }
 0x37b   : > { %v5554_v13 = vadd.f32 %v15181_v17, %v5483_v2  ;;  %v6585_v2 = vpop.permute.xlu1 %6584  ;;  %v12036_v17 = vld [vmem:[#allocation3 + $0x90] sm:$0x3c]  }
 0x37c   : > { %v12034_v20 = vld [vmem:[#allocation3 + $0xa0] sm:$0x1e]  }
 0x37d   : > { %6848 = vrot.lane.b32.xlu1 %v6819_v35, %s12186_s19  ;;  %v12033_v35 = vld [vmem:[#allocation3 + $0xa0] ss:$0 sps:$4 sm:$0xff]   ;;  %v5618_v7 = vmax.f32 %v5554_v13, 0.0  ;;  %v7026_v63 = vrot.slane %v12034_v20, 1  ;;  %v6711_v26 = vpop.permute.xlu0 %6710 }
 0x37e   : > { %6926 = vrot.lane.b32.xlu0 %v12033_v35, %s12187_s28  ;;  %v6029_v13 = vld [vmem:[#allocation3 + $0x60] sm:$0xf]  ;;  %v6484_v35 = vrot.slane %v12036_v17, 2 }
 0x37f   : > { %v5650_v61 = vadd.f32 %v5618_v7, %v5616_v1  ;;  %v5682_v42 = vmax.f32 %v5616_v1, %v5618_v7  ;;  %v6713_v41 = vpop.permute.xlu1 %6712  ;;  %v7184_v1 = vsel %vm598_vm13, %v6029_v13, %v6375_v22  ;;  %v12038_v17 = vld [vmem:[#allocation3 + $0xa0] sm:$0x1e]   ;;  %v15247_v22 = vld [vmem:[%s17084_s5] ss:$0 sm:$0xff] }
 0x380   : > { %v7223_v31 = vsel %vm17344_vm0, %v7184_v1, %v6503_v28 }
 0x381   : > { %v5714_v27 = vsel %vm17373_vm11, %v5650_v61, %v5682_v42  ;;  %v6839_v62 = vpop.permute.xlu0 %6838  ;;  %v7187_v42 = vsel %vm598_vm13, %v6030_v48, %v6377_v46  ;;  %v7255_v28 = vsel %vm17379_vm15, %v7223_v31, %v6583_v12  ;;  %vm17383_vm11 = vmmov %vm17344_vm0 }
 0x382   : > { %5747 = vst.msk [vmem:[#allocation6 + $0xf8] sm:$0xff] %vm17374_vm6, %v5714_v27  ;;  %7054 = vrot.lane.b32.xlu0 %v7026_v63, %s12188_s17  ;;  %v7225_v13 = vsel %vm17378_vm2, %v7187_v42, %v6505_v57  ;;  %v7604_v48 = vpop.f32.mrf.mxu1  ;;  %v7288_v42 = vsel %vm7270_vm14, %v7255_v28, %v6711_v26  ;;  %vm17385_vm15 = vmmov %vm17378_vm2 }
 0x383   : > { %v6841_v63 = vpop.permute.xlu1 %6840  ;;  %v7674_v1 = vmul.f32 %v15247_v22, %v7604_v48  ;;  %v7321_v49 = vsel %vm7303_vm5, %v7288_v42, %v6839_v62 }
 0x385   : > { %v6919_v33 = vpop.permute.xlu0 %6918 }
 0x386   : > { %6386 = vrot.lane.b32.xlu0 %v6356_v19, %s12180_s15  ;;  %v12037_v19 = vld [vmem:[#allocation3 + $0xa0] ss:$0 sps:$4 sm:$0xff]   ;;  %v7354_v26 = vsel %vm7336_vm1, %v7321_v49, %v6919_v33 }
 0x389   : > { %v15230_v7 = vld [vmem:[#allocation6 + $0xf0] ss:$2 sm:$0xff]  ;;  %v15232_v8 = vld [vmem:[#allocation6 + $0xf1] ss:$2 sm:$0xff]  ;;  %v7047_v53 = vpop.permute.xlu0 %7046 }
 0x38a   : > { %17375 = vst [vmem:[#allocation34_spill] sm:$0xff] %v15230_v7  ;;  %17376 = vst [vmem:[#allocation35_spill] sm:$0xff] %v15232_v8  ;;  %v5826_v20 = vadd.f32 %v15232_v8, %v15230_v7  ;;  %6514 = vrot.lane.b32.xlu0 %v6484_v35, %s12183_s18  ;;  %v15256_v35 = vld [vmem:[%s17085_s6] ss:$0 sm:$0xff]  ;;  %v6692_v8 = vrot.slane %v12038_v17, 1 }
 0x38b   : > { %v12039_v7 = vld [vmem:[#allocation3 + $0xa0] sm:$0x3c]   ;;  %v7697_v54 = vadd.f32 %v15256_v35, %v7674_v1  ;;  %v7152_v1 = vrot.slane %v12040_v16, 2 }
 0x38c   : > { %v15241_v27 = vmul.f32 0.25, %v5826_v20  ;;  %v12041_v20 = vld [vmem:[#allocation3 + $0x98] sm:$0x3c]  }
 0x38e   : > { %17377 = vst [vmem:[#allocation36_spill] sm:$0xff] %v15241_v27  ;;  %6594 = vrot.lane.b32.xlu0 %v12037_v19, %s12184_s29  ;;  %v11235_v46 = vpack.c.bf16 %v15241_v27, %v15241_v27  ;;  %v7257_v19 = vsel %vm17380_vm7, %v7225_v13, %v6585_v2  ;;  %v7606_v27 = vpop.f32.mrf.mxu1  ;;  %v7153_v2 = vrot.slane %v12041_v20, 2 }
 0x38f   : > { %v7290_v5 = vsel %vm7270_vm14, %v7257_v19, %v6713_v41  ;;  %v7713_v27 = vmax.f32 %v7697_v54, 0.0  ;;  %v12042_v54 = vld [vmem:[#allocation3 + $0xb0] ss:$0 sps:$4 sm:$0xff]   ;;  %v12047_v19 = vld [vmem:[#allocation3 + $0x98] sm:$0x3c]  }
 0x390   : > { %v5953_v57 = vrot.slane %v11235_v46, 7  ;;  %v7323_v31 = vsel %vm7303_vm5, %v7290_v5, %v6841_v63  ;;  %v7607_v17 = vpop.f32.mrf.mxu1  ;;  %v6820_v46 = vrot.slane %v12039_v7, 2  ;;  %v11152_v63 = vcombine.low %v7152_v1, %v7153_v2  ;;  %v12043_v7 = vld [vmem:[#allocation3 + $0xa8] ss:$0 sps:$4 sm:$0xff]  }
 0x391   : > { %v7675_v62 = vmul.f32 %v15247_v22, %v7607_v17  ;;  %7730 = vst.msk [vmem:[#allocation4 + $0x11] sm:$0xff] %vm598_vm13, %v7713_v27  ;;  %6928 = vrot.lane.b32.xlu1 %v12043_v7, %s12187_s28 }
 0x392   : > { %6722 = vrot.lane.b32.xlu0 %v6692_v8, %s12185_s30  ;;  %6019 = vst.msk [vmem:[#allocation3 + $0xa8] sm:$0xe] %vm5988_vm8, %v5953_v57  ;;  %v5954_v12 = vrot.slane %v5953_v57, 4  ;;  %v7387_v8 = vsel %vm7369_vm9, %v7354_v26, %v7047_v53  ;;  %v7609_v48 = vpop.f32.mrf.mxu1  ;;  %v12046_v57 = vld [vmem:[#allocation3 + $0x98] sm:$0x1e]   ;;  %vm17382_vm8 = vmmov %vm17344_vm0 }
 0x393   : > { %v7698_v5 = vadd.f32 %v15256_v35, %v7675_v62  ;;  %v6357_v42 = vrot.slane %v12046_v57, 1  ;;  %vm17384_vm0 = vmmov %vm17374_vm6 }
 0x394   : > { %6020 = vst.msk [vmem:[#allocation3 + $0xac] sm:$0x1] %vm17381_vm4, %v5954_v12  ;;  %v6485_v12 = vrot.slane %v12047_v19, 2  ;;  %vm17386_vm7 = vmmov %vm17384_vm0 }
 0x395   : > { %v7714_v33 = vmax.f32 %v7698_v5, 0.0  ;;  %vm17387_vm4 = vmmov %vm17384_vm0 }
 0x396   : > { %6850 = vrot.lane.b32.xlu0 %v6820_v46, %s12186_s19 }
 0x397   : > { %7731 = vst.msk [vmem:[#allocation4 + $0x21] sm:$0xff] %vm598_vm13, %v7714_v33 }
 0x399   : > { %v6921_v61 = vpop.permute.xlu1 %6920 }
 0x39a   : > { %v7356_v13 = vsel %vm7336_vm1, %v7323_v31, %v6921_v61  ;;  %v12044_v61 = vld [vmem:[#allocation3 + $0xb0] sm:$0x1e]   ;;  %6930 = vrot.lane.b32.xlu0 %v12042_v54, %s12187_s28  ;;  %v12048_v31 = vld [vmem:[#allocation3 + $0xa8] ss:$0 sps:$4 sm:$0xff]   ;;  %v12051_v54 = vld [vmem:[#allocation3 + $0xb8] ss:$0 sps:$4 sm:$0xff]  }
 0x39b   : > { %v7028_v53 = vrot.slane %v12044_v61, 1  ;;  %v12045_v16 = vld [vmem:[#allocation3 + $0xa8] sm:$0x1e]   ;;  %v12052_v61 = vld [vmem:[#allocation3 + $0xb8] sm:$0x1e]  }
 0x39c   : > { %v7027_v20 = vrot.slane %v12045_v16, 1  ;;  %v12049_v26 = vld [vmem:[#allocation3 + $0xa8] sm:$0x1e]  }
 0x39d   : > { %v12050_v62 = vld [vmem:[#allocation3 + $0xa8] sm:$0x3c]  }
 0x39e   : > { %7058 = vrot.lane.b32.xlu0 %v7028_v53, %s12188_s17  ;;  %7056 = vrot.lane.b32.xlu1 %v7027_v20, %s12188_s17  ;;  %v7612_v17 = vpop.f32.mrf.mxu1  ;;  %v6821_v5 = vrot.slane %v12050_v62, 2  ;;  %v7029_v53 = vrot.slane %v12052_v61, 1  ;;  %v12054_v62 = vld [vmem:[#allocation3 + $0xa8] sm:$0x3c]  }
 0x39f   : > { %v7676_v2 = vmul.f32 %v15247_v22, %v7612_v17  ;;  %v6031_v17 = vld [vmem:[#allocation3 + $0x70] sm:$0xf] }
 0x3a0   : > { %v7614_v27 = vpop.f32.mrf.mxu1 }
 0x3a2   : > { %6388 = vrot.lane.b32.xlu1 %v6357_v42, %s12180_s15  ;;  %v7615_v46 = vpop.f32.mrf.mxu1 }
 0x3a3   : > { %v7049_v41 = vpop.permute.xlu1 %7048 }
 0x3a4   : > { %v7389_v28 = vsel %vm7369_vm9, %v7356_v13, %v7049_v41  ;;  %v6693_v13 = vrot.slane %v12049_v26, 1  ;;  %v7699_v41 = vadd.f32 %v15256_v35, %v7676_v2  ;;  %v7617_v1 = vpop.f32.mrf.mxu1  ;;  %v6032_v2 = vld [vmem:[#allocation3 + $0x78] sm:$0xf] }
 0x3a5   : > { %v11149_v49 = vcombine.low %v7387_v8, %v7389_v28  ;;  %v6379_v8 = vpop.permute.xlu0 %6378  ;;  %v7677_v28 = vmul.f32 %v15247_v22, %v7615_v46 }
 0x3a6   : > { %6516 = vrot.lane.b32.xlu1 %v6485_v12, %s12183_s18  ;;  %v7715_v48 = vmax.f32 %v7699_v41, 0.0  ;;  %v7190_v27 = vsel %vm598_vm13, %v6031_v17, %v6379_v8 }
 0x3a7   : > { %7635 = vmatmul.mubr.bf16.gmra.mxu1 %v11149_v49  ;;  %v7700_v49 = vadd.f32 %v15256_v35, %v7677_v28 }
 0x3a8   : > { %11171 = vmatprep.mubr.msk.bf16.mxu1 %vm598_vm13, %v11152_v63  ;;  %7732 = vst.msk [vmem:[#allocation4 + $0x31] sm:$0xff] %vm598_vm13, %v7715_v48  ;;  %v6381_v63 = vpop.permute.xlu1 %6380 }
 0x3a9   : > { %v7716_v33 = vmax.f32 %v7700_v49, 0.0  ;;  %v6507_v7 = vpop.permute.xlu0 %6506 }
 0x3aa   : > { %6596 = vrot.lane.b32.xlu1 %v12048_v31, %s12184_s29  ;;  %v7227_v41 = vsel %vm17382_vm8, %v7190_v27, %v6507_v7  ;;  %vm17388_vm8 = vmmov %vm17378_vm2 }
 0x3ab   : > { %7733 = vst.msk [vmem:[#allocation4 + $0x41] sm:$0xff] %vm598_vm13, %v7716_v33  ;;  %v7155_v33 = vrot.slane %v12054_v62, 2 }
 0x3ac   : > { %v6509_v16 = vpop.permute.xlu1 %6508 }
 0x3ad   : > { %v6587_v20 = vpop.permute.xlu0 %6586 }
 0x3ae   : > { %6724 = vrot.lane.b32.xlu1 %v6693_v13, %s12185_s30  ;;  %v7193_v13 = vsel %vm598_vm13, %v6032_v2, %v6381_v63  ;;  %v7259_v28 = vsel %vm17374_vm6, %v7227_v41, %v6587_v20  ;;  %vm17390_vm6 = vmmov %vm17384_vm0 }
 0x3af   : > { %v7229_v46 = vsel %vm17383_vm11, %v7193_v13, %v6509_v16  ;;  %vm17389_vm11 = vmmov %vm17378_vm2 }
 0x3b0   : > { %v6589_v57 = vpop.permute.xlu1 %6588 }
 0x3b1   : > { %v6715_v42 = vpop.permute.xlu0 %6714  ;;  %v7261_v1 = vsel %vm17384_vm0, %v7229_v46, %v6589_v57 }
 0x3b2   : > { %6852 = vrot.lane.b32.xlu1 %v6821_v5, %s12186_s19  ;;  %v12053_v5 = vld [vmem:[#allocation3 + $0xa0] sm:$0x3c]   ;;  %v7292_v49 = vsel %vm7270_vm14, %v7259_v28, %v6715_v42  ;;  %s12191_s19 = smov 6  }
 0x3b3   : > { %v7154_v17 = vrot.slane %v12053_v5, 2 }
 0x3b4   : > { %v6717_v19 = vpop.permute.xlu1 %6716 }
 0x3b5   : > { %v6843_v12 = vpop.permute.xlu0 %6842  ;;  %v11154_v42 = vcombine.low %v7154_v17, %v7155_v33 }
 0x3b6   : > { %6932 = vrot.lane.b32.xlu1 %v12051_v54, %s12187_s28  ;;  %v7294_v54 = vsel %vm7270_vm14, %v7261_v1, %v6717_v19  ;;  %v7325_v8 = vsel %vm7303_vm5, %v7292_v49, %v6843_v12 }
 0x3b8   : > { %v6845_v31 = vpop.permute.xlu1 %6844 }
 0x3b9   : > { %v6923_v26 = vpop.permute.xlu0 %6922  ;;  %v7327_v63 = vsel %vm7303_vm5, %v7294_v54, %v6845_v31 }
 0x3ba   : > { %7060 = vrot.lane.b32.xlu1 %v7029_v53, %s12188_s17  ;;  %v7358_v7 = vsel %vm7336_vm1, %v7325_v8, %v6923_v26 }
 0x3c1   : > { %v7051_v61 = vpop.permute.xlu0 %7050 }
 0x3c2   : > { %v7391_v20 = vsel %vm7369_vm9, %v7358_v7, %v7051_v61 }
 0x3c5   : > { %v6383_v46 = vpop.permute.xlu0 %6382 }
 0x3c9   : > { %v6511_v1 = vpop.permute.xlu0 %6510 }
 0x3ca   : > { %v6925_v48 = vpop.permute.xlu1 %6924 }
 0x3cb   : > { %v7360_v53 = vsel %vm7336_vm1, %v7327_v63, %v6925_v48 }
 0x3cd   : > { %v6591_v5 = vpop.permute.xlu0 %6590 }
 0x3d1   : > { %v6719_v49 = vpop.permute.xlu0 %6718 }
 0x3d5   : > { %v6847_v33 = vpop.permute.xlu0 %6846 }
 0x3db   : > { %v7053_v16 = vpop.permute.xlu1 %7052 }
 0x3dc   : > { %v7393_v57 = vsel %vm7369_vm9, %v7360_v53, %v7053_v16 }
 0x3dd   : > { %v11151_v2 = vcombine.low %v7391_v20, %v7393_v57 }
 0x3df   : > { %7643 = vmatmul.mubr.bf16.gmra.mxu1 %v11151_v2  ;;  %v6385_v54 = vpop.permute.xlu1 %6384 }
 0x3e0   : > { %11172 = vmatprep.mubr.msk.bf16.mxu1 %vm598_vm13, %v11154_v42 }
 0x3e3   : > { %v6513_v7 = vpop.permute.xlu1 %6512 }
 0x3ea   : > { %v7620_v27 = vpop.f32.mrf.mxu1 }
 0x3eb   : > { %v7678_v19 = vmul.f32 %v15247_v22, %v7620_v27  ;;  %v6593_v27 = vpop.permute.xlu1 %6592 }
 0x3ec   : > { %v7622_v12 = vpop.f32.mrf.mxu1 }
 0x3ed   : > { %v7701_v31 = vadd.f32 %v15256_v35, %v7678_v19 }
 0x3ee   : > { %v7623_v26 = vpop.f32.mrf.mxu1 }
 0x3ef   : > { %v7717_v13 = vmax.f32 %v7701_v31, 0.0  ;;  %v7679_v62 = vmul.f32 %v15247_v22, %v7623_v26  ;;  %v6721_v31 = vpop.permute.xlu1 %6720 }
 0x3f0   : > { %v7625_v41 = vpop.f32.mrf.mxu1  ;;  %v6927_v2 = vpop.permute.xlu0 %6926 }
 0x3f1   : > { %7734 = vst.msk [vmem:[#allocation4 + $0x51] sm:$0xff] %vm598_vm13, %v7717_v13  ;;  %v7702_v48 = vadd.f32 %v15256_v35, %v7679_v62  ;;  %v12055_v62 = vld [vmem:[#allocation3 + $0xb0] sm:$0x3c]   ;;  %v12056_v41 = vld [vmem:[#allocation3 + $0xb8] sm:$0x3c]  }
 0x3f3   : > { %v7718_v28 = vmax.f32 %v7702_v48, 0.0  ;;  %v6849_v13 = vpop.permute.xlu1 %6848  ;;  %v6033_v48 = vld [vmem:[#allocation3 + $0x80] sm:$0xf] }
 0x3f4   : > { %v7055_v12 = vpop.permute.xlu0 %7054 }
 0x3f5   : > { %7735 = vst.msk [vmem:[#allocation4 + $0x61] sm:$0xff] %vm598_vm13, %v7718_v28  ;;  %v6034_v28 = vld [vmem:[#allocation3 + $0x88] sm:$0xf] }
 0x3f8   : > { %v6387_v26 = vpop.permute.xlu0 %6386  ;;  %v15423_v37 = vld [vmem:[#allocation4 + $0x52] sm:$0xff] }
 0x402   : > { %v7628_v61 = vpop.f32.mrf.mxu1 }
 0x403   : > { %v7680_v8 = vmul.f32 %v15247_v22, %v7628_v61  ;;  %v7196_v61 = vsel %vm598_vm13, %v6033_v48, %v6383_v46 }
 0x404   : > { %v7630_v63 = vpop.f32.mrf.mxu1 }
 0x405   : > { %v7703_v53 = vadd.f32 %v15256_v35, %v7680_v8  ;;  %v7199_v8 = vsel %vm598_vm13, %v6034_v28, %v6385_v54  ;;  %v7231_v63 = vsel %vm17378_vm2, %v7196_v61, %v6511_v1 }
 0x406   : > { %v7631_v16 = vpop.f32.mrf.mxu1 }
 0x407   : > { %v7719_v20 = vmax.f32 %v7703_v53, 0.0  ;;  %v7681_v57 = vmul.f32 %v15247_v22, %v7631_v16  ;;  %v7233_v53 = vsel %vm17385_vm15, %v7199_v8, %v6513_v7  ;;  %v6515_v16 = vpop.permute.xlu0 %6514  ;;  %v6035_v8 = vld [vmem:[#allocation3 + $0x90] sm:$0xf]  ;;  %vm17399_vm15 = vmmov %vm17384_vm0 }
 0x408   : > { %v7633_v17 = vpop.f32.mrf.mxu1 }
 0x409   : > { %7736 = vst.msk [vmem:[#allocation4 + $0x71] sm:$0xff] %vm598_vm13, %v7719_v20  ;;  %v7704_v42 = vadd.f32 %v15256_v35, %v7681_v57  ;;  %v6929_v20 = vpop.permute.xlu1 %6928  ;;  %v7263_v57 = vsel %vm17386_vm7, %v7231_v63, %v6591_v5  ;;  %v7265_v17 = vsel %vm17387_vm4, %v7233_v53, %v6593_v27  ;;  %v6036_v63 = vld [vmem:[#allocation3 + $0x98] sm:$0xf]  ;;  %vm17402_vm4 = vmmov %vm17384_vm0 }
 0x40a   : > { %v7296_v21 = vsel %vm7270_vm14, %v7263_v57, %v6719_v49  ;;  %v7298_v24 = vsel %vm7270_vm14, %v7265_v17, %v6721_v31 }
 0x40b   : > { %v7720_v19 = vmax.f32 %v7704_v42, 0.0  ;;  %v7156_v42 = vrot.slane %v12055_v62, 2  ;;  %v7329_v46 = vsel %vm7303_vm5, %v7296_v21, %v6847_v33  ;;  %v7331_v54 = vsel %vm7303_vm5, %v7298_v24, %v6849_v13  ;;  %v6595_v62 = vpop.permute.xlu0 %6594 }
 0x40c   : > { %v7362_v1 = vsel %vm7336_vm1, %v7329_v46, %v6927_v2  ;;  %v7364_v7 = vsel %vm7336_vm1, %v7331_v54, %v6929_v20 }
 0x40d   : > { %7737 = vst.msk [vmem:[#allocation4 + $0x81] sm:$0xff] %vm598_vm13, %v7720_v19  ;;  %v7157_v19 = vrot.slane %v12056_v41, 2  ;;  %v7395_v28 = vsel %vm7369_vm9, %v7362_v1, %v7055_v12  ;;  %v7202_v12 = vsel %vm598_vm13, %v6035_v8, %v6387_v26 }
 0x40e   : > { %v7235_v20 = vsel %vm17388_vm8, %v7202_v12, %v6515_v16  ;;  %v8153_v12 = vld [vmem:[%s17086_s7 + $0x20] sm:$0xff]  ;;  %vm17403_vm8 = vmmov %vm17384_vm0 }
 0x40f   : > { %v11156_v27 = vcombine.low %v7156_v42, %v7157_v19  ;;  %v6723_v31 = vpop.permute.xlu0 %6722  ;;  %v7267_v42 = vsel %vm17390_vm6, %v7235_v20, %v6595_v62  ;;  %v8152_v20 = vld [vmem:[%s17086_s7 + $0x18] sm:$0xff] }
 0x410   : > { %v7057_v48 = vpop.permute.xlu1 %7056  ;;  %v7300_v46 = vsel %vm7270_vm14, %v7267_v42, %v6723_v31  ;;  %v8149_v42 = vld [vmem:[%s17086_s7] sm:$0xff] }
 0x411   : > { %v7397_v5 = vsel %vm7369_vm9, %v7364_v7, %v7057_v48 }
 0x412   : > { %v11153_v41 = vcombine.low %v7395_v28, %v7397_v5 }
 0x413   : > { %v6851_v24 = vpop.permute.xlu0 %6850 }
 0x414   : > { %7651 = vmatmul.mubr.bf16.gmra.mxu1 %v11153_v41  ;;  %v6389_v49 = vpop.permute.xlu1 %6388  ;;  %v7333_v7 = vsel %vm7303_vm5, %v7300_v46, %v6851_v24 }
 0x415   : > { %11173 = vmatprep.mubr.msk.bf16.mxu1 %vm598_vm13, %v11156_v27  ;;  %v7205_v53 = vsel %vm598_vm13, %v6036_v63, %v6389_v49  ;;  %v8154_v63 = vld [vmem:[%s17086_s7 + $0x28] sm:$0xff] }
 0x416   : > { %11384 = vmatpush3.msra.mxu1 %v8154_v63  ;;  %v15393_v63 = vld [vmem:[#allocation4 + $0x31] sm:$0xff] }
 0x417   : > { %v6931_v2 = vpop.permute.xlu0 %6930 }
 0x418   : > { %v6517_v21 = vpop.permute.xlu1 %6516  ;;  %v7366_v48 = vsel %vm7336_vm1, %v7333_v7, %v6931_v2 }
 0x419   : > { %v7237_v57 = vsel %vm17389_vm11, %v7205_v53, %v6517_v21  ;;  %v17391_v53 = vmov 0.0   ;;  %vm17404_vm11 = vmmov %vm17384_vm0 }
 0x41a   : > { %11385 = vmatprep.subr.mxu1 %v17391_v53 }
 0x41b   : > { %v7059_v54 = vpop.permute.xlu0 %7058  ;;  %11386 = vmatpush3.msra.mxu1 %v8153_v12  ;;  %v7795_v12 = vld [vmem:[#allocation4 + $0x12] sm:$0xff] }
 0x41c   : > { %v6597_v33 = vpop.permute.xlu1 %6596  ;;  %v7399_v5 = vsel %vm7369_vm9, %v7366_v48, %v7059_v54  ;;  %11387 = vmatprep.subr.mxu1 %v17391_v53 }
 0x41d   : > { %v7269_v19 = vsel %vm17384_vm0, %v7237_v57, %v6597_v33  ;;  %v8151_v57 = vld [vmem:[%s17086_s7 + $0x10] sm:$0xff]  ;;  %11388 = vmatpush3.msra.mxu1 %v8152_v20  ;;  %v15395_v20 = vld [vmem:[#allocation4 + $0x22] sm:$0xff] }
 0x41e   : > { %11389 = vmatprep.subr.mxu1 %v17391_v53 }
 0x41f   : > { %11390 = vmatpush3.msra.mxu1 %v8151_v57 }
 0x420   : > { %v6725_v13 = vpop.permute.xlu1 %6724  ;;  %11391 = vmatprep.subr.mxu1 %v17391_v53 }
 0x421   : > { %v7302_v1 = vsel %vm7270_vm14, %v7269_v19, %v6725_v13  ;;  %vm12190_vm14 = vmmov 0  }
 0x424   : > { %v6853_v61 = vpop.permute.xlu1 %6852 }
 0x425   : > { %v7335_v26 = vsel %vm7303_vm5, %v7302_v1, %v6853_v61  ;;  %vm17393_vm5 = vmmov %vm17378_vm2 }
 0x428   : > { %v6933_v17 = vpop.permute.xlu1 %6932 }
 0x429   : > { %v7368_v16 = vsel %vm7336_vm1, %v7335_v26, %v6933_v17  ;;  %v8150_v17 = vld [vmem:[%s17086_s7 + $0x8] sm:$0xff]  ;;  %vm17395_vm1 = vmmov %vm17378_vm2 }
 0x42a   : > { %11392 = vmatpush3.msra.mxu1 %v8150_v17  ;;  %vm17398_vm2 = vmmov %vm17384_vm0 }
 0x42b   : > { %11393 = vmatprep.subr.mxu1 %v17391_v53  ;;  %vm17401_vm7 = vmmov %vm17395_vm1 }
 0x42c   : > { %v7061_v28 = vpop.permute.xlu1 %7060  ;;  %11394 = vmatpush3.msra.mxu1 %v8149_v42  ;;  %vm17406_vm6 = vmmov %vm17395_vm1 }
 0x42d   : > { %v7401_v27 = vsel %vm7369_vm9, %v7368_v16, %v7061_v28  ;;  %11398 = vmatprep.subr.mxu1 %v17391_v53  ;;  %vm17397_vm9 = vmmov %vm17395_vm1 }
 0x42e   : > { %v11155_v62 = vcombine.low %v7399_v5, %v7401_v27  ;;  %v7746_v27 = vld [vmem:[#allocation4] sm:$0xff] }
 0x430   : > { %7659 = vmatmul.mubr.bf16.gmra.mxu1 %v11155_v62  ;;  %v7762_v62 = vld [vmem:[#allocation4 + $0x1] sm:$0xff] }
 0x431   : > { %11395 = vmatprep.mubr.msk.f32.mxu1 %vm12190_vm14, %v17391_v53  ;;  %v15419_v53 = vld [vmem:[#allocation4 + $0x71] sm:$0xff] }
 0x467   : > { %v7636_v41 = vpop.f32.mrf.mxu1 }
 0x468   : > { %v7682_v49 = vmul.f32 %v15247_v22, %v7636_v41  ;;  %v7747_v41 = vld [vmem:[#allocation4 + $0x10] sm:$0xff] }
 0x469   : > { %v7638_v31 = vpop.f32.mrf.mxu1 }
 0x46a   : > { %v7705_v21 = vadd.f32 %v15256_v35, %v7682_v49  ;;  %v7763_v49 = vld [vmem:[#allocation4 + $0x11] sm:$0xff]  ;;  %v7748_v31 = vld [vmem:[#allocation4 + $0x20] sm:$0xff] }
 0x46b   : > { %v7639_v33 = vpop.f32.mrf.mxu1 }
 0x46c   : > { %v7721_v24 = vmax.f32 %v7705_v21, 0.0  ;;  %v7683_v13 = vmul.f32 %v15247_v22, %v7639_v33  ;;  %v15390_v21 = vld [vmem:[#allocation4 + $0x21] sm:$0xff]  ;;  %v7778_v33 = vmax.f32 %v7746_v27, %v7762_v62 }
 0x46d   : > { %v7641_v2 = vpop.f32.mrf.mxu1 }
 0x46e   : > { %7738 = vst.msk [vmem:[#allocation4 + $0xb1] sm:$0xff] %vm598_vm13, %v7721_v24  ;;  %v7706_v61 = vadd.f32 %v15256_v35, %v7683_v13  ;;  %v7794_v24 = vld [vmem:[#allocation4 + $0x2] sm:$0xff]  ;;  %v7779_v13 = vmax.f32 %v7747_v41, %v7763_v49  ;;  %v7780_v2 = vmax.f32 %v7748_v31, %v15390_v21 }
 0x470   : > { %v7722_v8 = vmax.f32 %v7706_v61, 0.0  ;;  %v7810_v61 = vmax.f32 %v7778_v33, %v7794_v24  ;;  %v7811_v57 = vmax.f32 %v7779_v13, %v7795_v12  ;;  %v7812_v17 = vmax.f32 %v7780_v2, %v15395_v20  ;;  %v15411_v24 = vld [vmem:[#allocation4 + $0x61] sm:$0xff] }
 0x471   : > { %v15414_v2 = vld [vmem:[#allocation4 + $0x42] sm:$0xff] }
 0x472   : > { %7739 = vst.msk [vmem:[#allocation4 + $0xc1] sm:$0xff] %vm598_vm13, %v7722_v8  ;;  %v7749_v8 = vld [vmem:[#allocation4 + $0x30] sm:$0xff] }
 0x473   : > { %v7781_v42 = vmax.f32 %v7749_v8, %v15393_v63 }
 0x475   : > { %v7755_v34 = vld [vmem:[#allocation4 + $0xb0] sm:$0xff] }
 0x476   : > { %v15457_v50 = vld [vmem:[#allocation4 + $0xb2] sm:$0xff] }
 0x49f   : > { %v7644_v19 = vpop.f32.mrf.mxu1 }
 0x4a0   : > { %v7684_v46 = vmul.f32 %v15247_v22, %v7644_v19  ;;  %v7842_v19 = vmax.f32 %v7810_v61, %v7747_v41  ;;  %v15409_v41 = vld [vmem:[#allocation4 + $0x60] sm:$0xff] }
 0x4a1   : > { %v7646_v54 = vpop.f32.mrf.mxu1 }
 0x4a2   : > { %v7707_v1 = vadd.f32 %v15256_v35, %v7684_v46  ;;  %v7844_v46 = vmax.f32 %v7812_v17, %v7749_v8  ;;  %v7750_v54 = vld [vmem:[#allocation4 + $0x40] sm:$0xff]  ;;  %v7874_v27 = vmax.f32 %v7842_v19, %v7763_v49 }
 0x4a3   : > { %v7647_v7 = vpop.f32.mrf.mxu1 }
 0x4a4   : > { %v7723_v26 = vmax.f32 %v7707_v1, 0.0  ;;  %v7685_v48 = vmul.f32 %v15247_v22, %v7647_v7  ;;  %v15399_v1 = vld [vmem:[#allocation4 + $0x41] sm:$0xff]  ;;  %v7843_v7 = vmax.f32 %v7811_v57, %v7748_v31  ;;  %v7876_v62 = vmax.f32 %v7844_v46, %v15393_v63 }
 0x4a5   : > { %v7649_v16 = vpop.f32.mrf.mxu1  ;;  %v7906_v19 = vmax.f32 %v7874_v27, %v7795_v12  ;;  %v15433_v27 = vld [vmem:[#allocation4 + $0x62] sm:$0xff] }
 0x4a6   : > { %7740 = vst.msk [vmem:[#allocation4 + $0xd1] sm:$0xff] %vm598_vm13, %v7723_v26  ;;  %v7708_v28 = vadd.f32 %v15256_v35, %v7685_v48  ;;  %v15401_v26 = vld [vmem:[#allocation4 + $0x32] sm:$0xff]  ;;  %v7875_v13 = vmax.f32 %v7843_v7, %v15390_v21  ;;  %v7784_v7 = vmax.f32 %v15409_v41, %v15411_v24 }
 0x4a7   : > { %v7751_v48 = vld [vmem:[#allocation4 + $0x50] sm:$0xff]  ;;  %v7908_v46 = vmax.f32 %v7876_v62, %v15401_v26  ;;  %v7754_v62 = vld [vmem:[#allocation4 + $0xa0] sm:$0xff]  ;;  %v7939_v30 = vmax.f32 %v7906_v19, %v7748_v31 }
 0x4a8   : > { %v7724_v5 = vmax.f32 %v7708_v28, 0.0  ;;  %v15403_v16 = vld [vmem:[#allocation4 + $0x51] sm:$0xff]  ;;  %v7813_v28 = vmax.f32 %v7781_v42, %v15401_v26 }
 0x4a9   : > { %v7783_v33 = vmax.f32 %v7751_v48, %v15403_v16  ;;  %v15417_v42 = vld [vmem:[#allocation4 + $0x70] sm:$0xff] }
 0x4aa   : > { %7741 = vst.msk [vmem:[#allocation4 + $0xe1] sm:$0xff] %vm598_vm13, %v7724_v5  ;;  %v7782_v5 = vmax.f32 %v7750_v54, %v15399_v1  ;;  %v7845_v17 = vmax.f32 %v7813_v28, %v7750_v54  ;;  %v7785_v0 = vmax.f32 %v15417_v42, %v15419_v53 }
 0x4ab   : > { %v7815_v29 = vmax.f32 %v7783_v33, %v15423_v37 }
 0x4ac   : > { %v7814_v57 = vmax.f32 %v7782_v5, %v15414_v2  ;;  %v7907_v5 = vmax.f32 %v7875_v13, %v15395_v20  ;;  %v7877_v12 = vmax.f32 %v7845_v17, %v15399_v1  ;;  %v7771_v13 = vld [vmem:[#allocation4 + $0xb1] sm:$0xff] }
 0x4ad   : > { %v7847_v6 = vmax.f32 %v7815_v29, %v15409_v41  ;;  %v15439_v17 = vld [vmem:[#allocation4 + $0x72] sm:$0xff] }
 0x4ae   : > { %v7846_v52 = vmax.f32 %v7814_v57, %v7751_v48  ;;  %v7940_v33 = vmax.f32 %v7907_v5, %v7749_v8  ;;  %v7941_v57 = vmax.f32 %v7908_v46, %v7750_v54  ;;  %v7786_v8 = vmax.f32 %v7754_v62, %v7770_v55  ;;  %v7802_v54 = vld [vmem:[#allocation4 + $0xa2] sm:$0xff] }
 0x4af   : > { %v7909_v19 = vmax.f32 %v7877_v12, %v15414_v2  ;;  %v7833_v46 = vld [vmem:[#allocation4 + $0x80] sm:$0xff]  ;;  %v7971_v5 = vmax.f32 %v7939_v30, %v15390_v21  ;;  %v7879_v55 = vmax.f32 %v7847_v6, %v15411_v24  ;;  %v7757_v21 = vld [vmem:[#allocation4 + $0xd0] sm:$0xff] }
 0x4b0   : > { %v7878_v38 = vmax.f32 %v7846_v52, %v15403_v16  ;;  %v15448_v52 = vld [vmem:[#allocation4 + $0xc1] sm:$0xff]  ;;  %v7818_v18 = vmax.f32 %v7786_v8, %v7802_v54 }
 0x4b1   : > { %v8003_v6 = vmax.f32 %v7971_v5, %v15395_v20  ;;  %v7865_v8 = vld [vmem:[#allocation4 + $0x81] sm:$0xff]  ;;  %v15483_v5 = vld [vmem:[#allocation4 + $0xd2] sm:$0xff] }
 0x4b2   : > { %v15474_v54 = vld [vmem:[#allocation4 + $0xc2] sm:$0xff]  ;;  %v7850_v59 = vmax.f32 %v7818_v18, %v7755_v34 }
 0x4d4   : > { %v7652_v61 = vpop.f32.mrf.mxu1 }
 0x4d5   : > { %v7686_v49 = vmul.f32 %v15247_v22, %v7652_v61 }
 0x4d6   : > { %v7654_v45 = vpop.f32.mrf.mxu1 }
 0x4d7   : > { %v7709_v28 = vadd.f32 %v15256_v35, %v7686_v49  ;;  %v7816_v49 = vmax.f32 %v7784_v7, %v15433_v27  ;;  %v15446_v7 = vld [vmem:[#allocation4 + $0xc0] sm:$0xff] }
 0x4d8   : > { %v7655_v61 = vpop.f32.mrf.mxu1  ;;  %v7788_v30 = vmax.f32 %v15446_v7, %v15448_v52 }
 0x4d9   : > { %v7725_v25 = vmax.f32 %v7709_v28, 0.0  ;;  %v7687_v45 = vmul.f32 %v15247_v22, %v7655_v61  ;;  %v7817_v61 = vmax.f32 %v7785_v0, %v15439_v17  ;;  %v7848_v31 = vmax.f32 %v7816_v49, %v15417_v42 }
 0x4da   : > { %v7657_v9 = vpop.f32.mrf.mxu1  ;;  %v7910_v0 = vmax.f32 %v7878_v38, %v15423_v37  ;;  %v7942_v49 = vmax.f32 %v7909_v19, %v7751_v48  ;;  %v15464_v38 = vld [vmem:[#allocation4 + $0xe0] sm:$0xff]  ;;  %v7820_v20 = vmax.f32 %v7788_v30, %v15474_v54 }
 0x4db   : > { %7742 = vst.msk [vmem:[#allocation4 + $0xf1] sm:$0xff] %vm598_vm13, %v7725_v25  ;;  %v7710_v28 = vadd.f32 %v15256_v35, %v7687_v45  ;;  %v7787_v9 = vmax.f32 %v7755_v34, %v7771_v13  ;;  %v7972_v25 = vmax.f32 %v7940_v33, %v15393_v63  ;;  %v7973_v45 = vmax.f32 %v7941_v57, %v15399_v1  ;;  %v15461_v63 = vld [vmem:[#allocation4 + $0xd1] sm:$0xff]  ;;  %v15466_v48 = vld [vmem:[#allocation4 + $0xe1] sm:$0xff] }
 0x4dc   : > { %v7880_v12 = vmax.f32 %v7848_v31, %v15419_v53  ;;  %v7849_v62 = vmax.f32 %v7817_v61, %v7833_v46  ;;  %v7911_v61 = vmax.f32 %v7879_v55, %v15433_v27  ;;  %v7943_v31 = vmax.f32 %v7910_v0, %v15409_v41  ;;  %v7897_v0 = vld [vmem:[#allocation4 + $0x82] sm:$0xff] }
 0x4dd   : > { %v7726_v29 = vmax.f32 %v7710_v28, 0.0  ;;  %v7819_v1 = vmax.f32 %v7787_v9, %v15457_v50  ;;  %v8004_v33 = vmax.f32 %v7972_v25, %v15401_v26  ;;  %v8005_v57 = vmax.f32 %v7973_v45, %v15414_v2 }
 0x4de   : > { %v7974_v28 = vmax.f32 %v7942_v49, %v15403_v16  ;;  %v7789_v19 = vmax.f32 %v7757_v21, %v15461_v63  ;;  %v7912_v9 = vmax.f32 %v7880_v12, %v15439_v17  ;;  %v7944_v26 = vmax.f32 %v7911_v61, %v15417_v42  ;;  %v15494_v12 = vld [vmem:[#allocation4 + $0xe2] sm:$0xff] }
 0x4df   : > { %7743 = vst.msk [vmem:[#allocation4 + $0x101] sm:$0xff] %vm598_vm13, %v7726_v29  ;;  %v7881_v29 = vmax.f32 %v7849_v62, %v7865_v8  ;;  %v7851_v2 = vmax.f32 %v7819_v1, %v15446_v7  ;;  %v7790_v16 = vmax.f32 %v15464_v38, %v15466_v48  ;;  %v7852_v41 = vmax.f32 %v7820_v20, %v7757_v21 }
 0x4e0   : > { %v8019_v25 = vsel %vm598_vm13, %v8003_v6, %v13822_v44  ;;  %v8020_v45 = vsel %vm598_vm13, %v8004_v33, %v13973_v11  ;;  %v7821_v34 = vmax.f32 %v7789_v19, %v15483_v5  ;;  %v7975_v18 = vmax.f32 %v7943_v31, %v15411_v24  ;;  %v7930_v6 = vld [vmem:[#allocation4 + $0x90] sm:$0xff] }
 0x4e1   : > { %v8006_v42 = vmax.f32 %v7974_v28, %v15423_v37  ;;  %v8021_v49 = vsel %vm598_vm13, %v8005_v57, %v14175_v4  ;;  %v7882_v55 = vmax.f32 %v7850_v59, %v7771_v13  ;;  %v7913_v30 = vmax.f32 %v7881_v29, %v7897_v0 }
 0x4e2   : > { %v7759_v62 = vld [vmem:[#allocation4 + $0xf0] sm:$0xff]  ;;  %v7945_v1 = vmax.f32 %v7912_v9, %v7833_v46  ;;  %v7883_v44 = vmax.f32 %v7851_v2, %v15448_v52  ;;  %v7822_v11 = vmax.f32 %v7790_v16, %v15494_v12  ;;  %v7976_v33 = vmax.f32 %v7944_v26, %v15419_v53 }
 0x4e3   : > { %v17392_v24 = vmax.f32 %v13706_v56, %v13708_v32  ;;  %v7884_v4 = vmax.f32 %v7852_v41, %v15461_v63  ;;  %v15506_v59 = vld [vmem:[#allocation4 + $0xf1] sm:$0xff]  ;;  %v17394_v13 = vmax.f32 %v13922_v58, %v13924_v15  ;;  %v17396_v57 = vmax.f32 %v14144_v10, %v14146_v3 }
 0x4e4   : > { %v7853_v56 = vmax.f32 %v7821_v34, %v15464_v38  ;;  %v7854_v32 = vmax.f32 %v7822_v11, %v7759_v62  ;;  %v8007_v28 = vmax.f32 %v7975_v18, %v15433_v27  ;;  %v8022_v61 = vsel %vm598_vm13, %v8006_v42, %v14301_v43  ;;  %v7962_v9 = vld [vmem:[#allocation4 + $0x91] sm:$0xff] }
 0x4e5   : > { %v15503_v37 = vsel %vm17393_vm5, %v8019_v25, %v17392_v24  ;;  %v15512_v46 = vsel %vm17395_vm1, %v8020_v45, %v17394_v13  ;;  %v15518_v53 = vsel %vm17397_vm9, %v8021_v49, %v17396_v57  ;;  %v7914_v31 = vmax.f32 %v7882_v55, %v15457_v50  ;;  %vm17409_vm5 = vmmov %vm17395_vm1 }
 0x4e6   : > { %v7946_v58 = vmax.f32 %v7913_v30, %v7930_v6  ;;  %v7977_v15 = vmax.f32 %v7945_v1, %v7865_v8  ;;  %v8051_v19 = vsel %vm17398_vm2, %v15503_v37, 0.0  ;;  %v7915_v10 = vmax.f32 %v7883_v44, %v15474_v54  ;;  %vm17410_vm1 = vmmov %vm17384_vm0 }
 0x4e7   : > { %v7791_v3 = vmax.f32 %v7759_v62, %v15506_v59  ;;  %v8008_v29 = vmax.f32 %v7976_v33, %v15439_v17  ;;  %v8052_v27 = vsel %vm17399_vm15, %v15512_v46, 0.0  ;;  %v7916_v20 = vmax.f32 %v7884_v4, %v15483_v5  ;;  %vm17411_vm9 = vmmov %vm17384_vm0 }
 0x4e8   : > { %v17400_v43 = vmax.f32 %v14273_v39, %v14275_v40  ;;  %v8054_v8 = vsel %vm17402_vm4, %v15518_v53, 0.0  ;;  %v15543_v26 = vsel %vm17403_vm8, %v15503_v37, -inf  ;;  %v7948_v2 = vmax.f32 %v7915_v10, %v7757_v21  ;;  %v15550_v40 = vld [vmem:[#allocation4 + $0xf2] sm:$0xff]  ;;  %vm17412_vm2 = vmmov %vm17384_vm0 }
 0x4e9   : > { %v7885_v17 = vmax.f32 %v7853_v56, %v15466_v48  ;;  %v7886_v16 = vmax.f32 %v7854_v32, %v15506_v59  ;;  %v8023_v41 = vsel %vm598_vm13, %v8007_v28, %v14421_v60  ;;  %v7947_v39 = vmax.f32 %v7914_v31, %v15446_v7  ;;  %v7994_v21 = vld [vmem:[#allocation4 + $0x92] sm:$0xff]  ;;  %v7760_v7 = vld [vmem:[#allocation4 + $0x100] sm:$0xff]  ;;  %vm17417_vm15 = vmmov %vm17409_vm5 }
 0x4ea   : > { %v15537_v50 = vsel %vm17401_vm7, %v8022_v61, %v17400_v43  ;;  %v7978_v45 = vmax.f32 %v7946_v58, %v7962_v9  ;;  %v8009_v34 = vmax.f32 %v7977_v15, %v7897_v0  ;;  %v8053_v18 = vadd.f32 %v8052_v27, %v8051_v19  ;;  %v7776_v15 = vld [vmem:[#allocation4 + $0x101] sm:$0xff]  ;;  %vm17418_vm7 = vmmov %vm17384_vm0 }
 0x4eb   : > { %v7823_v42 = vmax.f32 %v7791_v3, %v15550_v40  ;;  %v8024_v55 = vsel %vm598_vm13, %v8008_v29, %v14535_v23  ;;  %v8098_v30 = vsel %vm17404_vm11, %v15518_v53, -inf  ;;  %v7949_v60 = vmax.f32 %v7916_v20, %v15464_v38  ;;  %v17413_v9 = vld [vmem:[#allocation12_spill] sm:$0xff]  ;;  %v17415_v20 = vld [vmem:[#allocation9_spill] sm:$0xff]  ;;  %vm17419_vm4 = vmmov %vm17384_vm0 }
 0x4ec   : > { %v17405_v44 = vmax.f32 %v14395_v36, %v14397_v51  ;;  %v8055_v11 = vadd.f32 %v8054_v8, %v8053_v18  ;;  %v8056_v6 = vsel %vm17384_vm0, %v15537_v50, 0.0  ;;  %v7980_v33 = vmax.f32 %v7948_v2, %v15461_v63  ;;  %v17407_v51 = vld [vmem:[#allocation7_spill] sm:$0xff]  ;;  %v17414_v27 = vld [vmem:[#allocation8_spill] sm:$0xff]  ;;  %vm17424_vm8 = vmmov %vm17409_vm5 }
 0x4ed   : > { %v7917_v23 = vmax.f32 %v7885_v17, %v15494_v12  ;;  %v7918_v24 = vmax.f32 %v7886_v16, %v15550_v40  ;;  %v7979_v4 = vmax.f32 %v7947_v39, %v15448_v52  ;;  %v8010_v57 = vmax.f32 %v7978_v45, %v7994_v21  ;;  %vm17425_vm11 = vmmov %vm17384_vm0 }
 0x4ee   : > { %v15563_v0 = vsel %vm17406_vm6, %v8023_v41, %v17405_v44  ;;  %v8025_v36 = vsel %vm598_vm13, %v8009_v34, %v14632_v14  ;;  %v17408_v56 = vmax.f32 %v14514_v47, %v17407_v51  ;;  %v7855_v28 = vmax.f32 %v7823_v42, %v7760_v7  ;;  %v17420_v34 = vld [vmem:[#allocation18_spill] sm:$0xff]  ;;  %vm17426_vm6 = vmmov %vm17384_vm0 }
 0x4ef   : > { %v7950_v63 = vmax.f32 %v7917_v23, %v7759_v62  ;;  %v7981_v58 = vmax.f32 %v7949_v60, %v15466_v48  ;;  %v8057_v19 = vadd.f32 %v8056_v6, %v8055_v11  ;;  %v8058_v10 = vsel %vm17410_vm1, %v15563_v0, 0.0  ;;  %v17421_v42 = vld [vmem:[#allocation10_spill] sm:$0xff]  ;;  %v17427_v6 = vld [vmem:[#allocation15_spill] sm:$0xff]  ;;  %vm17432_vm0 = vmmov %vm17409_vm5 }
 0x4f0   : > { %v7660_v25 = vpop.f32.mrf.mxu1  ;;  %v15578_v32 = vsel %vm17409_vm5, %v8024_v55, %v17408_v56  ;;  %v8100_v14 = vsel %vm17411_vm9, %v15537_v50, -inf  ;;  %v7951_v47 = vmax.f32 %v7918_v24, %v7760_v7  ;;  %v8012_v3 = vmax.f32 %v7980_v33, %v15483_v5  ;;  %vm17433_vm5 = vmmov %vm17410_vm1 }
 0x4f1   : > { %v7688_v49 = vmul.f32 %v15247_v22, %v7660_v25  ;;  %v8011_v48 = vmax.f32 %v7979_v4, %v15474_v54  ;;  %v8026_v29 = vsel %vm598_vm13, %v8010_v57, %v17413_v9  ;;  %v17416_v43 = vmax.f32 %v17414_v27, %v17415_v20  ;;  %v17430_v57 = vld [vmem:[#allocation17_spill] sm:$0xff]  ;;  %vm17437_vm9 = vmmov %vm17432_vm0  ;;  %v17439_v9 = vld [vmem:[#allocation24_spill] sm:$0xff] }
 0x4f2   : > { %v7662_v1 = vpop.f32.mrf.mxu1  ;;  %v8060_v2 = vsel %vm17418_vm7, %v15578_v32, 0.0  ;;  %v7792_v5 = vmax.f32 %v7760_v7, %v7776_v15  ;;  %v7887_v17 = vmax.f32 %v7855_v28, %v7776_v15  ;;  %v8013_v41 = vmax.f32 %v7981_v58, %v15494_v12  ;;  %v7808_v12 = vld [vmem:[#allocation4 + $0x102] sm:$0xff]  ;;  %vm17444_vm7 = vmmov %vm17410_vm1 }
 0x4f3   : > { %v7711_v38 = vadd.f32 %v15256_v35, %v7688_v49  ;;  %v15598_v8 = vsel %vm17417_vm15, %v8025_v36, %v17416_v43  ;;  %v8059_v54 = vadd.f32 %v8058_v10, %v8057_v19  ;;  %v8097_v39 = vsel %vm17419_vm4, %v15512_v46, -inf  ;;  %v17422_v49 = vld [vmem:[#allocation11_spill] sm:$0xff]  ;;  %v17441_v43 = vld [vmem:[#allocation20_spill] sm:$0xff]  ;;  %vm17443_vm15 = vmmov %vm17432_vm0 }
 0x4f4   : > { %v7663_v13 = vpop.f32.mrf.mxu1  ;;  %v8099_v25 = vmax.f32 %v15543_v26, %v8098_v30  ;;  %v7983_v45 = vmax.f32 %v7951_v47, %v7776_v15  ;;  %v8028_v18 = vsel %vm598_vm13, %v8012_v3, %v17420_v34  ;;  %v8101_v55 = vmax.f32 %v8097_v39, %v8100_v14  ;;  %v17434_v15 = vld [vmem:[#allocation13_spill] sm:$0xff]  ;;  %v17440_v20 = vld [vmem:[#allocation19_spill] sm:$0xff]  ;;  %vm17449_vm4 = vmmov %vm17432_vm0 }
 0x4f5   : > { %v7727_v61 = vmax.f32 %v7711_v38, 0.0  ;;  %v7689_v31 = vmul.f32 %v15247_v22, %v7663_v13  ;;  %v8102_v22 = vsel %vm17412_vm2, %v15563_v0, -inf  ;;  %v8061_v60 = vadd.f32 %v8060_v2, %v8059_v54  ;;  %v17428_v38 = vld [vmem:[#allocation21_spill] sm:$0xff]  ;;  %v17429_v13 = vld [vmem:[#allocation16_spill] sm:$0xff]  ;;  %vm17438_vm2 = vmmov %vm17410_vm1 }
 0x4f6   : > { %v7665_v52 = vpop.f32.mrf.mxu1  ;;  %v8062_v7 = vsel %vm17425_vm11, %v15598_v8, 0.0  ;;  %v8103_v1 = vmax.f32 %v8099_v25, %v8102_v22  ;;  %v8104_v26 = vsel %vm17426_vm6, %v15578_v32, -inf  ;;  %v7824_v30 = vmax.f32 %v7792_v5, %v7808_v12  ;;  %v17445_v25 = vld [vmem:[#allocation27_spill] sm:$0xff]  ;;  %vm17452_vm11 = vmmov %vm17410_vm1 }
 0x4f7   : > { %7744 = vst.msk [vmem:[#allocation4 + $0x111] sm:$0xff] %vm598_vm13, %v7727_v61  ;;  %v7712_v62 = vadd.f32 %v15256_v35, %v7689_v31  ;;  %v7982_v35 = vmax.f32 %v7950_v63, %v15506_v59  ;;  %v17423_v59 = vmax.f32 %v17421_v42, %v17422_v49  ;;  %v7919_v44 = vmax.f32 %v7887_v17, %v7808_v12  ;;  %v17435_v52 = vld [vmem:[#allocation14_spill] sm:$0xff]  ;;  %v17447_v42 = vld [vmem:[#allocation23_spill] sm:$0xff]  ;;  %vm17456_vm6 = vmmov %vm17432_vm0 }
 0x4f8   : > { %v8027_v33 = vsel %vm598_vm13, %v8011_v48, %v17427_v6  ;;  %v8029_v4 = vsel %vm598_vm13, %v8013_v41, %v17428_v38  ;;  %v17431_v36 = vmax.f32 %v17429_v13, %v17430_v57  ;;  %v8015_v31 = vmax.f32 %v7983_v45, %v7808_v12  ;;  %v7938_v6 = vld [vmem:[#allocation4 + $0x130] sm:$0xff] }
 0x4f9   : > { %v7728_v16 = vmax.f32 %v7712_v62, 0.0  ;;  %v15614_v21 = vsel %vm17424_vm8, %v8026_v29, %v17423_v59  ;;  %v8014_v11 = vmax.f32 %v7982_v35, %v15550_v40  ;;  %v17436_v19 = vmax.f32 %v17434_v15, %v17435_v52  ;;  %vm17450_vm8 = vmmov %vm17410_vm1 }
 0x4fa   : > { %v15629_v51 = vsel %vm17432_vm0, %v8028_v18, %v17431_v36  ;;  %v8064_v56 = vsel %vm17433_vm5, %v15614_v21, 0.0  ;;  %v8108_v40 = vsel %vm17410_vm1, %v15614_v21, -inf  ;;  %v8063_v14 = vadd.f32 %v8062_v7, %v8061_v60  ;;  %v17446_v18 = vld [vmem:[#allocation22_spill] sm:$0xff]  ;;  %vm17457_vm0 = vmmov %vm17410_vm1 }
 0x4fb   : > { %7745 = vst.msk [vmem:[#allocation4 + $0x121] sm:$0xff] %vm598_vm13, %v7728_v16  ;;  %v15639_v10 = vsel %vm17437_vm9, %v8027_v33, %v17436_v19  ;;  %v8105_v47 = vmax.f32 %v8101_v55, %v8104_v26  ;;  %v8106_v62 = vsel %vm17438_vm2, %v15598_v8, -inf  ;;  %v8030_v29 = vsel %vm598_vm13, %v8014_v11, %v17439_v9  ;;  %v17451_v26 = vld [vmem:[#allocation30_spill] sm:$0xff]  ;;  %v17453_v33 = vld [vmem:[#allocation25_spill] sm:$0xff]  ;;  %vm17461_vm5 = vmmov %vm17449_vm4 }
 0x4fc   : > { %v17442_v2 = vmax.f32 %v17440_v20, %v17441_v43  ;;  %v8065_v5 = vadd.f32 %v8064_v56, %v8063_v14  ;;  %v8073_v17 = vsel %vm17444_vm7, %v15629_v51, 0.0  ;;  %v8031_v45 = vsel %vm598_vm13, %v8015_v31, %v17445_v25  ;;  %vm17462_vm1 = vmmov %vm17457_vm0  ;;  %v8002_v14 = vld [vmem:[#allocation4 + $0x132] sm:$0xff]  ;;  %v17467_v43 = vld [vmem:[#allocation31_spill] sm:$0xff] }
 0x4fd   : > { %v8109_v16 = vmax.f32 %v8105_v47, %v8108_v40  ;;  %v17448_v49 = vmax.f32 %v17446_v18, %v17447_v42  ;;  %v8072_v55 = vsel %vm17450_vm8, %v15639_v10, 0.0  ;;  %v8107_v12 = vmax.f32 %v8103_v1, %v8106_v62  ;;  %v7970_v40 = vld [vmem:[#allocation4 + $0x131] sm:$0xff]  ;;  %vm17463_vm9 = vmmov %vm17457_vm0 }
 0x4fe   : > { %v7761_v23 = vld [vmem:[#allocation4 + $0x110] sm:$0xff]  ;;  %v15649_v35 = vsel %vm17443_vm15, %v8029_v4, %v17442_v2  ;;  %v8066_v4 = vrot.slane %v8065_v5, 4  ;;  %v8074_v13 = vadd.f32 %v8073_v17, %v8072_v55  ;;  %vm17465_vm2 = vmmov %vm17457_vm0  ;;  %v17468_v2 = vld [vmem:[#allocation32_spill] sm:$0xff] }
 0x4ff   : > { %v7777_v24 = vld [vmem:[#allocation4 + $0x111] sm:$0xff]  ;;  %v7856_v28 = vmax.f32 %v7824_v30, %v7761_v23  ;;  %v7952_v61 = vmax.f32 %v7919_v44, %v7761_v23  ;;  %v15659_v59 = vsel %vm17449_vm4, %v8030_v29, %v17448_v49  ;;  %v8075_v44 = vsel %vm17452_vm11, %v15649_v35, 0.0  ;;  %vm17466_vm15 = vmmov %vm17457_vm0  ;;  %v17475_v55 = vld [vmem:[#allocation36_spill] sm:$0xff] }
 0x500   : > { %v7793_v63 = vmax.f32 %v7761_v23, %v7777_v24  ;;  %v7809_v58 = vld [vmem:[#allocation4 + $0x112] sm:$0xff]  ;;  %v8110_v57 = vmax.f32 %v8107_v12, %v8109_v16  ;;  %v8077_v56 = vsel %vm17457_vm0, %v15659_v59, 0.0  ;;  %v8067_v47 = vadd.f32 %v8066_v4, %v8065_v5  ;;  %vm17470_vm7 = vmmov %vm17449_vm4 }
 0x501   : > { %v7888_v22 = vmax.f32 %v7856_v28, %v7777_v24  ;;  %v7984_v48 = vmax.f32 %v7952_v61, %v7777_v24  ;;  %v17454_v23 = vld [vmem:[#allocation26_spill] sm:$0xff]  ;;  %v17459_v28 = vld [vmem:[#allocation29_spill] sm:$0xff]  ;;  %v8121_v20 = vsel %vm17466_vm15, %v15659_v59, -inf  ;;  %v17469_v17 = vmax.f32 %v17467_v43, %v17468_v2  ;;  %vm17471_vm4 = vmmov %vm17457_vm0 }
 0x502   : > { %v7825_v3 = vmax.f32 %v7793_v63, %v7809_v58  ;;  %v7841_v27 = vld [vmem:[#allocation4 + $0x120] sm:$0xff]  ;;  %v17455_v24 = vmax.f32 %v17453_v33, %v17454_v23  ;;  %v17458_v63 = vld [vmem:[#allocation28_spill] sm:$0xff]  ;;  %v17464_v9 = vld [vmem:[#allocation33_spill] sm:$0xff]  ;;  %vm8140_vm15 = vcmask 1041409  }
 0x503   : > { %v7920_v41 = vmax.f32 %v7888_v22, %v7809_v58  ;;  %v8016_v39 = vmax.f32 %v7984_v48, %v7809_v58  ;;  %v7873_v34 = vld [vmem:[#allocation4 + $0x121] sm:$0xff]  ;;  %v17460_v61 = vmax.f32 %v17458_v63, %v17459_v28  ;;  %v8076_v58 = vadd.f32 %v8075_v44, %v8074_v13  ;;  %vm17472_vm8 = vmmov %vm17457_vm0 }
 0x504   : > { %v7857_v54 = vmax.f32 %v7825_v3, %v7841_v27  ;;  %v7905_v11 = vld [vmem:[#allocation4 + $0x122] sm:$0xff]  ;;  %v15671_v38 = vsel %vm17456_vm6, %v8031_v45, %v17455_v24  ;;  %v8111_v3 = vrot.slane %v8110_v57, 4  ;;  %v8119_v22 = vsel %vm17463_vm9, %v15649_v35, -inf  ;;  %vm17473_vm11 = vmmov %vm17457_vm0 }
 0x505   : > { %v7953_v7 = vmax.f32 %v7920_v41, %v7841_v27  ;;  %v8032_v30 = vsel %vm598_vm13, %v8016_v39, %v17451_v26  ;;  %v8079_v19 = vsel %vm17462_vm1, %v15671_v38, 0.0  ;;  %v8078_v62 = vadd.f32 %v8077_v56, %v8076_v58  ;;  %vm17474_vm6 = vmmov %vm17457_vm0  ;;  %v17478_v44 = vld [vmem:[#allocation35_spill] sm:$0xff] }
 0x506   : > { %v7889_v60 = vmax.f32 %v7857_v54, %v7873_v34  ;;  %v15679_v31 = vsel %vm17461_vm5, %v8032_v30, %v17460_v61  ;;  %v8117_v41 = vsel %vm17471_vm4, %v15639_v10, -inf  ;;  %v8118_v54 = vsel %vm17472_vm8, %v15629_v51, -inf  ;;  %vm17476_vm5 = vmmov %vm17457_vm0  ;;  %v17477_v30 = vld [vmem:[#allocation34_spill] sm:$0xff] }
 0x507   : > { %v7985_v36 = vmax.f32 %v7953_v7, %v7873_v34  ;;  %v8081_v27 = vsel %vm17465_vm2, %v15679_v31, 0.0  ;;  %v8080_v16 = vadd.f32 %v8079_v19, %v8078_v62  ;;  %v8123_v45 = vsel %vm17474_vm6, %v15671_v38, -inf  ;;  %vm17480_vm1 = vmmov %vm17470_vm7 }
 0x508   : > { %v7921_v1 = vmax.f32 %v7889_v60, %v7905_v11  ;;  %v8125_v34 = vsel %vm17457_vm0, %v15679_v31, -inf  ;;  %v8120_v42 = vmax.f32 %v8117_v41, %v8119_v22  ;;  %v8122_v49 = vmax.f32 %v8118_v54, %v8121_v20  ;;  %vm17481_vm9 = vmmov %vm17457_vm0 }
 0x509   : > { %v8017_v52 = vmax.f32 %v7985_v36, %v7905_v11  ;;  %v8082_v18 = vadd.f32 %v8081_v27, %v8080_v16  ;;  %v8068_v60 = vrot.slane %v8067_v47, 2  ;;  %v8112_v7 = vmax.f32 %v8110_v57, %v8111_v3  ;;  %vm17482_vm2 = vmmov %vm17457_vm0 }
 0x50a   : > { %v7954_v15 = vmax.f32 %v7921_v1, %v7938_v6  ;;  %v17479_v11 = vmax.f32 %v17477_v30, %v17478_v44  ;;  %v8124_v23 = vmax.f32 %v8120_v42, %v8123_v45  ;;  %v8126_v24 = vmax.f32 %v8122_v49, %v8125_v34  ;;  %vm17484_vm8 = vmmov %vm17457_vm0 }
 0x50b   : > { %v8033_v29 = vsel %vm598_vm13, %v8017_v52, %v17464_v9  ;;  %v8069_v56 = vadd.f32 %v8068_v60, %v8067_v47  ;;  %v8113_v63 = vrot.slane %v8112_v7, 2  ;;  %vm17483_vm4 = vcmask 1041408  }
 0x50c   : > { %v7986_v48 = vmax.f32 %v7954_v15, %v7970_v40  ;;  %v15695_v5 = vsel %vm17470_vm7, %v8033_v29, %v17469_v17  ;;  %vm8145_vm7 = vcmask 1043459   ;;  %vm8230_vm6 = vcmask 23552  }
 0x50d   : > { %v8083_v25 = vsel %vm17473_vm11, %v15695_v5, 0.0  ;;  %v8127_v26 = vsel %vm17476_vm5, %v15695_v5, -inf  ;;  %v8070_v15 = vrot.slane %v8069_v56, 1  ;;  %v8114_v19 = vmax.f32 %v8112_v7, %v8113_v63 }
 0x50e   : > { %v8018_v39 = vmax.f32 %v7986_v48, %v8002_v14  ;;  %v8084_v33 = vadd.f32 %v8083_v25, %v8082_v18  ;;  %v8128_v57 = vmax.f32 %v8124_v23, %v8127_v26  ;;  %v8229_v25 = vld [vmem:[%s17087_s8] sm:$0x7]  ;;  %vm8234_vm11 = vcmask 1042432  }
 0x50f   : > { %v8071_v22 = vadd.f32 %v8070_v15, %v8069_v56  ;;  %v8115_v9 = vrot.slane %v8114_v19, 1  ;;  %vm648_vm0 = vcmask 48128   ;;  %vm650_vm5 = vcmask 41984  }
 0x510   : > { %v8034_v12 = vsel %vm598_vm13, %v8018_v39, %v17475_v55  ;;  %v17485_v39 = vmov 0.0   ;;  %v8322_v56 = vlaneseq }
 0x511   : > { %v15715_v6 = vsel %vm17480_vm1, %v8034_v12, %v17479_v11  ;;  %v8094_v47 = vmul.f32 0.015625, %v8071_v22  ;;  %v8116_v2 = vmax.f32 %v8114_v19, %v8115_v9  ;;  %vm659_vm1 = vcmask 40960   ;;  %649 = vst.msk [vmem:[#allocation5] sm:$0xff] %vm648_vm0, %v17485_v39  ;;  %652 = vst.msk [vmem:[#allocation5 + $0xa0] sm:$0xff] %vm648_vm0, %v17485_v39 }
 0x512   : > { %v8085_v4 = vsel %vm17481_vm9, %v15715_v6, 0.0  ;;  %v8129_v13 = vsel %vm17482_vm2, %v15715_v6, -inf  ;;  %651 = vst.msk [vmem:[#allocation5 + $0x8] sm:$0x3] %vm650_vm5, %v17485_v39  ;;  %653 = vst.msk [vmem:[#allocation5 + $0xa8] sm:$0x3] %vm650_vm5, %v17485_v39 }
 0x513   : > { %v8086_v1 = vadd.f32 %v8085_v4, %v8084_v33  ;;  %v8130_v36 = vmax.f32 %v8126_v24, %v8129_v13  ;;  %655 = vst.msk [vmem:[#allocation5 + $0x90] sm:$0xff] %vm648_vm0, %v17485_v39  ;;  %657 = vst.msk [vmem:[#allocation5 + $0x130] sm:$0xff] %vm648_vm0, %v17485_v39  ;;  %v8323_v63 = vshrl.u32 %v8322_v56, 7  ;;  %vm8769_vm9 = vcmask 392448  }
 0x514   : > { %656 = vst.msk [vmem:[#allocation5 + $0x98] sm:$0x3] %vm650_vm5, %v17485_v39  ;;  %658 = vst.msk [vmem:[#allocation5 + $0x138] sm:$0x3] %vm650_vm5, %v17485_v39  ;;  %vm8818_vm2 = vcmask 7168   ;;  %vm17537_vm5 = vcmask 392192  }
 0x515   : > { %v8087_v40 = vrot.slane %v8086_v1, 4  ;;  %v8131_v28 = vmax.f32 %v8128_v57, %v8130_v36  ;;  %661 = vst.msk [vmem:[#allocation5 + $0x10] sm:$0x1] %vm659_vm1, %v17485_v39  ;;  %662 = vst.msk [vmem:[#allocation5 + $0x20] sm:$0x1] %vm659_vm1, %v17485_v39  ;;  %v8343_v15 = vsub.s32 0, %v8323_v63 }
 0x516   : > { %663 = vst.msk [vmem:[#allocation5 + $0x30] sm:$0x1] %vm659_vm1, %v17485_v39  ;;  %664 = vst.msk [vmem:[#allocation5 + $0x40] sm:$0x1] %vm659_vm1, %v17485_v39  ;;  %v12194_v57 = vmov 1966171168  }
 0x517   : > { %v8088_v61 = vadd.f32 %v8087_v40, %v8086_v1  ;;  %v8132_v58 = vrot.slane %v8131_v28, 4  ;;  %665 = vst.msk [vmem:[#allocation5 + $0x50] sm:$0x1] %vm659_vm1, %v17485_v39  ;;  %666 = vst.msk [vmem:[#allocation5 + $0x60] sm:$0x1] %vm659_vm1, %v17485_v39  ;;  %v8320_v36 = vunpack.c.l.s4 %v12194_v57 }
 0x518   : > { %667 = vst.msk [vmem:[#allocation5 + $0x70] sm:$0x1] %vm659_vm1, %v17485_v39  ;;  %668 = vst.msk [vmem:[#allocation5 + $0x80] sm:$0x1] %vm659_vm1, %v17485_v39 }
 0x519   : > { %v8089_v52 = vrot.slane %v8088_v61, 2  ;;  %v8133_v14 = vmax.f32 %v8131_v28, %v8132_v58  ;;  %671 = vst.msk [vmem:[#allocation5 + $0xb0] sm:$0x1] %vm659_vm1, %v17485_v39  ;;  %672 = vst.msk [vmem:[#allocation5 + $0xc0] sm:$0x1] %vm659_vm1, %v17485_v39  ;;  %v8934_v42 = vld [vmem:[#allocation5 + $0x1] sm:$0xff]  ;;  %v8321_v40 = vunpack.c.0.s8 %v8320_v36 }
 0x51a   : > { %673 = vst.msk [vmem:[#allocation5 + $0xd0] sm:$0x1] %vm659_vm1, %v17485_v39  ;;  %674 = vst.msk [vmem:[#allocation5 + $0xe0] sm:$0x1] %vm659_vm1, %v17485_v39  ;;  %v8942_v49 = vld [vmem:[#allocation5 + $0xa1] sm:$0xff]  ;;  %9079 = vrot.lane.b32.xlu1 %v8934_v42, %s12191_s19 }
 0x51b   : > { %v8090_v62 = vadd.f32 %v8089_v52, %v8088_v61  ;;  %v8134_v3 = vrot.slane %v8133_v14, 2  ;;  %675 = vst.msk [vmem:[#allocation5 + $0xf0] sm:$0x1] %vm659_vm1, %v17485_v39  ;;  %676 = vst.msk [vmem:[#allocation5 + $0x100] sm:$0x1] %vm659_vm1, %v17485_v39  ;;  %9095 = vrot.lane.b32.xlu0 %v8942_v49, %s12191_s19  ;;  %v9038_v7 = vld [vmem:[#allocation5 + $0x91] sm:$0xff]  ;;  %v8324_v28 = vsub.s32 %v8321_v40, %v8323_v63 }
 0x51c   : > { %677 = vst.msk [vmem:[#allocation5 + $0x110] sm:$0x1] %vm659_vm1, %v17485_v39  ;;  %678 = vst.msk [vmem:[#allocation5 + $0x120] sm:$0x1] %vm659_vm1, %v17485_v39  ;;  %v9046_v44 = vld [vmem:[#allocation5 + $0x131] sm:$0xff] }
 0x51d   : > { %v8091_v48 = vrot.slane %v8090_v62, 1  ;;  %v8135_v29 = vmax.f32 %v8133_v14, %v8134_v3  ;;  %681 = vst.msk [vmem:[#allocation5 + $0x19] sm:$0x1] %vm659_vm1, %v17485_v39  ;;  %682 = vst.msk [vmem:[#allocation5 + $0x29] sm:$0x1] %vm659_vm1, %v17485_v39 }
 0x51e   : > { %683 = vst.msk [vmem:[#allocation5 + $0x39] sm:$0x1] %vm659_vm1, %v17485_v39  ;;  %684 = vst.msk [vmem:[#allocation5 + $0x49] sm:$0x1] %vm659_vm1, %v17485_v39 }
 0x51f   : > { %v8092_v27 = vadd.f32 %v8091_v48, %v8090_v62  ;;  %v8136_v20 = vrot.slane %v8135_v29, 1  ;;  %685 = vst.msk [vmem:[#allocation5 + $0x59] sm:$0x1] %vm659_vm1, %v17485_v39  ;;  %686 = vst.msk [vmem:[#allocation5 + $0x69] sm:$0x1] %vm659_vm1, %v17485_v39 }
 0x520   : > { %687 = vst.msk [vmem:[#allocation5 + $0x79] sm:$0x1] %vm659_vm1, %v17485_v39  ;;  %688 = vst.msk [vmem:[#allocation5 + $0x89] sm:$0x1] %vm659_vm1, %v17485_v39 }
 0x521   : > { %v8095_v43 = vmul.f32 0.015625, %v8092_v27  ;;  %v8137_v17 = vmax.f32 %v8135_v29, %v8136_v20  ;;  %691 = vst.msk [vmem:[#allocation5 + $0xb9] sm:$0x1] %vm659_vm1, %v17485_v39  ;;  %692 = vst.msk [vmem:[#allocation5 + $0xc9] sm:$0x1] %vm659_vm1, %v17485_v39 }
 0x522   : > { %693 = vst.msk [vmem:[#allocation5 + $0xd9] sm:$0x1] %vm659_vm1, %v17485_v39  ;;  %694 = vst.msk [vmem:[#allocation5 + $0xe9] sm:$0x1] %vm659_vm1, %v17485_v39 }
 0x523   : > { %v8141_v16 = vsel %vm8140_vm15, %v8095_v43, %v8094_v47  ;;  %v8146_v41 = vsel %vm8145_vm7, %v8137_v17, %v8116_v2  ;;  %695 = vst.msk [vmem:[#allocation5 + $0xf9] sm:$0x1] %vm659_vm1, %v17485_v39  ;;  %696 = vst.msk [vmem:[#allocation5 + $0x109] sm:$0x1] %vm659_vm1, %v17485_v39  ;;  %vm8835_vm15 = vcmask 15360   ;;  %vm8884_vm7 = vcmask 39936  }
 0x524   : > { %v8148_v54 = vsel %vm17483_vm4, %v8141_v16, %v8146_v41  ;;  %697 = vst.msk [vmem:[#allocation5 + $0x119] sm:$0x1] %vm659_vm1, %v17485_v39  ;;  %698 = vst.msk [vmem:[#allocation5 + $0x129] sm:$0x1] %vm659_vm1, %v17485_v39  ;;  %vm17535_vm4 = vcmask 195584  }
 0x525   : > { %11396 = vmatmul.mubr.msk.f32.vlgmr.msra.gmra.mxu1 %vm17484_vm8, %v8148_v54  ;;  %680 = vst.msk [vmem:[#allocation5 + $0x9] sm:$0x1] %vm659_vm1, %v17485_v39  ;;  %660 = vst.msk [vmem:[#allocation5] sm:$0x1] %vm659_vm1, %v17485_v39  ;;  %vm9673_vm8 = vcmask 343040  }
 0x526   : > { %11400 = vmatprep.mubr.msk.f32.mxu1 %vm12190_vm14, %v17485_v39  ;;  %11399 = vmatpush3.msk.msra.mxu1 %vm8234_vm11, %v8229_v25  ;;  %669 = vst.msk [vmem:[#allocation5 + $0x90] sm:$0x1] %vm659_vm1, %v17485_v39  ;;  %670 = vst.msk [vmem:[#allocation5 + $0xa0] sm:$0x1] %vm659_vm1, %v17485_v39  ;;  %vm8608_vm14 = vcmask 261248   ;;  %vm17536_vm11 = vcmask 293888  }
 0x527   : > { %679 = vst.msk [vmem:[#allocation5 + $0x130] sm:$0x1] %vm659_vm1, %v17485_v39  ;;  %689 = vst.msk [vmem:[#allocation5 + $0x99] sm:$0x1] %vm659_vm1, %v17485_v39 }
 0x528   : > { %690 = vst.msk [vmem:[#allocation5 + $0xa9] sm:$0x1] %vm659_vm1, %v17485_v39  ;;  %699 = vst.msk [vmem:[#allocation5 + $0x139] sm:$0x1] %vm659_vm1, %v17485_v39 }
 0x529   : > { %vm17538_vm1 = vmmov %vm17535_vm4 }
 0x52c   : > { %v8950_v55 = vld [vmem:[#allocation5 + $0x2] sm:$0xff] }
 0x52d   : > { %v9022_v12 = vld [vmem:[#allocation5 + $0x90] sm:$0xff]  ;;  %9143 = vrot.lane.b32.xlu1 %v8950_v55, %s12178_s13 }
 0x52e   : > { %9413 = vrot.lane.b32.xlu0 %v9022_v12, %s12192_s27  ;;  %v9054_v26 = vld [vmem:[#allocation5 + $0x92] sm:$0xff] }
 0x52f   : > { %v8958_v60 = vld [vmem:[#allocation5 + $0xa2] sm:$0xff]  ;;  %v9030_v30 = vld [vmem:[#allocation5 + $0x130] sm:$0xff] }
 0x531   : > { %9159 = vrot.lane.b32.xlu1 %v8958_v60, %s12178_s13 }
 0x532   : > { %9477 = vrot.lane.b32.xlu0 %v9038_v7, %s12193_s20 }
 0x535   : > { %9541 = vrot.lane.b32.xlu1 %v9054_v26, %s12184_s29 }
 0x539   : > { %9429 = vrot.lane.b32.xlu1 %v9030_v30, %s12192_s27 }
 0x53d   : > { %9493 = vrot.lane.b32.xlu1 %v9046_v44, %s12193_s20 }
 0x58d   : > { %v15956_v57 = vpop.permute.xlu0 %9095 }
 0x58e   : > { %17496 = vst [vmem:[#allocation17_spill] sm:$0xff] %v15956_v57 }
 0x5a0   : > { %v15964_v40 = vpop.permute.xlu0 %9413 }
 0x5a1   : > { %17499 = vst [vmem:[#allocation24_spill] sm:$0xff] %v15964_v40 }
 0x5e5   : > { %v8224_v45 = vpop.f32.mrf.mxu1 }
 0x5e6   : > { %v8228_v34 = vmax.f32 %v8224_v45, 0.0 }
 0x5e7   : > { %v11397_v18 = vpop.f32.mrf.mxu1 }
 0x5e8   : > { %11401 = vmatmul.mubr.msk.f32.vlgmr.msra.gmra.mxu1 %vm8230_vm6, %v8228_v34 }
 0x6a8   : > { %v8304_v11 = vpop.f32.mrf.mxu1 }
 0x6a9   : > { %v8309_v33 = vrot.slane %v8304_v11, 2 }
 0x6aa   : > { %v11402_v23 = vpop.f32.mrf.mxu1 }
 0x6ab   : > { %v8311_v24 = vadd.f32 %v8309_v33, %v8304_v11 }
 0x6ad   : > { %v11179_v4 = vmul.f32 -1.442695, %v8311_v24 }
 0x6af   : > { %12059 = vpow2.f32 %v11179_v4  ;;  %v15950_v4 = vpop.permute.xlu1 %9079 }
 0x6b0   : > { %17494 = vst [vmem:[#allocation21_spill] sm:$0xff] %v15950_v4 }
 0x6bc   : > { %v12060_v13 = vpop.eup %12059 }
 0x6bd   : > { %v8315_v1 = vadd.f32 1.0, %v12060_v13 }
 0x6bf   : > { %12061 = vrcp.f32 %v8315_v1  ;;  %v15954_v1 = vpop.permute.xlu1 %9143 }
 0x6c0   : > { %17495 = vst [vmem:[#allocation16_spill] sm:$0xff] %v15954_v1 }
 0x6c3   : > { %v15958_v36 = vpop.permute.xlu1 %9159 }
 0x6c4   : > { %17497 = vst [vmem:[#allocation13_spill] sm:$0xff] %v15958_v36 }
 0x6c7   : > { %v15968_v63 = vpop.permute.xlu1 %9541 }
 0x6c8   : > { %17500 = vst [vmem:[#allocation19_spill] sm:$0xff] %v15968_v63 }
 0x6cc   : > { %v12062_v61 = vpop.eup %12061 }
 0x6cd   : > { %v8325_v58 = vrot.slane %v12062_v61, %v8324_v28  ;;  %v15976_v61 = vpop.permute.xlu0 %9477 }
 0x6ce   : > { %17502 = vst [vmem:[#allocation27_spill] sm:$0xff] %v15976_v61 }
 0x6cf   : > { %v8326_v52 = vcombine.high %v8325_v58, %v8325_v58  ;;  %v8333_v19 = vrot.slane %v8325_v58, %v8324_v28  ;;  %v15982_v58 = vpop.permute.xlu1 %9429 }
 0x6d0   : > { %17504 = vst [vmem:[#allocation23_spill] sm:$0xff] %v15982_v58 }
 0x6d1   : > { %v8340_v14 = vrot.slane %v8326_v52, %v8324_v28  ;;  %v8344_v62 = vrot.slane %v8333_v19, %v8343_v15 }
 0x6d3   : > { %v15830_v3 = vrot.slane %v8340_v14, %v8343_v15  ;;  %v15833_v22 = vmul.f32 %v8344_v62, %v15512_v46  ;;  %v15836_v48 = vmul.f32 %v8344_v62, %v15503_v37  ;;  %v15843_v9 = vmul.f32 %v8344_v62, %v15518_v53 }
 0x6d4   : > { %v15850_v46 = vmul.f32 %v8344_v62, %v15537_v50  ;;  %v15857_v37 = vmul.f32 %v8344_v62, %v15563_v0  ;;  %v15864_v53 = vmul.f32 %v8344_v62, %v15578_v32  ;;  %v15871_v50 = vmul.f32 %v8344_v62, %v15598_v8 }
 0x6d5   : > { %17486 = vst [vmem:[#allocation7_spill] sm:$0xff] %v15833_v22  ;;  %17487 = vst [vmem:[#allocation12_spill] sm:$0xff] %v15836_v48  ;;  %8498 = vrot.lane.b32.xlu1 %v15833_v22, %s12188_s17  ;;  %8496 = vrot.lane.b32.xlu0 %v15836_v48, %s12188_s17  ;;  %v15878_v0 = vmul.f32 %v8344_v62, %v15614_v21  ;;  %v8373_v32 = vsel %vm598_vm13, %v15843_v9, 0.0  ;;  %v8367_v8 = vsel %vm598_vm13, %v15836_v48, 0.0  ;;  %v8609_v21 = vsel %vm8608_vm14, %v15836_v48, -inf }
 0x6d6   : > { %17488 = vst [vmem:[#allocation8_spill] sm:$0xff] %v15843_v9  ;;  %17489 = vst [vmem:[#allocation9_spill] sm:$0xff] %v15850_v46  ;;  %v8370_v29 = vsel %vm598_vm13, %v15833_v22, 0.0  ;;  %v8438_v27 = vsel %vm598_vm13, %v15843_v9, -inf  ;;  %v8432_v20 = vsel %vm598_vm13, %v15836_v48, -inf  ;;  %v8770_v47 = vsel %vm8769_vm9, %v15836_v48, -inf }
 0x6d7   : > { %17490 = vst [vmem:[#allocation18_spill] sm:$0xff] %v15857_v37  ;;  %17491 = vst [vmem:[#allocation10_spill] sm:$0xff] %v15864_v53  ;;  %v8435_v43 = vsel %vm598_vm13, %v15833_v22, -inf  ;;  %v8441_v2 = vsel %vm598_vm13, %v15850_v46, -inf  ;;  %v8376_v17 = vsel %vm598_vm13, %v15850_v46, 0.0  ;;  %v8773_v16 = vsel %vm8769_vm9, %v15833_v22, -inf }
 0x6d8   : > { %17492 = vst [vmem:[#allocation11_spill] sm:$0xff] %v15871_v50  ;;  %17493 = vst [vmem:[#allocation15_spill] sm:$0xff] %v15878_v0  ;;  %v8612_v41 = vsel %vm8608_vm14, %v15833_v22, -inf  ;;  %v8444_v54 = vsel %vm598_vm13, %v15857_v37, -inf  ;;  %v8379_v39 = vsel %vm598_vm13, %v15857_v37, 0.0  ;;  %v8776_v25 = vsel %vm8769_vm9, %v15843_v9, -inf }
 0x6d9   : > { %8500 = vrot.lane.b32.xlu1 %v15843_v9, %s12188_s17  ;;  %8657 = vrot.lane.b32.xlu0 %v15836_v48, %s12187_s28  ;;  %v8615_v45 = vsel %vm8608_vm14, %v15843_v9, -inf  ;;  %v8447_v34 = vsel %vm598_vm13, %v15864_v53, -inf  ;;  %v8382_v18 = vsel %vm598_vm13, %v15864_v53, 0.0  ;;  %v8779_v42 = vsel %vm8769_vm9, %v15850_v46, -inf }
 0x6da   : > { %v8618_v49 = vsel %vm8608_vm14, %v15850_v46, -inf  ;;  %v8450_v55 = vsel %vm598_vm13, %v15871_v50, -inf  ;;  %v8385_v12 = vsel %vm598_vm13, %v15871_v50, 0.0  ;;  %v8782_v60 = vsel %vm8769_vm9, %v15857_v37, -inf }
 0x6db   : > { %v8621_v7 = vsel %vm8608_vm14, %v15857_v37, -inf  ;;  %v8453_v26 = vsel %vm598_vm13, %v15878_v0, -inf  ;;  %v8388_v30 = vsel %vm598_vm13, %v15878_v0, 0.0  ;;  %v8785_v44 = vsel %vm8769_vm9, %v15864_v53, -inf }
 0x6dc   : > { %v8624_v11 = vsel %vm8608_vm14, %v15864_v53, -inf  ;;  %v8788_v33 = vsel %vm8769_vm9, %v15871_v50, -inf  ;;  %v8627_v23 = vsel %vm8608_vm14, %v15871_v50, -inf  ;;  %v8791_v24 = vsel %vm8769_vm9, %v15878_v0, -inf }
 0x6dd   : > { %8502 = vrot.lane.b32.xlu1 %v15850_v46, %s12188_s17  ;;  %8659 = vrot.lane.b32.xlu0 %v15833_v22, %s12187_s28  ;;  %v8630_v13 = vsel %vm8608_vm14, %v15878_v0, -inf  ;;  %v15962_v56 = vmul.f32 %v15830_v3, %v15639_v10  ;;  %v15972_v28 = vmul.f32 %v15830_v3, %v15629_v51  ;;  %v15980_v10 = vmul.f32 %v15830_v3, %v15649_v35  ;;  %v15998_v35 = vpop.permute.xlu1 %9493 }
 0x6de   : > { %v15990_v51 = vmul.f32 %v15830_v3, %v15659_v59  ;;  %17506 = vst [vmem:[#allocation25_spill] sm:$0xff] %v15998_v35  ;;  %v16002_v52 = vmul.f32 %v15830_v3, %v15671_v38  ;;  %v16012_v19 = vmul.f32 %v15830_v3, %v15679_v31  ;;  %v16022_v38 = vmul.f32 %v15830_v3, %v15695_v5 }
 0x6df   : > { %17498 = vst [vmem:[#allocation14_spill] sm:$0xff] %v15962_v56  ;;  %17501 = vst [vmem:[#allocation20_spill] sm:$0xff] %v15972_v28 }
 0x6e0   : > { %17503 = vst [vmem:[#allocation22_spill] sm:$0xff] %v15980_v10  ;;  %17505 = vst [vmem:[#allocation30_spill] sm:$0xff] %v15990_v51 }
 0x6e1   : > { %8504 = vrot.lane.b32.xlu1 %v15857_v37, %s12188_s17  ;;  %8661 = vrot.lane.b32.xlu0 %v15843_v9, %s12187_s28  ;;  %17507 = vst [vmem:[#allocation26_spill] sm:$0xff] %v16002_v52  ;;  %17508 = vst [vmem:[#allocation28_spill] sm:$0xff] %v16012_v19 }
 0x6e2   : > { %17509 = vst [vmem:[#allocation29_spill] sm:$0xff] %v16022_v38 }
 0x6e5   : > { %8506 = vrot.lane.b32.xlu1 %v15864_v53, %s12188_s17  ;;  %8663 = vrot.lane.b32.xlu0 %v15850_v46, %s12187_s28 }
 0x6e9   : > { %8508 = vrot.lane.b32.xlu1 %v15871_v50, %s12188_s17  ;;  %8665 = vrot.lane.b32.xlu0 %v15857_v37, %s12187_s28 }
 0x6ed   : > { %8510 = vrot.lane.b32.xlu1 %v15878_v0, %s12188_s17  ;;  %8667 = vrot.lane.b32.xlu0 %v15864_v53, %s12187_s28 }
 0x6f1   : > { %8669 = vrot.lane.b32.xlu0 %v15871_v50, %s12187_s28  ;;  %v8651_v50 = vsel %vm8608_vm14, %v16022_v38, -inf }
 0x6f5   : > { %8671 = vrot.lane.b32.xlu0 %v15878_v0, %s12187_s28  ;;  %v8812_v0 = vsel %vm8769_vm9, %v16022_v38, -inf }
 0x711   : > { %8374 = vadd.xlane.f32.xlu1 %v8373_v32  ;;  %v16034_v32 = vmul.f32 %v15830_v3, %v15715_v6 }
 0x713   : > { %17510 = vst [vmem:[#allocation33_spill] sm:$0xff] %v16034_v32  ;;  %v8412_v37 = vsel %vm598_vm13, %v16034_v32, 0.0 }
 0x714   : > { %8368 = vadd.xlane.f32.xlu0 %v8367_v8 }
 0x715   : > { %8610 = vmax.xlane.f32.xlu1 %v8609_v21 }
 0x718   : > { %8371 = vadd.xlane.f32.xlu0 %v8370_v29 }
 0x719   : > { %8439 = vmax.xlane.f32.xlu1 %v8438_v27 }
 0x71c   : > { %8433 = vmax.xlane.f32.xlu0 %v8432_v20 }
 0x71d   : > { %8771 = vmax.xlane.f32.xlu1 %v8770_v47 }
 0x720   : > { %8436 = vmax.xlane.f32.xlu0 %v8435_v43 }
 0x721   : > { %8442 = vmax.xlane.f32.xlu1 %v8441_v2 }
 0x724   : > { %8377 = vadd.xlane.f32.xlu0 %v8376_v17 }
 0x725   : > { %8774 = vmax.xlane.f32.xlu1 %v8773_v16  ;;  %v8391_v16 = vsel %vm598_vm13, %v15962_v56, 0.0 }
 0x728   : > { %8613 = vmax.xlane.f32.xlu0 %v8612_v41 }
 0x729   : > { %8445 = vmax.xlane.f32.xlu1 %v8444_v54 }
 0x72c   : > { %8380 = vadd.xlane.f32.xlu0 %v8379_v39  ;;  %v8394_v39 = vsel %vm598_vm13, %v15972_v28, 0.0 }
 0x72d   : > { %8777 = vmax.xlane.f32.xlu1 %v8776_v25 }
 0x730   : > { %8616 = vmax.xlane.f32.xlu0 %v8615_v45  ;;  %v8456_v45 = vsel %vm598_vm13, %v15962_v56, -inf }
 0x731   : > { %8448 = vmax.xlane.f32.xlu1 %v8447_v34 }
 0x734   : > { %8383 = vadd.xlane.f32.xlu0 %v8382_v18  ;;  %v8397_v18 = vsel %vm598_vm13, %v15980_v10, 0.0 }
 0x735   : > { %8780 = vmax.xlane.f32.xlu1 %v8779_v42 }
 0x738   : > { %8619 = vmax.xlane.f32.xlu0 %v8618_v49  ;;  %v8459_v49 = vsel %vm598_vm13, %v15972_v28, -inf }
 0x739   : > { %8451 = vmax.xlane.f32.xlu1 %v8450_v55 }
 0x73c   : > { %8386 = vadd.xlane.f32.xlu0 %v8385_v12  ;;  %v8633_v12 = vsel %vm8608_vm14, %v15962_v56, -inf }
 0x73d   : > { %8783 = vmax.xlane.f32.xlu1 %v8782_v60 }
 0x740   : > { %8622 = vmax.xlane.f32.xlu0 %v8621_v7  ;;  %v8462_v7 = vsel %vm598_vm13, %v15980_v10, -inf }
 0x741   : > { %8454 = vmax.xlane.f32.xlu1 %v8453_v26 }
 0x744   : > { %8389 = vadd.xlane.f32.xlu0 %v8388_v30  ;;  %v8400_v30 = vsel %vm598_vm13, %v15990_v51, 0.0 }
 0x745   : > { %8786 = vmax.xlane.f32.xlu1 %v8785_v44 }
 0x747   : > { %v15992_v15 = vpop.permute.xlu0 %8496  ;;  %v16014_v14 = vpop.permute.xlu1 %8498 }
 0x748   : > { %8625 = vmax.xlane.f32.xlu0 %v8624_v11  ;;  %v8794_v11 = vsel %vm8769_vm9, %v15962_v56, -inf }
 0x749   : > { %8789 = vmax.xlane.f32.xlu1 %v8788_v33 }
 0x74b   : > { %v16008_v59 = vpop.permute.xlu0 %8657  ;;  %v16030_v31 = vpop.permute.xlu1 %8500 }
 0x74c   : > { %8628 = vmax.xlane.f32.xlu0 %v8627_v23  ;;  %v8636_v23 = vsel %vm8608_vm14, %v15972_v28, -inf }
 0x74d   : > { %8792 = vmax.xlane.f32.xlu1 %v8791_v24 }
 0x74f   : > { %v16024_v62 = vpop.permute.xlu0 %8659  ;;  %v16042_v8 = vpop.permute.xlu1 %8502 }
 0x750   : > { %8631 = vmax.xlane.f32.xlu0 %v8630_v13  ;;  %v8465_v13 = vsel %vm598_vm13, %v15990_v51, -inf }
 0x753   : > { %v16040_v5 = vpop.permute.xlu0 %8661  ;;  %v16050_v6 = vpop.permute.xlu1 %8504 }
 0x757   : > { %v16048_v21 = vpop.permute.xlu0 %8663  ;;  %v16054_v29 = vpop.permute.xlu1 %8506 }
 0x75b   : > { %v16052_v3 = vpop.permute.xlu0 %8665  ;;  %v16058_v20 = vpop.permute.xlu1 %8508 }
 0x75e   : > { %8512 = vrot.lane.b32.xlu1 %v15962_v56, %s12188_s17 }
 0x75f   : > { %v16056_v27 = vpop.permute.xlu0 %8667  ;;  %v16062_v43 = vpop.permute.xlu1 %8510 }
 0x762   : > { %8514 = vrot.lane.b32.xlu1 %v15972_v28, %s12188_s17 }
 0x763   : > { %v16060_v47 = vpop.permute.xlu0 %8669 }
 0x766   : > { %8673 = vrot.lane.b32.xlu0 %v15962_v56, %s12187_s28  ;;  %8516 = vrot.lane.b32.xlu1 %v15980_v10, %s12188_s17  ;;  %v8809_v56 = vsel %vm8769_vm9, %v16012_v19, -inf }
 0x767   : > { %v16064_v2 = vpop.permute.xlu0 %8671 }
 0x76a   : > { %8675 = vrot.lane.b32.xlu0 %v15972_v28, %s12187_s28  ;;  %8518 = vrot.lane.b32.xlu1 %v15990_v51, %s12188_s17 }
 0x76e   : > { %8677 = vrot.lane.b32.xlu0 %v15980_v10, %s12187_s28  ;;  %8520 = vrot.lane.b32.xlu1 %v16002_v52, %s12188_s17 }
 0x772   : > { %8679 = vrot.lane.b32.xlu0 %v15990_v51, %s12187_s28  ;;  %8522 = vrot.lane.b32.xlu1 %v16012_v19, %s12188_s17 }
 0x776   : > { %8681 = vrot.lane.b32.xlu0 %v16002_v52, %s12187_s28  ;;  %8524 = vrot.lane.b32.xlu1 %v16022_v38, %s12188_s17 }
 0x77a   : > { %8683 = vrot.lane.b32.xlu0 %v16012_v19, %s12187_s28  ;;  %8526 = vrot.lane.b32.xlu1 %v16034_v32, %s12188_s17  ;;  %s12196_s17 = smov 30  }
 0x77e   : > { %8685 = vrot.lane.b32.xlu0 %v16022_v38, %s12187_s28  ;;  %8687 = vrot.lane.b32.xlu1 %v16034_v32, %s12187_s28  ;;  %s12195_s28 = smov 18  }
 0x79a   : > { %v16066_v17 = vpop.xlane.xlu1 %8374 }
 0x79d   : > { %v16070_v41 = vpop.xlane.xlu0 %8368  ;;  %8392 = vadd.xlane.f32.xlu0 %v8391_v16 }
 0x79e   : > { %v16072_v54 = vpop.xlane.xlu1 %8610 }
 0x7a1   : > { %v16076_v25 = vpop.xlane.xlu0 %8371  ;;  %8395 = vadd.xlane.f32.xlu0 %v8394_v39  ;;  %v8403_v39 = vsel %vm598_vm13, %v16002_v52, 0.0 }
 0x7a2   : > { %8457 = vmax.xlane.f32.xlu1 %v8456_v45  ;;  %v16080_v34 = vpop.xlane.xlu1 %8439 }
 0x7a5   : > { %v16084_v42 = vpop.xlane.xlu0 %8433  ;;  %8398 = vadd.xlane.f32.xlu0 %v8397_v18  ;;  %v8797_v18 = vsel %vm8769_vm9, %v15972_v28, -inf }
 0x7a6   : > { %8460 = vmax.xlane.f32.xlu1 %v8459_v49  ;;  %v16088_v55 = vpop.xlane.xlu1 %8771 }
 0x7a9   : > { %v16092_v60 = vpop.xlane.xlu0 %8436  ;;  %8634 = vmax.xlane.f32.xlu0 %v8633_v12  ;;  %v8639_v12 = vsel %vm8608_vm14, %v15980_v10, -inf }
 0x7aa   : > { %8463 = vmax.xlane.f32.xlu1 %v8462_v7  ;;  %v16096_v26 = vpop.xlane.xlu1 %8442 }
 0x7ad   : > { %v16100_v44 = vpop.xlane.xlu0 %8377  ;;  %8401 = vadd.xlane.f32.xlu0 %v8400_v30  ;;  %v8468_v30 = vsel %vm598_vm13, %v16002_v52, -inf }
 0x7ae   : > { %8795 = vmax.xlane.f32.xlu1 %v8794_v11  ;;  %v16104_v33 = vpop.xlane.xlu1 %8774 }
 0x7b1   : > { %v16108_v24 = vpop.xlane.xlu0 %8613  ;;  %8637 = vmax.xlane.f32.xlu0 %v8636_v23  ;;  %v8406_v23 = vsel %vm598_vm13, %v16012_v19, 0.0 }
 0x7b2   : > { %8466 = vmax.xlane.f32.xlu1 %v8465_v13  ;;  %v16112_v16 = vpop.xlane.xlu1 %8445  ;;  %v8800_v13 = vsel %vm8769_vm9, %v15980_v10, -inf }
 0x7b5   : > { %v16116_v45 = vpop.xlane.xlu0 %8380  ;;  %8404 = vadd.xlane.f32.xlu0 %v8403_v39 }
 0x7b6   : > { %8798 = vmax.xlane.f32.xlu1 %v8797_v18  ;;  %v16120_v49 = vpop.xlane.xlu1 %8777 }
 0x7b9   : > { %v16124_v7 = vpop.xlane.xlu0 %8616  ;;  %8640 = vmax.xlane.f32.xlu0 %v8639_v12  ;;  %v8642_v12 = vsel %vm8608_vm14, %v15990_v51, -inf }
 0x7ba   : > { %8469 = vmax.xlane.f32.xlu1 %v8468_v30  ;;  %v16128_v11 = vpop.xlane.xlu1 %8448  ;;  %v8471_v30 = vsel %vm598_vm13, %v16012_v19, -inf }
 0x7bd   : > { %8407 = vadd.xlane.f32.xlu0 %v8406_v23  ;;  %v16134_v39 = vpop.xlane.xlu0 %8383  ;;  %v8409_v23 = vsel %vm598_vm13, %v16022_v38, 0.0 }
 0x7be   : > { %8801 = vmax.xlane.f32.xlu1 %v8800_v13  ;;  %v16136_v18 = vpop.xlane.xlu1 %8780  ;;  %v8803_v13 = vsel %vm8769_vm9, %v15990_v51, -inf }
 0x7c1   : > { %8643 = vmax.xlane.f32.xlu0 %v8642_v12  ;;  %v16144_v22 = vpop.xlane.xlu0 %8619  ;;  %v8645_v12 = vsel %vm8608_vm14, %v16002_v52, -inf }
 0x7c2   : > { %8472 = vmax.xlane.f32.xlu1 %v8471_v30  ;;  %v16142_v48 = vpop.xlane.xlu1 %8451  ;;  %v8474_v30 = vsel %vm598_vm13, %v16022_v38, -inf  ;;  %v8547_v38 = vsel %vm598_vm13, %v16014_v14, 0.0  ;;  %v8711_v14 = vsel %vm598_vm13, %v16040_v5, 0.0 }
 0x7c5   : > { %8410 = vadd.xlane.f32.xlu0 %v8409_v23  ;;  %v16156_v46 = vpop.xlane.xlu0 %8386  ;;  %v8806_v23 = vsel %vm8769_vm9, %v16002_v52, -inf }
 0x7c6   : > { %8804 = vmax.xlane.f32.xlu1 %v8803_v13  ;;  %v16150_v9 = vpop.xlane.xlu1 %8783 }
 0x7c9   : > { %8646 = vmax.xlane.f32.xlu0 %v8645_v12  ;;  %v16164_v53 = vpop.xlane.xlu0 %8622  ;;  %v8648_v12 = vsel %vm8608_vm14, %v16012_v19, -inf  ;;  %v8705_v19 = vsel %vm598_vm13, %v16008_v59, 0.0  ;;  %v8553_v59 = vsel %vm598_vm13, %v16042_v8, 0.0  ;;  %v8723_v8 = vsel %vm598_vm13, %v16060_v47, 0.0 }
 0x7ca   : > { %8475 = vmax.xlane.f32.xlu1 %v8474_v30  ;;  %v16162_v13 = vpop.xlane.xlu1 %8454 }
 0x7cd   : > { %8413 = vadd.xlane.f32.xlu0 %v8412_v37  ;;  %v8477_v37 = vsel %vm598_vm13, %v16034_v32, -inf }
 0x7ce   : > { %8807 = vmax.xlane.f32.xlu1 %v8806_v23  ;;  %v16170_v30 = vpop.xlane.xlu1 %8786  ;;  %v16176_v23 = vpop.xlane.xlu0 %8389 }
 0x7d1   : > { %8649 = vmax.xlane.f32.xlu0 %v8648_v12  ;;  %v8544_v12 = vsel %vm598_vm13, %v15992_v15, 0.0  ;;  %v8708_v15 = vsel %vm598_vm13, %v16024_v62, 0.0  ;;  %v8714_v62 = vsel %vm598_vm13, %v16048_v21, 0.0 }
 0x7d2   : > { %8652 = vmax.xlane.f32.xlu1 %v8651_v50  ;;  %v16182_v50 = vpop.xlane.xlu1 %8789  ;;  %v16184_v28 = vpop.xlane.xlu0 %8625 }
 0x7d5   : > { %8478 = vmax.xlane.f32.xlu0 %v8477_v37  ;;  %v8654_v37 = vsel %vm8608_vm14, %v16034_v32, -inf  ;;  %vm17539_vm14 = vmmov %vm17536_vm11 }
 0x7d6   : > { %8813 = vmax.xlane.f32.xlu1 %v8812_v0  ;;  %v16190_v0 = vpop.xlane.xlu1 %8792 }
 0x7d9   : > { %8810 = vmax.xlane.f32.xlu0 %v8809_v56  ;;  %v8815_v56 = vsel %vm8769_vm9, %v16034_v32, -inf  ;;  %vm17540_vm9 = vmmov %vm17537_vm5 }
 0x7da   : > { %8545 = vadd.xlane.f32.xlu1 %v8544_v12  ;;  %v16196_v12 = vpop.xlane.xlu0 %8628 }
 0x7dd   : > { %8655 = vmax.xlane.f32.xlu0 %v8654_v37 }
 0x7de   : > { %8548 = vadd.xlane.f32.xlu1 %v8547_v38  ;;  %v8513_v38 = vpop.permute.xlu1 %8512  ;;  %v16202_v37 = vpop.xlane.xlu0 %8631 }
 0x7e1   : > { %8816 = vmax.xlane.f32.xlu0 %v8815_v56  ;;  %v8550_v56 = vsel %vm598_vm13, %v16030_v31, 0.0  ;;  %v8720_v31 = vsel %vm598_vm13, %v16056_v27, 0.0 }
 0x7e2   : > { %8709 = vadd.xlane.f32.xlu1 %v8708_v15  ;;  %v8515_v15 = vpop.permute.xlu1 %8514  ;;  %v8674_v5 = vpop.permute.xlu0 %8673 }
 0x7e5   : > { %8706 = vadd.xlane.f32.xlu0 %v8705_v19  ;;  %v8717_v19 = vsel %vm598_vm13, %v16052_v3, 0.0 }
 0x7e6   : > { %8712 = vadd.xlane.f32.xlu1 %v8711_v14  ;;  %v8556_v14 = vsel %vm598_vm13, %v16050_v6, 0.0  ;;  %v8676_v21 = vpop.permute.xlu0 %8675  ;;  %v8726_v6 = vsel %vm598_vm13, %v16064_v2, 0.0  ;;  %v8571_v2 = vsel %vm598_vm13, %v8515_v15, 0.0 }
 0x7e9   : > { %8551 = vadd.xlane.f32.xlu0 %v8550_v56  ;;  %v8517_v56 = vpop.permute.xlu1 %8516 }
 0x7ea   : > { %8715 = vadd.xlane.f32.xlu1 %v8714_v62  ;;  %v8559_v62 = vsel %vm598_vm13, %v16054_v29, 0.0  ;;  %v8678_v27 = vpop.permute.xlu0 %8677  ;;  %v8729_v29 = vsel %vm598_vm13, %v8674_v5, 0.0 }
 0x7ed   : > { %8554 = vadd.xlane.f32.xlu0 %v8553_v59  ;;  %v8519_v3 = vpop.permute.xlu1 %8518  ;;  %v8562_v59 = vsel %vm598_vm13, %v16058_v20, 0.0  ;;  %v8732_v20 = vsel %vm598_vm13, %v8676_v21, 0.0 }
 0x7ee   : > { %8718 = vadd.xlane.f32.xlu1 %v8717_v19  ;;  %v8565_v19 = vsel %vm598_vm13, %v16062_v43, 0.0  ;;  %v8680_v47 = vpop.permute.xlu0 %8679  ;;  %v8574_v43 = vsel %vm598_vm13, %v8517_v56, 0.0 }
 0x7ef   : > { %v8738_v5 = vsel %vm598_vm13, %v8680_v47, 0.0 }
 0x7f1   : > { %8557 = vadd.xlane.f32.xlu0 %v8556_v14  ;;  %v8521_v14 = vpop.permute.xlu1 %8520 }
 0x7f2   : > { %8721 = vadd.xlane.f32.xlu1 %v8720_v31  ;;  %v8568_v31 = vsel %vm598_vm13, %v8513_v38, 0.0 }
 0x7f5   : > { %8560 = vadd.xlane.f32.xlu0 %v8559_v62  ;;  %v8523_v62 = vpop.permute.xlu1 %8522 }
 0x7f6   : > { %8724 = vadd.xlane.f32.xlu1 %v8723_v8  ;;  %v8735_v8 = vsel %vm598_vm13, %v8678_v27, 0.0  ;;  %v8583_v56 = vsel %vm598_vm13, %v8523_v62, 0.0 }
 0x7f9   : > { %8563 = vadd.xlane.f32.xlu0 %v8562_v59  ;;  %v8682_v59 = vpop.permute.xlu0 %8681 }
 0x7fa   : > { %8727 = vadd.xlane.f32.xlu1 %v8726_v6  ;;  %v8525_v6 = vpop.permute.xlu1 %8524  ;;  %v8741_v21 = vsel %vm598_vm13, %v8682_v59, 0.0 }
 0x7fd   : > { %8566 = vadd.xlane.f32.xlu0 %v8565_v19  ;;  %v8684_v38 = vpop.permute.xlu0 %8683  ;;  %v8577_v19 = vsel %vm598_vm13, %v8519_v3, 0.0  ;;  %v8586_v3 = vsel %vm598_vm13, %v8525_v6, 0.0 }
 0x7fe   : > { %8730 = vadd.xlane.f32.xlu1 %v8729_v29  ;;  %v8527_v15 = vpop.permute.xlu1 %8526  ;;  %v8580_v29 = vsel %vm598_vm13, %v8521_v14, 0.0  ;;  %v8744_v27 = vsel %vm598_vm13, %v8684_v38, 0.0 }
 0x7ff   : > { %v8589_v14 = vsel %vm598_vm13, %v8527_v15, 0.0 }
 0x801   : > { %8569 = vadd.xlane.f32.xlu0 %v8568_v31  ;;  %v8686_v31 = vpop.permute.xlu0 %8685 }
 0x802   : > { %8733 = vadd.xlane.f32.xlu1 %v8732_v20  ;;  %v8747_v47 = vsel %vm598_vm13, %v8686_v31, 0.0  ;;  %v8688_v20 = vpop.permute.xlu1 %8687 }
 0x805   : > { %8572 = vadd.xlane.f32.xlu0 %v8571_v2  ;;  %v8750_v2 = vsel %vm598_vm13, %v8688_v20, 0.0 }
 0x806   : > { %8736 = vadd.xlane.f32.xlu1 %v8735_v8 }
 0x809   : > { %8575 = vadd.xlane.f32.xlu0 %v8574_v43 }
 0x80a   : > { %8739 = vadd.xlane.f32.xlu1 %v8738_v5 }
 0x80d   : > { %8578 = vadd.xlane.f32.xlu0 %v8577_v19 }
 0x80e   : > { %8742 = vadd.xlane.f32.xlu1 %v8741_v21 }
 0x811   : > { %8581 = vadd.xlane.f32.xlu0 %v8580_v29 }
 0x812   : > { %8745 = vadd.xlane.f32.xlu1 %v8744_v27 }
 0x815   : > { %8584 = vadd.xlane.f32.xlu0 %v8583_v56 }
 0x816   : > { %8748 = vadd.xlane.f32.xlu1 %v8747_v47 }
 0x819   : > { %8587 = vadd.xlane.f32.xlu0 %v8586_v3 }
 0x81a   : > { %8751 = vadd.xlane.f32.xlu1 %v8750_v2 }
 0x81d   : > { %8590 = vadd.xlane.f32.xlu0 %v8589_v14 }
 0x826   : > { %v16242_v8 = vpop.xlane.xlu0 %8392 }
 0x82a   : > { %v16244_v59 = vpop.xlane.xlu0 %8395 }
 0x82b   : > { %v16246_v43 = vpop.xlane.xlu1 %8457 }
 0x82e   : > { %v16248_v62 = vpop.xlane.xlu0 %8398 }
 0x82f   : > { %v16250_v5 = vpop.xlane.xlu1 %8460 }
 0x832   : > { %v16252_v38 = vpop.xlane.xlu0 %8634 }
 0x833   : > { %v16254_v6 = vpop.xlane.xlu1 %8463 }
 0x836   : > { %v16256_v19 = vpop.xlane.xlu0 %8401 }
 0x837   : > { %v16258_v21 = vpop.xlane.xlu1 %8795 }
 0x83a   : > { %v16260_v15 = vpop.xlane.xlu0 %8637 }
 0x83b   : > { %v16262_v29 = vpop.xlane.xlu1 %8466 }
 0x83e   : > { %v16264_v27 = vpop.xlane.xlu0 %8404 }
 0x83f   : > { %v16266_v31 = vpop.xlane.xlu1 %8798 }
 0x842   : > { %v16268_v56 = vpop.xlane.xlu0 %8640 }
 0x843   : > { %v16270_v47 = vpop.xlane.xlu1 %8469 }
 0x846   : > { %v16272_v20 = vpop.xlane.xlu0 %8407 }
 0x847   : > { %v16274_v3 = vpop.xlane.xlu1 %8801 }
 0x84a   : > { %v16276_v2 = vpop.xlane.xlu0 %8643 }
 0x84b   : > { %v16278_v14 = vpop.xlane.xlu1 %8472 }
 0x84c   : > { %17511 = vst [vmem:[#allocation31_spill] sm:$0xff] %v16278_v14 }
 0x84e   : > { %v16280_v32 = vpop.xlane.xlu0 %8410 }
 0x84f   : > { %17512 = vst [vmem:[#allocation32_spill] sm:$0xff] %v16280_v32  ;;  %v16282_v52 = vpop.xlane.xlu1 %8804  ;;  %v8417_v32 = vmul.f32 0.0625, %v16076_v25 }
 0x852   : > { %v16284_v51 = vpop.xlane.xlu0 %8646 }
 0x853   : > { %v16286_v10 = vpop.xlane.xlu1 %8475 }
 0x854   : > { %17513 = vst [vmem:[#allocation36_spill] sm:$0xff] %v16286_v10 }
 0x856   : > { %v16288_v35 = vpop.xlane.xlu0 %8413 }
 0x857   : > { %17514 = vst [vmem:[#allocation34_spill] sm:$0xff] %v16288_v35  ;;  %v16290_v58 = vpop.xlane.xlu1 %8807 }
 0x858   : > { %17515 = vst [vmem:[#allocation35_spill] sm:$0xff] %v16290_v58  ;;  %v8820_v58 = vsel %vm8818_vm2, %v8417_v32, %v16092_v60 }
 0x85a   : > { %v16292_v36 = vpop.xlane.xlu0 %8649 }
 0x85b   : > { %17516 = vst [vmem:[#allocation37_spill] sm:$0xff] %v16292_v36  ;;  %v16294_v57 = vpop.xlane.xlu1 %8652 }
 0x85c   : > { %17517 = vst [vmem:[#allocation38_spill] sm:$0xff] %v16294_v57  ;;  %v8416_v57 = vmul.f32 0.0625, %v16070_v41 }
 0x85e   : > { %v16296_v63 = vpop.xlane.xlu0 %8478 }
 0x85f   : > { %17518 = vst [vmem:[#allocation39_spill] sm:$0xff] %v16296_v63  ;;  %v16298_v61 = vpop.xlane.xlu1 %8813 }
 0x860   : > { %17519 = vst [vmem:[#allocation40_spill] sm:$0xff] %v16298_v61 }
 0x862   : > { %v16300_v40 = vpop.xlane.xlu0 %8810 }
 0x863   : > { %17520 = vst [vmem:[#allocation41_spill] sm:$0xff] %v16300_v40  ;;  %v8546_v1 = vpop.xlane.xlu1 %8545 }
 0x864   : > { %v8592_v36 = vmul.f32 0.0625, %v8546_v1 }
 0x866   : > { %v16302_v4 = vpop.xlane.xlu0 %8655 }
 0x867   : > { %17521 = vst [vmem:[#allocation42_spill] sm:$0xff] %v16302_v4  ;;  %v8549_v10 = vpop.xlane.xlu1 %8548  ;;  %v8819_v4 = vsel %vm8818_vm2, %v8416_v57, %v16084_v42 }
 0x868   : > { %v8593_v35 = vmul.f32 0.0625, %v8549_v10  ;;  %v8836_v14 = vsel %vm8835_vm15, %v8819_v4, %v8592_v36  ;;  %v8418_v4 = vmul.f32 0.0625, %v16066_v17 }
 0x869   : > { %v8852_v57 = vsel %vm8230_vm6, %v8836_v14, %v16072_v54 }
 0x86a   : > { %v8837_v63 = vsel %vm8835_vm15, %v8820_v58, %v8593_v35  ;;  %v16309_v61 = vpop.xlane.xlu0 %8816 }
 0x86b   : > { %v8710_v40 = vpop.xlane.xlu1 %8709  ;;  %v8853_v10 = vsel %vm8230_vm6, %v8837_v63, %v16108_v24  ;;  %v8419_v24 = vmul.f32 0.0625, %v16100_v44 }
 0x86c   : > { %v8754_v25 = vmul.f32 0.0625, %v8710_v40 }
 0x86e   : > { %v8869_v32 = vsel %vm4484_vm10, %v8853_v10, %v8754_v25  ;;  %v8707_v1 = vpop.xlane.xlu0 %8706 }
 0x86f   : > { %v8886_v41 = vsel %vm8884_vm7, %v8869_v32, %v16104_v33  ;;  %v8753_v58 = vmul.f32 0.0625, %v8707_v1  ;;  %v8713_v35 = vpop.xlane.xlu1 %8712  ;;  %v8821_v33 = vsel %vm8818_vm2, %v8418_v4, %v16080_v34  ;;  %v8822_v1 = vsel %vm8818_vm2, %v8419_v24, %v16096_v26 }
 0x870   : > { %8903 = vst.msk [vmem:[#allocation5 + $0x21] sm:$0xff] %vm648_vm0, %v8886_v41  ;;  %v8755_v25 = vmul.f32 0.0625, %v8713_v35  ;;  %v8420_v41 = vmul.f32 0.0625, %v16116_v45 }
 0x871   : > { %v8868_v40 = vsel %vm4484_vm10, %v8852_v57, %v8753_v58 }
 0x872   : > { %v8885_v36 = vsel %vm8884_vm7, %v8868_v40, %v16088_v55  ;;  %v8552_v63 = vpop.xlane.xlu0 %8551  ;;  %v8823_v45 = vsel %vm8818_vm2, %v8420_v41, %v16112_v16 }
 0x873   : > { %8902 = vst.msk [vmem:[#allocation5 + $0x11] sm:$0xff] %vm648_vm0, %v8885_v36  ;;  %v8594_v42 = vmul.f32 0.0625, %v8552_v63  ;;  %v8716_v60 = vpop.xlane.xlu1 %8715 }
 0x874   : > { %v8756_v44 = vmul.f32 0.0625, %v8716_v60 }
 0x875   : > { %v8838_v54 = vsel %vm8835_vm15, %v8821_v33, %v8594_v42 }
 0x876   : > { %v8854_v14 = vsel %vm8230_vm6, %v8838_v54, %v16124_v7  ;;  %v8555_v17 = vpop.xlane.xlu0 %8554 }
 0x877   : > { %v8870_v10 = vsel %vm4484_vm10, %v8854_v14, %v8755_v25  ;;  %v8595_v55 = vmul.f32 0.0625, %v8555_v17  ;;  %v8719_v32 = vpop.xlane.xlu1 %8718  ;;  %v16357_v25 = vld [vmem:[#allocation5 + $0x20] sm:$0xff] }
 0x878   : > { %v8887_v34 = vsel %vm8884_vm7, %v8870_v10, %v16120_v49  ;;  %v8421_v49 = vmul.f32 0.0625, %v16134_v39 }
 0x879   : > { %8904 = vst.msk [vmem:[#allocation5 + $0x31] sm:$0xff] %vm648_vm0, %v8887_v34  ;;  %v8839_v58 = vsel %vm8835_vm15, %v8822_v1, %v8595_v55  ;;  %v16373_v1 = vld [vmem:[#allocation5 + $0x21] sm:$0xff] }
 0x87a   : > { %v8855_v7 = vsel %vm8230_vm6, %v8839_v58, %v16144_v22  ;;  %v8558_v35 = vpop.xlane.xlu0 %8557  ;;  %v8951_v57 = vld [vmem:[#allocation5 + $0x12] sm:$0xff]  ;;  %v8757_v22 = vmul.f32 0.0625, %v8719_v32 }
 0x87b   : > { %v8935_v40 = vld [vmem:[#allocation5 + $0x11] sm:$0xff]  ;;  %v8871_v4 = vsel %vm4484_vm10, %v8855_v7, %v8756_v44  ;;  %v8596_v36 = vmul.f32 0.0625, %v8558_v35  ;;  %9145 = vrot.lane.b32.xlu1 %v8951_v57, %s12178_s13  ;;  %v8722_v26 = vpop.xlane.xlu1 %8721 }
 0x87c   : > { %9081 = vrot.lane.b32.xlu0 %v8935_v40, %s12191_s19  ;;  %v8888_v63 = vsel %vm8884_vm7, %v8871_v4, %v16136_v18  ;;  %v16355_v24 = vld [vmem:[#allocation5 + $0x10] sm:$0xff]  ;;  %v8824_v18 = vsel %vm8818_vm2, %v8421_v49, %v16128_v11  ;;  %v8758_v17 = vmul.f32 0.0625, %v8722_v26  ;;  %v8423_v11 = vmul.f32 0.0625, %v16176_v23 }
 0x87d   : > { %8905 = vst.msk [vmem:[#allocation5 + $0x41] sm:$0xff] %vm648_vm0, %v8888_v63  ;;  %v8840_v42 = vsel %vm8835_vm15, %v8823_v45, %v8596_v36  ;;  %v8424_v26 = vmul.f32 0.0625, %v16242_v8  ;;  %v16401_v63 = vld [vmem:[#allocation5 + $0x22] sm:$0xff]  ;;  %v9712_v8 = vld [vmem:[%s17088_s9 + $0x30] sm:$0x3f] }
 0x87e   : > { %v8856_v60 = vsel %vm8230_vm6, %v8840_v42, %v16164_v53  ;;  %v8561_v33 = vpop.xlane.xlu0 %8560  ;;  %v8422_v53 = vmul.f32 0.0625, %v16156_v46  ;;  %11403 = vmatprep.subr.msk.mxu1 %vm2467_vm3, %v9712_v8 }
 0x87f   : > { %v8872_v16 = vsel %vm4484_vm10, %v8856_v60, %v8757_v22  ;;  %v8597_v54 = vmul.f32 0.0625, %v8561_v33  ;;  %9209 = vrot.lane.b32.xlu1 %v16357_v25, %s12195_s28  ;;  %v8725_v39 = vpop.xlane.xlu1 %8724  ;;  %11404 = vmatpush3.msk.msra.mxu1 %vm2467_vm3, %v9712_v8  ;;  %vm9607_vm3 = vcmask 146432  }
 0x880   : > { %9207 = vrot.lane.b32.xlu0 %v16355_v24, %s12195_s28  ;;  %v8889_v14 = vsel %vm8884_vm7, %v8872_v16, %v16150_v9  ;;  %v8825_v46 = vsel %vm8818_vm2, %v8422_v53, %v16142_v48  ;;  %v8759_v44 = vmul.f32 0.0625, %v8725_v39  ;;  %v8425_v16 = vmul.f32 0.0625, %v16244_v59  ;;  %v9710_v59 = vld [vmem:[%s17088_s9 + $0x20] sm:$0xff] }
 0x881   : > { %8906 = vst.msk [vmem:[#allocation5 + $0x51] sm:$0xff] %vm648_vm0, %v8889_v14  ;;  %v8841_v10 = vsel %vm8835_vm15, %v8824_v18, %v8597_v54 }
 0x882   : > { %v8857_v55 = vsel %vm8230_vm6, %v8841_v10, %v16184_v28  ;;  %v8564_v32 = vpop.xlane.xlu0 %8563 }
 0x883   : > { %v8873_v41 = vsel %vm4484_vm10, %v8857_v55, %v8758_v17  ;;  %v8598_v34 = vmul.f32 0.0625, %v8564_v32  ;;  %9083 = vrot.lane.b32.xlu1 %v16373_v1, %s12191_s19  ;;  %v8728_v9 = vpop.xlane.xlu1 %8727  ;;  %v8426_v55 = vmul.f32 0.0625, %v16248_v62 }
 0x884   : > { %9271 = vrot.lane.b32.xlu0 %v8935_v40, %s12179_s14  ;;  %v8890_v28 = vsel %vm8884_vm7, %v8873_v41, %v16170_v30  ;;  %v8826_v30 = vsel %vm8818_vm2, %v8423_v11, %v16162_v13 }
 0x885   : > { %8907 = vst.msk [vmem:[#allocation5 + $0x61] sm:$0xff] %vm648_vm0, %v8890_v28  ;;  %v8842_v58 = vsel %vm8835_vm15, %v8825_v46, %v8598_v34  ;;  %v16444_v34 = vld [vmem:[#allocation5 + $0x30] sm:$0xff] }
 0x886   : > { %v8858_v7 = vsel %vm8230_vm6, %v8842_v58, %v16196_v12  ;;  %v8567_v35 = vpop.xlane.xlu0 %8566  ;;  %v8760_v12 = vmul.f32 0.0625, %v8728_v9  ;;  %v16446_v9 = vld [vmem:[#allocation5 + $0x32] sm:$0xff] }
 0x887   : > { %v8874_v40 = vsel %vm4484_vm10, %v8858_v7, %v8759_v44  ;;  %v8599_v4 = vmul.f32 0.0625, %v8567_v35  ;;  %9335 = vrot.lane.b32.xlu1 %v8951_v57, %s12196_s17  ;;  %v8731_v48 = vpop.xlane.xlu1 %8730  ;;  %v16403_v57 = vld [vmem:[#allocation5 + $0x31] sm:$0xff]  ;;  %v8427_v7 = vmul.f32 0.0625, %v16256_v19 }
 0x888   : > { %9273 = vrot.lane.b32.xlu0 %v16373_v1, %s12179_s14  ;;  %v8891_v23 = vsel %vm8884_vm7, %v8874_v40, %v16182_v50  ;;  %v8761_v60 = vmul.f32 0.0625, %v8731_v48  ;;  %v9708_v58 = vld [vmem:[%s17088_s9 + $0x10] sm:$0xff]  ;;  %v9707_v48 = vld [vmem:[%s17088_s9 + $0x8] sm:$0xff] }
 0x889   : > { %8908 = vst.msk [vmem:[#allocation5 + $0x71] sm:$0xff] %vm648_vm0, %v8891_v23  ;;  %v8843_v36 = vsel %vm8835_vm15, %v8826_v30, %v8599_v4  ;;  %v8830_v19 = vsel %vm8818_vm2, %v8427_v7, %v16262_v29  ;;  %v8428_v23 = vmul.f32 0.0625, %v16264_v27  ;;  %v9706_v29 = vld [vmem:[%s17088_s9] sm:$0xff]  ;;  %v17531_v7 = vld [vmem:[#allocation40_spill] sm:$0xff] }
 0x88a   : > { %v8859_v45 = vsel %vm8230_vm6, %v8843_v36, %v16202_v37  ;;  %v8570_v49 = vpop.xlane.xlu0 %8569  ;;  %v8827_v37 = vsel %vm8818_vm2, %v8424_v26, %v16246_v43  ;;  %v9711_v43 = vld [vmem:[%s17088_s9 + $0x28] sm:$0xff]  ;;  %v16485_v26 = vld [vmem:[#allocation5 + $0x40] sm:$0xff] }
 0x88b   : > { %v8875_v13 = vsel %vm4484_vm10, %v8859_v45, %v8760_v12  ;;  %v8600_v22 = vmul.f32 0.0625, %v8570_v49  ;;  %9147 = vrot.lane.b32.xlu1 %v16401_v63, %s12178_s13  ;;  %v8734_v50 = vpop.xlane.xlu1 %8733  ;;  %11405 = vmatprep.subr.mxu1 %v9711_v43 }
 0x88c   : > { %9085 = vrot.lane.b32.xlu0 %v16403_v57, %s12191_s19  ;;  %v8892_v42 = vsel %vm8884_vm7, %v8875_v13, %v16190_v0  ;;  %v8762_v17 = vmul.f32 0.0625, %v8734_v50  ;;  %11406 = vmatpush3.msra.mxu1 %v9711_v43  ;;  %v8429_v50 = vmul.f32 0.0625, %v16272_v20 }
 0x88d   : > { %8909 = vst.msk [vmem:[#allocation5 + $0x81] sm:$0xff] %vm648_vm0, %v8892_v42  ;;  %v8844_v33 = vsel %vm8835_vm15, %v8827_v37, %v8600_v22  ;;  %11407 = vmatprep.subr.mxu1 %v9710_v59 }
 0x88e   : > { %v8860_v54 = vsel %vm8230_vm6, %v8844_v33, %v16252_v38  ;;  %v8573_v39 = vpop.xlane.xlu0 %8572  ;;  %v8828_v38 = vsel %vm8818_vm2, %v8425_v16, %v16250_v5  ;;  %v9709_v5 = vld [vmem:[%s17088_s9 + $0x18] sm:$0xff]  ;;  %11408 = vmatpush3.msra.mxu1 %v9710_v59  ;;  %v17523_v33 = vld [vmem:[#allocation35_spill] sm:$0xff] }
 0x88f   : > { %v8876_v0 = vsel %vm4484_vm10, %v8860_v54, %v8761_v60  ;;  %v8601_v18 = vmul.f32 0.0625, %v8573_v39  ;;  %9399 = vrot.lane.b32.xlu1 %v16357_v25, %s12192_s27  ;;  %v8737_v53 = vpop.xlane.xlu1 %8736  ;;  %11409 = vmatprep.subr.mxu1 %v9709_v5  ;;  %v17524_v39 = vld [vmem:[#allocation32_spill] sm:$0xff] }
 0x890   : > { %9337 = vrot.lane.b32.xlu0 %v16401_v63, %s12196_s17  ;;  %v8893_v14 = vsel %vm8884_vm7, %v8876_v0, %v16258_v21  ;;  %v8763_v28 = vmul.f32 0.0625, %v8737_v53  ;;  %11410 = vmatpush3.msra.mxu1 %v9709_v5  ;;  %v8430_v43 = vmul.f32 0.0625, %v17524_v39  ;;  %v17525_v0 = vld [vmem:[#allocation37_spill] sm:$0xff]  ;;  %v8985_v53 = vld [vmem:[#allocation5 + $0x41] sm:$0xff] }
 0x891   : > { %8910 = vst.msk [vmem:[#allocation5 + $0xb1] sm:$0xff] %vm648_vm0, %v8893_v14  ;;  %v8845_v10 = vsel %vm8835_vm15, %v8828_v38, %v8601_v18  ;;  %11411 = vmatprep.subr.mxu1 %v9708_v58  ;;  %v17526_v38 = vld [vmem:[#allocation36_spill] sm:$0xff] }
 0x892   : > { %v8861_v32 = vsel %vm8230_vm6, %v8845_v10, %v16260_v15  ;;  %v8576_v41 = vpop.xlane.xlu0 %8575  ;;  %v8829_v15 = vsel %vm8818_vm2, %v8426_v55, %v16254_v6  ;;  %11412 = vmatpush3.msra.mxu1 %v9708_v58  ;;  %v8833_v14 = vsel %vm8818_vm2, %v8430_v43, %v17526_v38  ;;  %v17533_v38 = vld [vmem:[#allocation21_spill] sm:$0xff] }
 0x893   : > { %v8877_v21 = vsel %vm4484_vm10, %v8861_v32, %v8762_v17  ;;  %v8602_v46 = vmul.f32 0.0625, %v8576_v41  ;;  %9211 = vrot.lane.b32.xlu1 %v16444_v34, %s12195_s28  ;;  %v8740_v62 = vpop.xlane.xlu1 %8739  ;;  %11413 = vmatprep.subr.mxu1 %v9707_v48  ;;  %v17527_v17 = vld [vmem:[#allocation41_spill] sm:$0xff]  ;;  %v17528_v41 = vld [vmem:[#allocation34_spill] sm:$0xff] }
 0x894   : > { %9149 = vrot.lane.b32.xlu0 %v16446_v9, %s12178_s13  ;;  %v8894_v11 = vsel %vm8884_vm7, %v8877_v21, %v16266_v31  ;;  %v8764_v30 = vmul.f32 0.0625, %v8740_v62  ;;  %11414 = vmatpush3.msra.mxu1 %v9707_v48  ;;  %v8431_v5 = vmul.f32 0.0625, %v17528_v41  ;;  %v17529_v21 = vld [vmem:[#allocation38_spill] sm:$0xff]  ;;  %v8954_v48 = vld [vmem:[#allocation5 + $0x42] sm:$0xff] }
 0x895   : > { %8911 = vst.msk [vmem:[#allocation5 + $0xc1] sm:$0xff] %vm648_vm0, %v8894_v11  ;;  %v8846_v44 = vsel %vm8835_vm15, %v8829_v15, %v8602_v46  ;;  %11415 = vmatprep.subr.mxu1 %v9706_v29 }
 0x896   : > { %v8862_v35 = vsel %vm8230_vm6, %v8846_v44, %v16268_v56  ;;  %v8579_v6 = vpop.xlane.xlu0 %8578  ;;  %11416 = vmatpush3.msra.mxu1 %v9706_v29  ;;  %v17530_v44 = vld [vmem:[#allocation39_spill] sm:$0xff]  ;;  %v16576_v29 = vld [vmem:[#allocation5 + $0x70] sm:$0xff] }
 0x897   : > { %v8878_v31 = vsel %vm4484_vm10, %v8862_v35, %v8763_v28  ;;  %v8603_v40 = vmul.f32 0.0625, %v8579_v6  ;;  %9463 = vrot.lane.b32.xlu1 %v16373_v1, %s12193_s20  ;;  %v8743_v4 = vpop.xlane.xlu1 %8742  ;;  %v8834_v58 = vsel %vm8818_vm2, %v8431_v5, %v17530_v44 }
 0x898   : > { %9401 = vrot.lane.b32.xlu0 %v16444_v34, %s12192_s27  ;;  %v8895_v56 = vsel %vm8884_vm7, %v8878_v31, %v16274_v3  ;;  %v8765_v13 = vmul.f32 0.0625, %v8743_v4 }
 0x899   : > { %8912 = vst.msk [vmem:[#allocation5 + $0xd1] sm:$0xff] %vm648_vm0, %v8895_v56  ;;  %v8847_v1 = vsel %vm8835_vm15, %v8830_v19, %v8603_v40  ;;  %v17532_v40 = vld [vmem:[#allocation42_spill] sm:$0xff] }
 0x89a   : > { %v8863_v12 = vsel %vm8230_vm6, %v8847_v1, %v16276_v2  ;;  %v8582_v36 = vpop.xlane.xlu0 %8581  ;;  %v8831_v2 = vsel %vm8818_vm2, %v8428_v23, %v16270_v47  ;;  %v8939_v19 = vld [vmem:[#allocation5 + $0x51] sm:$0xff]  ;;  %v8987_v23 = vld [vmem:[#allocation5 + $0x61] sm:$0xff] }
 0x89b   : > { %v8879_v3 = vsel %vm4484_vm10, %v8863_v12, %v8764_v30  ;;  %v8604_v45 = vmul.f32 0.0625, %v8582_v36  ;;  %9275 = vrot.lane.b32.xlu1 %v16403_v57, %s12179_s14  ;;  %v8746_v27 = vpop.xlane.xlu1 %8745  ;;  %v16552_v30 = vld [vmem:[#allocation5 + $0x50] sm:$0xff]  ;;  %v8956_v12 = vld [vmem:[#allocation5 + $0x62] sm:$0xff] }
 0x89c   : > { %9213 = vrot.lane.b32.xlu0 %v16485_v26, %s12195_s28  ;;  %v8896_v49 = vsel %vm8884_vm7, %v8879_v3, %v16282_v52  ;;  %v17522_v52 = vld [vmem:[#allocation31_spill] sm:$0xff]  ;;  %v8955_v1 = vld [vmem:[#allocation5 + $0x52] sm:$0xff] }
 0x89d   : > { %8913 = vst.msk [vmem:[#allocation5 + $0xe1] sm:$0xff] %vm648_vm0, %v8896_v49  ;;  %v8848_v22 = vsel %vm8835_vm15, %v8831_v2, %v8604_v45  ;;  %v8832_v60 = vsel %vm8818_vm2, %v8429_v50, %v17522_v52  ;;  %v8941_v36 = vld [vmem:[#allocation5 + $0x71] sm:$0xff]  ;;  %v8973_v45 = vld [vmem:[#allocation5 + $0x80] sm:$0xff]  ;;  %vm17541_vm2 = vmmov %vm17538_vm1 }
 0x89e   : > { %v8864_v8 = vsel %vm8230_vm6, %v8848_v22, %v16284_v51  ;;  %v8585_v37 = vpop.xlane.xlu0 %8584  ;;  %v8766_v51 = vmul.f32 0.0625, %v8746_v27  ;;  %v8957_v3 = vld [vmem:[#allocation5 + $0x72] sm:$0xff]  ;;  %v8989_v27 = vld [vmem:[#allocation5 + $0x81] sm:$0xff] }
 0x89f   : > { %v8880_v42 = vsel %vm4484_vm10, %v8864_v8, %v8765_v13  ;;  %v8605_v47 = vmul.f32 0.0625, %v8585_v37  ;;  %9527 = vrot.lane.b32.xlu1 %v16401_v63, %s12184_s29  ;;  %v8749_v16 = vpop.xlane.xlu1 %8748  ;;  %v9005_v2 = vld [vmem:[#allocation5 + $0x82] sm:$0xff]  ;;  %v8943_v49 = vld [vmem:[#allocation5 + $0xb1] sm:$0xff] }
 0x8a0   : > { %9465 = vrot.lane.b32.xlu0 %v16403_v57, %s12193_s20  ;;  %v8897_v20 = vsel %vm8884_vm7, %v8880_v42, %v17523_v33  ;;  %v8767_v55 = vmul.f32 0.0625, %v8749_v16  ;;  %v8959_v50 = vld [vmem:[#allocation5 + $0xb2] sm:$0xff]  ;;  %v16598_v42 = vld [vmem:[#allocation5 + $0xc0] sm:$0xff] }
 0x8a1   : > { %8914 = vst.msk [vmem:[#allocation5 + $0xf1] sm:$0xff] %vm648_vm0, %v8897_v20  ;;  %v8849_v54 = vsel %vm8835_vm15, %v8832_v60, %v8605_v47  ;;  %v16605_v60 = vld [vmem:[#allocation5 + $0xb0] sm:$0xff]  ;;  %v8944_v33 = vld [vmem:[#allocation5 + $0xc1] sm:$0xff] }
 0x8a2   : > { %v8865_v63 = vsel %vm8230_vm6, %v8849_v54, %v17525_v0  ;;  %v8588_v18 = vpop.xlane.xlu0 %8587  ;;  %v8945_v39 = vld [vmem:[#allocation5 + $0xd1] sm:$0xff] }
 0x8a3   : > { %v8881_v57 = vsel %vm4484_vm10, %v8865_v63, %v8766_v51  ;;  %v8606_v59 = vmul.f32 0.0625, %v8588_v18  ;;  %9277 = vrot.lane.b32.xlu1 %v8985_v53, %s12179_s14  ;;  %v8752_v62 = vpop.xlane.xlu1 %8751  ;;  %v8960_v63 = vld [vmem:[#allocation5 + $0xc2] sm:$0xff] }
 0x8a4   : > { %9087 = vrot.lane.b32.xlu0 %v8985_v53, %s12191_s19  ;;  %v8898_v10 = vsel %vm8884_vm7, %v8881_v57, %v17527_v17  ;;  %v8768_v6 = vmul.f32 0.0625, %v8752_v62  ;;  %v8918_v57 = vld [vmem:[#allocation5] sm:$0xff] }
 0x8a5   : > { %8915 = vst.msk [vmem:[#allocation5 + $0x101] sm:$0xff] %vm648_vm0, %v8898_v10  ;;  %v8850_v32 = vsel %vm8835_vm15, %v8833_v14, %v8606_v59  ;;  %v8961_v59 = vld [vmem:[#allocation5 + $0xd2] sm:$0xff]  ;;  %v9575_v14 = vsel %vm648_vm0, %v8918_v57, %v17533_v38 }
 0x8a6   : > { %v8866_v46 = vsel %vm8230_vm6, %v8850_v32, %v17529_v21  ;;  %v8591_v15 = vpop.xlane.xlu0 %8590  ;;  %v17534_v32 = vld [vmem:[#allocation16_spill] sm:$0xff] }
 0x8a7   : > { %v8882_v11 = vsel %vm4484_vm10, %v8866_v46, %v8767_v55  ;;  %v8607_v28 = vmul.f32 0.0625, %v8591_v15  ;;  %9529 = vrot.lane.b32.xlu1 %v16446_v9, %s12184_s29  ;;  %v16629_v55 = vld [vmem:[#allocation5 + $0xd0] sm:$0xff]  ;;  %v9591_v41 = vsel %vm4646_vm12, %v9575_v14, %v17534_v32  ;;  %v16641_v15 = vld [vmem:[#allocation5 + $0xe0] sm:$0xff] }
 0x8a8   : > { %9339 = vrot.lane.b32.xlu0 %v16446_v9, %s12196_s17  ;;  %v8899_v35 = vsel %vm8884_vm7, %v8882_v11, %v17531_v7 }
 0x8a9   : > { %8916 = vst.msk [vmem:[#allocation5 + $0x111] sm:$0xff] %vm648_vm0, %v8899_v35  ;;  %v8851_v31 = vsel %vm8835_vm15, %v8834_v58, %v8607_v28  ;;  %vm17542_vm15 = vmmov %vm17536_vm11 }
 0x8aa   : > { %v8867_v4 = vsel %vm8230_vm6, %v8851_v31, %v17532_v40  ;;  %vm9713_vm6 = vcmask 441344  }
 0x8ab   : > { %v8883_v56 = vsel %vm4484_vm10, %v8867_v4, %v8768_v6  ;;  %9151 = vrot.lane.b32.xlu1 %v8954_v48, %s12178_s13  ;;  %vm9640_vm10 = vcmask 244736  }
 0x8ac   : > { %9089 = vrot.lane.b32.xlu0 %v8939_v19, %s12191_s19  ;;  %v8900_v9 = vsel %vm8884_vm7, %v8883_v56, %v16309_v61  ;;  %v16560_v61 = vld [vmem:[#allocation5 + $0x60] sm:$0xff]  ;;  %vm17543_vm7 = vmmov %vm17537_vm5 }
 0x8ad   : > { %8917 = vst.msk [vmem:[#allocation5 + $0x121] sm:$0xff] %vm648_vm0, %v8900_v9  ;;  %v16701_v57 = vld [vmem:[#allocation5 + $0x100] sm:$0xff] }
 0x8af   : > { %9403 = vrot.lane.b32.xlu1 %v16485_v26, %s12192_s27 }
 0x8b0   : > { %9341 = vrot.lane.b32.xlu0 %v8954_v48, %s12196_s17 }
 0x8b3   : > { %9215 = vrot.lane.b32.xlu1 %v16552_v30, %s12195_s28 }
 0x8b4   : > { %9153 = vrot.lane.b32.xlu0 %v8955_v1, %s12178_s13 }
 0x8b7   : > { %9467 = vrot.lane.b32.xlu1 %v8985_v53, %s12193_s20 }
 0x8b8   : > { %9405 = vrot.lane.b32.xlu0 %v16552_v30, %s12192_s27 }
 0x8bb   : > { %9279 = vrot.lane.b32.xlu1 %v8939_v19, %s12179_s14 }
 0x8bc   : > { %9217 = vrot.lane.b32.xlu0 %v16560_v61, %s12195_s28 }
 0x8bf   : > { %9531 = vrot.lane.b32.xlu1 %v8954_v48, %s12184_s29 }
 0x8c0   : > { %9469 = vrot.lane.b32.xlu0 %v8939_v19, %s12193_s20  ;;  %v8946_v19 = vld [vmem:[#allocation5 + $0xe1] sm:$0xff] }
 0x8c3   : > { %9281 = vrot.lane.b32.xlu1 %v8987_v23, %s12179_s14 }
 0x8c4   : > { %9091 = vrot.lane.b32.xlu0 %v8987_v23, %s12191_s19 }
 0x8c7   : > { %9533 = vrot.lane.b32.xlu1 %v8955_v1, %s12184_s29 }
 0x8c8   : > { %9343 = vrot.lane.b32.xlu0 %v8955_v1, %s12196_s17 }
 0x8cb   : > { %9155 = vrot.lane.b32.xlu1 %v8956_v12, %s12178_s13 }
 0x8cc   : > { %9093 = vrot.lane.b32.xlu0 %v8941_v36, %s12191_s19 }
 0x8cf   : > { %9407 = vrot.lane.b32.xlu1 %v16560_v61, %s12192_s27 }
 0x8d0   : > { %9345 = vrot.lane.b32.xlu0 %v8956_v12, %s12196_s17 }
 0x8d3   : > { %9219 = vrot.lane.b32.xlu1 %v16576_v29, %s12195_s28 }
 0x8d4   : > { %9157 = vrot.lane.b32.xlu0 %v8957_v3, %s12178_s13 }
 0x8d7   : > { %9471 = vrot.lane.b32.xlu1 %v8987_v23, %s12193_s20 }
 0x8d8   : > { %9409 = vrot.lane.b32.xlu0 %v16576_v29, %s12192_s27 }
 0x8db   : > { %9283 = vrot.lane.b32.xlu1 %v8941_v36, %s12179_s14 }
 0x8dc   : > { %9221 = vrot.lane.b32.xlu0 %v8973_v45, %s12195_s28 }
 0x8df   : > { %9535 = vrot.lane.b32.xlu1 %v8956_v12, %s12184_s29 }
 0x8e0   : > { %9473 = vrot.lane.b32.xlu0 %v8941_v36, %s12193_s20 }
 0x8e3   : > { %9285 = vrot.lane.b32.xlu1 %v8989_v27, %s12179_s14 }
 0x8e4   : > { %9347 = vrot.lane.b32.xlu0 %v8957_v3, %s12196_s17 }
 0x8e7   : > { %9537 = vrot.lane.b32.xlu1 %v8957_v3, %s12184_s29 }
 0x8e8   : > { %9349 = vrot.lane.b32.xlu0 %v9005_v2, %s12196_s17 }
 0x8eb   : > { %9411 = vrot.lane.b32.xlu1 %v8973_v45, %s12192_s27 }
 0x8ec   : > { %9097 = vrot.lane.b32.xlu0 %v8943_v49, %s12191_s19 }
 0x8ed   : > { %v16594_v22 = vpop.permute.xlu1 %9145 }
 0x8ee   : > { %v9082_v13 = vpop.permute.xlu0 %9081 }
 0x8ef   : > { %9475 = vrot.lane.b32.xlu1 %v8989_v27, %s12193_s20  ;;  %v9576_v44 = vsel %vm648_vm0, %v16355_v24, %v9082_v13  ;;  %v8947_v27 = vld [vmem:[#allocation5 + $0xf1] sm:$0xff]  ;;  %v8962_v13 = vld [vmem:[#allocation5 + $0xe2] sm:$0xff] }
 0x8f0   : > { %9161 = vrot.lane.b32.xlu0 %v8959_v50, %s12178_s13  ;;  %v9592_v31 = vsel %vm4646_vm12, %v9576_v44, %v16594_v22 }
 0x8f1   : > { %v9210_v37 = vpop.permute.xlu1 %9209 }
 0x8f2   : > { %v9208_v8 = vpop.permute.xlu0 %9207  ;;  %v9609_v40 = vsel %vm9607_vm3, %v9592_v31, %v9210_v37 }
 0x8f3   : > { %9539 = vrot.lane.b32.xlu1 %v9005_v2, %s12184_s29  ;;  %v9608_v5 = vsel %vm9607_vm3, %v9591_v41, %v9208_v8  ;;  %v8963_v8 = vld [vmem:[#allocation5 + $0xf2] sm:$0xff] }
 0x8f4   : > { %9225 = vrot.lane.b32.xlu0 %v16598_v42, %s12195_s28 }
 0x8f5   : > { %v16603_v52 = vpop.permute.xlu1 %9083 }
 0x8f6   : > { %v9272_v47 = vpop.permute.xlu0 %9271 }
 0x8f7   : > { %9223 = vrot.lane.b32.xlu1 %v16605_v60, %s12195_s28  ;;  %v9624_v62 = vsel %vm17535_vm4, %v9608_v5, %v9272_v47  ;;  %vm17544_vm4 = vmmov %vm17538_vm1 }
 0x8f8   : > { %9099 = vrot.lane.b32.xlu0 %v8944_v33, %s12191_s19 }
 0x8f9   : > { %v9336_v16 = vpop.permute.xlu1 %9335 }
 0x8fa   : > { %v9274_v20 = vpop.permute.xlu0 %9273  ;;  %v9641_v11 = vsel %vm9640_vm10, %v9624_v62, %v9336_v16 }
 0x8fb   : > { %9287 = vrot.lane.b32.xlu1 %v8943_v49, %s12179_s14  ;;  %v9625_v48 = vsel %vm17538_vm1, %v9609_v40, %v9274_v20  ;;  %v9577_v20 = vsel %vm648_vm0, %v16357_v25, %v16603_v52 }
 0x8fc   : > { %9351 = vrot.lane.b32.xlu0 %v8959_v50, %s12196_s17 }
 0x8fd   : > { %v16614_v54 = vpop.permute.xlu1 %9147 }
 0x8fe   : > { %v16612_v51 = vpop.permute.xlu0 %9085  ;;  %v9593_v16 = vsel %vm4646_vm12, %v9577_v20, %v16614_v54 }
 0x8ff   : > { %9289 = vrot.lane.b32.xlu1 %v8944_v33, %s12179_s14  ;;  %v9578_v14 = vsel %vm648_vm0, %v16444_v34, %v16612_v51 }
 0x900   : > { %9101 = vrot.lane.b32.xlu0 %v8945_v39, %s12191_s19 }
 0x901   : > { %v9400_v0 = vpop.permute.xlu1 %9399 }
 0x902   : > { %v9338_v43 = vpop.permute.xlu0 %9337  ;;  %v9657_v28 = vsel %vm17536_vm11, %v9641_v11, %v9400_v0 }
 0x903   : > { %9163 = vrot.lane.b32.xlu1 %v8960_v63, %s12178_s13  ;;  %v9642_v56 = vsel %vm9640_vm10, %v9625_v48, %v9338_v43 }
 0x904   : > { %9353 = vrot.lane.b32.xlu0 %v8960_v63, %s12196_s17 }
 0x905   : > { %v16622_v53 = vpop.permute.xlu1 %9211 }
 0x906   : > { %v16620_v18 = vpop.permute.xlu0 %9149 }
 0x907   : > { %9415 = vrot.lane.b32.xlu1 %v16598_v42, %s12192_s27 }
 0x908   : > { %9165 = vrot.lane.b32.xlu0 %v8961_v59, %s12178_s13 }
 0x909   : > { %v9464_v10 = vpop.permute.xlu1 %9463 }
 0x90a   : > { %v9402_v17 = vpop.permute.xlu0 %9401  ;;  %v9674_v58 = vsel %vm9673_vm8, %v9657_v28, %v9464_v10 }
 0x90b   : > { %9227 = vrot.lane.b32.xlu1 %v16629_v55, %s12195_s28  ;;  %v9658_v9 = vsel %vm17539_vm14, %v9642_v56, %v9402_v17  ;;  %v9594_v17 = vsel %vm4646_vm12, %v9578_v14, %v16620_v18  ;;  %v16741_v56 = vld [vmem:[#allocation5 + $0x110] sm:$0xff]  ;;  %vm17545_vm14 = vmmov %vm17536_vm11 }
 0x90c   : > { %9417 = vrot.lane.b32.xlu0 %v16629_v55, %s12192_s27 }
 0x90d   : > { %v9276_v46 = vpop.permute.xlu1 %9275 }
 0x90e   : > { %v16638_v21 = vpop.permute.xlu0 %9213 }
 0x90f   : > { %9479 = vrot.lane.b32.xlu1 %v8944_v33, %s12193_s20  ;;  %v16685_v33 = vld [vmem:[#allocation5 + $0xf0] sm:$0xff]  ;;  %v9611_v10 = vsel %vm9607_vm3, %v9594_v17, %v16638_v21 }
 0x910   : > { %9229 = vrot.lane.b32.xlu0 %v16641_v15, %s12195_s28 }
 0x911   : > { %v9528_v35 = vpop.permute.xlu1 %9527 }
 0x912   : > { %v9466_v7 = vpop.permute.xlu0 %9465  ;;  %v9690_v6 = vsel %vm17537_vm5, %v9674_v58, %v9528_v35  ;;  %v8949_v58 = vld [vmem:[#allocation5 + $0x111] sm:$0xff] }
 0x913   : > { %9291 = vrot.lane.b32.xlu1 %v8945_v39, %s12179_s14  ;;  %11417 = vmatprep.mubr.msk.f32.mxu1 %vm9713_vm6, %v9690_v6  ;;  %v9675_v1 = vsel %vm9673_vm8, %v9658_v9, %v9466_v7  ;;  %v9011_v6 = vld [vmem:[#allocation5 + $0x102] sm:$0xff] }
 0x914   : > { %9481 = vrot.lane.b32.xlu0 %v8945_v39, %s12193_s20  ;;  %v9610_v39 = vsel %vm9607_vm3, %v9593_v16, %v16622_v53 }
 0x915   : > { %v9278_v24 = vpop.permute.xlu1 %9277 }
 0x916   : > { %v16658_v4 = vpop.permute.xlu0 %9087  ;;  %v9627_v5 = vsel %vm17544_vm4, %v9611_v10, %v9278_v24  ;;  %v8965_v24 = vld [vmem:[#allocation5 + $0x112] sm:$0xff]  ;;  %vm17550_vm4 = vmmov %vm17538_vm1  ;;  %v9013_v10 = vld [vmem:[#allocation5 + $0x122] sm:$0xff] }
 0x917   : > { %9543 = vrot.lane.b32.xlu1 %v8960_v63, %s12184_s29  ;;  %v9626_v63 = vsel %vm17541_vm2, %v9610_v39, %v9276_v46  ;;  %v8948_v46 = vld [vmem:[#allocation5 + $0x101] sm:$0xff]  ;;  %v9579_v9 = vsel %vm648_vm0, %v16485_v26, %v16658_v4  ;;  %vm17547_vm2 = vmmov %vm17538_vm1 }
 0x918   : > { %9103 = vrot.lane.b32.xlu0 %v8946_v19, %s12191_s19 }
 0x919   : > { %v9530_v12 = vpop.permute.xlu1 %9529 }
 0x91a   : > { %v9340_v23 = vpop.permute.xlu0 %9339  ;;  %v9691_v36 = vsel %vm17540_vm9, %v9675_v1, %v9530_v12  ;;  %vm17546_vm9 = vmmov %vm17537_vm5 }
 0x91b   : > { %9293 = vrot.lane.b32.xlu1 %v8946_v19, %s12179_s14  ;;  %11418 = vmatmul.mubr.msk.f32.vlgmr.msra.gmra.mxu1 %vm9713_vm6, %v9691_v36  ;;  %v9643_v25 = vsel %vm9640_vm10, %v9626_v63, %v9340_v23 }
 0x91c   : > { %9355 = vrot.lane.b32.xlu0 %v8961_v59, %s12196_s17 }
 0x91d   : > { %v16672_v45 = vpop.permute.xlu1 %9151 }
 0x91e   : > { %v16670_v3 = vpop.permute.xlu0 %9089  ;;  %v9595_v1 = vsel %vm4646_vm12, %v9579_v9, %v16672_v45 }
 0x91f   : > { %9545 = vrot.lane.b32.xlu1 %v8961_v59, %s12184_s29 }
 0x920   : > { %9105 = vrot.lane.b32.xlu0 %v8947_v27, %s12191_s19 }
 0x921   : > { %v9404_v49 = vpop.permute.xlu1 %9403 }
 0x922   : > { %v9342_v2 = vpop.permute.xlu0 %9341  ;;  %v9659_v52 = vsel %vm17542_vm15, %v9643_v25, %v9404_v49  ;;  %vm17548_vm15 = vmmov %vm17536_vm11 }
 0x923   : > { %9167 = vrot.lane.b32.xlu1 %v8962_v13, %s12178_s13  ;;  %v9644_v34 = vsel %vm9640_vm10, %v9627_v5, %v9342_v2  ;;  %v8981_v2 = vld [vmem:[#allocation5 + $0x120] sm:$0xff]  ;;  %v9062_v5 = vld [vmem:[#allocation5 + $0x132] sm:$0xff] }
 0x924   : > { %9357 = vrot.lane.b32.xlu0 %v8962_v13, %s12196_s17 }
 0x925   : > { %v16680_v50 = vpop.permute.xlu1 %9215 }
 0x926   : > { %v16678_v22 = vpop.permute.xlu0 %9153  ;;  %v9612_v23 = vsel %vm9607_vm3, %v9595_v1, %v16680_v50  ;;  %v9580_v50 = vsel %vm648_vm0, %v16552_v30, %v16670_v3 }
 0x927   : > { %9419 = vrot.lane.b32.xlu1 %v16641_v15, %s12192_s27 }
 0x928   : > { %9169 = vrot.lane.b32.xlu0 %v8963_v8, %s12178_s13 }
 0x929   : > { %v9468_v47 = vpop.permute.xlu1 %9467 }
 0x92a   : > { %v9406_v37 = vpop.permute.xlu0 %9405  ;;  %v9676_v54 = vsel %vm9673_vm8, %v9659_v52, %v9468_v47 }
 0x92b   : > { %9231 = vrot.lane.b32.xlu1 %v16685_v33, %s12195_s28  ;;  %v9660_v51 = vsel %vm17536_vm11, %v9644_v34, %v9406_v37  ;;  %v9596_v37 = vsel %vm4646_vm12, %v9580_v50, %v16678_v22  ;;  %v17551_v34 = vld [vmem:[#allocation24_spill] sm:$0xff]  ;;  %v17559_v50 = vld [vmem:[#allocation13_spill] sm:$0xff] }
 0x92c   : > { %9421 = vrot.lane.b32.xlu0 %v16685_v33, %s12192_s27 }
 0x92d   : > { %v9280_v0 = vpop.permute.xlu1 %9279 }
 0x92e   : > { %v16698_v43 = vpop.permute.xlu0 %9217 }
 0x92f   : > { %9483 = vrot.lane.b32.xlu1 %v8946_v19, %s12193_s20  ;;  %v9613_v47 = vsel %vm9607_vm3, %v9596_v37, %v16698_v43 }
 0x930   : > { %9233 = vrot.lane.b32.xlu0 %v16701_v57, %s12195_s28 }
 0x931   : > { %v9532_v53 = vpop.permute.xlu1 %9531 }
 0x932   : > { %v9470_v59 = vpop.permute.xlu0 %9469  ;;  %v9692_v38 = vsel %vm17543_vm7, %v9676_v54, %v9532_v53  ;;  %vm17549_vm7 = vmmov %vm17537_vm5 }
 0x933   : > { %9295 = vrot.lane.b32.xlu1 %v8947_v27, %s12179_s14  ;;  %11420 = vmatprep.mubr.msk.f32.mxu1 %vm9713_vm6, %v9692_v38  ;;  %v9677_v18 = vsel %vm9673_vm8, %v9660_v51, %v9470_v59 }
 0x934   : > { %9485 = vrot.lane.b32.xlu0 %v8947_v27, %s12193_s20  ;;  %v9628_v27 = vsel %vm17538_vm1, %v9612_v23, %v9280_v0  ;;  %v8997_v0 = vld [vmem:[#allocation5 + $0x121] sm:$0xff] }
 0x935   : > { %v9282_v41 = vpop.permute.xlu1 %9281 }
 0x936   : > { %v16720_v32 = vpop.permute.xlu0 %9091  ;;  %v9629_v39 = vsel %vm17547_vm2, %v9613_v47, %v9282_v41 }
 0x937   : > { %9547 = vrot.lane.b32.xlu1 %v8962_v13, %s12184_s29 }
 0x938   : > { %9107 = vrot.lane.b32.xlu0 %v8948_v46, %s12191_s19 }
 0x939   : > { %v9534_v11 = vpop.permute.xlu1 %9533 }
 0x93a   : > { %v9344_v62 = vpop.permute.xlu0 %9343  ;;  %v9693_v21 = vsel %vm17537_vm5, %v9677_v18, %v9534_v11  ;;  %vm17552_vm5 = vmmov %vm17538_vm1 }
 0x93b   : > { %9297 = vrot.lane.b32.xlu1 %v8948_v46, %s12179_s14  ;;  %11421 = vmatmul.mubr.msk.f32.gmra.mxu1 %vm9713_vm6, %v9693_v21  ;;  %v9645_v49 = vsel %vm9640_vm10, %v9628_v27, %v9344_v62  ;;  %vm17553_vm1 = vmmov %vm17536_vm11 }
 0x93c   : > { %9359 = vrot.lane.b32.xlu0 %v8963_v8, %s12196_s17 }
 0x93d   : > { %v16732_v44 = vpop.permute.xlu1 %9155 }
 0x93e   : > { %v9094_v28 = vpop.permute.xlu0 %9093 }
 0x93f   : > { %9549 = vrot.lane.b32.xlu1 %v8963_v8, %s12184_s29  ;;  %v9582_v43 = vsel %vm648_vm0, %v16576_v29, %v9094_v28  ;;  %v9581_v29 = vsel %vm648_vm0, %v16560_v61, %v16720_v32  ;;  %v17554_v32 = vld [vmem:[#allocation27_spill] sm:$0xff] }
 0x940   : > { %9109 = vrot.lane.b32.xlu0 %v8949_v58, %s12191_s19  ;;  %v9597_v41 = vsel %vm4646_vm12, %v9581_v29, %v16732_v44 }
 0x941   : > { %v9408_v35 = vpop.permute.xlu1 %9407 }
 0x942   : > { %v9346_v7 = vpop.permute.xlu0 %9345  ;;  %v9661_v26 = vsel %vm17545_vm14, %v9645_v49, %v9408_v35  ;;  %vm17555_vm14 = vmmov %vm17549_vm7 }
 0x943   : > { %9171 = vrot.lane.b32.xlu1 %v9011_v6, %s12178_s13  ;;  %v9646_v63 = vsel %vm9640_vm10, %v9629_v39, %v9346_v7 }
 0x944   : > { %9361 = vrot.lane.b32.xlu0 %v9011_v6, %s12196_s17 }
 0x945   : > { %v9220_v40 = vpop.permute.xlu1 %9219 }
 0x946   : > { %v9158_v31 = vpop.permute.xlu0 %9157 }
 0x947   : > { %9423 = vrot.lane.b32.xlu1 %v16701_v57, %s12192_s27  ;;  %v9598_v54 = vsel %vm4646_vm12, %v9582_v43, %v9158_v31 }
 0x948   : > { %9173 = vrot.lane.b32.xlu0 %v8965_v24, %s12178_s13 }
 0x949   : > { %v9472_v19 = vpop.permute.xlu1 %9471 }
 0x94a   : > { %v9410_v48 = vpop.permute.xlu0 %9409  ;;  %v9678_v4 = vsel %vm9673_vm8, %v9661_v26, %v9472_v19 }
 0x94b   : > { %9235 = vrot.lane.b32.xlu1 %v16741_v56, %s12195_s28  ;;  %v9662_v30 = vsel %vm17548_vm15, %v9646_v63, %v9410_v48  ;;  %vm17560_vm15 = vmmov %vm17553_vm1 }
 0x94c   : > { %9425 = vrot.lane.b32.xlu0 %v16741_v56, %s12192_s27 }
 0x94d   : > { %v9284_v36 = vpop.permute.xlu1 %9283 }
 0x94e   : > { %v9222_v12 = vpop.permute.xlu0 %9221 }
 0x94f   : > { %9487 = vrot.lane.b32.xlu1 %v8948_v46, %s12193_s20  ;;  %v9615_v59 = vsel %vm9607_vm3, %v9598_v54, %v9222_v12  ;;  %v9614_v46 = vsel %vm9607_vm3, %v9597_v41, %v9220_v40 }
 0x950   : > { %9237 = vrot.lane.b32.xlu0 %v8981_v2, %s12195_s28  ;;  %v9630_v11 = vsel %vm17552_vm5, %v9614_v46, %v9284_v36  ;;  %vm17563_vm5 = vmmov %vm17549_vm7 }
 0x951   : > { %v9536_v45 = vpop.permute.xlu1 %9535 }
 0x952   : > { %v9474_v13 = vpop.permute.xlu0 %9473  ;;  %v9694_v8 = vsel %vm17546_vm9, %v9678_v4, %v9536_v45  ;;  %vm17557_vm9 = vmmov %vm17549_vm7  ;;  %v17558_v4 = vld [vmem:[#allocation17_spill] sm:$0xff] }
 0x953   : > { %9299 = vrot.lane.b32.xlu1 %v8949_v58, %s12179_s14  ;;  %11423 = vmatprep.mubr.msk.f32.mxu1 %vm9713_vm6, %v9694_v8  ;;  %v9679_v3 = vsel %vm9673_vm8, %v9662_v30, %v9474_v13 }
 0x954   : > { %9489 = vrot.lane.b32.xlu0 %v8949_v58, %s12193_s20 }
 0x955   : > { %v9286_v16 = vpop.permute.xlu1 %9285 }
 0x956   : > { %v9348_v20 = vpop.permute.xlu0 %9347  ;;  %v9631_v53 = vsel %vm17550_vm4, %v9615_v59, %v9286_v16  ;;  %vm17561_vm4 = vmmov %vm17547_vm2 }
 0x957   : > { %9551 = vrot.lane.b32.xlu1 %v9011_v6, %s12184_s29  ;;  %v9647_v21 = vsel %vm9640_vm10, %v9630_v11, %v9348_v20  ;;  %v17556_v6 = vld [vmem:[#allocation19_spill] sm:$0xff] }
 0x958   : > { %9301 = vrot.lane.b32.xlu0 %v8997_v0, %s12179_s14 }
 0x959   : > { %v9538_v25 = vpop.permute.xlu1 %9537 }
 0x95a   : > { %v9350_v22 = vpop.permute.xlu0 %9349  ;;  %v9695_v52 = vsel %vm17549_vm7, %v9679_v3, %v9538_v25 }
 0x95b   : > { %9363 = vrot.lane.b32.xlu1 %v8965_v24, %s12196_s17  ;;  %11424 = vmatmul.mubr.msk.f32.gmra.mxu1 %vm9713_vm6, %v9695_v52  ;;  %v9648_v17 = vsel %vm9640_vm10, %v9631_v53, %v9350_v22 }
 0x95c   : > { %9553 = vrot.lane.b32.xlu0 %v8965_v24, %s12184_s29  ;;  %v9664_v51 = vsel %vm17536_vm11, %v9648_v17, %v17551_v34  ;;  %vm17562_vm11 = vmmov %vm17553_vm1 }
 0x95d   : > { %v9412_v14 = vpop.permute.xlu1 %9411  ;;  %v9681_v28 = vsel %vm9673_vm8, %v9664_v51, %v17554_v32 }
 0x95e   : > { %v9098_v38 = vpop.permute.xlu0 %9097  ;;  %v9663_v61 = vsel %vm17553_vm1, %v9647_v21, %v9412_v14  ;;  %v9697_v31 = vsel %vm17557_vm9, %v9681_v28, %v17556_v6  ;;  %vm17564_vm1 = vmmov %vm17547_vm2 }
 0x95f   : > { %9365 = vrot.lane.b32.xlu1 %v9013_v10, %s12196_s17  ;;  %v9584_v43 = vsel %vm648_vm0, %v16605_v60, %v9098_v38  ;;  %vm17566_vm9 = vmmov %vm17563_vm5 }
 0x960   : > { %9427 = vrot.lane.b32.xlu0 %v8981_v2, %s12192_s27  ;;  %v8926_v2 = vld [vmem:[#allocation5 + $0xa0] sm:$0xff] }
 0x961   : > { %v9476_v62 = vpop.permute.xlu1 %9475  ;;  %v9583_v13 = vsel %vm648_vm0, %v8926_v2, %v17558_v4 }
 0x962   : > { %v9162_v18 = vpop.permute.xlu0 %9161  ;;  %v9680_v44 = vsel %vm9673_vm8, %v9663_v61, %v9476_v62  ;;  %v9599_v37 = vsel %vm4646_vm12, %v9583_v13, %v17559_v50 }
 0x963   : > { %9557 = vrot.lane.b32.xlu1 %v9062_v5, %s12184_s29  ;;  %v9600_v52 = vsel %vm4646_vm12, %v9584_v43, %v9162_v18 }
 0x964   : > { %9491 = vrot.lane.b32.xlu0 %v8997_v0, %s12193_s20 }
 0x965   : > { %v9540_v7 = vpop.permute.xlu1 %9539 }
 0x966   : > { %v9226_v58 = vpop.permute.xlu0 %9225  ;;  %v9696_v35 = vsel %vm17555_vm14, %v9680_v44, %v9540_v7  ;;  %vm17565_vm14 = vmmov %vm17562_vm11 }
 0x967   : > { %11426 = vmatprep.mubr.msk.f32.mxu1 %vm9713_vm6, %v9696_v35  ;;  %v9617_v54 = vsel %vm9607_vm3, %v9600_v52, %v9226_v58 }
 0x968   : > { %9555 = vrot.lane.b32.xlu0 %v9013_v10, %s12184_s29  ;;  %11427 = vmatmul.mubr.msk.f32.gmra.mxu1 %vm9713_vm6, %v9697_v31 }
 0x969   : > { %v9224_v24 = vpop.permute.xlu1 %9223 }
 0x96a   : > { %v9100_v40 = vpop.permute.xlu0 %9099  ;;  %v9616_v47 = vsel %vm9607_vm3, %v9599_v37, %v9224_v24 }
 0x96b   : > { %v9585_v61 = vsel %vm648_vm0, %v16598_v42, %v9100_v40 }
 0x96d   : > { %v9288_v19 = vpop.permute.xlu1 %9287 }
 0x96e   : > { %v9352_v48 = vpop.permute.xlu0 %9351  ;;  %v9632_v20 = vsel %vm17547_vm2, %v9616_v47, %v9288_v19  ;;  %vm17567_vm2 = vmmov %vm17564_vm1 }
 0x96f   : > { %v9649_v0 = vsel %vm9640_vm10, %v9632_v20, %v9352_v48 }
 0x971   : > { %v9290_v1 = vpop.permute.xlu1 %9289 }
 0x972   : > { %v9102_v9 = vpop.permute.xlu0 %9101  ;;  %v9633_v14 = vsel %vm17561_vm4, %v9617_v54, %v9290_v1  ;;  %vm17570_vm4 = vmmov %vm17564_vm1 }
 0x973   : > { %v9586_v42 = vsel %vm648_vm0, %v16629_v55, %v9102_v9 }
 0x975   : > { %v9164_v12 = vpop.permute.xlu1 %9163 }
 0x976   : > { %v9354_v23 = vpop.permute.xlu0 %9353  ;;  %v9601_v32 = vsel %vm4646_vm12, %v9585_v61, %v9164_v12 }
 0x977   : > { %v9650_v17 = vsel %vm9640_vm10, %v9633_v14, %v9354_v23 }
 0x979   : > { %v9416_v27 = vpop.permute.xlu1 %9415 }
 0x97a   : > { %v9166_v36 = vpop.permute.xlu0 %9165  ;;  %v9665_v63 = vsel %vm17560_vm15, %v9649_v0, %v9416_v27  ;;  %vm17568_vm15 = vmmov %vm17562_vm11 }
 0x97b   : > { %v9602_v40 = vsel %vm4646_vm12, %v9586_v42, %v9166_v36 }
 0x97d   : > { %v9228_v26 = vpop.permute.xlu1 %9227 }
 0x97e   : > { %v9418_v49 = vpop.permute.xlu0 %9417  ;;  %v9618_v28 = vsel %vm9607_vm3, %v9601_v32, %v9228_v26  ;;  %v17575_v32 = vld [vmem:[#allocation23_spill] sm:$0xff] }
 0x97f   : > { %v9666_v10 = vsel %vm17562_vm11, %v9650_v17, %v9418_v49 }
 0x981   : > { %v9480_v8 = vpop.permute.xlu1 %9479 }
 0x982   : > { %v9230_v45 = vpop.permute.xlu0 %9229  ;;  %v9682_v30 = vsel %vm9673_vm8, %v9665_v63, %v9480_v8 }
 0x983   : > { %v9619_v1 = vsel %vm9607_vm3, %v9602_v40, %v9230_v45 }
 0x985   : > { %v9292_v39 = vpop.permute.xlu1 %9291 }
 0x986   : > { %v9482_v16 = vpop.permute.xlu0 %9481  ;;  %v9634_v7 = vsel %vm17564_vm1, %v9618_v28, %v9292_v39 }
 0x987   : > { %v9683_v29 = vsel %vm9673_vm8, %v9666_v10, %v9482_v16 }
 0x989   : > { %v9544_v22 = vpop.permute.xlu1 %9543 }
 0x98a   : > { %v9104_v3 = vpop.permute.xlu0 %9103  ;;  %v9698_v25 = vsel %vm17549_vm7, %v9682_v30, %v9544_v22  ;;  %vm17569_vm7 = vmmov %vm17563_vm5 }
 0x98b   : > { %11429 = vmatprep.mubr.msk.f32.mxu1 %vm9713_vm6, %v9698_v25  ;;  %v9587_v16 = vsel %vm648_vm0, %v16641_v15, %v9104_v3 }
 0x98d   : > { %v9294_v53 = vpop.permute.xlu1 %9293 }
 0x98e   : > { %v9356_v59 = vpop.permute.xlu0 %9355  ;;  %v9635_v27 = vsel %vm17567_vm2, %v9619_v1, %v9294_v53 }
 0x98f   : > { %v9651_v35 = vsel %vm9640_vm10, %v9634_v7, %v9356_v59 }
 0x991   : > { %v9546_v5 = vpop.permute.xlu1 %9545 }
 0x992   : > { %v9106_v41 = vpop.permute.xlu0 %9105  ;;  %v9699_v60 = vsel %vm17563_vm5, %v9683_v29, %v9546_v5  ;;  %vm17571_vm5 = vmmov %vm17564_vm1 }
 0x993   : > { %11430 = vmatmul.mubr.msk.f32.gmra.mxu1 %vm9713_vm6, %v9699_v60  ;;  %v9588_v25 = vsel %vm648_vm0, %v16685_v33, %v9106_v41  ;;  %vm17572_vm1 = vmmov %vm17569_vm7 }
 0x995   : > { %v9168_v46 = vpop.permute.xlu1 %9167 }
 0x996   : > { %v9358_v38 = vpop.permute.xlu0 %9357  ;;  %v9603_v39 = vsel %vm4646_vm12, %v9587_v16, %v9168_v46 }
 0x997   : > { %v9652_v2 = vsel %vm9640_vm10, %v9635_v27, %v9358_v38 }
 0x999   : > { %v9420_v51 = vpop.permute.xlu1 %9419 }
 0x99a   : > { %v9170_v34 = vpop.permute.xlu0 %9169  ;;  %v9667_v6 = vsel %vm17565_vm14, %v9651_v35, %v9420_v51  ;;  %vm17573_vm14 = vmmov %vm17562_vm11 }
 0x99b   : > { %v9604_v52 = vsel %vm4646_vm12, %v9588_v25, %v9170_v34  ;;  %v12198_v25 = vmov 1  }
 0x99d   : > { %v9232_v62 = vpop.permute.xlu1 %9231 }
 0x99e   : > { %v9422_v18 = vpop.permute.xlu0 %9421  ;;  %v9620_v0 = vsel %vm9607_vm3, %v9603_v39, %v9232_v62 }
 0x99f   : > { %v9668_v49 = vsel %vm17568_vm15, %v9652_v2, %v9422_v18  ;;  %vm17576_vm15 = vmmov %vm17562_vm11 }
 0x9a1   : > { %v9484_v21 = vpop.permute.xlu1 %9483 }
 0x9a2   : > { %v9234_v11 = vpop.permute.xlu0 %9233  ;;  %v9684_v31 = vsel %vm9673_vm8, %v9667_v6, %v9484_v21  ;;  %v17579_v6 = vld [vmem:[#allocation25_spill] sm:$0xff] }
 0x9a3   : > { %v9621_v59 = vsel %vm9607_vm3, %v9604_v52, %v9234_v11 }
 0x9a5   : > { %v9296_v58 = vpop.permute.xlu1 %9295 }
 0x9a6   : > { %v9486_v44 = vpop.permute.xlu0 %9485  ;;  %v9636_v22 = vsel %vm17570_vm4, %v9620_v0, %v9296_v58  ;;  %vm17578_vm4 = vmmov %vm17562_vm11 }
 0x9a7   : > { %v9685_v26 = vsel %vm9673_vm8, %v9668_v49, %v9486_v44 }
 0x9a9   : > { %v9548_v48 = vpop.permute.xlu1 %9547 }
 0x9aa   : > { %v9108_v24 = vpop.permute.xlu0 %9107  ;;  %v9700_v19 = vsel %vm17566_vm9, %v9684_v31, %v9548_v48  ;;  %vm17574_vm9 = vmmov %vm17572_vm1 }
 0x9ab   : > { %11432 = vmatprep.mubr.msk.f32.mxu1 %vm9713_vm6, %v9700_v19  ;;  %v9589_v21 = vsel %vm648_vm0, %v16701_v57, %v9108_v24 }
 0x9ad   : > { %v9298_v12 = vpop.permute.xlu1 %9297 }
 0x9ae   : > { %v9360_v23 = vpop.permute.xlu0 %9359  ;;  %v9637_v14 = vsel %vm17571_vm5, %v9621_v59, %v9298_v12 }
 0x9af   : > { %v9653_v43 = vsel %vm9640_vm10, %v9636_v22, %v9360_v23  ;;  %v12197_v22 = vmov 2  }
 0x9b1   : > { %v9550_v13 = vpop.permute.xlu1 %9549 }
 0x9b2   : > { %v9110_v4 = vpop.permute.xlu0 %9109  ;;  %v9701_v55 = vsel %vm17569_vm7, %v9685_v26, %v9550_v13  ;;  %vm17577_vm7 = vmmov %vm17567_vm2 }
 0x9b3   : > { %11433 = vmatmul.mubr.msk.f32.gmra.mxu1 %vm9713_vm6, %v9701_v55  ;;  %v9590_v60 = vsel %vm648_vm0, %v16741_v56, %v9110_v4  ;;  %vm17581_vm0 = vmmov %vm17572_vm1 }
 0x9b5   : > { %v9172_v36 = vpop.permute.xlu1 %9171 }
 0x9b6   : > { %v9362_v9 = vpop.permute.xlu0 %9361  ;;  %v9605_v61 = vsel %vm4646_vm12, %v9589_v21, %v9172_v36 }
 0x9b7   : > { %v9654_v10 = vsel %vm9640_vm10, %v9637_v14, %v9362_v9 }
 0x9b9   : > { %v9424_v45 = vpop.permute.xlu1 %9423 }
 0x9ba   : > { %v9174_v8 = vpop.permute.xlu0 %9173  ;;  %v9669_v54 = vsel %vm17562_vm11, %v9653_v43, %v9424_v45 }
 0x9bb   : > { %v9606_v46 = vsel %vm4646_vm12, %v9590_v60, %v9174_v8  ;;  %vm17580_vm12 = vmmov %vm17572_vm1 }
 0x9bd   : > { %v9236_v37 = vpop.permute.xlu1 %9235 }
 0x9be   : > { %v9426_v50 = vpop.permute.xlu0 %9425  ;;  %v9622_v56 = vsel %vm9607_vm3, %v9605_v61, %v9236_v37 }
 0x9bf   : > { %v9670_v33 = vsel %vm17573_vm14, %v9654_v10, %v9426_v50  ;;  %vm17596_vm14 = vmmov %vm17581_vm0 }
 0x9c1   : > { %v9488_v20 = vpop.permute.xlu1 %9487 }
 0x9c2   : > { %v9238_v47 = vpop.permute.xlu0 %9237  ;;  %v9686_v15 = vsel %vm9673_vm8, %v9669_v54, %v9488_v20 }
 0x9c3   : > { %v9623_v34 = vsel %vm9607_vm3, %v9606_v46, %v9238_v47  ;;  %vm17584_vm3 = vcmask 261120  }
 0x9c4   : > { %vm17593_vm11 = vmmov %vm17584_vm3 }
 0x9c5   : > { %v9300_v30 = vpop.permute.xlu1 %9299  ;;  %vm17594_vm5 = vmmov %vm17584_vm3 }
 0x9c6   : > { %v9490_v63 = vpop.permute.xlu0 %9489  ;;  %v9638_v58 = vsel %vm17577_vm7, %v9622_v56, %v9300_v30  ;;  %vm17602_vm7 = vmmov %vm17581_vm0 }
 0x9c7   : > { %v9687_v29 = vsel %vm9673_vm8, %v9670_v33, %v9490_v63  ;;  %v17582_v33 = vmov 0  }
 0x9c9   : > { %v9552_v53 = vpop.permute.xlu1 %9551 }
 0x9ca   : > { %v9302_v3 = vpop.permute.xlu0 %9301  ;;  %v9702_v17 = vsel %vm17572_vm1, %v9686_v15, %v9552_v53  ;;  %vm17595_vm1 = vmmov %vm17584_vm3 }
 0x9cb   : > { %11435 = vmatprep.mubr.msk.f32.mxu1 %vm9713_vm6, %v9702_v17  ;;  %v9639_v51 = vsel %vm17567_vm2, %v9623_v34, %v9302_v3  ;;  %vm17598_vm2 = vmmov %vm17581_vm0 }
 0x9cd   : > { %v9364_v5 = vpop.permute.xlu1 %9363 }
 0x9ce   : > { %v9554_v41 = vpop.permute.xlu0 %9553  ;;  %v9655_v7 = vsel %vm9640_vm10, %v9638_v58, %v9364_v5 }
 0x9cf   : > { %v9703_v38 = vsel %vm17574_vm9, %v9687_v29, %v9554_v41  ;;  %vm17597_vm9 = vmmov %vm17581_vm0 }
 0x9d0   : > { %11436 = vmatmul.mubr.msk.f32.gmra.mxu1 %vm9713_vm6, %v9703_v38 }
 0x9d1   : > { %v9366_v62 = vpop.permute.xlu1 %9365 }
 0x9d2   : > { %v9428_v18 = vpop.permute.xlu0 %9427  ;;  %v9656_v11 = vsel %vm9640_vm10, %v9639_v51, %v9366_v62  ;;  %vm17585_vm10 = vmmov %vm17581_vm0 }
 0x9d3   : > { %v9672_v28 = vsel %vm17576_vm15, %v9656_v11, %v17575_v32  ;;  %v9671_v35 = vsel %vm17578_vm4, %v9655_v7, %v9428_v18  ;;  %vm17600_vm15 = vmmov %vm17581_vm0 }
 0x9d4   : > { %v9689_v31 = vsel %vm9673_vm8, %v9672_v28, %v17579_v6  ;;  %vm17603_vm4 = vmmov %vm17595_vm1 }
 0x9d5   : > { %v9558_v48 = vpop.permute.xlu1 %9557 }
 0x9d6   : > { %v9492_v44 = vpop.permute.xlu0 %9491  ;;  %v9705_v42 = vsel %vm17581_vm0, %v9689_v31, %v9558_v48 }
 0x9d7   : > { %v9688_v57 = vsel %vm9673_vm8, %v9671_v35, %v9492_v44  ;;  %vm17587_vm8 = vmmov %vm17584_vm3 }
 0x9da   : > { %v9556_v24 = vpop.permute.xlu0 %9555 }
 0x9db   : > { %v9704_v19 = vsel %vm17580_vm12, %v9688_v57, %v9556_v24  ;;  %v16894_v40 = vpop.f32.mrf.mxu1  ;;  %vm17604_vm12 = vmmov %vm17595_vm1 }
 0x9dc   : > { %11438 = vmatprep.mubr.msk.f32.mxu1 %vm9713_vm6, %v9704_v19 }
 0x9dd   : > { %11439 = vmatmul.mubr.msk.f32.gmra.mxu1 %vm9713_vm6, %v9705_v42  ;;  %v16896_v1 = vpop.f32.mrf.mxu1  ;;  %vm17592_vm6 = vmmov %vm17584_vm3 }
 0x9de   : > { %v11197_v24 = vmul.f32 -1.442695, %v16896_v1 }
 0x9fb   : > { %v16898_v23 = vpop.f32.mrf.mxu1 }
 0x9fc   : > { %v11200_v32 = vmul.f32 -1.442695, %v16898_v23 }
 0x9fd   : > { %v16900_v12 = vpop.f32.mrf.mxu1 }
 0x9fe   : > { %v11199_v6 = vmul.f32 -1.442695, %v16900_v12  ;;  %v11198_v12 = vmul.f32 -1.442695, %v16894_v40 }
 0xa1b   : > { %v16902_v27 = vpop.f32.mrf.mxu1 }
 0xa1c   : > { %v11202_v21 = vmul.f32 -1.442695, %v16902_v27 }
 0xa1d   : > { %v16904_v2 = vpop.f32.mrf.mxu1 }
 0xa1e   : > { %v11201_v58 = vmul.f32 -1.442695, %v16904_v2 }
 0xa28   : > { %v11428_v49 = vpop.f32.mrf.mxu1 }
 0xa29   : > { %v11204_v51 = vmul.f32 -1.442695, %v11428_v49 }
 0xa2a   : > { %v9862_v26 = vpop.f32.mrf.mxu1 }
 0xa2b   : > { %v11203_v10 = vmul.f32 -1.442695, %v9862_v26 }
 0xa53   : > { %v11431_v4 = vpop.f32.mrf.mxu1 }
 0xa54   : > { %v11206_v29 = vmul.f32 -1.442695, %v11431_v4 }
 0xa55   : > { %v9872_v13 = vpop.f32.mrf.mxu1 }
 0xa56   : > { %v11205_v3 = vmul.f32 -1.442695, %v9872_v13 }
 0xa73   : > { %v11434_v55 = vpop.f32.mrf.mxu1 }
 0xa74   : > { %v11208_v9 = vmul.f32 -1.442695, %v11434_v55 }
 0xa75   : > { %v9882_v36 = vpop.f32.mrf.mxu1 }
 0xa76   : > { %12063 = vpow2.f32 %v11208_v9  ;;  %v11207_v8 = vmul.f32 -1.442695, %v9882_v36 }
 0xa78   : > { %12065 = vpow2.f32 %v11207_v8 }
 0xa83   : > { %v12064_v45 = vpop.eup %12063 }
 0xa84   : > { %v9970_v50 = vadd.f32 1.0, %v12064_v45 }
 0xa85   : > { %v12066_v37 = vpop.eup %12065 }
 0xa86   : > { %12067 = vrcp.f32 %v9970_v50  ;;  %v9969_v47 = vadd.f32 1.0, %v12066_v37 }
 0xa88   : > { %12069 = vrcp.f32 %v9969_v47 }
 0xa90   : > { %v11437_v20 = vpop.f32.mrf.mxu1 }
 0xa91   : > { %v11210_v16 = vmul.f32 -1.442695, %v11437_v20 }
 0xa92   : > { %v9892_v39 = vpop.f32.mrf.mxu1 }
 0xa93   : > { %12071 = vpow2.f32 %v11210_v16  ;;  %v11209_v0 = vmul.f32 -1.442695, %v9892_v39  ;;  %v16906_v63 = vpop.eup %12067 }
 0xa94   : > { %10064 = vperm.xlu1 %11503, %v16906_v63  }
 0xa95   : > { %12073 = vpow2.f32 %v11209_v0  ;;  %v12070_v30 = vpop.eup %12069 }
 0xa96   : > { %10059 = vperm.xlu0 %11505, %v12070_v30  }
 0xa98   : > { %11504 = vset.pattern.permute.xlu1 %v12197_v22 }
 0xa99   : > { %10228 = vperm.xlu1 %11504, %v16906_v63  }
 0xa9a   : > { %11509 = vset.pattern.permute.xlu0 %v12198_v25 }
 0xa9d   : > { %v11440_v43 = vpop.f32.mrf.mxu1  ;;  %11506 = vset.pattern.permute.xlu1 %v12198_v25 }
 0xa9e   : > { %v11212_v52 = vmul.f32 -1.442695, %v11440_v43  ;;  %10144 = vperm.xlu1 %11506, %v12070_v30  }
 0xa9f   : > { %v9902_v54 = vpop.f32.mrf.mxu1 }
 0xaa0   : > { %v12072_v59 = vpop.eup %12071  ;;  %12075 = vpow2.f32 %v11212_v52  ;;  %v11211_v15 = vmul.f32 -1.442695, %v9902_v54 }
 0xaa1   : > { %v9972_v53 = vadd.f32 1.0, %v12072_v59 }
 0xaa2   : > { %v12074_v14 = vpop.eup %12073  ;;  %12077 = vpow2.f32 %v11211_v15  ;;  %11507 = vset.pattern.permute.xlu1 %v12197_v22 }
 0xaa3   : > { %12079 = vrcp.f32 %v9972_v53  ;;  %v9971_v17 = vadd.f32 1.0, %v12074_v14  ;;  %10224 = vperm.xlu1 %11507, %v12070_v30   ;;  %v17583_v30 = vld [vmem:[#allocation22_spill] sm:$0xff] }
 0xaa4   : > { %12081 = vpow2.f32 %v11205_v3 }
 0xaa5   : > { %12083 = vrcp.f32 %v9971_v17 }
 0xaa6   : > { %12085 = vpow2.f32 %v11203_v10  ;;  %v12057_v10 = vld [vmem:[%s17089_s10] sm:$0xff]  }
 0xaa7   : > { %11508 = vset.pattern.permute.xlu1 %v17582_v33  ;;  %12087 = vpow2.f32 %v11206_v29  ;;  %11457 = vmatprep.mubr.msk.bf16.mxu0 %vm17585_vm10, %v12057_v10  ;;  %vm17608_vm10 = vmmov %vm17595_vm1 }
 0xaad   : > { %v12076_v41 = vpop.eup %12075 }
 0xaae   : > { %v9974_v5 = vadd.f32 1.0, %v12076_v41 }
 0xaaf   : > { %v12078_v60 = vpop.eup %12077 }
 0xab0   : > { %v12080_v38 = vpop.eup %12079  ;;  %12089 = vrcp.f32 %v9974_v5  ;;  %v9973_v46 = vadd.f32 1.0, %v12078_v60 }
 0xab1   : > { %10156 = vperm.xlu0 %11509, %v12080_v38   ;;  %10074 = vperm.xlu1 %11508, %v12080_v38   ;;  %v12082_v34 = vpop.eup %12081 }
 0xab2   : > { %v12084_v18 = vpop.eup %12083  ;;  %v9967_v62 = vadd.f32 1.0, %v12082_v34  ;;  %12091 = vrcp.f32 %v9973_v46 }
 0xab3   : > { %v12086_v11 = vpop.eup %12085  ;;  %12093 = vpow2.f32 %v11204_v51 }
 0xab4   : > { %v9965_v61 = vadd.f32 1.0, %v12086_v11  ;;  %12095 = vrcp.f32 %v9967_v62  ;;  %v12088_v56 = vpop.eup %12087 }
 0xab5   : > { %11511 = vset.pattern.permute.xlu0 %v17582_v33  ;;  %11510 = vset.pattern.permute.xlu1 %v12197_v22  ;;  %12097 = vpow2.f32 %v11202_v21  ;;  %v9968_v44 = vadd.f32 1.0, %v12088_v56  ;;  %v17586_v21 = vld [vmem:[#allocation30_spill] sm:$0xff] }
 0xab6   : > { %10236 = vperm.xlu1 %11510, %v12080_v38   ;;  %10069 = vperm.xlu0 %11511, %v12084_v18   ;;  %12099 = vrcp.f32 %v9965_v61  ;;  %v10308_v38 = vld [vmem:[%s17090_s11 + $0x10] sm:$0xff] }
 0xab7   : > { %12101 = vpow2.f32 %v11200_v32 }
 0xab8   : > { %12103 = vrcp.f32 %v9968_v44 }
 0xab9   : > { %12105 = vpow2.f32 %v11201_v58 }
 0xaba   : > { %11512 = vset.pattern.permute.xlu1 %v12198_v25  ;;  %11515 = vset.pattern.permute.xlu0 %v12198_v25  ;;  %12107 = vpow2.f32 %v11199_v6 }
 0xabb   : > { %10152 = vperm.xlu1 %11512, %v12084_v18  }
 0xabd   : > { %v12090_v28 = vpop.eup %12089 }
 0xabe   : > { %10164 = vperm.xlu0 %11515, %v12090_v28  }
 0xabf   : > { %11513 = vset.pattern.permute.xlu1 %v12197_v22  ;;  %v16923_v7 = vpop.eup %12091 }
 0xac0   : > { %10232 = vperm.xlu1 %11513, %v12084_v18   ;;  %v12094_v35 = vpop.eup %12093 }
 0xac1   : > { %v12096_v31 = vpop.eup %12095  ;;  %v9966_v48 = vadd.f32 1.0, %v12094_v35 }
 0xac2   : > { %11517 = vset.pattern.permute.xlu0 %v17582_v33  ;;  %v12098_v57 = vpop.eup %12097 }
 0xac3   : > { %10079 = vperm.xlu0 %11517, %v16923_v7   ;;  %v12100_v19 = vpop.eup %12099  ;;  %v9964_v42 = vadd.f32 1.0, %v12098_v57  ;;  %12109 = vrcp.f32 %v9966_v48 }
 0xac4   : > { %11514 = vset.pattern.permute.xlu1 %v17582_v33  ;;  %v12102_v23 = vpop.eup %12101  ;;  %12111 = vpow2.f32 %v11197_v24  ;;  %v17588_v24 = vld [vmem:[#allocation26_spill] sm:$0xff] }
 0xac5   : > { %10084 = vperm.xlu1 %11514, %v12090_v28   ;;  %v12104_v27 = vpop.eup %12103  ;;  %v9962_v2 = vadd.f32 1.0, %v12102_v23  ;;  %12113 = vrcp.f32 %v9964_v42  ;;  %v17589_v42 = vld [vmem:[#allocation33_spill] sm:$0xff] }
 0xac6   : > { %v12106_v1 = vpop.eup %12105  ;;  %12115 = vpow2.f32 %v11198_v12  ;;  %v17590_v12 = vld [vmem:[#allocation29_spill] sm:$0xff] }
 0xac7   : > { %10049 = vperm.xlu0 %11517, %v12096_v31   ;;  %12117 = vrcp.f32 %v9962_v2  ;;  %v9963_v49 = vadd.f32 1.0, %v12106_v1  ;;  %v12108_v26 = vpop.eup %12107  ;;  %v17591_v2 = vld [vmem:[#allocation28_spill] sm:$0xff] }
 0xac8   : > { %v9961_v4 = vadd.f32 1.0, %v12108_v26 }
 0xac9   : > { %11516 = vset.pattern.permute.xlu1 %v12197_v22  ;;  %12119 = vrcp.f32 %v9963_v49 }
 0xaca   : > { %10244 = vperm.xlu1 %11516, %v12090_v28   ;;  %12121 = vrcp.f32 %v9961_v4 }
 0xacb   : > { %10039 = vperm.xlu0 %11517, %v12100_v19  }
 0xace   : > { %11518 = vset.pattern.permute.xlu1 %v17582_v33 }
 0xacf   : > { %10054 = vperm.xlu1 %11518, %v12104_v27   ;;  %11521 = vset.pattern.permute.xlu0 %v12198_v25 }
 0xad0   : > { %10148 = vperm.xlu0 %11521, %v16906_v63   ;;  %v12110_v40 = vpop.eup %12109 }
 0xad1   : > { %v12112_v13 = vpop.eup %12111 }
 0xad2   : > { %v12114_v55 = vpop.eup %12113  ;;  %v9959_v9 = vadd.f32 1.0, %v12112_v13 }
 0xad3   : > { %11519 = vset.pattern.permute.xlu1 %v12198_v25  ;;  %v12116_v36 = vpop.eup %12115 }
 0xad4   : > { %10136 = vperm.xlu1 %11519, %v12096_v31   ;;  %10140 = vperm.xlu0 %11521, %v12104_v27   ;;  %v12118_v8 = vpop.eup %12117  ;;  %12123 = vrcp.f32 %v9959_v9  ;;  %v9960_v45 = vadd.f32 1.0, %v12116_v36 }
 0xad6   : > { %v12120_v50 = vpop.eup %12119  ;;  %12125 = vrcp.f32 %v9960_v45 }
 0xad7   : > { %v12122_v37 = vpop.eup %12121 }
 0xad8   : > { %11520 = vset.pattern.permute.xlu1 %v12197_v22  ;;  %10132 = vperm.xlu0 %11521, %v12110_v40  }
 0xad9   : > { %10216 = vperm.xlu1 %11520, %v12096_v31  }
 0xadc   : > { %10124 = vperm.xlu0 %11521, %v12114_v55  }
 0xadd   : > { %10220 = vperm.xlu1 %11520, %v12104_v27  }
 0xae0   : > { %10116 = vperm.xlu0 %11521, %v12118_v8  }
 0xae1   : > { %11522 = vset.pattern.permute.xlu1 %v17582_v33  ;;  %v12124_v47 = vpop.eup %12123 }
 0xae2   : > { %10044 = vperm.xlu1 %11522, %v12110_v40  }
 0xae3   : > { %v12126_v20 = vpop.eup %12125 }
 0xae4   : > { %11530 = vset.pattern.permute.xlu0 %v17582_v33 }
 0xae5   : > { %10029 = vperm.xlu0 %11530, %v12120_v50  }
 0xae6   : > { %11523 = vset.pattern.permute.xlu1 %v12198_v25 }
 0xae7   : > { %10128 = vperm.xlu1 %11523, %v12100_v19  }
 0xae9   : > { %10019 = vperm.xlu0 %11530, %v12122_v37  }
 0xaeb   : > { %10160 = vperm.xlu1 %11523, %v16923_v7  }
 0xaed   : > { %10009 = vperm.xlu0 %11530, %v12124_v47  }
 0xaef   : > { %11524 = vset.pattern.permute.xlu1 %v12197_v22 }
 0xaf0   : > { %10240 = vperm.xlu1 %11524, %v16923_v7  }
 0xaf1   : > { %11534 = vset.pattern.permute.xlu0 %v12198_v25 }
 0xaf2   : > { %10108 = vperm.xlu0 %11534, %v12126_v20  }
 0xaf4   : > { %10208 = vperm.xlu1 %11524, %v12100_v19  }
 0xaf6   : > { %11536 = vset.pattern.permute.xlu0 %v17582_v33 }
 0xaf8   : > { %10212 = vperm.xlu1 %11524, %v12110_v40  }
 0xafc   : > { %11525 = vset.pattern.permute.xlu1 %v17582_v33 }
 0xafd   : > { %10034 = vperm.xlu1 %11525, %v12114_v55  }
 0xb01   : > { %11526 = vset.pattern.permute.xlu1 %v12198_v25 }
 0xb02   : > { %10120 = vperm.xlu1 %11526, %v12120_v50  }
 0xb06   : > { %11527 = vset.pattern.permute.xlu1 %v12197_v22 }
 0xb07   : > { %10200 = vperm.xlu1 %11527, %v12120_v50  }
 0xb0b   : > { %10204 = vperm.xlu1 %11527, %v12114_v55  }
 0xb0f   : > { %11528 = vset.pattern.permute.xlu1 %v17582_v33  ;;  %v10065_v16 = vpop.permute.xlu1 %10064 }
 0xb10   : > { %10024 = vperm.xlu1 %11528, %v12118_v8   ;;  %v10098_v61 = vmul.f32 %v10065_v16, %v17586_v21 }
 0xb11   : > { %v10060_v63 = vpop.permute.xlu0 %10059 }
 0xb12   : > { %v10097_v52 = vmul.f32 %v10060_v63, %v17583_v30 }
 0xb14   : > { %11529 = vset.pattern.permute.xlu1 %v12198_v25  ;;  %v10229_v39 = vpop.permute.xlu1 %10228 }
 0xb15   : > { %10112 = vperm.xlu1 %11529, %v12122_v37   ;;  %v10258_v32 = vmul.f32 %v10229_v39, %v17586_v21 }
 0xb19   : > { %11531 = vset.pattern.permute.xlu1 %v12197_v22  ;;  %v10145_v0 = vpop.permute.xlu1 %10144 }
 0xb1a   : > { %10192 = vperm.xlu1 %11531, %v12122_v37   ;;  %v10177_v43 = vmul.f32 %v10145_v0, %v17583_v30 }
 0xb1c   : > { %v10273_v15 = vsel %vm598_vm13, %v10097_v52, %v10177_v43 }
 0xb1e   : > { %10196 = vperm.xlu1 %11531, %v12118_v8   ;;  %v10225_v54 = vpop.permute.xlu1 %10224 }
 0xb1f   : > { %v10257_v59 = vmul.f32 %v10225_v54, %v17583_v30 }
 0xb21   : > { %v10289_v3 = vsel %vm17584_vm3, %v10273_v15, %v10257_v59  ;;  %vm17607_vm3 = vmmov %vm17581_vm0 }
 0xb22   : > { %11532 = vset.pattern.permute.xlu1 %v17582_v33 }
 0xb23   : > { %10014 = vperm.xlu1 %11532, %v12126_v20  }
 0xb27   : > { %11533 = vset.pattern.permute.xlu1 %v12198_v25  ;;  %v10306_v25 = vld [vmem:[%s17090_s11] sm:$0xff] }
 0xb28   : > { %10104 = vperm.xlu1 %11533, %v12124_v47   ;;  %10311 = vperm.xlu0 %11536, %v10306_v25  }
 0xb2c   : > { %11535 = vset.pattern.permute.xlu1 %v12197_v22  ;;  %v10075_v53 = vpop.permute.xlu1 %10074  ;;  %v10157_v14 = vpop.permute.xlu0 %10156  ;;  %v10307_v22 = vld [vmem:[%s17090_s11 + $0x8] sm:$0xff] }
 0xb2d   : > { %10184 = vperm.xlu1 %11535, %v12124_v47   ;;  %v10180_v1 = vmul.f32 %v10157_v14, %v17591_v2  ;;  %v10100_v40 = vmul.f32 %v10075_v53, %v17591_v2  ;;  %v17599_v53 = vld [vmem:[#allocation20_spill] sm:$0xff] }
 0xb2f   : > { %v10276_v39 = vsel %vm598_vm13, %v10100_v40, %v10180_v1 }
 0xb31   : > { %10188 = vperm.xlu1 %11535, %v12126_v20   ;;  %v10237_v17 = vpop.permute.xlu1 %10236  ;;  %v10070_v29 = vpop.permute.xlu0 %10069 }
 0xb32   : > { %v10099_v4 = vmul.f32 %v10070_v29, %v17588_v24  ;;  %v10260_v36 = vmul.f32 %v10237_v17, %v17591_v2 }
 0xb34   : > { %v10292_v30 = vsel %vm17595_vm1, %v10276_v39, %v10260_v36 }
 0xb35   : > { %11537 = vset.pattern.permute.xlu1 %v17582_v33 }
 0xb36   : > { %v10153_v41 = vpop.permute.xlu1 %10152  ;;  %10316 = vperm.xlu1 %11537, %v10307_v22  }
 0xb37   : > { %v10179_v19 = vmul.f32 %v10153_v41, %v17588_v24  ;;  %v17601_v41 = vld [vmem:[#allocation14_spill] sm:$0xff] }
 0xb39   : > { %v10165_v5 = vpop.permute.xlu0 %10164  ;;  %v10275_v45 = vsel %vm598_vm13, %v10099_v4, %v10179_v19 }
 0xb3a   : > { %10321 = vperm.xlu1 %11537, %v10308_v38   ;;  %v10182_v13 = vmul.f32 %v10165_v5, %v17589_v42 }
 0xb3b   : > { %v10233_v60 = vpop.permute.xlu1 %10232 }
 0xb3c   : > { %v10259_v49 = vmul.f32 %v10233_v60, %v17588_v24 }
 0xb3e   : > { %v10080_v46 = vpop.permute.xlu0 %10079  ;;  %v10291_v47 = vsel %vm17592_vm6, %v10275_v45, %v10259_v49  ;;  %vm17611_vm6 = vmmov %vm17581_vm0  ;;  %v17612_v49 = vld [vmem:[#allocation18_spill] sm:$0xff] }
 0xb3f   : > { %v10101_v55 = vmul.f32 %v10080_v46, %v17590_v12  ;;  %v10304_v43 = vpack.c.bf16 %v10292_v30, %v10291_v47 }
 0xb40   : > { %v10085_v33 = vpop.permute.xlu1 %10084 }
 0xb41   : > { %v10102_v23 = vmul.f32 %v10085_v33, %v17589_v42  ;;  %v10357_v17 = vsel %vm17600_vm15, %v10304_v43, 0  ;;  %vm17620_vm15 = vmmov %vm17595_vm1 }
 0xb42   : > { %v10050_v34 = vpop.permute.xlu0 %10049 }
 0xb43   : > { %v10278_v50 = vsel %vm598_vm13, %v10102_v23, %v10182_v13  ;;  %v10095_v25 = vmul.f32 %v10050_v34, %v17601_v41 }
 0xb45   : > { %v10245_v51 = vpop.permute.xlu1 %10244 }
 0xb46   : > { %v16973_v18 = vpop.permute.xlu0 %10039  ;;  %v10262_v26 = vmul.f32 %v10245_v51, %v17589_v42 }
 0xb48   : > { %v10294_v20 = vsel %vm17593_vm11, %v10278_v50, %v10262_v26  ;;  %vm17613_vm11 = vmmov %vm17581_vm0 }
 0xb4a   : > { %v10055_v62 = vpop.permute.xlu1 %10054 }
 0xb4b   : > { %v10149_v11 = vpop.permute.xlu0 %10148  ;;  %v10096_v29 = vmul.f32 %v10055_v62, %v17599_v53  ;;  %v17605_v62 = vld [vmem:[#allocation15_spill] sm:$0xff] }
 0xb4c   : > { %v10178_v56 = vmul.f32 %v10149_v11, %v17586_v21 }
 0xb4e   : > { %v10274_v28 = vsel %vm598_vm13, %v10098_v61, %v10178_v56 }
 0xb4f   : > { %v10290_v44 = vsel %vm17587_vm8, %v10274_v28, %v10258_v32  ;;  %v10137_v58 = vpop.permute.xlu1 %10136  ;;  %v10141_v54 = vpop.permute.xlu0 %10140  ;;  %vm17609_vm8 = vmmov %vm17595_vm1 }
 0xb50   : > { %v10303_v7 = vpack.c.bf16 %v10290_v44, %v10289_v3  ;;  %v10176_v14 = vmul.f32 %v10141_v54, %v17599_v53  ;;  %v10175_v5 = vmul.f32 %v10137_v58, %v17601_v41  ;;  %v17606_v44 = vld [vmem:[#allocation11_spill] sm:$0xff] }
 0xb52   : > { %v10272_v60 = vsel %vm598_vm13, %v10096_v29, %v10176_v14  ;;  %v10271_v51 = vsel %vm598_vm13, %v10095_v25, %v10175_v5  ;;  %v10354_v56 = vsel %vm17581_vm0, %v10303_v7, 0 }
 0xb53   : > { %v10133_v15 = vpop.permute.xlu0 %10132 }
 0xb54   : > { %v10217_v35 = vpop.permute.xlu1 %10216  ;;  %v10174_v34 = vmul.f32 %v10133_v15, %v17605_v62 }
 0xb55   : > { %v10255_v22 = vmul.f32 %v10217_v35, %v17601_v41 }
 0xb57   : > { %v10125_v46 = vpop.permute.xlu0 %10124  ;;  %v10287_v11 = vsel %vm17604_vm12, %v10271_v51, %v10255_v22  ;;  %vm17623_vm12 = vmmov %vm17581_vm0 }
 0xb58   : > { %v10221_v6 = vpop.permute.xlu1 %10220 }
 0xb59   : > { %v10256_v10 = vmul.f32 %v10221_v6, %v17599_v53 }
 0xb5b   : > { %v10288_v33 = vsel %vm17603_vm4, %v10272_v60, %v10256_v10  ;;  %v10117_v35 = vpop.permute.xlu0 %10116  ;;  %vm17622_vm4 = vmmov %vm17581_vm0 }
 0xb5c   : > { %v10302_v21 = vpack.c.bf16 %v10288_v33, %v10287_v11  ;;  %v17625_v33 = vld [vmem:[#allocation12_spill] sm:$0xff] }
 0xb5d   : > { %v10045_v31 = vpop.permute.xlu1 %10044 }
 0xb5e   : > { %v10094_v61 = vmul.f32 %v10045_v31, %v17605_v62 }
 0xb60   : > { %v10270_v31 = vsel %vm598_vm13, %v10094_v61, %v10174_v34  ;;  %v10030_v2 = vpop.permute.xlu0 %10029 }
 0xb61   : > { %v10091_v13 = vmul.f32 %v10030_v2, %v17612_v49 }
 0xb62   : > { %v10129_v48 = vpop.permute.xlu1 %10128 }
 0xb63   : > { %v10173_v58 = vmul.f32 %v10129_v48, %v17606_v44 }
 0xb66   : > { %v10161_v57 = vpop.permute.xlu1 %10160 }
 0xb67   : > { %v10181_v27 = vmul.f32 %v10161_v57, %v17590_v12  ;;  %v10093_v57 = vmul.f32 %v16973_v18, %v17606_v44 }
 0xb69   : > { %v10277_v37 = vsel %vm598_vm13, %v10101_v55, %v10181_v27  ;;  %v10269_v19 = vsel %vm598_vm13, %v10093_v57, %v10173_v58  ;;  %v10351_v27 = vsel %vm17611_vm6, %v10302_v21, 0 }
 0xb6b   : > { %v10241_v9 = vpop.permute.xlu1 %10240 }
 0xb6c   : > { %v10261_v8 = vmul.f32 %v10241_v9, %v17590_v12  ;;  %v17610_v12 = vld [vmem:[#allocation10_spill] sm:$0xff] }
 0xb6d   : > { %v10172_v18 = vmul.f32 %v10125_v46, %v17610_v12 }
 0xb6e   : > { %v10293_v16 = vsel %vm17594_vm5, %v10277_v37, %v10261_v8  ;;  %vm17614_vm5 = vmmov %vm17595_vm1 }
 0xb6f   : > { %v10305_v0 = vpack.c.bf16 %v10294_v20, %v10293_v16  ;;  %v10209_v63 = vpop.permute.xlu1 %10208  ;;  %v10020_v20 = vpop.permute.xlu0 %10019  ;;  %v17617_v16 = vld [vmem:[#allocation9_spill] sm:$0xff] }
 0xb70   : > { %v10253_v6 = vmul.f32 %v10209_v63, %v17606_v44 }
 0xb71   : > { %11462 = vmatprep.subr.msk.bf16.mxu0 %vm17596_vm14, %v10305_v0  ;;  %v10360_v52 = vsel %vm17597_vm9, %v10305_v0, 0  ;;  %vm17615_vm14 = vmmov %vm17581_vm0  ;;  %v17618_v0 = vld [vmem:[#allocation8_spill] sm:$0xff] }
 0xb72   : > { %11442 = vmatpush3.bf16.xpose.msra.mxu0 %v10360_v52  ;;  %v10285_v42 = vsel %vm17609_vm8, %v10269_v19, %v10253_v6  ;;  %vm17616_vm9 = vmmov %vm17581_vm0  ;;  %v10089_v52 = vmul.f32 %v10020_v20, %v17618_v0  ;;  %v12058_v6 = vld [vmem:[%s17089_s10 + $0x8] ss:$0 sps:$4 sm:$0xff]  }
 0xb73   : > { %11463 = vmatprep.subr.msk.bf16.mxu0 %vm17598_vm2, %v10304_v43  ;;  %v10213_v59 = vpop.permute.xlu1 %10212  ;;  %v10170_v43 = vmul.f32 %v10117_v35, %v17617_v16  ;;  %vm17619_vm2 = vmmov %vm17581_vm0  ;;  %v10010_v5 = vpop.permute.xlu0 %10009 }
 0xb74   : > { %v10254_v32 = vmul.f32 %v10213_v59, %v17605_v62  ;;  %vm17626_vm0 = vmmov %vm17595_vm1 }
 0xb75   : > { %vm17629_vm8 = vmmov %vm17619_vm2 }
 0xb76   : > { %vm17630_vm6 = vmmov %vm17619_vm2 }
 0xb77   : > { %v10109_v60 = vpop.permute.xlu0 %10108 }
 0xb78   : > { %v10035_v3 = vpop.permute.xlu1 %10034 }
 0xb79   : > { %v10092_v48 = vmul.f32 %v10035_v3, %v17610_v12 }
 0xb7a   : > { %11444 = vmatpush3.bf16.xpose.msra.mxu0 %v10357_v17 }
 0xb7b   : > { %11464 = vmatprep.subr.msk.bf16.mxu0 %vm17602_vm7, %v10303_v7  ;;  %v10286_v7 = vsel %vm17608_vm10, %v10270_v31, %v10254_v32  ;;  %v10268_v55 = vsel %vm598_vm13, %v10092_v48, %v10172_v18  ;;  %vm17621_vm7 = vmmov %vm17595_vm1 }
 0xb7c   : > { %v10301_v23 = vpack.c.bf16 %v10286_v7, %v10285_v42  ;;  %vm17628_vm10 = vmmov %vm17619_vm2 }
 0xb7d   : > { %v10121_v38 = vpop.permute.xlu1 %10120 }
 0xb7e   : > { %v10171_v26 = vmul.f32 %v10121_v38, %v17612_v49  ;;  %v10348_v37 = vsel %vm17615_vm14, %v10301_v23, 0  ;;  %v17624_v38 = vld [vmem:[#allocation7_spill] sm:$0xff] }
 0xb7f   : > { %v10168_v62 = vmul.f32 %v10109_v60, %v17624_v38 }
 0xb80   : > { %v10267_v36 = vsel %vm598_vm13, %v10091_v13, %v10171_v26 }
 0xb82   : > { %11446 = vmatpush3.bf16.xpose.msra.mxu0 %v10354_v56  ;;  %v10201_v28 = vpop.permute.xlu1 %10200 }
 0xb83   : > { %11465 = vmatprep.subr.msk.bf16.mxu0 %vm17607_vm3, %v10302_v21  ;;  %v10251_v4 = vmul.f32 %v10201_v28, %v17612_v49  ;;  %v10087_v21 = vmul.f32 %v10010_v5, %v17625_v33  ;;  %vm17627_vm3 = vmmov %vm17626_vm0 }
 0xb85   : > { %v10283_v8 = vsel %vm17595_vm1, %v10267_v36, %v10251_v4 }
 0xb86   : > { %v10205_v24 = vpop.permute.xlu1 %10204 }
 0xb87   : > { %v10252_v1 = vmul.f32 %v10205_v24, %v17610_v12 }
 0xb89   : > { %v10284_v9 = vsel %vm17614_vm5, %v10268_v55, %v10252_v1 }
 0xb8a   : > { %11448 = vmatpush3.bf16.xpose.msra.mxu0 %v10351_v27  ;;  %v10300_v50 = vpack.c.bf16 %v10284_v9, %v10283_v8 }
 0xb8b   : > { %11466 = vmatprep.subr.msk.bf16.mxu0 %vm17613_vm11, %v10301_v23  ;;  %v10025_v40 = vpop.permute.xlu1 %10024 }
 0xb8c   : > { %v10090_v39 = vmul.f32 %v10025_v40, %v17617_v16  ;;  %v10345_v59 = vsel %vm17619_vm2, %v10300_v50, 0 }
 0xb8e   : > { %v10266_v3 = vsel %vm598_vm13, %v10090_v39, %v10170_v43 }
 0xb90   : > { %v10113_v45 = vpop.permute.xlu1 %10112 }
 0xb91   : > { %v10169_v63 = vmul.f32 %v10113_v45, %v17618_v0 }
 0xb92   : > { %11450 = vmatpush3.bf16.xpose.msra.mxu0 %v10348_v37 }
 0xb93   : > { %11467 = vmatprep.subr.msk.bf16.mxu0 %vm17616_vm9, %v10300_v50  ;;  %v10265_v53 = vsel %vm598_vm13, %v10089_v52, %v10169_v63 }
 0xb95   : > { %v10193_v47 = vpop.permute.xlu1 %10192 }
 0xb96   : > { %v10249_v30 = vmul.f32 %v10193_v47, %v17618_v0 }
 0xb98   : > { %v10281_v14 = vsel %vm17620_vm15, %v10265_v53, %v10249_v30 }
 0xb99   : > { %v10197_v54 = vpop.permute.xlu1 %10196 }
 0xb9a   : > { %v10250_v15 = vmul.f32 %v10197_v54, %v17617_v16  ;;  %11452 = vmatpush3.bf16.xpose.msra.mxu0 %v10345_v59 }
 0xb9c   : > { %v10282_v17 = vsel %vm17621_vm7, %v10266_v3, %v10250_v15 }
 0xb9d   : > { %v10299_v10 = vpack.c.bf16 %v10282_v17, %v10281_v14 }
 0xb9e   : > { %v10015_v29 = vpop.permute.xlu1 %10014 }
 0xb9f   : > { %11468 = vmatprep.subr.msk.bf16.mxu0 %vm17622_vm4, %v10299_v10  ;;  %v10342_v41 = vsel %vm17623_vm12, %v10299_v10, 0  ;;  %v10088_v46 = vmul.f32 %v10015_v29, %v17624_v38 }
 0xba1   : > { %v10264_v32 = vsel %vm598_vm13, %v10088_v46, %v10168_v62 }
 0xba2   : > { %11454 = vmatpush3.bf16.xpose.msra.mxu0 %v10342_v41 }
 0xba3   : > { %v10105_v22 = vpop.permute.xlu1 %10104  ;;  %v10312_v24 = vpop.permute.xlu0 %10311 }
 0xba4   : > { %v10167_v51 = vmul.f32 %v10105_v22, %v17625_v33 }
 0xba6   : > { %v10263_v28 = vsel %vm598_vm13, %v10087_v21, %v10167_v51 }
 0xba8   : > { %v10185_v25 = vpop.permute.xlu1 %10184 }
 0xba9   : > { %v10247_v11 = vmul.f32 %v10185_v25, %v17625_v33 }
 0xbab   : > { %v10279_v34 = vsel %vm17626_vm0, %v10263_v28, %v10247_v11 }
 0xbac   : > { %v10189_v61 = vpop.permute.xlu1 %10188 }
 0xbad   : > { %v10248_v56 = vmul.f32 %v10189_v61, %v17624_v38 }
 0xbaf   : > { %v10280_v44 = vsel %vm17627_vm3, %v10264_v32, %v10248_v56 }
 0xbb0   : > { %v10298_v58 = vpack.c.bf16 %v10280_v44, %v10279_v34 }
 0xbb1   : > { %v10317_v57 = vpop.permute.xlu1 %10316 }
 0xbb2   : > { %11469 = vmatprep.subr.msk.bf16.mxu0 %vm17628_vm10, %v10298_v58  ;;  %v10339_v35 = vsel %vm17629_vm8, %v10298_v58, 0 }
 0xbb3   : > { %11456 = vmatpush3.bf16.xpose.msra.mxu0 %v10339_v35 }
 0xbb5   : > { %v10322_v31 = vpop.permute.xlu1 %10321 }
 0xbba   : > { %11458 = vmatmul.mubr.msk.bf16.vlgmr.msra.gmra.mxu0 %vm17630_vm6, %v12058_v6 }
 0xc7a   : > { %v11459_v7 = vpop.f32.mrf.mxu0 }
 0xc7b   : > { %v10405_v19 = vadd.f32 %v11459_v7, %v10322_v31 }
 0xc7c   : > { %v10396_v42 = vpop.f32.mrf.mxu0 }
 0xc7d   : > { %v10397_v23 = vadd.f32 %v10396_v42, %v10312_v24  ;;  %v10412_v12 = vmax.f32 %v10405_v19, 0.0 }
 0xc7e   : > { %v11460_v48 = vpop.f32.mrf.mxu0 }
 0xc7f   : > { %v10410_v27 = vmax.f32 %v10397_v23, 0.0  ;;  %10415 = vst [vmem:[%s418_s26 + $0x10] sm:$0xff] %v10412_v12 }
 0xc80   : > { %v10399_v2 = vpop.f32.mrf.mxu0 }
 0xc81   : > { %10413 = vst [vmem:[%s418_s26] sm:$0xff] %v10410_v27  ;;  %v10400_v1 = vadd.f32 %v10399_v2, %v10317_v57 }
 0xc83   : > { %v10411_v18 = vmax.f32 %v10400_v1, 0.0 }
 0xc85   : > { %10414 = vst [vmem:[%s418_s26 + $0x8] sm:$0xff] %v10411_v18 }
 0xc86 PF: > { %s22_s21 = sadd.s32 1, %s12173_s21  }
 0xc87   : > { %p19_p5 = scmp.ge.s32.totalorder %s22_s21, 4  }
 0xc89   :  { %21 = sbr.rel (!%p19_p5) target bundleno = 1 (0x1), region = 141 }

</bundles_post_ra>
